<compile_context>
chip_gen: v7x
topology: tpu7x:2x2x1
jax: 0.10.0
libtpu: 0.0.40
codegen_flags: <defaults>
</compile_context>

<pallas_src>
import functools

import jax
import jax.numpy as jnp
from jax.experimental import pallas as pl
from jax.experimental.pallas import tpu as pltpu


def _relu_conv1x1_bn_kernel(x_ref, w_ref, gamma_ref, beta_ref, o_ref, *,
                            n_valid, eps, matmul_dtype):
    # x_ref     : (Cin, Mp) f32   -- columns >= n_valid are exact zeros
    # w_ref     : (Cout, Cin) f32 -- PyTorch conv weight layout, unchanged
    # gamma_ref : (Cout, 1) f32
    # beta_ref  : (Cout, 1) f32
    # o_ref     : (Cout, M)  f32  -- unpadded output (== NCHW layout for N=1)
    x = jnp.maximum(x_ref[...], 0.0)                         # ReLU (VPU, f32)
    xm = x.astype(matmul_dtype)
    wm = w_ref[...].astype(matmul_dtype)

    # 1x1 conv as W @ X on the MXU, f32 accumulation.
    y = jnp.dot(wm, xm, preferred_element_type=jnp.float32)  # (Cout, Mp)

    # Batch statistics per output channel (reduce over the pixel/lane axis).
    # Padded columns of x are zero -> y's padded columns are exactly zero and
    # contribute nothing to the sum; divide by the true pixel count.
    inv_n = jnp.float32(1.0 / n_valid)
    mean = jnp.sum(y, axis=1, keepdims=True) * inv_n          # (Cout, 1)

    centered = y - mean
    if y.shape[1] != n_valid:
        # Padded columns hold -mean after centering; mask them out of the
        # variance sum.
        lane = jax.lax.broadcasted_iota(jnp.int32, y.shape, 1)
        centered_m = jnp.where(lane < n_valid, centered, 0.0)
    else:
        centered_m = centered
    var = jnp.sum(centered_m * centered_m, axis=1, keepdims=True) * inv_n
    inv_std = jax.lax.rsqrt(var + jnp.float32(eps))           # EUP

    # FMA-form affine normalization: one multiply + one add per element.
    scale = gamma_ref[...] * inv_std                          # (Cout, 1)
    shift = beta_ref[...] - mean * scale                      # (Cout, 1)
    out = y * scale + shift                                   # (Cout, Mp)

    # Drop the padded pixel columns on the way out (masked partial-tile store).
    o_ref[...] = out[:, :o_ref.shape[1]]


def relu_conv1x1_bn(x_nchw, w_oi, gamma, beta, *, eps=1e-5,
                    matmul_dtype=jnp.bfloat16):
    """x_nchw: (N, Cin, H, W) f32; w_oi: (Cout, Cin) f32 (1x1 conv weight,
    trailing 1x1 dims squeezed); gamma/beta: (Cout,) f32."""
    N, Cin, H, W = x_nchw.shape
    Cout = w_oi.shape[0]
    HW = H * W
    M = N * HW

    # NCHW -> (Cin, N*H*W).  For N == 1 (the module spec) the transpose only
    # moves a size-1 axis, so this is a pure metadata reshape (no copy).
    x2d = jnp.transpose(x_nchw.reshape(N, Cin, HW), (1, 0, 2)).reshape(Cin, M)

    # Zero-pad the pixel axis to a lane multiple (128) so the in-kernel batch
    # statistics see exact zeros in the padding (cheap: ~0.25 MB at this size).
    Mp = ((M + 127) // 128) * 128
    if Mp != M:
        x2d = jnp.pad(x2d, ((0, 0), (0, Mp - M)))

    gamma2 = gamma.reshape(Cout, 1)
    beta2 = beta.reshape(Cout, 1)

    kernel = functools.partial(_relu_conv1x1_bn_kernel, n_valid=M, eps=eps,
                               matmul_dtype=matmul_dtype)

    bytes_accessed = 4 * (Cin * Mp + Cout * Cin + 2 * Cout + Cout * M)
    out = pl.pallas_call(
        kernel,
        out_shape=jax.ShapeDtypeStruct((Cout, M), jnp.float32),
        in_specs=[
            pl.BlockSpec(memory_space=pltpu.MemorySpace.VMEM),  # x (Cin, Mp)
            pl.BlockSpec(memory_space=pltpu.MemorySpace.VMEM),  # w (Cout, Cin)
            pl.BlockSpec(memory_space=pltpu.MemorySpace.VMEM),  # gamma
            pl.BlockSpec(memory_space=pltpu.MemorySpace.VMEM),  # beta
        ],
        out_specs=pl.BlockSpec(memory_space=pltpu.MemorySpace.VMEM),
        cost_estimate=pl.CostEstimate(
            flops=2 * M * Cin * Cout,
            transcendentals=0,
            bytes_accessed=bytes_accessed),
        compiler_params=pltpu.CompilerParams(
            vmem_limit_bytes=32 * 1024 * 1024),
    )(x2d, w_oi, gamma2, beta2)

    # (Cout, N*H*W) -> (N, Cout, H, W); for N == 1 these are free reshapes.
    out = jnp.transpose(out.reshape(Cout, N, HW), (1, 0, 2)).reshape(N, Cout, H, W)
    return out


def _reference(x_nchw, w_oi, gamma, beta, eps=1e-5):
    x = jnp.maximum(x_nchw, 0.0)
    y = jnp.einsum('nchw,oc->nohw', x, w_oi)   # 1x1 conv
    mean = jnp.mean(y, axis=(0, 2, 3), keepdims=True)
    var = jnp.mean((y - mean) ** 2, axis=(0, 2, 3), keepdims=True)
    g = gamma.reshape(1, -1, 1, 1)
    b = beta.reshape(1, -1, 1, 1)
    return (y - mean) / jnp.sqrt(var + eps) * g + b


if __name__ == "__main__":
    key = jax.random.PRNGKey(0)
    k_x, k_w, k_g, k_b = jax.random.split(key, 4)

    # Shapes fixed by the module: input (1, 256, 14, 14), Conv2d 256 -> 1024 1x1.
    N, Cin, H, W = 1, 256, 14, 14
    Cout = 1024

    x = jax.random.normal(k_x, (N, Cin, H, W), dtype=jnp.float32)
    w = jax.random.normal(k_w, (Cout, Cin), dtype=jnp.float32) * 0.05
    gamma = 1.0 + 0.1 * jax.random.normal(k_g, (Cout,), dtype=jnp.float32)
    beta = 0.1 * jax.random.normal(k_b, (Cout,), dtype=jnp.float32)

    fn = jax.jit(relu_conv1x1_bn, static_argnames=("eps", "matmul_dtype"))
    ref = _reference(x, w, gamma, beta)

    # Fast path: bf16 matmul operands, f32 accumulation + f32 BN math.
    out_bf16 = jax.block_until_ready(fn(x, w, gamma, beta,
                                        matmul_dtype=jnp.bfloat16))
    assert out_bf16.shape == (N, Cout, H, W), out_bf16.shape
    err_bf16 = float(jnp.max(jnp.abs(out_bf16 - ref)))
    assert jnp.allclose(out_bf16, ref, atol=2e-2, rtol=2e-2), err_bf16

    # Full-precision path: same kernel with f32 matmul operands (tight check).
    out_f32 = jax.block_until_ready(fn(x, w, gamma, beta,
                                       matmul_dtype=jnp.float32))
    err_f32 = float(jnp.max(jnp.abs(out_f32 - ref)))
    assert jnp.allclose(out_f32, ref, atol=2e-3, rtol=2e-3), err_f32

    print("KERNEL_OK")
</pallas_src>

<mosaic_0001>
module attributes {stable_mosaic.version = 11 : i64} {
  func.func @_relu_conv1x1_bn_kernel(%arg0: memref<256x256xf32, #tpu.memory_space<vmem>>, %arg1: memref<1024x256xf32, #tpu.memory_space<vmem>>, %arg2: memref<1024x1xf32, #tpu.memory_space<vmem>>, %arg3: memref<1024x1xf32, #tpu.memory_space<vmem>>, %arg4: memref<1024x196xf32, #tpu.memory_space<vmem>>) attributes {dimension_semantics = [], scalar_prefetch = 0 : i64, scratch_operands = 0 : i64, tpu.core_type = #tpu.core_type<tc>} {
    %c0 = arith.constant 0 : index
    %c0_0 = arith.constant 0 : index
    %0 = vector.load %arg0[%c0, %c0_0] : memref<256x256xf32, #tpu.memory_space<vmem>>, vector<256x256xf32>
    %cst = arith.constant 0.000000e+00 : f32
    %1 = vector.broadcast %cst : f32 to vector<256x256xf32>
    %2 = arith.maximumf %0, %1 : vector<256x256xf32>
    %3 = arith.truncf %2 : vector<256x256xf32> to vector<256x256xbf16>
    %c0_1 = arith.constant 0 : index
    %c0_2 = arith.constant 0 : index
    %4 = vector.load %arg1[%c0_1, %c0_2] : memref<1024x256xf32, #tpu.memory_space<vmem>>, vector<1024x256xf32>
    %5 = arith.truncf %4 : vector<1024x256xf32> to vector<1024x256xbf16>
    %cst_3 = arith.constant dense<0.000000e+00> : vector<1024x256xf32>
    %6 = tpu.matmul %5, %3, %cst_3 {dimension_numbers = #tpu.dot_dimension_numbers<[1], [0], [0], [1], [0, 0, 1, 1], [], []>} : vector<1024x256xbf16>, vector<256x256xbf16>, vector<1024x256xf32> -> vector<1024x256xf32>
    %cst_4 = arith.constant dense<0.000000e+00> : vector<1024xf32>
    %7 = vector.multi_reduction <add>, %6, %cst_4 [1] : vector<1024x256xf32> to vector<1024xf32>
    %8 = vector.shape_cast %7 : vector<1024xf32> to vector<1024x1xf32>
    %cst_5 = arith.constant 0.00510204071 : f32
    %9 = vector.broadcast %cst_5 : f32 to vector<1024x1xf32>
    %10 = arith.mulf %8, %9 : vector<1024x1xf32>
    %11 = vector.broadcast %10 : vector<1024x1xf32> to vector<1024x256xf32>
    %12 = arith.subf %6, %11 : vector<1024x256xf32>
    %13 = tpu.iota {dimensions = array<i32: 1>} : vector<1024x256xi32>
    %c196_i32 = arith.constant 196 : i32
    %14 = vector.broadcast %c196_i32 : i32 to vector<1024x256xi32>
    %15 = arith.cmpi slt, %13, %14 : vector<1024x256xi32>
    %cst_6 = arith.constant 0.000000e+00 : f32
    %16 = vector.broadcast %cst_6 : f32 to vector<1024x256xf32>
    %17 = arith.select %15, %12, %16 : vector<1024x256xi1>, vector<1024x256xf32>
    %18 = arith.mulf %17, %17 : vector<1024x256xf32>
    %cst_7 = arith.constant dense<0.000000e+00> : vector<1024xf32>
    %19 = vector.multi_reduction <add>, %18, %cst_7 [1] : vector<1024x256xf32> to vector<1024xf32>
    %20 = vector.shape_cast %19 : vector<1024xf32> to vector<1024x1xf32>
    %cst_8 = arith.constant 0.00510204071 : f32
    %21 = vector.broadcast %cst_8 : f32 to vector<1024x1xf32>
    %22 = arith.mulf %20, %21 : vector<1024x1xf32>
    %cst_9 = arith.constant 9.99999974E-6 : f32
    %23 = vector.broadcast %cst_9 : f32 to vector<1024x1xf32>
    %24 = arith.addf %22, %23 : vector<1024x1xf32>
    %25 = math.rsqrt %24 : vector<1024x1xf32>
    %c0_10 = arith.constant 0 : index
    %c0_11 = arith.constant 0 : index
    %26 = vector.load %arg2[%c0_10, %c0_11] : memref<1024x1xf32, #tpu.memory_space<vmem>>, vector<1024x1xf32>
    %27 = arith.mulf %26, %25 : vector<1024x1xf32>
    %c0_12 = arith.constant 0 : index
    %c0_13 = arith.constant 0 : index
    %28 = vector.load %arg3[%c0_12, %c0_13] : memref<1024x1xf32, #tpu.memory_space<vmem>>, vector<1024x1xf32>
    %29 = arith.mulf %10, %27 : vector<1024x1xf32>
    %30 = arith.subf %28, %29 : vector<1024x1xf32>
    %31 = vector.broadcast %27 : vector<1024x1xf32> to vector<1024x256xf32>
    %32 = arith.mulf %6, %31 : vector<1024x256xf32>
    %33 = vector.broadcast %30 : vector<1024x1xf32> to vector<1024x256xf32>
    %34 = arith.addf %32, %33 : vector<1024x256xf32>
    %35 = vector.extract_strided_slice %34 {offsets = [0, 0], sizes = [1024, 196], strides = [1, 1]} : vector<1024x256xf32> to vector<1024x196xf32>
    %c0_14 = arith.constant 0 : index
    %c0_15 = arith.constant 0 : index
    %36 = vector.load %arg4[%c0_14, %c0_15] : memref<1024x196xf32, #tpu.memory_space<vmem>>, vector<1024x196xf32>
    tpu.vector_store %arg4[%c0_14, %c0_15], %35 {strides = array<i32>} : memref<1024x196xf32, #tpu.memory_space<vmem>>, vector<1024x196xf32>,
    return
  }
}

</mosaic_0001>

<bundles_post_ra>
// kernel: relu_conv1x1_bn.1
= control target key start
LH: loop header
LB: loop body
LE: loop exit
PB: predicated region body
PF: predicated region fallthrough
CT: control target
= control target key end

     0   :  { %vm5720_vm1 = vcmask 556032   ;;  %s12837_s0 = inlined_call_operand.vmem [shape: f32[256,256], index: 0, kind: input, shape index: {}]   ;;  %s12838_s1 = inlined_call_operand.vmem [shape: f32[1024,256], index: 1, kind: input, shape index: {}]   ;;  %s12839_s2 = inlined_call_operand.vmem [shape: f32[1024,1], index: 2, kind: input, shape index: {}]   ;;  %s12840_s3 = inlined_call_operand.vmem [shape: f32[1024,1], index: 3, kind: input, shape index: {}]   ;;  %s12841_s4 = inlined_call_operand.vmem [shape: f32[1024,196], index: 4, kind: output, shape index: {}]  }
   0x1   :  { %v18_v0 = vld [vmem:[%s12837_s0 + $0x8] sm:$0xff]  ;;  %v20_v1 = vld [vmem:[%s12837_s0 + $0x18] sm:$0xff]  ;;  %v17_v2 = vld [vmem:[%s12837_s0] sm:$0xff] }
   0x2   :  { %v82_v3 = vmax.f32 %v18_v0, 0.0  ;;  %v84_v4 = vmax.f32 %v20_v1, 0.0  ;;  %v19_v5 = vld [vmem:[%s12837_s0 + $0x10] sm:$0xff]  ;;  %v81_v6 = vmax.f32 %v17_v2, 0.0  ;;  %v22_v7 = vld [vmem:[%s12837_s0 + $0x28] sm:$0xff]  ;;  %v24_v8 = vld [vmem:[%s12837_s0 + $0x38] sm:$0xff] }
   0x3   :  { %v83_v9 = vmax.f32 %v19_v5, 0.0  ;;  %v86_v10 = vmax.f32 %v22_v7, 0.0  ;;  %v88_v11 = vmax.f32 %v24_v8, 0.0  ;;  %v21_v12 = vld [vmem:[%s12837_s0 + $0x20] sm:$0xff]  ;;  %v23_v13 = vld [vmem:[%s12837_s0 + $0x30] sm:$0xff]  ;;  %v26_v14 = vld [vmem:[%s12837_s0 + $0x48] sm:$0xff] }
   0x4   :  { %v146_v15 = vpack.c.bf16 %v84_v4, %v82_v3  ;;  %v85_v16 = vmax.f32 %v21_v12, 0.0  ;;  %v87_v17 = vmax.f32 %v23_v13, 0.0  ;;  %v28_v18 = vld [vmem:[%s12837_s0 + $0x58] sm:$0xff]  ;;  %v90_v19 = vmax.f32 %v26_v14, 0.0  ;;  %v25_v20 = vld [vmem:[%s12837_s0 + $0x40] sm:$0xff]  ;;  %v27_v21 = vld [vmem:[%s12837_s0 + $0x50] sm:$0xff] }
   0x5   :  { %v145_v22 = vpack.c.bf16 %v83_v9, %v81_v6  ;;  %v148_v23 = vpack.c.bf16 %v88_v11, %v86_v10  ;;  %v92_v24 = vmax.f32 %v28_v18, 0.0  ;;  %v30_v25 = vld [vmem:[%s12837_s0 + $0x68] sm:$0xff]  ;;  %v32_v26 = vld [vmem:[%s12837_s0 + $0x78] sm:$0xff]  ;;  %v89_v28 = vmax.f32 %v25_v20, 0.0  ;;  %v29_v33 = vld [vmem:[%s12837_s0 + $0x60] sm:$0xff] }
   0x6   :  { %561 = vmatprep.subr.bf16.mxu0 %v146_v15  ;;  %5980 = vmatprep.subr.bf16.mxu1 %v146_v15  ;;  %v147_v27 = vpack.c.bf16 %v87_v17, %v85_v16  ;;  %v91_v29 = vmax.f32 %v27_v21, 0.0  ;;  %v94_v31 = vmax.f32 %v30_v25, 0.0  ;;  %v96_v32 = vmax.f32 %v32_v26, 0.0  ;;  %v31_v34 = vld [vmem:[%s12837_s0 + $0x70] sm:$0xff]  ;;  %v34_v35 = vld [vmem:[%s12837_s0 + $0x88] sm:$0xff]  ;;  %v36_v36 = vld [vmem:[%s12837_s0 + $0x98] sm:$0xff] }
   0x7   :  { %562 = vmatpush1.bf16.msra.mxu0 %v145_v22  ;;  %5996 = vmatpush1.bf16.msra.mxu1 %v145_v22  ;;  %v150_v30 = vpack.c.bf16 %v92_v24, %v90_v19  ;;  %v93_v38 = vmax.f32 %v29_v33, 0.0  ;;  %v95_v39 = vmax.f32 %v31_v34, 0.0  ;;  %v98_v41 = vmax.f32 %v34_v35, 0.0  ;;  %v33_v43 = vld [vmem:[%s12837_s0 + $0x80] sm:$0xff]  ;;  %v35_v44 = vld [vmem:[%s12837_s0 + $0x90] sm:$0xff]  ;;  %v38_v45 = vld [vmem:[%s12837_s0 + $0xa8] sm:$0xff] }
   0x8   :  { %563 = vmatprep.subr.bf16.mxu0 %v148_v23  ;;  %5981 = vmatprep.subr.bf16.mxu1 %v148_v23  ;;  %v149_v37 = vpack.c.bf16 %v91_v29, %v89_v28  ;;  %v152_v40 = vpack.c.bf16 %v96_v32, %v94_v31  ;;  %v100_v42 = vmax.f32 %v36_v36, 0.0  ;;  %v40_v46 = vld [vmem:[%s12837_s0 + $0xb8] sm:$0xff]  ;;  %v97_v48 = vmax.f32 %v33_v43, 0.0  ;;  %v37_v53 = vld [vmem:[%s12837_s0 + $0xa0] sm:$0xff]  ;;  %v39_v54 = vld [vmem:[%s12837_s0 + $0xb0] sm:$0xff] }
   0x9   :  { %v151_v47 = vpack.c.bf16 %v95_v39, %v93_v38  ;;  %v99_v49 = vmax.f32 %v35_v44, 0.0  ;;  %v102_v51 = vmax.f32 %v38_v45, 0.0  ;;  %v104_v52 = vmax.f32 %v40_v46, 0.0  ;;  %v42_v55 = vld [vmem:[%s12837_s0 + $0xc8] sm:$0xff]  ;;  %v44_v56 = vld [vmem:[%s12837_s0 + $0xd8] sm:$0xff]  ;;  %v41_v63 = vld [vmem:[%s12837_s0 + $0xc0] sm:$0xff] }
   0xa   :  { %v154_v50 = vpack.c.bf16 %v100_v42, %v98_v41  ;;  %v101_v58 = vmax.f32 %v37_v53, 0.0  ;;  %v103_v59 = vmax.f32 %v39_v54, 0.0  ;;  %v106_v61 = vmax.f32 %v42_v55, 0.0  ;;  %v43_v0 = vld [vmem:[%s12837_s0 + $0xd0] sm:$0xff]  ;;  %v46_v1 = vld [vmem:[%s12837_s0 + $0xe8] sm:$0xff]  ;;  %v48_v2 = vld [vmem:[%s12837_s0 + $0xf8] sm:$0xff] }
   0xb   :  { %564 = vmatpush1.bf16.msra.mxu0 %v147_v27  ;;  %5997 = vmatpush1.bf16.msra.mxu1 %v147_v27  ;;  %v153_v57 = vpack.c.bf16 %v99_v49, %v97_v48  ;;  %v156_v60 = vpack.c.bf16 %v104_v52, %v102_v51  ;;  %v108_v62 = vmax.f32 %v44_v56, 0.0  ;;  %v178_v3 = vld [vmem:[%s12838_s1 + $0x8] sm:$0xff]  ;;  %v180_v4 = vld [vmem:[%s12838_s1 + $0x18] sm:$0xff]  ;;  %v105_v6 = vmax.f32 %v41_v63, 0.0  ;;  %v45_v13 = vld [vmem:[%s12837_s0 + $0xe0] sm:$0xff] }
   0xc   :  { %565 = vmatprep.subr.bf16.mxu0 %v150_v30  ;;  %5982 = vmatprep.subr.bf16.mxu1 %v150_v30  ;;  %v155_v5 = vpack.c.bf16 %v103_v59, %v101_v58  ;;  %v107_v7 = vmax.f32 %v43_v0, 0.0  ;;  %v306_v8 = vld [vmem:[%s12838_s1 + $0x408] sm:$0xff]  ;;  %v308_v9 = vld [vmem:[%s12838_s1 + $0x418] sm:$0xff]  ;;  %v110_v11 = vmax.f32 %v46_v1, 0.0  ;;  %v112_v12 = vmax.f32 %v48_v2, 0.0  ;;  %v47_v14 = vld [vmem:[%s12837_s0 + $0xf0] sm:$0xff] }
   0xd   :  { %v158_v10 = vpack.c.bf16 %v108_v62, %v106_v61  ;;  %v50_v15 = vld [vmem:[%s12837_s0 + $0x108] sm:$0xff]  ;;  %v52_v16 = vld [vmem:[%s12837_s0 + $0x118] sm:$0xff]  ;;  %v434_v17 = vpack.c.bf16 %v180_v4, %v178_v3  ;;  %v498_v18 = vpack.c.bf16 %v308_v9, %v306_v8  ;;  %v109_v20 = vmax.f32 %v45_v13, 0.0  ;;  %v49_v25 = vld [vmem:[%s12837_s0 + $0x100] sm:$0xff] }
   0xe   :  { %v157_v19 = vpack.c.bf16 %v107_v7, %v105_v6  ;;  %v111_v21 = vmax.f32 %v47_v14, 0.0  ;;  %v160_v22 = vpack.c.bf16 %v112_v12, %v110_v11  ;;  %v114_v23 = vmax.f32 %v50_v15, 0.0  ;;  %v51_v26 = vld [vmem:[%s12837_s0 + $0x110] sm:$0xff]  ;;  %v54_v27 = vld [vmem:[%s12837_s0 + $0x128] sm:$0xff]  ;;  %v56_v28 = vld [vmem:[%s12837_s0 + $0x138] sm:$0xff] }
   0xf   :  { %566 = vmatpush1.bf16.msra.mxu0 %v149_v37  ;;  %5998 = vmatpush1.bf16.msra.mxu1 %v149_v37  ;;  %v116_v24 = vmax.f32 %v52_v16, 0.0  ;;  %v113_v30 = vmax.f32 %v49_v25, 0.0  ;;  %v115_v31 = vmax.f32 %v51_v26, 0.0  ;;  %v118_v33 = vmax.f32 %v54_v27, 0.0  ;;  %v53_v35 = vld [vmem:[%s12837_s0 + $0x120] sm:$0xff]  ;;  %v55_v36 = vld [vmem:[%s12837_s0 + $0x130] sm:$0xff] }
  0x10   :  { %567 = vmatprep.subr.bf16.mxu0 %v152_v40  ;;  %5983 = vmatprep.subr.bf16.mxu1 %v152_v40  ;;  %v159_v29 = vpack.c.bf16 %v111_v21, %v109_v20  ;;  %v120_v34 = vmax.f32 %v56_v28, 0.0  ;;  %v58_v37 = vld [vmem:[%s12837_s0 + $0x148] sm:$0xff]  ;;  %v60_v38 = vld [vmem:[%s12837_s0 + $0x158] sm:$0xff]  ;;  %v117_v40 = vmax.f32 %v53_v35, 0.0  ;;  %v119_v41 = vmax.f32 %v55_v36, 0.0  ;;  %v57_v45 = vld [vmem:[%s12837_s0 + $0x140] sm:$0xff] }
  0x11   :  { %593 = vmatprep.mubr.bf16.mxu0 %v434_v17  ;;  %913 = vmatprep.mubr.bf16.mxu1 %v498_v18  ;;  %v162_v32 = vpack.c.bf16 %v116_v24, %v114_v23  ;;  %v161_v39 = vpack.c.bf16 %v115_v31, %v113_v30  ;;  %v122_v43 = vmax.f32 %v58_v37, 0.0  ;;  %v124_v44 = vmax.f32 %v60_v38, 0.0  ;;  %v59_v46 = vld [vmem:[%s12837_s0 + $0x150] sm:$0xff]  ;;  %v64_v48 = vld [vmem:[%s12837_s0 + $0x178] sm:$0xff]  ;;  %v61_v55 = vld [vmem:[%s12837_s0 + $0x160] sm:$0xff] }
  0x12   :  { %v164_v42 = vpack.c.bf16 %v120_v34, %v118_v33  ;;  %v163_v49 = vpack.c.bf16 %v119_v41, %v117_v40  ;;  %v123_v51 = vmax.f32 %v59_v46, 0.0  ;;  %v128_v54 = vmax.f32 %v64_v48, 0.0  ;;  %v63_v56 = vld [vmem:[%s12837_s0 + $0x170] sm:$0xff]  ;;  %v68_v58 = vld [vmem:[%s12837_s0 + $0x198] sm:$0xff]  ;;  %v65_v1 = vld [vmem:[%s12837_s0 + $0x180] sm:$0xff] }
  0x13   :  { %568 = vmatpush1.bf16.msra.mxu0 %v151_v47  ;;  %5999 = vmatpush1.bf16.msra.mxu1 %v151_v47  ;;  %v62_v47 = vld [vmem:[%s12837_s0 + $0x168] sm:$0xff]  ;;  %v166_v52 = vpack.c.bf16 %v124_v44, %v122_v43  ;;  %v127_v61 = vmax.f32 %v63_v56, 0.0  ;;  %v132_v0 = vmax.f32 %v68_v58, 0.0  ;;  %v67_v2 = vld [vmem:[%s12837_s0 + $0x190] sm:$0xff]  ;;  %v72_v4 = vld [vmem:[%s12837_s0 + $0x1b8] sm:$0xff]  ;;  %v129_v6 = vmax.f32 %v65_v1, 0.0 }
  0x14   :  { %569 = vmatprep.subr.bf16.mxu0 %v154_v50  ;;  %5984 = vmatprep.subr.bf16.mxu1 %v154_v50  ;;  %v121_v50 = vmax.f32 %v57_v45, 0.0  ;;  %v126_v53 = vmax.f32 %v62_v47, 0.0  ;;  %v70_v3 = vld [vmem:[%s12837_s0 + $0x1a8] sm:$0xff]  ;;  %v131_v7 = vmax.f32 %v67_v2, 0.0  ;;  %v69_v11 = vld [vmem:[%s12837_s0 + $0x1a0] sm:$0xff]  ;;  %v71_v12 = vld [vmem:[%s12837_s0 + $0x1b0] sm:$0xff] }
  0x15   :  { %v134_v9 = vmax.f32 %v70_v3, 0.0  ;;  %v74_v13 = vld [vmem:[%s12837_s0 + $0x1c8] sm:$0xff]  ;;  %v76_v14 = vld [vmem:[%s12837_s0 + $0x1d8] sm:$0xff]  ;;  %v133_v16 = vmax.f32 %v69_v11, 0.0  ;;  %v135_v17 = vmax.f32 %v71_v12, 0.0  ;;  %v73_v21 = vld [vmem:[%s12837_s0 + $0x1c0] sm:$0xff] }
  0x16   :  { %v165_v59 = vpack.c.bf16 %v123_v51, %v121_v50  ;;  %v168_v62 = vpack.c.bf16 %v128_v54, %v126_v53  ;;  %v169_v15 = vpack.c.bf16 %v131_v7, %v129_v6  ;;  %v140_v20 = vmax.f32 %v76_v14, 0.0  ;;  %v78_v23 = vld [vmem:[%s12837_s0 + $0x1e8] sm:$0xff]  ;;  %v80_v24 = vld [vmem:[%s12837_s0 + $0x1f8] sm:$0xff]  ;;  %v77_v31 = vld [vmem:[%s12837_s0 + $0x1e0] sm:$0xff] }
  0x17   :  { %570 = vmatpush1.bf16.msra.mxu0 %v153_v57  ;;  %6000 = vmatpush1.bf16.msra.mxu1 %v153_v57  ;;  %v66_v57 = vld [vmem:[%s12837_s0 + $0x188] sm:$0xff]  ;;  %v171_v25 = vpack.c.bf16 %v135_v17, %v133_v16  ;;  %v137_v26 = vmax.f32 %v73_v21, 0.0  ;;  %v144_v30 = vmax.f32 %v80_v24, 0.0  ;;  %v141_v34 = vmax.f32 %v77_v31, 0.0  ;;  %v177_v37 = vld [vmem:[%s12838_s1] sm:$0xff]  ;;  %v179_v38 = vld [vmem:[%s12838_s1 + $0x10] sm:$0xff] }
  0x18   :  { %571 = vmatprep.subr.bf16.mxu0 %v156_v60  ;;  %5985 = vmatprep.subr.bf16.mxu1 %v156_v60  ;;  %v125_v60 = vmax.f32 %v61_v55, 0.0  ;;  %v130_v63 = vmax.f32 %v66_v57, 0.0  ;;  %v305_v40 = vld [vmem:[%s12838_s1 + $0x400] sm:$0xff]  ;;  %v307_v41 = vld [vmem:[%s12838_s1 + $0x410] sm:$0xff]  ;;  %v184_v43 = vld [vmem:[%s12838_s1 + $0x38] sm:$0xff]  ;;  %v433_v46 = vpack.c.bf16 %v179_v38, %v177_v37 }
  0x19   :  { %v310_v44 = vld [vmem:[%s12838_s1 + $0x428] sm:$0xff]  ;;  %v312_v45 = vld [vmem:[%s12838_s1 + $0x438] sm:$0xff]  ;;  %v497_v47 = vpack.c.bf16 %v307_v41, %v305_v40  ;;  %v181_v50 = vld [vmem:[%s12838_s1 + $0x20] sm:$0xff] }
  0x1a   :  { %v170_v8 = vpack.c.bf16 %v132_v0, %v130_v63  ;;  %v183_v51 = vld [vmem:[%s12838_s1 + $0x30] sm:$0xff]  ;;  %v186_v54 = vld [vmem:[%s12838_s1 + $0x48] sm:$0xff]  ;;  %v188_v55 = vld [vmem:[%s12838_s1 + $0x58] sm:$0xff] }
  0x1b   :  { %572 = vmatpush1.bf16.msra.mxu0 %v155_v5  ;;  %6001 = vmatpush1.bf16.msra.mxu1 %v155_v5  ;;  %v167_v5 = vpack.c.bf16 %v127_v61, %v125_v60  ;;  %v311_v53 = vld [vmem:[%s12838_s1 + $0x430] sm:$0xff]  ;;  %v314_v56 = vld [vmem:[%s12838_s1 + $0x448] sm:$0xff]  ;;  %v316_v57 = vld [vmem:[%s12838_s1 + $0x458] sm:$0xff]  ;;  %v435_v58 = vpack.c.bf16 %v183_v51, %v181_v50  ;;  %v438_v60 = vpack.c.bf16 %v188_v55, %v186_v54 }
  0x1c   :  { %573 = vmatprep.subr.bf16.mxu0 %v158_v10  ;;  %5986 = vmatprep.subr.bf16.mxu1 %v158_v10  ;;  %v136_v10 = vmax.f32 %v72_v4, 0.0  ;;  %v502_v61 = vpack.c.bf16 %v316_v57, %v314_v56  ;;  %v187_v63 = vld [vmem:[%s12838_s1 + $0x50] sm:$0xff]  ;;  %v313_v0 = vld [vmem:[%s12838_s1 + $0x440] sm:$0xff]  ;;  %v190_v2 = vld [vmem:[%s12838_s1 + $0x68] sm:$0xff] }
  0x1d   :  { %v315_v1 = vld [vmem:[%s12838_s1 + $0x450] sm:$0xff]  ;;  %v192_v3 = vld [vmem:[%s12838_s1 + $0x78] sm:$0xff]  ;;  %v318_v4 = vld [vmem:[%s12838_s1 + $0x468] sm:$0xff] }
  0x1e   :  { %v172_v18 = vpack.c.bf16 %v136_v10, %v134_v9  ;;  %v501_v7 = vpack.c.bf16 %v315_v1, %v313_v0  ;;  %v189_v10 = vld [vmem:[%s12838_s1 + $0x60] sm:$0xff]  ;;  %v191_v11 = vld [vmem:[%s12838_s1 + $0x70] sm:$0xff]  ;;  %v194_v14 = vld [vmem:[%s12838_s1 + $0x88] sm:$0xff] }
  0x1f   :  { %574 = vmatpush1.bf16.msra.mxu0 %v157_v19  ;;  %6002 = vmatpush1.bf16.msra.mxu1 %v157_v19  ;;  %v138_v19 = vmax.f32 %v74_v13, 0.0  ;;  %v317_v12 = vld [vmem:[%s12838_s1 + $0x460] sm:$0xff]  ;;  %v319_v13 = vld [vmem:[%s12838_s1 + $0x470] sm:$0xff]  ;;  %v322_v16 = vld [vmem:[%s12838_s1 + $0x488] sm:$0xff] }
  0x20   :  { %575 = vmatprep.subr.bf16.mxu0 %v160_v22  ;;  %5987 = vmatprep.subr.bf16.mxu1 %v160_v22  ;;  %v75_v22 = vld [vmem:[%s12837_s0 + $0x1d0] sm:$0xff]  ;;  %v324_v17 = vld [vmem:[%s12838_s1 + $0x498] sm:$0xff]  ;;  %v321_v24 = vld [vmem:[%s12838_s1 + $0x480] sm:$0xff] }
  0x21   :  { %v139_v27 = vmax.f32 %v75_v22, 0.0  ;;  %v174_v28 = vpack.c.bf16 %v140_v20, %v138_v19  ;;  %v503_v19 = vpack.c.bf16 %v319_v13, %v317_v12  ;;  %v506_v21 = vpack.c.bf16 %v324_v17, %v322_v16  ;;  %v193_v22 = vld [vmem:[%s12838_s1 + $0x80] sm:$0xff]  ;;  %v327_v37 = vld [vmem:[%s12838_s1 + $0x4b0] sm:$0xff]  ;;  %v202_v38 = vld [vmem:[%s12838_s1 + $0xc8] sm:$0xff] }
  0x22   :  { %v330_v40 = vld [vmem:[%s12838_s1 + $0x4c8] sm:$0xff]  ;;  %v332_v41 = vld [vmem:[%s12838_s1 + $0x4d8] sm:$0xff] }
  0x23   :  { %576 = vmatpush1.bf16.msra.mxu0 %v159_v29  ;;  %6003 = vmatpush1.bf16.msra.mxu1 %v159_v29  ;;  %v142_v29 = vmax.f32 %v78_v23, 0.0  ;;  %v173_v33 = vpack.c.bf16 %v139_v27, %v137_v26  ;;  %v195_v23 = vld [vmem:[%s12838_s1 + $0x90] sm:$0xff]  ;;  %v198_v26 = vld [vmem:[%s12838_s1 + $0xa8] sm:$0xff]  ;;  %v200_v27 = vld [vmem:[%s12838_s1 + $0xb8] sm:$0xff] }
  0x24   :  { %577 = vmatprep.subr.bf16.mxu0 %v162_v32  ;;  %5988 = vmatprep.subr.bf16.mxu1 %v162_v32  ;;  %v79_v32 = vld [vmem:[%s12837_s0 + $0x1f0] sm:$0xff]  ;;  %v206_v50 = vld [vmem:[%s12838_s1 + $0xe8] sm:$0xff]  ;;  %v208_v51 = vld [vmem:[%s12838_s1 + $0xf8] sm:$0xff] }
  0x25   :  { %v143_v35 = vmax.f32 %v79_v32, 0.0  ;;  %v176_v36 = vpack.c.bf16 %v144_v30, %v142_v29  ;;  %v328_v29 = vld [vmem:[%s12838_s1 + $0x4b8] sm:$0xff]  ;;  %v441_v30 = vpack.c.bf16 %v195_v23, %v193_v22  ;;  %v444_v32 = vpack.c.bf16 %v200_v27, %v198_v26  ;;  %v338_v0 = vld [vmem:[%s12838_s1 + $0x508] sm:$0xff] }
  0x26   :  { %v448_v56 = vpack.c.bf16 %v208_v51, %v206_v50  ;;  %v340_v1 = vld [vmem:[%s12838_s1 + $0x518] sm:$0xff]  ;;  %v342_v12 = vld [vmem:[%s12838_s1 + $0x528] sm:$0xff] }
  0x27   :  { %578 = vmatpush1.bf16.msra.mxu0 %v161_v39  ;;  %6004 = vmatpush1.bf16.msra.mxu1 %v161_v39  ;;  %v175_v39 = vpack.c.bf16 %v143_v35, %v141_v34  ;;  %v197_v34 = vld [vmem:[%s12838_s1 + $0xa0] sm:$0xff]  ;;  %v199_v35 = vld [vmem:[%s12838_s1 + $0xb0] sm:$0xff]  ;;  %v344_v13 = vld [vmem:[%s12838_s1 + $0x538] sm:$0xff] }
  0x28   :  { %579 = vmatprep.subr.bf16.mxu0 %v164_v42  ;;  %5989 = vmatprep.subr.bf16.mxu1 %v164_v42  ;;  %v182_v42 = vld [vmem:[%s12838_s1 + $0x28] sm:$0xff]  ;;  %v516_v17 = vpack.c.bf16 %v344_v13, %v342_v12  ;;  %v220_v23 = vld [vmem:[%s12838_s1 + $0x158] sm:$0xff] }
  0x29   :  { %v436_v48 = vpack.c.bf16 %v184_v43, %v182_v42  ;;  %v443_v42 = vpack.c.bf16 %v199_v35, %v197_v34  ;;  %v218_v22 = vld [vmem:[%s12838_s1 + $0x148] sm:$0xff]  ;;  %v224_v35 = vld [vmem:[%s12838_s1 + $0x178] sm:$0xff] }
  0x2a   :  { %v222_v34 = vld [vmem:[%s12838_s1 + $0x168] sm:$0xff] }
  0x2b   :  { %580 = vmatpush1.bf16.msra.mxu0 %v163_v49  ;;  %6005 = vmatpush1.bf16.msra.mxu1 %v163_v49  ;;  %v500_v49 = vpack.c.bf16 %v312_v45, %v310_v44  ;;  %v510_v45 = vpack.c.bf16 %v332_v41, %v330_v40  ;;  %v456_v40 = vpack.c.bf16 %v224_v35, %v222_v34 }
  0x2c   :  { %581 = vmatprep.subr.bf16.mxu0 %v166_v52  ;;  %5990 = vmatprep.subr.bf16.mxu1 %v166_v52  ;;  %v309_v52 = vld [vmem:[%s12838_s1 + $0x420] sm:$0xff] }
  0x2f   :  { %582 = vmatpush1.bf16.msra.mxu0 %v165_v59  ;;  %6006 = vmatpush1.bf16.msra.mxu1 %v165_v59  ;;  %v499_v59 = vpack.c.bf16 %v311_v53, %v309_v52  ;;  %v334_v52 = vld [vmem:[%s12838_s1 + $0x4e8] sm:$0xff]  ;;  %v336_v53 = vld [vmem:[%s12838_s1 + $0x4f8] sm:$0xff] }
  0x30   :  { %583 = vmatprep.subr.bf16.mxu0 %v168_v62  ;;  %5991 = vmatprep.subr.bf16.mxu1 %v168_v62  ;;  %v185_v62 = vld [vmem:[%s12838_s1 + $0x40] sm:$0xff]  ;;  %v512_v57 = vpack.c.bf16 %v336_v53, %v334_v52 }
  0x31   :  { %v437_v6 = vpack.c.bf16 %v187_v63, %v185_v62  ;;  %v210_v62 = vld [vmem:[%s12838_s1 + $0x108] sm:$0xff]  ;;  %v212_v63 = vld [vmem:[%s12838_s1 + $0x118] sm:$0xff] }
  0x33   :  { %584 = vmatpush1.bf16.msra.mxu0 %v167_v5  ;;  %6007 = vmatpush1.bf16.msra.mxu1 %v167_v5  ;;  %v320_v5 = vld [vmem:[%s12838_s1 + $0x478] sm:$0xff] }
  0x34   :  { %585 = vmatprep.subr.bf16.mxu0 %v170_v8  ;;  %5992 = vmatprep.subr.bf16.mxu1 %v170_v8  ;;  %v440_v8 = vpack.c.bf16 %v192_v3, %v190_v2  ;;  %v504_v9 = vpack.c.bf16 %v320_v5, %v318_v4  ;;  %v450_v4 = vpack.c.bf16 %v212_v63, %v210_v62 }
  0x35   :  { %v514_v5 = vpack.c.bf16 %v340_v1, %v338_v0 }
  0x37   :  { %586 = vmatpush1.bf16.msra.mxu0 %v169_v15  ;;  %6008 = vmatpush1.bf16.msra.mxu1 %v169_v15  ;;  %v196_v15 = vld [vmem:[%s12838_s1 + $0x98] sm:$0xff] }
  0x38   :  { %587 = vmatprep.subr.bf16.mxu0 %v172_v18  ;;  %5993 = vmatprep.subr.bf16.mxu1 %v172_v18  ;;  %v439_v18 = vpack.c.bf16 %v191_v11, %v189_v10  ;;  %v442_v20 = vpack.c.bf16 %v196_v15, %v194_v14  ;;  %v214_v10 = vld [vmem:[%s12838_s1 + $0x128] sm:$0xff]  ;;  %v216_v11 = vld [vmem:[%s12838_s1 + $0x138] sm:$0xff] }
  0x39   :  { %v452_v16 = vpack.c.bf16 %v216_v11, %v214_v10 }
  0x3b   :  { %588 = vmatpush1.bf16.msra.mxu0 %v171_v25  ;;  %6009 = vmatpush1.bf16.msra.mxu1 %v171_v25  ;;  %v323_v25 = vld [vmem:[%s12838_s1 + $0x490] sm:$0xff] }
  0x3c   :  { %589 = vmatprep.subr.bf16.mxu0 %v174_v28  ;;  %5994 = vmatprep.subr.bf16.mxu1 %v174_v28  ;;  %v326_v28 = vld [vmem:[%s12838_s1 + $0x4a8] sm:$0xff]  ;;  %v505_v31 = vpack.c.bf16 %v323_v25, %v321_v24  ;;  %v348_v25 = vld [vmem:[%s12838_s1 + $0x558] sm:$0xff] }
  0x3d   :  { %v346_v24 = vld [vmem:[%s12838_s1 + $0x548] sm:$0xff] }
  0x3f   :  { %590 = vmatpush1.bf16.msra.mxu0 %v173_v33  ;;  %6010 = vmatpush1.bf16.msra.mxu1 %v173_v33  ;;  %v508_v33 = vpack.c.bf16 %v328_v29, %v326_v28  ;;  %v454_v28 = vpack.c.bf16 %v220_v23, %v218_v22  ;;  %v518_v29 = vpack.c.bf16 %v348_v25, %v346_v24 }
  0x40   :  { %591 = vmatprep.subr.bf16.mxu0 %v176_v36  ;;  %5995 = vmatprep.subr.bf16.mxu1 %v176_v36  ;;  %v325_v36 = vld [vmem:[%s12838_s1 + $0x4a0] sm:$0xff] }
  0x41   :  { %v507_v43 = vpack.c.bf16 %v327_v37, %v325_v36  ;;  %v350_v36 = vld [vmem:[%s12838_s1 + $0x568] sm:$0xff]  ;;  %v352_v37 = vld [vmem:[%s12838_s1 + $0x578] sm:$0xff] }
  0x42   :  { %v520_v41 = vpack.c.bf16 %v352_v37, %v350_v36 }
  0x43   :  { %592 = vmatpush1.bf16.msra.mxu0 %v175_v39  ;;  %6011 = vmatpush1.bf16.msra.mxu1 %v175_v39  ;;  %v204_v39 = vld [vmem:[%s12838_s1 + $0xd8] sm:$0xff] }
  0x44   :  { %v446_v44 = vpack.c.bf16 %v204_v39, %v202_v38 }
  0x46   :  { %594 = vmatmul.mubr.bf16.vlgmr.msra.gmra.mrb[0].mxu0 %v433_v46  ;;  %914 = vmatmul.mubr.bf16.vlgmr.msra.gmra.mrb[0].mxu1 %v497_v47  ;;  %v201_v46 = vld [vmem:[%s12838_s1 + $0xc0] sm:$0xff]  ;;  %v203_v47 = vld [vmem:[%s12838_s1 + $0xd0] sm:$0xff] }
  0x47   :  { %603 = vmatprep.mubr.bf16.mxu0 %v436_v48  ;;  %923 = vmatprep.mubr.bf16.mxu1 %v500_v49  ;;  %v329_v48 = vld [vmem:[%s12838_s1 + $0x4c0] sm:$0xff]  ;;  %v331_v49 = vld [vmem:[%s12838_s1 + $0x4d0] sm:$0xff]  ;;  %v445_v54 = vpack.c.bf16 %v203_v47, %v201_v46  ;;  %v226_v46 = vld [vmem:[%s12838_s1 + $0x188] sm:$0xff] }
  0x48   :  { %v509_v55 = vpack.c.bf16 %v331_v49, %v329_v48  ;;  %v228_v47 = vld [vmem:[%s12838_s1 + $0x198] sm:$0xff]  ;;  %v354_v48 = vld [vmem:[%s12838_s1 + $0x588] sm:$0xff] }
  0x49   :  { %v356_v49 = vld [vmem:[%s12838_s1 + $0x598] sm:$0xff]  ;;  %v458_v52 = vpack.c.bf16 %v228_v47, %v226_v46 }
  0x4a   :  { %v522_v53 = vpack.c.bf16 %v356_v49, %v354_v48 }
  0x4e   :  { %604 = vmatmul.mubr.bf16.gmra.mrb[4].mxu0 %v435_v58  ;;  %924 = vmatmul.mubr.bf16.gmra.mrb[4].mxu1 %v499_v59  ;;  %v205_v58 = vld [vmem:[%s12838_s1 + $0xe0] sm:$0xff]  ;;  %v207_v59 = vld [vmem:[%s12838_s1 + $0xf0] sm:$0xff] }
  0x4f   :  { %613 = vmatprep.mubr.bf16.mxu0 %v438_v60  ;;  %933 = vmatprep.mubr.bf16.mxu1 %v502_v61  ;;  %v333_v60 = vld [vmem:[%s12838_s1 + $0x4e0] sm:$0xff]  ;;  %v335_v61 = vld [vmem:[%s12838_s1 + $0x4f0] sm:$0xff]  ;;  %v447_v2 = vpack.c.bf16 %v207_v59, %v205_v58  ;;  %v230_v58 = vld [vmem:[%s12838_s1 + $0x1a8] sm:$0xff] }
  0x50   :  { %v511_v3 = vpack.c.bf16 %v335_v61, %v333_v60  ;;  %v232_v59 = vld [vmem:[%s12838_s1 + $0x1b8] sm:$0xff]  ;;  %v358_v60 = vld [vmem:[%s12838_s1 + $0x5a8] sm:$0xff] }
  0x51   :  { %v360_v61 = vld [vmem:[%s12838_s1 + $0x5b8] sm:$0xff]  ;;  %v460_v0 = vpack.c.bf16 %v232_v59, %v230_v58 }
  0x52   :  { %v524_v1 = vpack.c.bf16 %v360_v61, %v358_v60 }
  0x56   :  { %614 = vmatmul.mubr.bf16.gmra.mrb[8].mxu0 %v437_v6  ;;  %934 = vmatmul.mubr.bf16.gmra.mrb[8].mxu1 %v501_v7  ;;  %v209_v6 = vld [vmem:[%s12838_s1 + $0x100] sm:$0xff]  ;;  %v211_v7 = vld [vmem:[%s12838_s1 + $0x110] sm:$0xff] }
  0x57   :  { %623 = vmatprep.mubr.bf16.mxu0 %v440_v8  ;;  %943 = vmatprep.mubr.bf16.mxu1 %v504_v9  ;;  %v337_v8 = vld [vmem:[%s12838_s1 + $0x500] sm:$0xff]  ;;  %v339_v9 = vld [vmem:[%s12838_s1 + $0x510] sm:$0xff]  ;;  %v449_v14 = vpack.c.bf16 %v211_v7, %v209_v6  ;;  %v234_v6 = vld [vmem:[%s12838_s1 + $0x1c8] sm:$0xff] }
  0x58   :  { %v513_v15 = vpack.c.bf16 %v339_v9, %v337_v8  ;;  %v236_v7 = vld [vmem:[%s12838_s1 + $0x1d8] sm:$0xff]  ;;  %v362_v8 = vld [vmem:[%s12838_s1 + $0x5c8] sm:$0xff] }
  0x59   :  { %v364_v9 = vld [vmem:[%s12838_s1 + $0x5d8] sm:$0xff]  ;;  %v462_v12 = vpack.c.bf16 %v236_v7, %v234_v6 }
  0x5a   :  { %v526_v13 = vpack.c.bf16 %v364_v9, %v362_v8 }
  0x5e   :  { %624 = vmatmul.mubr.bf16.gmra.mrb[12].mxu0 %v439_v18  ;;  %944 = vmatmul.mubr.bf16.gmra.mrb[12].mxu1 %v503_v19  ;;  %v213_v18 = vld [vmem:[%s12838_s1 + $0x120] sm:$0xff]  ;;  %v215_v19 = vld [vmem:[%s12838_s1 + $0x130] sm:$0xff] }
  0x5f   :  { %633 = vmatprep.mubr.bf16.mxu0 %v442_v20  ;;  %953 = vmatprep.mubr.bf16.mxu1 %v506_v21  ;;  %v341_v20 = vld [vmem:[%s12838_s1 + $0x520] sm:$0xff]  ;;  %v343_v21 = vld [vmem:[%s12838_s1 + $0x530] sm:$0xff]  ;;  %v451_v26 = vpack.c.bf16 %v215_v19, %v213_v18  ;;  %v238_v18 = vld [vmem:[%s12838_s1 + $0x1e8] sm:$0xff] }
  0x60   :  { %v515_v27 = vpack.c.bf16 %v343_v21, %v341_v20  ;;  %v240_v19 = vld [vmem:[%s12838_s1 + $0x1f8] sm:$0xff]  ;;  %v366_v20 = vld [vmem:[%s12838_s1 + $0x5e8] sm:$0xff] }
  0x61   :  { %v368_v21 = vld [vmem:[%s12838_s1 + $0x5f8] sm:$0xff]  ;;  %v464_v24 = vpack.c.bf16 %v240_v19, %v238_v18 }
  0x62   :  { %v528_v25 = vpack.c.bf16 %v368_v21, %v366_v20 }
  0x66   :  { %634 = vmatmul.mubr.bf16.gmra.mrb[16].mxu0 %v441_v30  ;;  %954 = vmatmul.mubr.bf16.gmra.mrb[16].mxu1 %v505_v31  ;;  %v217_v30 = vld [vmem:[%s12838_s1 + $0x140] sm:$0xff]  ;;  %v219_v31 = vld [vmem:[%s12838_s1 + $0x150] sm:$0xff] }
  0x67   :  { %643 = vmatprep.mubr.bf16.mxu0 %v444_v32  ;;  %963 = vmatprep.mubr.bf16.mxu1 %v508_v33  ;;  %v345_v32 = vld [vmem:[%s12838_s1 + $0x540] sm:$0xff]  ;;  %v347_v33 = vld [vmem:[%s12838_s1 + $0x550] sm:$0xff]  ;;  %v453_v38 = vpack.c.bf16 %v219_v31, %v217_v30  ;;  %v242_v30 = vld [vmem:[%s12838_s1 + $0x208] sm:$0xff] }
  0x68   :  { %v517_v39 = vpack.c.bf16 %v347_v33, %v345_v32  ;;  %v244_v31 = vld [vmem:[%s12838_s1 + $0x218] sm:$0xff]  ;;  %v370_v32 = vld [vmem:[%s12838_s1 + $0x608] sm:$0xff] }
  0x69   :  { %v372_v33 = vld [vmem:[%s12838_s1 + $0x618] sm:$0xff]  ;;  %v466_v36 = vpack.c.bf16 %v244_v31, %v242_v30 }
  0x6a   :  { %v530_v37 = vpack.c.bf16 %v372_v33, %v370_v32 }
  0x6e   :  { %644 = vmatmul.mubr.bf16.gmra.mrb[20].mxu0 %v443_v42  ;;  %964 = vmatmul.mubr.bf16.gmra.mrb[20].mxu1 %v507_v43  ;;  %v221_v42 = vld [vmem:[%s12838_s1 + $0x160] sm:$0xff]  ;;  %v223_v43 = vld [vmem:[%s12838_s1 + $0x170] sm:$0xff] }
  0x6f   :  { %653 = vmatprep.mubr.bf16.mxu0 %v446_v44  ;;  %973 = vmatprep.mubr.bf16.mxu1 %v510_v45  ;;  %v349_v44 = vld [vmem:[%s12838_s1 + $0x560] sm:$0xff]  ;;  %v351_v45 = vld [vmem:[%s12838_s1 + $0x570] sm:$0xff]  ;;  %v455_v50 = vpack.c.bf16 %v223_v43, %v221_v42  ;;  %v246_v42 = vld [vmem:[%s12838_s1 + $0x228] sm:$0xff] }
  0x70   :  { %v519_v51 = vpack.c.bf16 %v351_v45, %v349_v44  ;;  %v248_v43 = vld [vmem:[%s12838_s1 + $0x238] sm:$0xff]  ;;  %v374_v44 = vld [vmem:[%s12838_s1 + $0x628] sm:$0xff] }
  0x71   :  { %v376_v45 = vld [vmem:[%s12838_s1 + $0x638] sm:$0xff]  ;;  %v468_v48 = vpack.c.bf16 %v248_v43, %v246_v42 }
  0x72   :  { %v532_v49 = vpack.c.bf16 %v376_v45, %v374_v44 }
  0x76   :  { %654 = vmatmul.mubr.bf16.gmra.mrb[24].mxu0 %v445_v54  ;;  %974 = vmatmul.mubr.bf16.gmra.mrb[24].mxu1 %v509_v55  ;;  %v225_v54 = vld [vmem:[%s12838_s1 + $0x180] sm:$0xff]  ;;  %v227_v55 = vld [vmem:[%s12838_s1 + $0x190] sm:$0xff] }
  0x77   :  { %663 = vmatprep.mubr.bf16.mxu0 %v448_v56  ;;  %983 = vmatprep.mubr.bf16.mxu1 %v512_v57  ;;  %v353_v56 = vld [vmem:[%s12838_s1 + $0x580] sm:$0xff]  ;;  %v355_v57 = vld [vmem:[%s12838_s1 + $0x590] sm:$0xff]  ;;  %v457_v62 = vpack.c.bf16 %v227_v55, %v225_v54  ;;  %v250_v54 = vld [vmem:[%s12838_s1 + $0x248] sm:$0xff] }
  0x78   :  { %v521_v63 = vpack.c.bf16 %v355_v57, %v353_v56  ;;  %v252_v55 = vld [vmem:[%s12838_s1 + $0x258] sm:$0xff]  ;;  %v378_v56 = vld [vmem:[%s12838_s1 + $0x648] sm:$0xff] }
  0x79   :  { %v380_v57 = vld [vmem:[%s12838_s1 + $0x658] sm:$0xff]  ;;  %v470_v60 = vpack.c.bf16 %v252_v55, %v250_v54 }
  0x7a   :  { %v534_v61 = vpack.c.bf16 %v380_v57, %v378_v56 }
  0x7e   :  { %664 = vmatmul.mubr.bf16.gmra.mrb[28].mxu0 %v447_v2  ;;  %984 = vmatmul.mubr.bf16.gmra.mrb[28].mxu1 %v511_v3  ;;  %v229_v2 = vld [vmem:[%s12838_s1 + $0x1a0] sm:$0xff]  ;;  %v231_v3 = vld [vmem:[%s12838_s1 + $0x1b0] sm:$0xff] }
  0x7f   :  { %673 = vmatprep.mubr.bf16.mxu0 %v450_v4  ;;  %993 = vmatprep.mubr.bf16.mxu1 %v514_v5  ;;  %v357_v4 = vld [vmem:[%s12838_s1 + $0x5a0] sm:$0xff]  ;;  %v359_v5 = vld [vmem:[%s12838_s1 + $0x5b0] sm:$0xff]  ;;  %v459_v10 = vpack.c.bf16 %v231_v3, %v229_v2  ;;  %v254_v2 = vld [vmem:[%s12838_s1 + $0x268] sm:$0xff] }
  0x80   :  { %v523_v11 = vpack.c.bf16 %v359_v5, %v357_v4  ;;  %v256_v3 = vld [vmem:[%s12838_s1 + $0x278] sm:$0xff]  ;;  %v382_v4 = vld [vmem:[%s12838_s1 + $0x668] sm:$0xff] }
  0x81   :  { %v384_v5 = vld [vmem:[%s12838_s1 + $0x678] sm:$0xff]  ;;  %v472_v8 = vpack.c.bf16 %v256_v3, %v254_v2 }
  0x82   :  { %v536_v9 = vpack.c.bf16 %v384_v5, %v382_v4 }
  0x86   :  { %674 = vmatmul.mubr.bf16.gmra.mrb[32].mxu0 %v449_v14  ;;  %994 = vmatmul.mubr.bf16.gmra.mrb[32].mxu1 %v513_v15  ;;  %v233_v14 = vld [vmem:[%s12838_s1 + $0x1c0] sm:$0xff]  ;;  %v235_v15 = vld [vmem:[%s12838_s1 + $0x1d0] sm:$0xff] }
  0x87   :  { %683 = vmatprep.mubr.bf16.mxu0 %v452_v16  ;;  %1003 = vmatprep.mubr.bf16.mxu1 %v516_v17  ;;  %v361_v16 = vld [vmem:[%s12838_s1 + $0x5c0] sm:$0xff]  ;;  %v363_v17 = vld [vmem:[%s12838_s1 + $0x5d0] sm:$0xff]  ;;  %v461_v22 = vpack.c.bf16 %v235_v15, %v233_v14  ;;  %v258_v14 = vld [vmem:[%s12838_s1 + $0x288] sm:$0xff] }
  0x88   :  { %v525_v23 = vpack.c.bf16 %v363_v17, %v361_v16  ;;  %v260_v15 = vld [vmem:[%s12838_s1 + $0x298] sm:$0xff]  ;;  %v386_v16 = vld [vmem:[%s12838_s1 + $0x688] sm:$0xff] }
  0x89   :  { %v388_v17 = vld [vmem:[%s12838_s1 + $0x698] sm:$0xff]  ;;  %v474_v20 = vpack.c.bf16 %v260_v15, %v258_v14 }
  0x8a   :  { %v538_v21 = vpack.c.bf16 %v388_v17, %v386_v16 }
  0x8e   :  { %684 = vmatmul.mubr.bf16.gmra.mrb[36].mxu0 %v451_v26  ;;  %1004 = vmatmul.mubr.bf16.gmra.mrb[36].mxu1 %v515_v27  ;;  %v237_v26 = vld [vmem:[%s12838_s1 + $0x1e0] sm:$0xff]  ;;  %v239_v27 = vld [vmem:[%s12838_s1 + $0x1f0] sm:$0xff] }
  0x8f   :  { %693 = vmatprep.mubr.bf16.mxu0 %v454_v28  ;;  %1013 = vmatprep.mubr.bf16.mxu1 %v518_v29  ;;  %v365_v28 = vld [vmem:[%s12838_s1 + $0x5e0] sm:$0xff]  ;;  %v367_v29 = vld [vmem:[%s12838_s1 + $0x5f0] sm:$0xff]  ;;  %v463_v34 = vpack.c.bf16 %v239_v27, %v237_v26  ;;  %v262_v26 = vld [vmem:[%s12838_s1 + $0x2a8] sm:$0xff] }
  0x90   :  { %v527_v35 = vpack.c.bf16 %v367_v29, %v365_v28  ;;  %v264_v27 = vld [vmem:[%s12838_s1 + $0x2b8] sm:$0xff]  ;;  %v390_v28 = vld [vmem:[%s12838_s1 + $0x6a8] sm:$0xff] }
  0x91   :  { %v392_v29 = vld [vmem:[%s12838_s1 + $0x6b8] sm:$0xff]  ;;  %v476_v32 = vpack.c.bf16 %v264_v27, %v262_v26 }
  0x92   :  { %v540_v33 = vpack.c.bf16 %v392_v29, %v390_v28 }
  0x96   :  { %694 = vmatmul.mubr.bf16.gmra.mrb[40].mxu0 %v453_v38  ;;  %1014 = vmatmul.mubr.bf16.gmra.mrb[40].mxu1 %v517_v39  ;;  %v241_v38 = vld [vmem:[%s12838_s1 + $0x200] sm:$0xff]  ;;  %v243_v39 = vld [vmem:[%s12838_s1 + $0x210] sm:$0xff] }
  0x97   :  { %703 = vmatprep.mubr.bf16.mxu0 %v456_v40  ;;  %1023 = vmatprep.mubr.bf16.mxu1 %v520_v41  ;;  %v369_v40 = vld [vmem:[%s12838_s1 + $0x600] sm:$0xff]  ;;  %v371_v41 = vld [vmem:[%s12838_s1 + $0x610] sm:$0xff]  ;;  %v465_v46 = vpack.c.bf16 %v243_v39, %v241_v38  ;;  %v266_v38 = vld [vmem:[%s12838_s1 + $0x2c8] sm:$0xff] }
  0x98   :  { %v529_v47 = vpack.c.bf16 %v371_v41, %v369_v40  ;;  %v268_v39 = vld [vmem:[%s12838_s1 + $0x2d8] sm:$0xff]  ;;  %v394_v40 = vld [vmem:[%s12838_s1 + $0x6c8] sm:$0xff] }
  0x99   :  { %v396_v41 = vld [vmem:[%s12838_s1 + $0x6d8] sm:$0xff]  ;;  %v478_v44 = vpack.c.bf16 %v268_v39, %v266_v38 }
  0x9a   :  { %v542_v45 = vpack.c.bf16 %v396_v41, %v394_v40 }
  0x9e   :  { %704 = vmatmul.mubr.bf16.gmra.mrb[44].mxu0 %v455_v50  ;;  %1024 = vmatmul.mubr.bf16.gmra.mrb[44].mxu1 %v519_v51  ;;  %v245_v50 = vld [vmem:[%s12838_s1 + $0x220] sm:$0xff]  ;;  %v247_v51 = vld [vmem:[%s12838_s1 + $0x230] sm:$0xff] }
  0x9f   :  { %713 = vmatprep.mubr.bf16.mxu0 %v458_v52  ;;  %1033 = vmatprep.mubr.bf16.mxu1 %v522_v53  ;;  %v373_v52 = vld [vmem:[%s12838_s1 + $0x620] sm:$0xff]  ;;  %v375_v53 = vld [vmem:[%s12838_s1 + $0x630] sm:$0xff]  ;;  %v467_v58 = vpack.c.bf16 %v247_v51, %v245_v50  ;;  %v270_v50 = vld [vmem:[%s12838_s1 + $0x2e8] sm:$0xff] }
  0xa0   :  { %v531_v59 = vpack.c.bf16 %v375_v53, %v373_v52  ;;  %v272_v51 = vld [vmem:[%s12838_s1 + $0x2f8] sm:$0xff]  ;;  %v398_v52 = vld [vmem:[%s12838_s1 + $0x6e8] sm:$0xff] }
  0xa1   :  { %v400_v53 = vld [vmem:[%s12838_s1 + $0x6f8] sm:$0xff]  ;;  %v480_v56 = vpack.c.bf16 %v272_v51, %v270_v50  ;;  %v418_v50 = vld [vmem:[%s12838_s1 + $0x788] sm:$0xff] }
  0xa2   :  { %v544_v57 = vpack.c.bf16 %v400_v53, %v398_v52  ;;  %v420_v51 = vld [vmem:[%s12838_s1 + $0x798] sm:$0xff] }
  0xa6   :  { %714 = vmatmul.mubr.bf16.gmra.mrb[48].mxu0 %v457_v62  ;;  %1034 = vmatmul.mubr.bf16.gmra.mrb[48].mxu1 %v521_v63  ;;  %v249_v62 = vld [vmem:[%s12838_s1 + $0x240] sm:$0xff]  ;;  %v251_v63 = vld [vmem:[%s12838_s1 + $0x250] sm:$0xff] }
  0xa7   :  { %723 = vmatprep.mubr.bf16.mxu0 %v460_v0  ;;  %1043 = vmatprep.mubr.bf16.mxu1 %v524_v1  ;;  %v377_v0 = vld [vmem:[%s12838_s1 + $0x640] sm:$0xff]  ;;  %v379_v1 = vld [vmem:[%s12838_s1 + $0x650] sm:$0xff]  ;;  %v469_v6 = vpack.c.bf16 %v251_v63, %v249_v62  ;;  %v274_v62 = vld [vmem:[%s12838_s1 + $0x308] sm:$0xff] }
  0xa8   :  { %v533_v7 = vpack.c.bf16 %v379_v1, %v377_v0  ;;  %v276_v63 = vld [vmem:[%s12838_s1 + $0x318] sm:$0xff]  ;;  %v402_v0 = vld [vmem:[%s12838_s1 + $0x708] sm:$0xff] }
  0xa9   :  { %v404_v1 = vld [vmem:[%s12838_s1 + $0x718] sm:$0xff]  ;;  %v482_v4 = vpack.c.bf16 %v276_v63, %v274_v62  ;;  %v554_v63 = vpack.c.bf16 %v420_v51, %v418_v50 }
  0xaa   :  { %v546_v5 = vpack.c.bf16 %v404_v1, %v402_v0 }
  0xae   :  { %724 = vmatmul.mubr.bf16.gmra.mrb[52].mxu0 %v459_v10  ;;  %1044 = vmatmul.mubr.bf16.gmra.mrb[52].mxu1 %v523_v11  ;;  %v253_v10 = vld [vmem:[%s12838_s1 + $0x260] sm:$0xff]  ;;  %v255_v11 = vld [vmem:[%s12838_s1 + $0x270] sm:$0xff] }
  0xaf   :  { %733 = vmatprep.mubr.bf16.mxu0 %v462_v12  ;;  %1053 = vmatprep.mubr.bf16.mxu1 %v526_v13  ;;  %v381_v12 = vld [vmem:[%s12838_s1 + $0x660] sm:$0xff]  ;;  %v383_v13 = vld [vmem:[%s12838_s1 + $0x670] sm:$0xff]  ;;  %v471_v18 = vpack.c.bf16 %v255_v11, %v253_v10  ;;  %v278_v10 = vld [vmem:[%s12838_s1 + $0x328] sm:$0xff] }
  0xb0   :  { %v535_v19 = vpack.c.bf16 %v383_v13, %v381_v12  ;;  %v280_v11 = vld [vmem:[%s12838_s1 + $0x338] sm:$0xff]  ;;  %v406_v12 = vld [vmem:[%s12838_s1 + $0x728] sm:$0xff] }
  0xb1   :  { %v408_v13 = vld [vmem:[%s12838_s1 + $0x738] sm:$0xff]  ;;  %v484_v16 = vpack.c.bf16 %v280_v11, %v278_v10 }
  0xb2   :  { %v548_v17 = vpack.c.bf16 %v408_v13, %v406_v12 }
  0xb6   :  { %734 = vmatmul.mubr.bf16.gmra.mrb[56].mxu0 %v461_v22  ;;  %1054 = vmatmul.mubr.bf16.gmra.mrb[56].mxu1 %v525_v23  ;;  %v257_v22 = vld [vmem:[%s12838_s1 + $0x280] sm:$0xff]  ;;  %v259_v23 = vld [vmem:[%s12838_s1 + $0x290] sm:$0xff] }
  0xb7   :  { %743 = vmatprep.mubr.bf16.mxu0 %v464_v24  ;;  %1063 = vmatprep.mubr.bf16.mxu1 %v528_v25  ;;  %v385_v24 = vld [vmem:[%s12838_s1 + $0x680] sm:$0xff]  ;;  %v387_v25 = vld [vmem:[%s12838_s1 + $0x690] sm:$0xff]  ;;  %v473_v30 = vpack.c.bf16 %v259_v23, %v257_v22  ;;  %v282_v22 = vld [vmem:[%s12838_s1 + $0x348] sm:$0xff] }
  0xb8   :  { %v537_v31 = vpack.c.bf16 %v387_v25, %v385_v24  ;;  %v284_v23 = vld [vmem:[%s12838_s1 + $0x358] sm:$0xff]  ;;  %v410_v24 = vld [vmem:[%s12838_s1 + $0x748] sm:$0xff] }
  0xb9   :  { %v412_v25 = vld [vmem:[%s12838_s1 + $0x758] sm:$0xff]  ;;  %v486_v28 = vpack.c.bf16 %v284_v23, %v282_v22 }
  0xba   :  { %v550_v29 = vpack.c.bf16 %v412_v25, %v410_v24 }
  0xbe   :  { %744 = vmatmul.mubr.bf16.gmra.mrb[60].mxu0 %v463_v34  ;;  %1064 = vmatmul.mubr.bf16.gmra.mrb[60].mxu1 %v527_v35  ;;  %v261_v34 = vld [vmem:[%s12838_s1 + $0x2a0] sm:$0xff]  ;;  %v263_v35 = vld [vmem:[%s12838_s1 + $0x2b0] sm:$0xff] }
  0xbf   :  { %753 = vmatprep.mubr.bf16.mxu0 %v466_v36  ;;  %1073 = vmatprep.mubr.bf16.mxu1 %v530_v37  ;;  %v389_v36 = vld [vmem:[%s12838_s1 + $0x6a0] sm:$0xff]  ;;  %v391_v37 = vld [vmem:[%s12838_s1 + $0x6b0] sm:$0xff]  ;;  %v475_v42 = vpack.c.bf16 %v263_v35, %v261_v34  ;;  %v286_v34 = vld [vmem:[%s12838_s1 + $0x368] sm:$0xff] }
  0xc0   :  { %v539_v43 = vpack.c.bf16 %v391_v37, %v389_v36  ;;  %v288_v35 = vld [vmem:[%s12838_s1 + $0x378] sm:$0xff]  ;;  %v414_v36 = vld [vmem:[%s12838_s1 + $0x768] sm:$0xff] }
  0xc1   :  { %v416_v37 = vld [vmem:[%s12838_s1 + $0x778] sm:$0xff]  ;;  %v488_v40 = vpack.c.bf16 %v288_v35, %v286_v34 }
  0xc2   :  { %v552_v41 = vpack.c.bf16 %v416_v37, %v414_v36 }
  0xc6   :  { %754 = vmatmul.mubr.bf16.gmra.mrb[64].mxu0 %v465_v46  ;;  %1074 = vmatmul.mubr.bf16.gmra.mrb[64].mxu1 %v529_v47  ;;  %v265_v46 = vld [vmem:[%s12838_s1 + $0x2c0] sm:$0xff]  ;;  %v267_v47 = vld [vmem:[%s12838_s1 + $0x2d0] sm:$0xff] }
  0xc7   :  { %763 = vmatprep.mubr.bf16.mxu0 %v468_v48  ;;  %1083 = vmatprep.mubr.bf16.mxu1 %v532_v49  ;;  %v393_v48 = vld [vmem:[%s12838_s1 + $0x6c0] sm:$0xff]  ;;  %v395_v49 = vld [vmem:[%s12838_s1 + $0x6d0] sm:$0xff]  ;;  %v477_v54 = vpack.c.bf16 %v267_v47, %v265_v46  ;;  %v290_v46 = vld [vmem:[%s12838_s1 + $0x388] sm:$0xff] }
  0xc8   :  { %v541_v55 = vpack.c.bf16 %v395_v49, %v393_v48  ;;  %v292_v47 = vld [vmem:[%s12838_s1 + $0x398] sm:$0xff] }
  0xce   :  { %764 = vmatmul.mubr.bf16.gmra.mrb[68].mxu0 %v467_v58  ;;  %1084 = vmatmul.mubr.bf16.gmra.mrb[68].mxu1 %v531_v59  ;;  %v269_v58 = vld [vmem:[%s12838_s1 + $0x2e0] sm:$0xff]  ;;  %v271_v59 = vld [vmem:[%s12838_s1 + $0x2f0] sm:$0xff] }
  0xcf   :  { %773 = vmatprep.mubr.bf16.mxu0 %v470_v60  ;;  %1093 = vmatprep.mubr.bf16.mxu1 %v534_v61  ;;  %v397_v60 = vld [vmem:[%s12838_s1 + $0x6e0] sm:$0xff]  ;;  %v399_v61 = vld [vmem:[%s12838_s1 + $0x6f0] sm:$0xff]  ;;  %v479_v2 = vpack.c.bf16 %v271_v59, %v269_v58 }
  0xd0   :  { %v543_v3 = vpack.c.bf16 %v399_v61, %v397_v60  ;;  %v490_v60 = vpack.c.bf16 %v292_v47, %v290_v46 }
  0xd6   :  { %774 = vmatmul.mubr.bf16.gmra.mrb[72].mxu0 %v469_v6  ;;  %1094 = vmatmul.mubr.bf16.gmra.mrb[72].mxu1 %v533_v7  ;;  %v273_v6 = vld [vmem:[%s12838_s1 + $0x300] sm:$0xff]  ;;  %v275_v7 = vld [vmem:[%s12838_s1 + $0x310] sm:$0xff] }
  0xd7   :  { %783 = vmatprep.mubr.bf16.mxu0 %v472_v8  ;;  %1103 = vmatprep.mubr.bf16.mxu1 %v536_v9  ;;  %v401_v8 = vld [vmem:[%s12838_s1 + $0x700] sm:$0xff]  ;;  %v403_v9 = vld [vmem:[%s12838_s1 + $0x710] sm:$0xff]  ;;  %v481_v14 = vpack.c.bf16 %v275_v7, %v273_v6  ;;  %v294_v6 = vld [vmem:[%s12838_s1 + $0x3a8] sm:$0xff] }
  0xd8   :  { %v545_v15 = vpack.c.bf16 %v403_v9, %v401_v8  ;;  %v296_v7 = vld [vmem:[%s12838_s1 + $0x3b8] sm:$0xff]  ;;  %v422_v8 = vld [vmem:[%s12838_s1 + $0x7a8] sm:$0xff] }
  0xd9   :  { %v424_v9 = vld [vmem:[%s12838_s1 + $0x7b8] sm:$0xff] }
  0xde   :  { %784 = vmatmul.mubr.bf16.gmra.mrb[76].mxu0 %v471_v18  ;;  %1104 = vmatmul.mubr.bf16.gmra.mrb[76].mxu1 %v535_v19  ;;  %v277_v18 = vld [vmem:[%s12838_s1 + $0x320] sm:$0xff]  ;;  %v279_v19 = vld [vmem:[%s12838_s1 + $0x330] sm:$0xff] }
  0xdf   :  { %793 = vmatprep.mubr.bf16.mxu0 %v474_v20  ;;  %1113 = vmatprep.mubr.bf16.mxu1 %v538_v21  ;;  %v405_v20 = vld [vmem:[%s12838_s1 + $0x720] sm:$0xff]  ;;  %v407_v21 = vld [vmem:[%s12838_s1 + $0x730] sm:$0xff]  ;;  %v483_v26 = vpack.c.bf16 %v279_v19, %v277_v18 }
  0xe0   :  { %v547_v27 = vpack.c.bf16 %v407_v21, %v405_v20  ;;  %v492_v20 = vpack.c.bf16 %v296_v7, %v294_v6  ;;  %v556_v21 = vpack.c.bf16 %v424_v9, %v422_v8 }
  0xe6   :  { %794 = vmatmul.mubr.bf16.gmra.mrb[80].mxu0 %v473_v30  ;;  %1114 = vmatmul.mubr.bf16.gmra.mrb[80].mxu1 %v537_v31  ;;  %v281_v30 = vld [vmem:[%s12838_s1 + $0x340] sm:$0xff]  ;;  %v283_v31 = vld [vmem:[%s12838_s1 + $0x350] sm:$0xff] }
  0xe7   :  { %803 = vmatprep.mubr.bf16.mxu0 %v476_v32  ;;  %1123 = vmatprep.mubr.bf16.mxu1 %v540_v33  ;;  %v409_v32 = vld [vmem:[%s12838_s1 + $0x740] sm:$0xff]  ;;  %v411_v33 = vld [vmem:[%s12838_s1 + $0x750] sm:$0xff]  ;;  %v485_v38 = vpack.c.bf16 %v283_v31, %v281_v30  ;;  %v298_v30 = vld [vmem:[%s12838_s1 + $0x3c8] sm:$0xff] }
  0xe8   :  { %v549_v39 = vpack.c.bf16 %v411_v33, %v409_v32  ;;  %v300_v31 = vld [vmem:[%s12838_s1 + $0x3d8] sm:$0xff]  ;;  %v426_v32 = vld [vmem:[%s12838_s1 + $0x7c8] sm:$0xff] }
  0xe9   :  { %v428_v33 = vld [vmem:[%s12838_s1 + $0x7d8] sm:$0xff] }
  0xee   :  { %804 = vmatmul.mubr.bf16.gmra.mrb[84].mxu0 %v475_v42  ;;  %1124 = vmatmul.mubr.bf16.gmra.mrb[84].mxu1 %v539_v43  ;;  %v285_v42 = vld [vmem:[%s12838_s1 + $0x360] sm:$0xff]  ;;  %v287_v43 = vld [vmem:[%s12838_s1 + $0x370] sm:$0xff] }
  0xef   :  { %813 = vmatprep.mubr.bf16.mxu0 %v478_v44  ;;  %1133 = vmatprep.mubr.bf16.mxu1 %v542_v45  ;;  %v413_v44 = vld [vmem:[%s12838_s1 + $0x760] sm:$0xff]  ;;  %v415_v45 = vld [vmem:[%s12838_s1 + $0x770] sm:$0xff] }
  0xf6   :  { %814 = vmatmul.mubr.bf16.gmra.mrb[88].mxu0 %v477_v54  ;;  %1134 = vmatmul.mubr.bf16.gmra.mrb[88].mxu1 %v541_v55  ;;  %v487_v54 = vpack.c.bf16 %v287_v43, %v285_v42  ;;  %v551_v55 = vpack.c.bf16 %v415_v45, %v413_v44  ;;  %v494_v44 = vpack.c.bf16 %v300_v31, %v298_v30 }
  0xf7   :  { %823 = vmatprep.mubr.bf16.mxu0 %v480_v56  ;;  %1143 = vmatprep.mubr.bf16.mxu1 %v544_v57  ;;  %v558_v45 = vpack.c.bf16 %v428_v33, %v426_v32 }
  0xfe   :  { %824 = vmatmul.mubr.bf16.gmra.mrb[92].mxu0 %v479_v2  ;;  %1144 = vmatmul.mubr.bf16.gmra.mrb[92].mxu1 %v543_v3  ;;  %v289_v2 = vld [vmem:[%s12838_s1 + $0x380] sm:$0xff]  ;;  %v291_v3 = vld [vmem:[%s12838_s1 + $0x390] sm:$0xff] }
  0xff   :  { %833 = vmatprep.mubr.bf16.mxu0 %v482_v4  ;;  %1153 = vmatprep.mubr.bf16.mxu1 %v546_v5  ;;  %v417_v4 = vld [vmem:[%s12838_s1 + $0x780] sm:$0xff]  ;;  %v419_v5 = vld [vmem:[%s12838_s1 + $0x790] sm:$0xff] }
 0x106   :  { %834 = vmatmul.mubr.bf16.gmra.mrb[96].mxu0 %v481_v14  ;;  %1154 = vmatmul.mubr.bf16.gmra.mrb[96].mxu1 %v545_v15  ;;  %v489_v14 = vpack.c.bf16 %v291_v3, %v289_v2  ;;  %v553_v15 = vpack.c.bf16 %v419_v5, %v417_v4 }
 0x107   :  { %843 = vmatprep.mubr.bf16.mxu0 %v484_v16  ;;  %1163 = vmatprep.mubr.bf16.mxu1 %v548_v17 }
 0x10e   :  { %844 = vmatmul.mubr.bf16.gmra.mrb[100].mxu0 %v483_v26  ;;  %1164 = vmatmul.mubr.bf16.gmra.mrb[100].mxu1 %v547_v27  ;;  %v293_v26 = vld [vmem:[%s12838_s1 + $0x3a0] sm:$0xff]  ;;  %v295_v27 = vld [vmem:[%s12838_s1 + $0x3b0] sm:$0xff] }
 0x10f   :  { %853 = vmatprep.mubr.bf16.mxu0 %v486_v28  ;;  %1173 = vmatprep.mubr.bf16.mxu1 %v550_v29  ;;  %v421_v28 = vld [vmem:[%s12838_s1 + $0x7a0] sm:$0xff]  ;;  %v423_v29 = vld [vmem:[%s12838_s1 + $0x7b0] sm:$0xff] }
 0x116   :  { %854 = vmatmul.mubr.bf16.gmra.mrb[104].mxu0 %v485_v38  ;;  %1174 = vmatmul.mubr.bf16.gmra.mrb[104].mxu1 %v549_v39  ;;  %v491_v38 = vpack.c.bf16 %v295_v27, %v293_v26  ;;  %v555_v39 = vpack.c.bf16 %v423_v29, %v421_v28  ;;  %v301_v26 = vld [vmem:[%s12838_s1 + $0x3e0] sm:$0xff]  ;;  %v303_v27 = vld [vmem:[%s12838_s1 + $0x3f0] sm:$0xff] }
 0x117   :  { %863 = vmatprep.mubr.bf16.mxu0 %v488_v40  ;;  %1183 = vmatprep.mubr.bf16.mxu1 %v552_v41  ;;  %v429_v28 = vld [vmem:[%s12838_s1 + $0x7e0] sm:$0xff]  ;;  %v431_v29 = vld [vmem:[%s12838_s1 + $0x7f0] sm:$0xff] }
 0x119   :  { %v7167_v48 = vpop.f32.mrb[0].mxu0  ;;  %v7169_v49 = vpop.f32.mrb[0].mxu1 }
 0x11a   :  { %13556 = vst [vmem:[#allocation2_spill] sm:$0xff] %v7167_v48  ;;  %13557 = vst [vmem:[#allocation3_spill] sm:$0xff] %v7169_v49  ;;  %v7177_v52 = vpop.f32.mrb[1].mxu0  ;;  %v7179_v53 = vpop.f32.mrb[1].mxu1 }
 0x11b   :  { %13558 = vst [vmem:[#allocation4_spill] sm:$0xff] %v7177_v52  ;;  %13559 = vst [vmem:[#allocation5_spill] sm:$0xff] %v7179_v53  ;;  %v7181_v56 = vpop.f32.mrb[2].mxu0  ;;  %v7183_v57 = vpop.f32.mrb[2].mxu1  ;;  %v1234_v58 = vadd.f32 %v7177_v52, %v7167_v48  ;;  %v1426_v59 = vadd.f32 %v7179_v53, %v7169_v49 }
 0x11c   :  { %13560 = vst [vmem:[#allocation6_spill] sm:$0xff] %v7181_v56  ;;  %13561 = vst [vmem:[#allocation7_spill] sm:$0xff] %v7183_v57  ;;  %v7189_v61 = vpop.f32.mrb[3].mxu0  ;;  %v7191_v62 = vpop.f32.mrb[3].mxu1 }
 0x11d   :  { %13562 = vst [vmem:[#allocation8_spill] sm:$0xff] %v7189_v61  ;;  %13563 = vst [vmem:[#allocation9_spill] sm:$0xff] %v7191_v62  ;;  %1235 = vadd.xlane.f32.xlu0 %v1234_v58  ;;  %v1429_v0 = vadd.f32 %v7191_v62, %v7183_v57  ;;  %v1237_v1 = vadd.f32 %v7189_v61, %v7181_v56  ;;  %v425_v58 = vld [vmem:[%s12838_s1 + $0x7c0] sm:$0xff] }
 0x11e   :  { %864 = vmatmul.mubr.bf16.gmra.mrb[108].mxu0 %v487_v54  ;;  %1184 = vmatmul.mubr.bf16.gmra.mrb[108].mxu1 %v551_v55  ;;  %v297_v54 = vld [vmem:[%s12838_s1 + $0x3c0] sm:$0xff]  ;;  %v299_v55 = vld [vmem:[%s12838_s1 + $0x3d0] sm:$0xff] }
 0x11f   :  { %1430 = vadd.xlane.f32.xlu1 %v1429_v0  ;;  %873 = vmatprep.mubr.bf16.mxu0 %v490_v60  ;;  %v302_v60 = vld [vmem:[%s12838_s1 + $0x3e8] sm:$0xff]  ;;  %v493_v6 = vpack.c.bf16 %v299_v55, %v297_v54 }
 0x120   :  { %1193 = vmatprep.mubr.bf16.mxu1 %v554_v63  ;;  %v304_v63 = vld [vmem:[%s12838_s1 + $0x3f8] sm:$0xff]  ;;  %v430_v0 = vld [vmem:[%s12838_s1 + $0x7e8] sm:$0xff] }
 0x121   :  { %1427 = vadd.xlane.f32.xlu0 %v1426_v59  ;;  %v7221_v10 = vpop.f32.mrb[4].mxu0  ;;  %v7223_v11 = vpop.f32.mrb[4].mxu1  ;;  %v427_v59 = vld [vmem:[%s12838_s1 + $0x7d0] sm:$0xff] }
 0x122   :  { %13564 = vst [vmem:[#allocation10_spill] sm:$0xff] %v7221_v10  ;;  %13565 = vst [vmem:[#allocation11_spill] sm:$0xff] %v7223_v11  ;;  %v7225_v12 = vpop.f32.mrb[5].mxu0  ;;  %v7227_v13 = vpop.f32.mrb[5].mxu1  ;;  %v557_v7 = vpack.c.bf16 %v427_v59, %v425_v58 }
 0x123   :  { %13566 = vst [vmem:[#allocation12_spill] sm:$0xff] %v7225_v12  ;;  %13567 = vst [vmem:[#allocation13_spill] sm:$0xff] %v7227_v13  ;;  %v7229_v16 = vpop.f32.mrb[6].mxu0  ;;  %v1240_v17 = vadd.f32 %v7225_v12, %v7221_v10  ;;  %v7233_v18 = vpop.f32.mrb[6].mxu1  ;;  %v1432_v19 = vadd.f32 %v7227_v13, %v7223_v11 }
 0x124   :  { %13568 = vst [vmem:[#allocation14_spill] sm:$0xff] %v7229_v16  ;;  %13569 = vst [vmem:[#allocation15_spill] sm:$0xff] %v7233_v18  ;;  %v7237_v22 = vpop.f32.mrb[7].mxu0  ;;  %v7239_v23 = vpop.f32.mrb[7].mxu1 }
 0x125   :  { %13570 = vst [vmem:[#allocation16_spill] sm:$0xff] %v7237_v22  ;;  %13571 = vst [vmem:[#allocation17_spill] sm:$0xff] %v7239_v23  ;;  %1238 = vadd.xlane.f32.xlu0 %v1237_v1  ;;  %1241 = vadd.xlane.f32.xlu1 %v1240_v17  ;;  %v1243_v24 = vadd.f32 %v7237_v22, %v7229_v16  ;;  %v1435_v25 = vadd.f32 %v7239_v23, %v7233_v18  ;;  %v432_v1 = vld [vmem:[%s12838_s1 + $0x7f8] sm:$0xff] }
 0x126   :  { %874 = vmatmul.mubr.bf16.gmra.mrb[112].mxu0 %v489_v14  ;;  %1194 = vmatmul.mubr.bf16.gmra.mrb[112].mxu1 %v553_v15  ;;  %v496_v17 = vpack.c.bf16 %v304_v63, %v302_v60 }
 0x127   :  { %883 = vmatprep.mubr.bf16.mxu0 %v492_v20  ;;  %1203 = vmatprep.mubr.bf16.mxu1 %v556_v21 }
 0x129   :  { %1433 = vadd.xlane.f32.xlu0 %v1432_v19  ;;  %1244 = vadd.xlane.f32.xlu1 %v1243_v24  ;;  %v7269_v34 = vpop.f32.mrb[8].mxu0  ;;  %v7271_v35 = vpop.f32.mrb[8].mxu1  ;;  %v560_v19 = vpack.c.bf16 %v432_v1, %v430_v0 }
 0x12a   :  { %13572 = vst [vmem:[#allocation18_spill] sm:$0xff] %v7269_v34  ;;  %13573 = vst [vmem:[#allocation19_spill] sm:$0xff] %v7271_v35  ;;  %v7273_v36 = vpop.f32.mrb[9].mxu0  ;;  %v7275_v37 = vpop.f32.mrb[9].mxu1 }
 0x12b   :  { %13574 = vst [vmem:[#allocation20_spill] sm:$0xff] %v7273_v36  ;;  %13575 = vst [vmem:[#allocation21_spill] sm:$0xff] %v7275_v37  ;;  %v1246_v40 = vadd.f32 %v7273_v36, %v7269_v34  ;;  %v7279_v41 = vpop.f32.mrb[10].mxu0  ;;  %v7281_v42 = vpop.f32.mrb[10].mxu1  ;;  %v1438_v43 = vadd.f32 %v7275_v37, %v7271_v35 }
 0x12c   :  { %13576 = vst [vmem:[#allocation22_spill] sm:$0xff] %v7279_v41  ;;  %13577 = vst [vmem:[#allocation23_spill] sm:$0xff] %v7281_v42  ;;  %v7285_v46 = vpop.f32.mrb[11].mxu0  ;;  %v7287_v47 = vpop.f32.mrb[11].mxu1 }
 0x12d   :  { %13578 = vst [vmem:[#allocation24_spill] sm:$0xff] %v7285_v46  ;;  %13579 = vst [vmem:[#allocation25_spill] sm:$0xff] %v7287_v47  ;;  %1436 = vadd.xlane.f32.xlu1 %v1435_v25  ;;  %1247 = vadd.xlane.f32.xlu0 %v1246_v40  ;;  %v1249_v50 = vadd.f32 %v7285_v46, %v7279_v41  ;;  %v1441_v51 = vadd.f32 %v7287_v47, %v7281_v42 }
 0x12e   :  { %884 = vmatmul.mubr.bf16.gmra.mrb[116].mxu0 %v491_v38  ;;  %1204 = vmatmul.mubr.bf16.gmra.mrb[116].mxu1 %v555_v39  ;;  %v495_v38 = vpack.c.bf16 %v303_v27, %v301_v26  ;;  %v559_v39 = vpack.c.bf16 %v431_v29, %v429_v28 }
 0x12f   :  { %893 = vmatprep.mubr.bf16.mxu0 %v494_v44  ;;  %1213 = vmatprep.mubr.bf16.mxu1 %v558_v45 }
 0x131   :  { %1439 = vadd.xlane.f32.xlu0 %v1438_v43  ;;  %1250 = vadd.xlane.f32.xlu1 %v1249_v50  ;;  %v7317_v2 = vpop.f32.mrb[12].mxu0  ;;  %v7319_v3 = vpop.f32.mrb[12].mxu1 }
 0x132   :  { %13580 = vst [vmem:[#allocation26_spill] sm:$0xff] %v7317_v2  ;;  %13581 = vst [vmem:[#allocation27_spill] sm:$0xff] %v7319_v3  ;;  %v7321_v4 = vpop.f32.mrb[13].mxu0  ;;  %v7323_v5 = vpop.f32.mrb[13].mxu1 }
 0x133   :  { %13582 = vst [vmem:[#allocation28_spill] sm:$0xff] %v7321_v4  ;;  %13583 = vst [vmem:[#allocation29_spill] sm:$0xff] %v7323_v5  ;;  %v1252_v8 = vadd.f32 %v7321_v4, %v7317_v2  ;;  %v7327_v9 = vpop.f32.mrb[14].mxu0  ;;  %v7329_v14 = vpop.f32.mrb[14].mxu1  ;;  %v1444_v15 = vadd.f32 %v7323_v5, %v7319_v3 }
 0x134   :  { %13584 = vst [vmem:[#allocation30_spill] sm:$0xff] %v7327_v9  ;;  %13585 = vst [vmem:[#allocation31_spill] sm:$0xff] %v7329_v14  ;;  %v7333_v20 = vpop.f32.mrb[15].mxu0  ;;  %v7335_v21 = vpop.f32.mrb[15].mxu1 }
 0x135   :  { %13586 = vst [vmem:[#allocation32_spill] sm:$0xff] %v7333_v20  ;;  %13587 = vst [vmem:[#allocation33_spill] sm:$0xff] %v7335_v21  ;;  %1442 = vadd.xlane.f32.xlu1 %v1441_v51  ;;  %1253 = vadd.xlane.f32.xlu0 %v1252_v8  ;;  %v1255_v24 = vadd.f32 %v7333_v20, %v7327_v9  ;;  %v1447_v25 = vadd.f32 %v7335_v21, %v7329_v14 }
 0x136   :  { %894 = vmatmul.mubr.bf16.gmra.mrb[120].mxu0 %v493_v6  ;;  %1214 = vmatmul.mubr.bf16.gmra.mrb[120].mxu1 %v557_v7 }
 0x137   :  { %903 = vmatprep.mubr.bf16.mxu0 %v496_v17  ;;  %1223 = vmatprep.mubr.bf16.mxu1 %v560_v19 }
 0x139   :  { %1445 = vadd.xlane.f32.xlu0 %v1444_v15  ;;  %1256 = vadd.xlane.f32.xlu1 %v1255_v24  ;;  %v7353_v30 = vpop.f32.mrb[16].mxu0  ;;  %v7355_v31 = vpop.f32.mrb[16].mxu1 }
 0x13a   :  { %13588 = vst [vmem:[#allocation34_spill] sm:$0xff] %v7353_v30  ;;  %13589 = vst [vmem:[#allocation35_spill] sm:$0xff] %v7355_v31  ;;  %v7357_v32 = vpop.f32.mrb[17].mxu0  ;;  %v7359_v33 = vpop.f32.mrb[17].mxu1 }
 0x13b   :  { %13590 = vst [vmem:[#allocation36_spill] sm:$0xff] %v7357_v32  ;;  %13591 = vst [vmem:[#allocation37_spill] sm:$0xff] %v7359_v33  ;;  %v1258_v40 = vadd.f32 %v7357_v32, %v7353_v30  ;;  %v7363_v43 = vpop.f32.mrb[18].mxu0  ;;  %v7365_v44 = vpop.f32.mrb[18].mxu1  ;;  %v1450_v45 = vadd.f32 %v7359_v33, %v7355_v31 }
 0x13c   :  { %13592 = vst [vmem:[#allocation38_spill] sm:$0xff] %v7363_v43  ;;  %13593 = vst [vmem:[#allocation39_spill] sm:$0xff] %v7365_v44  ;;  %v7369_v50 = vpop.f32.mrb[19].mxu0  ;;  %v7371_v51 = vpop.f32.mrb[19].mxu1 }
 0x13d   :  { %13594 = vst [vmem:[#allocation40_spill] sm:$0xff] %v7369_v50  ;;  %13595 = vst [vmem:[#allocation41_spill] sm:$0xff] %v7371_v51  ;;  %1448 = vadd.xlane.f32.xlu1 %v1447_v25  ;;  %1259 = vadd.xlane.f32.xlu0 %v1258_v40  ;;  %v1261_v54 = vadd.f32 %v7369_v50, %v7363_v43  ;;  %v1453_v55 = vadd.f32 %v7371_v51, %v7365_v44 }
 0x13e   :  { %904 = vmatmul.mubr.bf16.gmra.mrb[124].mxu0 %v495_v38  ;;  %1224 = vmatmul.mubr.bf16.gmra.mrb[124].mxu1 %v559_v39 }
 0x141   :  { %1451 = vadd.xlane.f32.xlu0 %v1450_v45  ;;  %1262 = vadd.xlane.f32.xlu1 %v1261_v54  ;;  %v7377_v58 = vpop.f32.mrb[20].mxu0  ;;  %v7379_v59 = vpop.f32.mrb[20].mxu1 }
 0x142   :  { %13596 = vst [vmem:[#allocation42_spill] sm:$0xff] %v7377_v58  ;;  %13597 = vst [vmem:[#allocation43_spill] sm:$0xff] %v7379_v59  ;;  %v7381_v60 = vpop.f32.mrb[21].mxu0  ;;  %v7383_v63 = vpop.f32.mrb[21].mxu1 }
 0x143   :  { %13598 = vst [vmem:[#allocation44_spill] sm:$0xff] %v7381_v60  ;;  %13599 = vst [vmem:[#allocation45_spill] sm:$0xff] %v7383_v63  ;;  %v1264_v0 = vadd.f32 %v7381_v60, %v7377_v58  ;;  %v7387_v1 = vpop.f32.mrb[22].mxu0  ;;  %v7389_v6 = vpop.f32.mrb[22].mxu1  ;;  %v1456_v7 = vadd.f32 %v7383_v63, %v7379_v59 }
 0x144   :  { %13600 = vst [vmem:[#allocation46_spill] sm:$0xff] %v7387_v1  ;;  %13601 = vst [vmem:[#allocation47_spill] sm:$0xff] %v7389_v6  ;;  %v7393_v8 = vpop.f32.mrb[23].mxu0  ;;  %v7395_v15 = vpop.f32.mrb[23].mxu1 }
 0x145   :  { %13602 = vst [vmem:[#allocation48_spill] sm:$0xff] %v7393_v8  ;;  %13603 = vst [vmem:[#allocation49_spill] sm:$0xff] %v7395_v15  ;;  %1454 = vadd.xlane.f32.xlu1 %v1453_v55  ;;  %1265 = vadd.xlane.f32.xlu0 %v1264_v0  ;;  %v1267_v17 = vadd.f32 %v7393_v8, %v7387_v1  ;;  %v1459_v19 = vadd.f32 %v7395_v15, %v7389_v6 }
 0x149   :  { %1457 = vadd.xlane.f32.xlu0 %v1456_v7  ;;  %1268 = vadd.xlane.f32.xlu1 %v1267_v17  ;;  %v7401_v24 = vpop.f32.mrb[24].mxu0  ;;  %v7403_v25 = vpop.f32.mrb[24].mxu1 }
 0x14a   :  { %13604 = vst [vmem:[#allocation50_spill] sm:$0xff] %v7401_v24  ;;  %13605 = vst [vmem:[#allocation51_spill] sm:$0xff] %v7403_v25  ;;  %v7405_v26 = vpop.f32.mrb[25].mxu0  ;;  %v7407_v27 = vpop.f32.mrb[25].mxu1 }
 0x14b   :  { %13606 = vst [vmem:[#allocation52_spill] sm:$0xff] %v7405_v26  ;;  %13607 = vst [vmem:[#allocation53_spill] sm:$0xff] %v7407_v27  ;;  %v1270_v28 = vadd.f32 %v7405_v26, %v7401_v24  ;;  %v7411_v29 = vpop.f32.mrb[26].mxu0  ;;  %v7413_v38 = vpop.f32.mrb[26].mxu1  ;;  %v1462_v39 = vadd.f32 %v7407_v27, %v7403_v25 }
 0x14c   :  { %13608 = vst [vmem:[#allocation54_spill] sm:$0xff] %v7411_v29  ;;  %13609 = vst [vmem:[#allocation55_spill] sm:$0xff] %v7413_v38  ;;  %v7417_v40 = vpop.f32.mrb[27].mxu0  ;;  %v7419_v45 = vpop.f32.mrb[27].mxu1 }
 0x14d   :  { %13610 = vst [vmem:[#allocation56_spill] sm:$0xff] %v7417_v40  ;;  %13611 = vst [vmem:[#allocation57_spill] sm:$0xff] %v7419_v45  ;;  %1460 = vadd.xlane.f32.xlu1 %v1459_v19  ;;  %1271 = vadd.xlane.f32.xlu0 %v1270_v28  ;;  %v1273_v54 = vadd.f32 %v7417_v40, %v7411_v29  ;;  %v1465_v55 = vadd.f32 %v7419_v45, %v7413_v38 }
 0x151   :  { %1463 = vadd.xlane.f32.xlu0 %v1462_v39  ;;  %1274 = vadd.xlane.f32.xlu1 %v1273_v54  ;;  %v7425_v0 = vpop.f32.mrb[28].mxu0  ;;  %v7427_v7 = vpop.f32.mrb[28].mxu1 }
 0x152   :  { %13612 = vst [vmem:[#allocation58_spill] sm:$0xff] %v7425_v0  ;;  %13613 = vst [vmem:[#allocation59_spill] sm:$0xff] %v7427_v7  ;;  %v7429_v17 = vpop.f32.mrb[29].mxu0  ;;  %v7431_v27 = vpop.f32.mrb[29].mxu1 }
 0x153   :  { %13614 = vst [vmem:[#allocation60_spill] sm:$0xff] %v7429_v17  ;;  %13615 = vst [vmem:[#allocation61_spill] sm:$0xff] %v7431_v27  ;;  %v1276_v19 = vadd.f32 %v7429_v17, %v7425_v0  ;;  %v7435_v28 = vpop.f32.mrb[30].mxu0  ;;  %v7437_v25 = vpop.f32.mrb[30].mxu1  ;;  %v1468_v45 = vadd.f32 %v7431_v27, %v7427_v7 }
 0x154   :  { %13616 = vst [vmem:[#allocation62_spill] sm:$0xff] %v7435_v28  ;;  %13617 = vst [vmem:[#allocation63_spill] sm:$0xff] %v7437_v25  ;;  %v7441_v39 = vpop.f32.mrb[31].mxu0  ;;  %v7443_v54 = vpop.f32.mrb[31].mxu1 }
 0x155   :  { %13618 = vst [vmem:[#allocation64_spill] sm:$0xff] %v7441_v39  ;;  %13619 = vst [vmem:[#allocation65_spill] sm:$0xff] %v7443_v54  ;;  %1466 = vadd.xlane.f32.xlu1 %v1465_v55  ;;  %1277 = vadd.xlane.f32.xlu0 %v1276_v19  ;;  %v1279_v38 = vadd.f32 %v7441_v39, %v7435_v28  ;;  %v1471_v40 = vadd.f32 %v7443_v54, %v7437_v25 }
 0x159   :  { %1469 = vadd.xlane.f32.xlu0 %v1468_v45  ;;  %1280 = vadd.xlane.f32.xlu1 %v1279_v38  ;;  %v7449_v17 = vpop.f32.mrb[32].mxu0  ;;  %v7451_v0 = vpop.f32.mrb[32].mxu1 }
 0x15a   :  { %13620 = vst [vmem:[#allocation66_spill] sm:$0xff] %v7449_v17  ;;  %13621 = vst [vmem:[#allocation67_spill] sm:$0xff] %v7451_v0  ;;  %v7453_v29 = vpop.f32.mrb[33].mxu0  ;;  %v7455_v27 = vpop.f32.mrb[33].mxu1 }
 0x15b   :  { %13622 = vst [vmem:[#allocation68_spill] sm:$0xff] %v7453_v29  ;;  %13623 = vst [vmem:[#allocation69_spill] sm:$0xff] %v7455_v27  ;;  %v1282_v55 = vadd.f32 %v7453_v29, %v7449_v17  ;;  %v7459_v19 = vpop.f32.mrb[34].mxu0  ;;  %v7461_v7 = vpop.f32.mrb[34].mxu1  ;;  %v1474_v54 = vadd.f32 %v7455_v27, %v7451_v0 }
 0x15c   :  { %13624 = vst [vmem:[#allocation70_spill] sm:$0xff] %v7459_v19  ;;  %13625 = vst [vmem:[#allocation71_spill] sm:$0xff] %v7461_v7  ;;  %v7465_v45 = vpop.f32.mrb[35].mxu0  ;;  %v7467_v38 = vpop.f32.mrb[35].mxu1 }
 0x15d   :  { %13626 = vst [vmem:[#allocation72_spill] sm:$0xff] %v7465_v45  ;;  %13627 = vst [vmem:[#allocation73_spill] sm:$0xff] %v7467_v38  ;;  %1472 = vadd.xlane.f32.xlu1 %v1471_v40  ;;  %1283 = vadd.xlane.f32.xlu0 %v1282_v55  ;;  %v1285_v25 = vadd.f32 %v7465_v45, %v7459_v19  ;;  %v1477_v39 = vadd.f32 %v7467_v38, %v7461_v7 }
 0x161   :  { %1475 = vadd.xlane.f32.xlu0 %v1474_v54  ;;  %1286 = vadd.xlane.f32.xlu1 %v1285_v25  ;;  %v7473_v29 = vpop.f32.mrb[36].mxu0  ;;  %v7475_v17 = vpop.f32.mrb[36].mxu1 }
 0x162   :  { %13628 = vst [vmem:[#allocation74_spill] sm:$0xff] %v7473_v29  ;;  %13629 = vst [vmem:[#allocation75_spill] sm:$0xff] %v7475_v17  ;;  %v7477_v28 = vpop.f32.mrb[37].mxu0  ;;  %v7479_v27 = vpop.f32.mrb[37].mxu1 }
 0x163   :  { %13630 = vst [vmem:[#allocation76_spill] sm:$0xff] %v7477_v28  ;;  %13631 = vst [vmem:[#allocation77_spill] sm:$0xff] %v7479_v27  ;;  %v1288_v40 = vadd.f32 %v7477_v28, %v7473_v29  ;;  %v7483_v55 = vpop.f32.mrb[38].mxu0  ;;  %v7485_v0 = vpop.f32.mrb[38].mxu1  ;;  %v1480_v38 = vadd.f32 %v7479_v27, %v7475_v17 }
 0x164   :  { %13632 = vst [vmem:[#allocation78_spill] sm:$0xff] %v7483_v55  ;;  %13633 = vst [vmem:[#allocation79_spill] sm:$0xff] %v7485_v0  ;;  %v7489_v54 = vpop.f32.mrb[39].mxu0  ;;  %v7491_v25 = vpop.f32.mrb[39].mxu1 }
 0x165   :  { %13634 = vst [vmem:[#allocation80_spill] sm:$0xff] %v7489_v54  ;;  %13635 = vst [vmem:[#allocation81_spill] sm:$0xff] %v7491_v25  ;;  %1478 = vadd.xlane.f32.xlu1 %v1477_v39  ;;  %1289 = vadd.xlane.f32.xlu0 %v1288_v40  ;;  %v1291_v7 = vadd.f32 %v7489_v54, %v7483_v55  ;;  %v1483_v45 = vadd.f32 %v7491_v25, %v7485_v0 }
 0x169   :  { %1481 = vadd.xlane.f32.xlu0 %v1480_v38  ;;  %1292 = vadd.xlane.f32.xlu1 %v1291_v7  ;;  %v7497_v28 = vpop.f32.mrb[40].mxu0  ;;  %v7499_v29 = vpop.f32.mrb[40].mxu1 }
 0x16a   :  { %13636 = vst [vmem:[#allocation82_spill] sm:$0xff] %v7497_v28  ;;  %13637 = vst [vmem:[#allocation83_spill] sm:$0xff] %v7499_v29  ;;  %v7501_v19 = vpop.f32.mrb[41].mxu0  ;;  %v7503_v27 = vpop.f32.mrb[41].mxu1 }
 0x16b   :  { %13638 = vst [vmem:[#allocation84_spill] sm:$0xff] %v7501_v19  ;;  %13639 = vst [vmem:[#allocation85_spill] sm:$0xff] %v7503_v27  ;;  %v1294_v39 = vadd.f32 %v7501_v19, %v7497_v28  ;;  %v7507_v40 = vpop.f32.mrb[42].mxu0  ;;  %v7509_v17 = vpop.f32.mrb[42].mxu1  ;;  %v1486_v25 = vadd.f32 %v7503_v27, %v7499_v29 }
 0x16c   :  { %13640 = vst [vmem:[#allocation86_spill] sm:$0xff] %v7507_v40  ;;  %13641 = vst [vmem:[#allocation87_spill] sm:$0xff] %v7509_v17  ;;  %v7513_v38 = vpop.f32.mrb[43].mxu0  ;;  %v7515_v7 = vpop.f32.mrb[43].mxu1 }
 0x16d   :  { %13642 = vst [vmem:[#allocation88_spill] sm:$0xff] %v7513_v38  ;;  %13643 = vst [vmem:[#allocation89_spill] sm:$0xff] %v7515_v7  ;;  %1484 = vadd.xlane.f32.xlu1 %v1483_v45  ;;  %1295 = vadd.xlane.f32.xlu0 %v1294_v39  ;;  %v1297_v0 = vadd.f32 %v7513_v38, %v7507_v40  ;;  %v1489_v54 = vadd.f32 %v7515_v7, %v7509_v17 }
 0x171   :  { %1487 = vadd.xlane.f32.xlu0 %v1486_v25  ;;  %1298 = vadd.xlane.f32.xlu1 %v1297_v0  ;;  %v7521_v19 = vpop.f32.mrb[44].mxu0  ;;  %v7523_v28 = vpop.f32.mrb[44].mxu1 }
 0x172   :  { %13644 = vst [vmem:[#allocation90_spill] sm:$0xff] %v7521_v19  ;;  %13645 = vst [vmem:[#allocation91_spill] sm:$0xff] %v7523_v28  ;;  %v7525_v55 = vpop.f32.mrb[45].mxu0  ;;  %v7527_v27 = vpop.f32.mrb[45].mxu1 }
 0x173   :  { %13646 = vst [vmem:[#allocation92_spill] sm:$0xff] %v7525_v55  ;;  %13647 = vst [vmem:[#allocation93_spill] sm:$0xff] %v7527_v27  ;;  %v1300_v45 = vadd.f32 %v7525_v55, %v7521_v19  ;;  %v7531_v39 = vpop.f32.mrb[46].mxu0  ;;  %v7533_v29 = vpop.f32.mrb[46].mxu1  ;;  %v1492_v7 = vadd.f32 %v7527_v27, %v7523_v28 }
 0x174   :  { %13648 = vst [vmem:[#allocation94_spill] sm:$0xff] %v7531_v39  ;;  %13649 = vst [vmem:[#allocation95_spill] sm:$0xff] %v7533_v29  ;;  %v7537_v25 = vpop.f32.mrb[47].mxu0  ;;  %v7539_v0 = vpop.f32.mrb[47].mxu1 }
 0x175   :  { %13650 = vst [vmem:[#allocation96_spill] sm:$0xff] %v7537_v25  ;;  %13651 = vst [vmem:[#allocation97_spill] sm:$0xff] %v7539_v0  ;;  %1490 = vadd.xlane.f32.xlu1 %v1489_v54  ;;  %1301 = vadd.xlane.f32.xlu0 %v1300_v45  ;;  %v1303_v17 = vadd.f32 %v7537_v25, %v7531_v39  ;;  %v1495_v38 = vadd.f32 %v7539_v0, %v7533_v29 }
 0x179   :  { %1493 = vadd.xlane.f32.xlu0 %v1492_v7  ;;  %1304 = vadd.xlane.f32.xlu1 %v1303_v17  ;;  %v7545_v55 = vpop.f32.mrb[48].mxu0  ;;  %v7547_v19 = vpop.f32.mrb[48].mxu1 }
 0x17a   :  { %13652 = vst [vmem:[#allocation98_spill] sm:$0xff] %v7545_v55  ;;  %13653 = vst [vmem:[#allocation99_spill] sm:$0xff] %v7547_v19  ;;  %v7549_v40 = vpop.f32.mrb[49].mxu0  ;;  %v7551_v27 = vpop.f32.mrb[49].mxu1 }
 0x17b   :  { %13654 = vst [vmem:[#allocation100_spill] sm:$0xff] %v7549_v40  ;;  %13655 = vst [vmem:[#allocation101_spill] sm:$0xff] %v7551_v27  ;;  %v1306_v54 = vadd.f32 %v7549_v40, %v7545_v55  ;;  %v7555_v45 = vpop.f32.mrb[50].mxu0  ;;  %v7557_v28 = vpop.f32.mrb[50].mxu1  ;;  %v1498_v0 = vadd.f32 %v7551_v27, %v7547_v19 }
 0x17c   :  { %13656 = vst [vmem:[#allocation102_spill] sm:$0xff] %v7555_v45  ;;  %13657 = vst [vmem:[#allocation103_spill] sm:$0xff] %v7557_v28  ;;  %v7561_v7 = vpop.f32.mrb[51].mxu0  ;;  %v7563_v17 = vpop.f32.mrb[51].mxu1 }
 0x17d   :  { %13658 = vst [vmem:[#allocation104_spill] sm:$0xff] %v7561_v7  ;;  %13659 = vst [vmem:[#allocation105_spill] sm:$0xff] %v7563_v17  ;;  %1496 = vadd.xlane.f32.xlu1 %v1495_v38  ;;  %1307 = vadd.xlane.f32.xlu0 %v1306_v54  ;;  %v1309_v29 = vadd.f32 %v7561_v7, %v7555_v45  ;;  %v1501_v25 = vadd.f32 %v7563_v17, %v7557_v28 }
 0x181   :  { %1499 = vadd.xlane.f32.xlu0 %v1498_v0  ;;  %1310 = vadd.xlane.f32.xlu1 %v1309_v29  ;;  %v7569_v40 = vpop.f32.mrb[52].mxu0  ;;  %v7571_v55 = vpop.f32.mrb[52].mxu1 }
 0x182   :  { %13660 = vst [vmem:[#allocation106_spill] sm:$0xff] %v7569_v40  ;;  %13661 = vst [vmem:[#allocation107_spill] sm:$0xff] %v7571_v55  ;;  %v7573_v39 = vpop.f32.mrb[53].mxu0  ;;  %v7575_v27 = vpop.f32.mrb[53].mxu1 }
 0x183   :  { %13662 = vst [vmem:[#allocation108_spill] sm:$0xff] %v7573_v39  ;;  %13663 = vst [vmem:[#allocation109_spill] sm:$0xff] %v7575_v27  ;;  %v1312_v38 = vadd.f32 %v7573_v39, %v7569_v40  ;;  %v7579_v54 = vpop.f32.mrb[54].mxu0  ;;  %v7581_v19 = vpop.f32.mrb[54].mxu1  ;;  %v1504_v17 = vadd.f32 %v7575_v27, %v7571_v55 }
 0x184   :  { %13664 = vst [vmem:[#allocation110_spill] sm:$0xff] %v7579_v54  ;;  %13665 = vst [vmem:[#allocation111_spill] sm:$0xff] %v7581_v19  ;;  %v7585_v0 = vpop.f32.mrb[55].mxu0  ;;  %v7587_v29 = vpop.f32.mrb[55].mxu1 }
 0x185   :  { %13666 = vst [vmem:[#allocation112_spill] sm:$0xff] %v7585_v0  ;;  %13667 = vst [vmem:[#allocation113_spill] sm:$0xff] %v7587_v29  ;;  %1502 = vadd.xlane.f32.xlu1 %v1501_v25  ;;  %1313 = vadd.xlane.f32.xlu0 %v1312_v38  ;;  %v1315_v28 = vadd.f32 %v7585_v0, %v7579_v54  ;;  %v1507_v7 = vadd.f32 %v7587_v29, %v7581_v19 }
 0x189   :  { %1505 = vadd.xlane.f32.xlu0 %v1504_v17  ;;  %1316 = vadd.xlane.f32.xlu1 %v1315_v28  ;;  %v7593_v39 = vpop.f32.mrb[56].mxu0  ;;  %v7595_v40 = vpop.f32.mrb[56].mxu1 }
 0x18a   :  { %13668 = vst [vmem:[#allocation114_spill] sm:$0xff] %v7593_v39  ;;  %13669 = vst [vmem:[#allocation115_spill] sm:$0xff] %v7595_v40  ;;  %v7597_v45 = vpop.f32.mrb[57].mxu0  ;;  %v7599_v27 = vpop.f32.mrb[57].mxu1 }
 0x18b   :  { %13670 = vst [vmem:[#allocation116_spill] sm:$0xff] %v7597_v45  ;;  %13671 = vst [vmem:[#allocation117_spill] sm:$0xff] %v7599_v27  ;;  %v1318_v25 = vadd.f32 %v7597_v45, %v7593_v39  ;;  %v7603_v38 = vpop.f32.mrb[58].mxu0  ;;  %v7605_v55 = vpop.f32.mrb[58].mxu1  ;;  %v1510_v29 = vadd.f32 %v7599_v27, %v7595_v40 }
 0x18c   :  { %13672 = vst [vmem:[#allocation118_spill] sm:$0xff] %v7603_v38  ;;  %13673 = vst [vmem:[#allocation119_spill] sm:$0xff] %v7605_v55  ;;  %v7609_v17 = vpop.f32.mrb[59].mxu0  ;;  %v7611_v28 = vpop.f32.mrb[59].mxu1 }
 0x18d   :  { %13674 = vst [vmem:[#allocation120_spill] sm:$0xff] %v7609_v17  ;;  %13675 = vst [vmem:[#allocation121_spill] sm:$0xff] %v7611_v28  ;;  %1508 = vadd.xlane.f32.xlu1 %v1507_v7  ;;  %1319 = vadd.xlane.f32.xlu0 %v1318_v25  ;;  %v1321_v19 = vadd.f32 %v7609_v17, %v7603_v38  ;;  %v1513_v0 = vadd.f32 %v7611_v28, %v7605_v55 }
 0x191   :  { %1511 = vadd.xlane.f32.xlu0 %v1510_v29  ;;  %1322 = vadd.xlane.f32.xlu1 %v1321_v19  ;;  %v7617_v45 = vpop.f32.mrb[60].mxu0  ;;  %v7619_v39 = vpop.f32.mrb[60].mxu1 }
 0x192   :  { %13676 = vst [vmem:[#allocation122_spill] sm:$0xff] %v7617_v45  ;;  %13677 = vst [vmem:[#allocation123_spill] sm:$0xff] %v7619_v39  ;;  %v7621_v54 = vpop.f32.mrb[61].mxu0  ;;  %v7623_v27 = vpop.f32.mrb[61].mxu1 }
 0x193   :  { %13678 = vst [vmem:[#allocation124_spill] sm:$0xff] %v7621_v54  ;;  %13679 = vst [vmem:[#allocation125_spill] sm:$0xff] %v7623_v27  ;;  %v1324_v7 = vadd.f32 %v7621_v54, %v7617_v45  ;;  %v7627_v25 = vpop.f32.mrb[62].mxu0  ;;  %v7629_v40 = vpop.f32.mrb[62].mxu1  ;;  %v1516_v28 = vadd.f32 %v7623_v27, %v7619_v39 }
 0x194   :  { %13680 = vst [vmem:[#allocation126_spill] sm:$0xff] %v7627_v25  ;;  %13681 = vst [vmem:[#allocation127_spill] sm:$0xff] %v7629_v40  ;;  %v7633_v29 = vpop.f32.mrb[63].mxu0  ;;  %v7635_v19 = vpop.f32.mrb[63].mxu1 }
 0x195   :  { %13682 = vst [vmem:[#allocation128_spill] sm:$0xff] %v7633_v29  ;;  %13683 = vst [vmem:[#allocation129_spill] sm:$0xff] %v7635_v19  ;;  %1514 = vadd.xlane.f32.xlu1 %v1513_v0  ;;  %1325 = vadd.xlane.f32.xlu0 %v1324_v7  ;;  %v1327_v55 = vadd.f32 %v7633_v29, %v7627_v25  ;;  %v1519_v17 = vadd.f32 %v7635_v19, %v7629_v40 }
 0x199   :  { %1517 = vadd.xlane.f32.xlu0 %v1516_v28  ;;  %1328 = vadd.xlane.f32.xlu1 %v1327_v55  ;;  %v7641_v54 = vpop.f32.mrb[64].mxu0  ;;  %v7643_v45 = vpop.f32.mrb[64].mxu1 }
 0x19a   :  { %13684 = vst [vmem:[#allocation130_spill] sm:$0xff] %v7641_v54  ;;  %13685 = vst [vmem:[#allocation131_spill] sm:$0xff] %v7643_v45  ;;  %v7645_v38 = vpop.f32.mrb[65].mxu0  ;;  %v7647_v27 = vpop.f32.mrb[65].mxu1 }
 0x19b   :  { %13686 = vst [vmem:[#allocation132_spill] sm:$0xff] %v7645_v38  ;;  %13687 = vst [vmem:[#allocation133_spill] sm:$0xff] %v7647_v27  ;;  %v1330_v0 = vadd.f32 %v7645_v38, %v7641_v54  ;;  %v7651_v7 = vpop.f32.mrb[66].mxu0  ;;  %v7653_v39 = vpop.f32.mrb[66].mxu1  ;;  %v1522_v19 = vadd.f32 %v7647_v27, %v7643_v45  ;;  %v2002_v38 = vlaneseq }
 0x19c   :  { %13688 = vst [vmem:[#allocation134_spill] sm:$0xff] %v7651_v7  ;;  %13689 = vst [vmem:[#allocation135_spill] sm:$0xff] %v7653_v39  ;;  %v7657_v28 = vpop.f32.mrb[67].mxu0  ;;  %v7659_v55 = vpop.f32.mrb[67].mxu1 }
 0x19d   :  { %13690 = vst [vmem:[#allocation136_spill] sm:$0xff] %v7657_v28  ;;  %13691 = vst [vmem:[#allocation137_spill] sm:$0xff] %v7659_v55  ;;  %1520 = vadd.xlane.f32.xlu1 %v1519_v17  ;;  %1331 = vadd.xlane.f32.xlu0 %v1330_v0  ;;  %v1333_v40 = vadd.f32 %v7657_v28, %v7651_v7  ;;  %v1525_v29 = vadd.f32 %v7659_v55, %v7653_v39  ;;  %v2003_v39 = vand.u32 127, %v2002_v38 }
 0x1a1   :  { %1523 = vadd.xlane.f32.xlu0 %v1522_v19  ;;  %1334 = vadd.xlane.f32.xlu1 %v1333_v40  ;;  %v7665_v54 = vpop.f32.mrb[68].mxu0  ;;  %v7667_v25 = vpop.f32.mrb[68].mxu1 }
 0x1a2   :  { %13692 = vst [vmem:[#allocation138_spill] sm:$0xff] %v7665_v54  ;;  %13693 = vst [vmem:[#allocation139_spill] sm:$0xff] %v7667_v25  ;;  %v7669_v27 = vpop.f32.mrb[69].mxu0  ;;  %v7671_v45 = vpop.f32.mrb[69].mxu1 }
 0x1a3   :  { %13694 = vst [vmem:[#allocation140_spill] sm:$0xff] %v7669_v27  ;;  %13695 = vst [vmem:[#allocation141_spill] sm:$0xff] %v7671_v45  ;;  %v1336_v17 = vadd.f32 %v7669_v27, %v7665_v54  ;;  %v7675_v0 = vpop.f32.mrb[70].mxu0  ;;  %v7677_v28 = vpop.f32.mrb[70].mxu1  ;;  %v1528_v55 = vadd.f32 %v7671_v45, %v7667_v25  ;;  %v7689_v54 = vadd.s32 128, %v2003_v39 }
 0x1a4   :  { %13696 = vst [vmem:[#allocation142_spill] sm:$0xff] %v7675_v0  ;;  %13697 = vst [vmem:[#allocation143_spill] sm:$0xff] %v7677_v28  ;;  %v7681_v19 = vpop.f32.mrb[71].mxu0  ;;  %v7683_v40 = vpop.f32.mrb[71].mxu1 }
 0x1a5   :  { %13698 = vst [vmem:[#allocation144_spill] sm:$0xff] %v7681_v19  ;;  %13699 = vst [vmem:[#allocation145_spill] sm:$0xff] %v7683_v40  ;;  %1526 = vadd.xlane.f32.xlu1 %v1525_v29  ;;  %1337 = vadd.xlane.f32.xlu0 %v1336_v17  ;;  %v1339_v7 = vadd.f32 %v7681_v19, %v7675_v0  ;;  %v1531_v27 = vadd.f32 %v7683_v40, %v7677_v28  ;;  %vm2006_vm0 = vcmp.lt.s32.totalorder %v7689_v54, 196 }
 0x1a9   :  { %1529 = vadd.xlane.f32.xlu0 %v1528_v55  ;;  %1340 = vadd.xlane.f32.xlu1 %v1339_v7  ;;  %v7691_v26 = vpop.f32.mrb[72].mxu0  ;;  %v7693_v45 = vpop.f32.mrb[72].mxu1 }
 0x1aa   :  { %13700 = vst [vmem:[#allocation146_spill] sm:$0xff] %v7691_v26  ;;  %13701 = vst [vmem:[#allocation147_spill] sm:$0xff] %v7693_v45  ;;  %v1236_v25 = vpop.xlane.xlu0 %1235  ;;  %v7695_v24 = vpop.f32.mrb[73].mxu0 }
 0x1ab   :  { %13702 = vst [vmem:[#allocation148_spill] sm:$0xff] %v7695_v24  ;;  %v7697_v38 = vmul.f32 0.0051020407, %v1236_v25  ;;  %v1342_v29 = vadd.f32 %v7695_v24, %v7691_v26  ;;  %v7701_v17 = vpop.f32.mrb[74].mxu0  ;;  %v7703_v19 = vpop.f32.mrb[73].mxu1 }
 0x1ac   :  { %13704 = vst [vmem:[#allocation150_spill] sm:$0xff] %v7701_v17  ;;  %13705 = vst [vmem:[#allocation151_spill] sm:$0xff] %v7703_v19  ;;  %v1431_v39 = vpop.xlane.xlu1 %1430  ;;  %v7705_v40 = vpop.f32.mrb[75].mxu0  ;;  %v1534_v7 = vadd.f32 %v7703_v19, %v7693_v45 }
 0x1ad   :  { %13703 = vst [vmem:[#allocation149_spill] sm:$0xff] %v7697_v38  ;;  %13706 = vst [vmem:[#allocation152_spill] sm:$0xff] %v7705_v40  ;;  %v7710_v55 = vmul.f32 0.0051020407, %v1431_v39  ;;  %1532 = vadd.xlane.f32.xlu1 %v1531_v27  ;;  %1343 = vadd.xlane.f32.xlu0 %v1342_v29  ;;  %v7712_v25 = vpop.f32.mrb[74].mxu1  ;;  %v1345_v24 = vadd.f32 %v7705_v40, %v7701_v17  ;;  %v1746_v26 = vsub.f32 %v7167_v48, %v7697_v38 }
 0x1ae   :  { %13708 = vst [vmem:[#allocation154_spill] sm:$0xff] %v7712_v25  ;;  %v1747_v28 = vsub.f32 %v7177_v52, %v7697_v38  ;;  %v1428_v0 = vpop.xlane.xlu0 %1427  ;;  %v7720_v15 = vpop.f32.mrb[75].mxu1 }
 0x1af   :  { %13707 = vst [vmem:[#allocation153_spill] sm:$0xff] %v7710_v55  ;;  %13709 = vst [vmem:[#allocation155_spill] sm:$0xff] %v7720_v15  ;;  %v7722_v19 = vmul.f32 0.0051020407, %v1428_v0  ;;  %v2263_v29 = vmul.f32 %v1746_v26, %v1746_v26  ;;  %v1537_v39 = vadd.f32 %v7720_v15, %v7712_v25  ;;  %v1876_v40 = vsub.f32 %v7183_v57, %v7710_v55 }
 0x1b0   :  { %v2008_v27 = vsel %vm2006_vm0, %v1747_v28, 0.0  ;;  %v1877_v48 = vsub.f32 %v7191_v62, %v7710_v55 }
 0x1b1   :  { %13710 = vst [vmem:[#allocation156_spill] sm:$0xff] %v7722_v19  ;;  %v2264_v45 = vmul.f32 %v2008_v27, %v2008_v27  ;;  %1535 = vadd.xlane.f32.xlu0 %v1534_v7  ;;  %1346 = vadd.xlane.f32.xlu1 %v1345_v24  ;;  %v1874_v0 = vsub.f32 %v7169_v49, %v7722_v19  ;;  %v7736_v28 = vpop.f32.mrb[76].mxu0  ;;  %v7738_v26 = vpop.f32.mrb[76].mxu1 }
 0x1b2   :  { %v1875_v52 = vsub.f32 %v7179_v53, %v7722_v19  ;;  %13711 = vst [vmem:[#allocation157_spill] sm:$0xff] %v7736_v28  ;;  %13712 = vst [vmem:[#allocation158_spill] sm:$0xff] %v7738_v26  ;;  %v1239_v38 = vpop.xlane.xlu0 %1238  ;;  %v1242_v27 = vpop.xlane.xlu1 %1241  ;;  %v2138_v57 = vsel %vm2006_vm0, %v1877_v48, 0.0  ;;  %v2393_v25 = vmul.f32 %v1876_v40, %v1876_v40 }
 0x1b3   :  { %v2519_v15 = vadd.f32 %v2264_v45, %v2263_v29  ;;  %v7742_v62 = vmul.f32 0.0051020407, %v1239_v38  ;;  %v7744_v24 = vmul.f32 0.0051020407, %v1242_v27  ;;  %v2391_v49 = vmul.f32 %v1874_v0, %v1874_v0  ;;  %v7748_v53 = vpop.f32.mrb[77].mxu0  ;;  %v7754_v45 = vpop.f32.mrb[77].mxu1 }
 0x1b4   :  { %v2136_v7 = vsel %vm2006_vm0, %v1875_v52, 0.0  ;;  %13715 = vst [vmem:[#allocation161_spill] sm:$0xff] %v7748_v53  ;;  %v1348_v55 = vadd.f32 %v7748_v53, %v7736_v28  ;;  %v7752_v17 = vpop.f32.mrb[78].mxu0  ;;  %13717 = vst [vmem:[#allocation163_spill] sm:$0xff] %v7754_v45  ;;  %v2394_v48 = vmul.f32 %v2138_v57, %v2138_v57  ;;  %v7762_v29 = vpop.f32.mrb[78].mxu1  ;;  %v1540_v0 = vadd.f32 %v7754_v45, %v7738_v26 }
 0x1b5   :  { %13713 = vst [vmem:[#allocation159_spill] sm:$0xff] %v7742_v62  ;;  %13714 = vst [vmem:[#allocation160_spill] sm:$0xff] %v7744_v24  ;;  %v2392_v19 = vmul.f32 %v2136_v7, %v2136_v7  ;;  %2520 = vadd.xlane.f32.xlu0 %v2519_v15  ;;  %1538 = vadd.xlane.f32.xlu1 %v1537_v39  ;;  %v1748_v40 = vsub.f32 %v7181_v56, %v7742_v62  ;;  %v7760_v38 = vpop.f32.mrb[79].mxu0  ;;  %v7778_v45 = vpop.f32.mrb[79].mxu1 }
 0x1b6   :  { %13716 = vst [vmem:[#allocation162_spill] sm:$0xff] %v7752_v17  ;;  %v1749_v52 = vsub.f32 %v7189_v61, %v7742_v62  ;;  %13718 = vst [vmem:[#allocation164_spill] sm:$0xff] %v7760_v38  ;;  %v1434_v27 = vpop.xlane.xlu0 %1433  ;;  %v1245_v7 = vpop.xlane.xlu1 %1244  ;;  %v2714_v28 = vadd.f32 %v2394_v48, %v2393_v25  ;;  %v7768_v57 = vadd.f32 %v7760_v38, %v7752_v17 }
 0x1b7   :  { %13719 = vst [vmem:[#allocation165_spill] sm:$0xff] %v7762_v29  ;;  %v2711_v53 = vadd.f32 %v2392_v19, %v2391_v49  ;;  %v1750_v15 = vsub.f32 %v7221_v10, %v7744_v24  ;;  %v7772_v39 = vmul.f32 0.0051020407, %v1434_v27  ;;  %v7774_v61 = vmul.f32 0.0051020407, %v1245_v7  ;;  %13722 = vst [vmem:[#allocation168_spill] sm:$0xff] %v7778_v45 }
 0x1b8   :  { %v2010_v56 = vsel %vm2006_vm0, %v1749_v52, 0.0  ;;  %v2265_v62 = vmul.f32 %v1748_v40, %v1748_v40  ;;  %v1751_v49 = vsub.f32 %v7225_v12, %v7744_v24  ;;  %v7784_v25 = vadd.f32 %v7778_v45, %v7762_v29 }
 0x1b9   :  { %13720 = vst [vmem:[#allocation166_spill] sm:$0xff] %v7772_v39  ;;  %13721 = vst [vmem:[#allocation167_spill] sm:$0xff] %v7774_v61  ;;  %v2266_v26 = vmul.f32 %v2010_v56, %v2010_v56  ;;  %v2267_v19 = vmul.f32 %v1750_v15, %v1750_v15  ;;  %2712 = vadd.xlane.f32.xlu0 %v2711_v53  ;;  %v1878_v48 = vsub.f32 %v7223_v11, %v7772_v39  ;;  %v7790_v52 = vpop.f32.mrb[80].mxu0  ;;  %v7796_v7 = vpop.f32.mrb[80].mxu1 }
 0x1ba   :  { %v1879_v27 = vsub.f32 %v7227_v13, %v7772_v39  ;;  %13723 = vst [vmem:[#allocation169_spill] sm:$0xff] %v7790_v52  ;;  %v1752_v56 = vsub.f32 %v7229_v16, %v7774_v61  ;;  %v1753_v40 = vsub.f32 %v7237_v22, %v7774_v61  ;;  %13724 = vst [vmem:[#allocation170_spill] sm:$0xff] %v7796_v7  ;;  %v1437_v15 = vpop.xlane.xlu1 %1436  ;;  %v1248_v12 = vpop.xlane.xlu0 %1247  ;;  %v2012_v53 = vsel %vm2006_vm0, %v1751_v49, 0.0 }
 0x1bb   :  { %v2522_v10 = vadd.f32 %v2266_v26, %v2265_v62  ;;  %v7800_v11 = vmul.f32 0.0051020407, %v1437_v15  ;;  %v7802_v24 = vmul.f32 0.0051020407, %v1248_v12  ;;  %v2268_v13 = vmul.f32 %v2012_v53, %v2012_v53  ;;  %v7806_v16 = vpop.f32.mrb[81].mxu0  ;;  %v7812_v49 = vpop.f32.mrb[81].mxu1 }
 0x1bc   :  { %v2140_v39 = vsel %vm2006_vm0, %v1879_v27, 0.0  ;;  %13727 = vst [vmem:[#allocation173_spill] sm:$0xff] %v7806_v16  ;;  %v2395_v22 = vmul.f32 %v1878_v48, %v1878_v48  ;;  %v2014_v45 = vsel %vm2006_vm0, %v1753_v40, 0.0  ;;  %v2269_v62 = vmul.f32 %v1752_v56, %v1752_v56  ;;  %v7810_v26 = vpop.f32.mrb[82].mxu0  ;;  %13729 = vst [vmem:[#allocation175_spill] sm:$0xff] %v7812_v49 }
 0x1bd   :  { %13725 = vst [vmem:[#allocation171_spill] sm:$0xff] %v7800_v11  ;;  %13726 = vst [vmem:[#allocation172_spill] sm:$0xff] %v7802_v24  ;;  %2523 = vadd.xlane.f32.xlu1 %v2522_v10  ;;  %v2396_v61 = vmul.f32 %v2140_v39, %v2140_v39  ;;  %1349 = vadd.xlane.f32.xlu0 %v1348_v55  ;;  %v2525_v12 = vadd.f32 %v2268_v13, %v2267_v19  ;;  %v7818_v27 = vpop.f32.mrb[83].mxu0  ;;  %v7822_v39 = vpop.f32.mrb[82].mxu1 }
 0x1be   :  { %13728 = vst [vmem:[#allocation174_spill] sm:$0xff] %v7810_v26  ;;  %v2270_v15 = vmul.f32 %v2014_v45, %v2014_v45  ;;  %v7816_v53 = vadd.f32 %v7806_v16, %v7790_v52  ;;  %13730 = vst [vmem:[#allocation176_spill] sm:$0xff] %v7818_v27  ;;  %v1880_v10 = vsub.f32 %v7233_v18, %v7800_v11  ;;  %v1440_v48 = vpop.xlane.xlu0 %1439  ;;  %v1251_v56 = vpop.xlane.xlu1 %1250 }
 0x1bf   :  { %13731 = vst [vmem:[#allocation177_spill] sm:$0xff] %v7822_v39  ;;  %v7824_v40 = vadd.f32 %v2396_v61, %v2395_v22  ;;  %v1881_v55 = vsub.f32 %v7239_v23, %v7800_v11  ;;  %v7830_v13 = vadd.f32 %v7812_v49, %v7796_v7  ;;  %v7834_v45 = vadd.f32 %v7818_v27, %v7810_v26  ;;  %v7842_v61 = vpop.f32.mrb[83].mxu1 }
 0x1c0   :  { %v7836_v19 = vmul.f32 0.0051020407, %v1440_v48  ;;  %v7838_v18 = vmul.f32 0.0051020407, %v1251_v56  ;;  %v7840_v16 = vadd.f32 %v2270_v15, %v2269_v62  ;;  %v2397_v52 = vmul.f32 %v1880_v10, %v1880_v10  ;;  %13734 = vst [vmem:[#allocation180_spill] sm:$0xff] %v7842_v61 }
 0x1c1   :  { %2715 = vadd.xlane.f32.xlu1 %v2714_v28  ;;  %v2142_v22 = vsel %vm2006_vm0, %v1881_v55, 0.0  ;;  %v1754_v23 = vsub.f32 %v7269_v34, %v7802_v24  ;;  %v1755_v11 = vsub.f32 %v7273_v36, %v7802_v24  ;;  %v7852_v48 = vadd.f32 %v7842_v61, %v7822_v39  ;;  %1541 = vadd.xlane.f32.xlu0 %v1540_v0  ;;  %v7858_v10 = vpop.f32.mrb[84].mxu0  ;;  %v7862_v55 = vpop.f32.mrb[84].mxu1 }
 0x1c2   :  { %13732 = vst [vmem:[#allocation178_spill] sm:$0xff] %v7836_v19  ;;  %13733 = vst [vmem:[#allocation179_spill] sm:$0xff] %v7838_v18  ;;  %v2398_v62 = vmul.f32 %v2142_v22, %v2142_v22  ;;  %v1882_v15 = vsub.f32 %v7271_v35, %v7836_v19  ;;  %v1883_v28 = vsub.f32 %v7275_v37, %v7836_v19  ;;  %v1443_v36 = vpop.xlane.xlu1 %1442  ;;  %v1254_v34 = vpop.xlane.xlu0 %1253 }
 0x1c3   :  { %13735 = vst [vmem:[#allocation181_spill] sm:$0xff] %v7858_v10  ;;  %v1756_v56 = vsub.f32 %v7279_v41, %v7838_v18  ;;  %13736 = vst [vmem:[#allocation182_spill] sm:$0xff] %v7862_v55  ;;  %v2016_v24 = vsel %vm2006_vm0, %v1755_v11, 0.0  ;;  %v2271_v0 = vmul.f32 %v1754_v23, %v1754_v23  ;;  %v1757_v22 = vsub.f32 %v7285_v46, %v7838_v18  ;;  %v7874_v39 = vpop.f32.mrb[85].mxu0  ;;  %v7876_v41 = vpop.f32.mrb[85].mxu1 }
 0x1c4   :  { %v7868_v35 = vmul.f32 0.0051020407, %v1443_v36  ;;  %v7870_v61 = vmul.f32 0.0051020407, %v1254_v34  ;;  %v7872_v37 = vadd.f32 %v2398_v62, %v2397_v52  ;;  %v2272_v19 = vmul.f32 %v2016_v24, %v2016_v24  ;;  %13739 = vst [vmem:[#allocation185_spill] sm:$0xff] %v7874_v39  ;;  %13740 = vst [vmem:[#allocation186_spill] sm:$0xff] %v7876_v41 }
 0x1c5   :  { %1352 = vadd.xlane.f32.xlu1 %v7768_v57  ;;  %v2144_v11 = vsel %vm2006_vm0, %v1883_v28, 0.0  ;;  %v2399_v23 = vmul.f32 %v1882_v15, %v1882_v15  ;;  %v2018_v46 = vsel %vm2006_vm0, %v1757_v22, 0.0  ;;  %v2273_v36 = vmul.f32 %v1756_v56, %v1756_v56  ;;  %v7883_v18 = vpop.f32.mrb[86].mxu0  ;;  %v7885_v34 = vpop.f32.mrb[86].mxu1  ;;  %2526 = vadd.xlane.f32.xlu0 %v2525_v12 }
 0x1c6   :  { %13737 = vst [vmem:[#allocation183_spill] sm:$0xff] %v7868_v35  ;;  %13738 = vst [vmem:[#allocation184_spill] sm:$0xff] %v7870_v61  ;;  %v1758_v24 = vsub.f32 %v7317_v2, %v7870_v61  ;;  %v1759_v52 = vsub.f32 %v7321_v4, %v7870_v61  ;;  %v7891_v57 = vadd.f32 %v2272_v19, %v2271_v0  ;;  %v7893_v28 = vpop.f32.mrb[87].mxu0  ;;  %v7895_v15 = vpop.f32.mrb[87].mxu1 }
 0x1c7   :  { %13741 = vst [vmem:[#allocation187_spill] sm:$0xff] %v7883_v18  ;;  %13742 = vst [vmem:[#allocation188_spill] sm:$0xff] %v7885_v34  ;;  %v2400_v62 = vmul.f32 %v2144_v11, %v2144_v11  ;;  %v1446_v22 = vpop.xlane.xlu0 %1445  ;;  %v1257_v56 = vpop.xlane.xlu1 %1256  ;;  %v2274_v27 = vmul.f32 %v2018_v46, %v2018_v46  ;;  %v7899_v26 = vadd.f32 %v7874_v39, %v7858_v10 }
 0x1c8   :  { %13743 = vst [vmem:[#allocation189_spill] sm:$0xff] %v7893_v28  ;;  %13744 = vst [vmem:[#allocation190_spill] sm:$0xff] %v7895_v15  ;;  %v7903_v2 = vadd.f32 %v7876_v41, %v7862_v55  ;;  %v1884_v12 = vsub.f32 %v7281_v42, %v7868_v35  ;;  %v7907_v19 = vmul.f32 0.0051020407, %v1446_v22  ;;  %v7909_v0 = vmul.f32 0.0051020407, %v1257_v56 }
 0x1c9   :  { %v7911_v11 = vadd.f32 %v2400_v62, %v2399_v23  ;;  %v1885_v46 = vsub.f32 %v7287_v47, %v7868_v35  ;;  %1544 = vadd.xlane.f32.xlu1 %v7784_v25  ;;  %v7916_v4 = vadd.f32 %v2274_v27, %v2273_v36  ;;  %v7920_v61 = vadd.f32 %v7895_v15, %v7885_v34  ;;  %v7933_v27 = vpop.f32.mrb[88].mxu0  ;;  %v7935_v36 = vpop.f32.mrb[88].mxu1 }
 0x1ca   :  { %13745 = vst [vmem:[#allocation191_spill] sm:$0xff] %v7907_v19  ;;  %13746 = vst [vmem:[#allocation192_spill] sm:$0xff] %v7909_v0  ;;  %v7924_v42 = vadd.f32 %v7893_v28, %v7883_v18  ;;  %v1886_v22 = vsub.f32 %v7319_v3, %v7907_v19  ;;  %v1887_v23 = vsub.f32 %v7323_v5, %v7907_v19  ;;  %2718 = vadd.xlane.f32.xlu0 %v7824_v40  ;;  %v7947_v34 = vpop.f32.mrb[89].mxu0  ;;  %v7949_v28 = vpop.f32.mrb[89].mxu1 }
 0x1cb   :  { %v1761_v62 = vsub.f32 %v7333_v20, %v7909_v0  ;;  %v2401_v25 = vmul.f32 %v1884_v12, %v1884_v12  ;;  %13747 = vst [vmem:[#allocation193_spill] sm:$0xff] %v7933_v27  ;;  %13748 = vst [vmem:[#allocation194_spill] sm:$0xff] %v7935_v36  ;;  %v1760_v56 = vsub.f32 %v7327_v9, %v7909_v0  ;;  %v1449_v47 = vpop.xlane.xlu1 %1448  ;;  %v1260_v35 = vpop.xlane.xlu0 %1259  ;;  %v2146_v3 = vsel %vm2006_vm0, %v1885_v46, 0.0 }
 0x1cc   :  { %v2020_v5 = vsel %vm2006_vm0, %v1759_v52, 0.0  ;;  %v2275_v19 = vmul.f32 %v1758_v24, %v1758_v24  ;;  %v7943_v20 = vmul.f32 0.0051020407, %v1449_v47  ;;  %v7945_v40 = vmul.f32 0.0051020407, %v1260_v35  ;;  %13751 = vst [vmem:[#allocation197_spill] sm:$0xff] %v7947_v34 }
 0x1cd   :  { %v2402_v12 = vmul.f32 %v2146_v3, %v2146_v3  ;;  %v2276_v15 = vmul.f32 %v2020_v5, %v2020_v5  ;;  %13752 = vst [vmem:[#allocation198_spill] sm:$0xff] %v7949_v28  ;;  %2529 = vadd.xlane.f32.xlu1 %v7840_v16  ;;  %v2148_v9 = vsel %vm2006_vm0, %v1887_v23, 0.0  ;;  %v2403_v46 = vmul.f32 %v1886_v22, %v1886_v22  ;;  %v7960_v47 = vpop.f32.mrb[90].mxu0  ;;  %v7962_v3 = vpop.f32.mrb[90].mxu1 }
 0x1ce   :  { %13749 = vst [vmem:[#allocation195_spill] sm:$0xff] %v7943_v20  ;;  %13750 = vst [vmem:[#allocation196_spill] sm:$0xff] %v7945_v40  ;;  %v7956_v52 = vadd.f32 %v7947_v34, %v7933_v27  ;;  %v2022_v35 = vsel %vm2006_vm0, %v1761_v62, 0.0  ;;  %v1888_v5 = vsub.f32 %v7329_v14, %v7943_v20  ;;  %v1889_v16 = vsub.f32 %v7335_v21, %v7943_v20  ;;  %v7973_v23 = vpop.f32.mrb[91].mxu0  ;;  %v7975_v62 = vpop.f32.mrb[91].mxu1 }
 0x1cf   :  { %13753 = vst [vmem:[#allocation199_spill] sm:$0xff] %v7960_v47  ;;  %13754 = vst [vmem:[#allocation200_spill] sm:$0xff] %v7962_v3  ;;  %v1762_v24 = vsub.f32 %v7353_v30, %v7945_v40  ;;  %v1763_v22 = vsub.f32 %v7357_v32, %v7945_v40  ;;  %1355 = vadd.xlane.f32.xlu0 %v7816_v53  ;;  %v1452_v0 = vpop.xlane.xlu0 %1451  ;;  %v1263_v34 = vpop.xlane.xlu1 %1262  ;;  %v7977_v27 = vadd.f32 %v2402_v12, %v2401_v25 }
 0x1d0   :  { %13755 = vst [vmem:[#allocation201_spill] sm:$0xff] %v7973_v23  ;;  %13756 = vst [vmem:[#allocation202_spill] sm:$0xff] %v7975_v62  ;;  %v7979_v14 = vadd.f32 %v2276_v15, %v2275_v19  ;;  %v2404_v18 = vmul.f32 %v2148_v9, %v2148_v9  ;;  %v2277_v21 = vmul.f32 %v1760_v56, %v1760_v56  ;;  %v7981_v20 = vmul.f32 0.0051020407, %v1452_v0 }
 0x1d1   :  { %v7983_v30 = vmul.f32 0.0051020407, %v1263_v34  ;;  %v2278_v41 = vmul.f32 %v2022_v35, %v2022_v35  ;;  %v7987_v53 = vadd.f32 %v7949_v28, %v7935_v36  ;;  %2721 = vadd.xlane.f32.xlu1 %v7872_v37  ;;  %v7994_v25 = vadd.f32 %v7973_v23, %v7960_v47  ;;  %v8007_v37 = vpop.f32.mrb[92].mxu0  ;;  %v8009_v56 = vpop.f32.mrb[92].mxu1 }
 0x1d2   :  { %13757 = vst [vmem:[#allocation203_spill] sm:$0xff] %v7981_v20  ;;  %v7990_v32 = vadd.f32 %v2404_v18, %v2403_v46  ;;  %v2150_v9 = vsel %vm2006_vm0, %v1889_v16, 0.0  ;;  %v2405_v15 = vmul.f32 %v1888_v5, %v1888_v5  ;;  %v1890_v34 = vsub.f32 %v7355_v31, %v7981_v20  ;;  %13759 = vst [vmem:[#allocation205_spill] sm:$0xff] %v8007_v37  ;;  %v8025_v40 = vpop.f32.mrb[93].mxu1 }
 0x1d3   :  { %13758 = vst [vmem:[#allocation204_spill] sm:$0xff] %v7983_v30  ;;  %v1891_v19 = vsub.f32 %v7359_v33, %v7981_v20  ;;  %v1764_v0 = vsub.f32 %v7363_v43, %v7983_v30  ;;  %v1765_v18 = vsub.f32 %v7369_v50, %v7983_v30  ;;  %1547 = vadd.xlane.f32.xlu0 %v7830_v13  ;;  %13760 = vst [vmem:[#allocation206_spill] sm:$0xff] %v8009_v56  ;;  %v1455_v12 = vpop.xlane.xlu1 %1454  ;;  %v1266_v46 = vpop.xlane.xlu0 %1265 }
 0x1d4   :  { %v8011_v35 = vadd.f32 %v2278_v41, %v2277_v21  ;;  %v2406_v5 = vmul.f32 %v2150_v9, %v2150_v9  ;;  %v8015_v16 = vadd.f32 %v7975_v62, %v7962_v3  ;;  %v2024_v33 = vsel %vm2006_vm0, %v1763_v22, 0.0  ;;  %v8023_v43 = vpop.f32.mrb[93].mxu0  ;;  %13764 = vst [vmem:[#allocation210_spill] sm:$0xff] %v8025_v40 }
 0x1d5   :  { %v8019_v31 = vmul.f32 0.0051020407, %v1455_v12  ;;  %v8021_v20 = vmul.f32 0.0051020407, %v1266_v46  ;;  %v2279_v13 = vmul.f32 %v1762_v24, %v1762_v24  ;;  %v2280_v50 = vmul.f32 %v2024_v33, %v2024_v33  ;;  %13763 = vst [vmem:[#allocation209_spill] sm:$0xff] %v8023_v43  ;;  %1358 = vadd.xlane.f32.xlu1 %v7834_v45  ;;  %v8036_v12 = vpop.f32.mrb[94].mxu0 }
 0x1d6   :  { %v8028_v41 = vadd.f32 %v2406_v5, %v2405_v15  ;;  %v2152_v21 = vsel %vm2006_vm0, %v1891_v19, 0.0  ;;  %v2407_v9 = vmul.f32 %v1890_v34, %v1890_v34  ;;  %v8034_v22 = vadd.f32 %v8023_v43, %v8007_v37  ;;  %13765 = vst [vmem:[#allocation211_spill] sm:$0xff] %v8036_v12  ;;  %v8038_v24 = vpop.f32.mrb[94].mxu1  ;;  %v8049_v19 = vpop.f32.mrb[95].mxu0 }
 0x1d7   :  { %13761 = vst [vmem:[#allocation207_spill] sm:$0xff] %v8019_v31  ;;  %13762 = vst [vmem:[#allocation208_spill] sm:$0xff] %v8021_v20  ;;  %v1892_v33 = vsub.f32 %v7365_v44, %v8019_v31  ;;  %v1893_v45 = vsub.f32 %v7371_v51, %v8019_v31  ;;  %v1766_v15 = vsub.f32 %v7377_v58, %v8021_v20  ;;  %2532 = vadd.xlane.f32.xlu0 %v7891_v57  ;;  %v8051_v46 = vpop.f32.mrb[95].mxu1  ;;  %v1458_v5 = vpop.xlane.xlu0 %1457 }
 0x1d8   :  { %13766 = vst [vmem:[#allocation212_spill] sm:$0xff] %v8038_v24  ;;  %v1767_v34 = vsub.f32 %v7381_v60, %v8021_v20  ;;  %13767 = vst [vmem:[#allocation213_spill] sm:$0xff] %v8049_v19  ;;  %v1269_v30 = vpop.xlane.xlu1 %1268  ;;  %v8053_v43 = vadd.f32 %v2280_v50, %v2279_v13  ;;  %v2408_v44 = vmul.f32 %v2152_v21, %v2152_v21  ;;  %v2026_v51 = vsel %vm2006_vm0, %v1765_v18, 0.0 }
 0x1d9   :  { %13768 = vst [vmem:[#allocation214_spill] sm:$0xff] %v8051_v46  ;;  %v2281_v31 = vmul.f32 %v1764_v0, %v1764_v0  ;;  %v8057_v37 = vmul.f32 0.0051020407, %v1458_v5  ;;  %v8059_v58 = vmul.f32 0.0051020407, %v1269_v30  ;;  %v2282_v60 = vmul.f32 %v2026_v51, %v2026_v51  ;;  %1550 = vadd.xlane.f32.xlu1 %v7852_v48  ;;  %v8083_v48 = vpop.f32.mrb[96].mxu0 }
 0x1da   :  { %v8063_v57 = vadd.f32 %v8025_v40, %v8009_v56  ;;  %v8066_v20 = vadd.f32 %v2408_v44, %v2407_v9  ;;  %v8070_v50 = vadd.f32 %v8049_v19, %v8036_v12  ;;  %v2154_v0 = vsel %vm2006_vm0, %v1893_v45, 0.0  ;;  %13771 = vst [vmem:[#allocation217_spill] sm:$0xff] %v8083_v48  ;;  %v8085_v21 = vpop.f32.mrb[96].mxu1 }
 0x1db   :  { %13769 = vst [vmem:[#allocation215_spill] sm:$0xff] %v8057_v37  ;;  %13770 = vst [vmem:[#allocation216_spill] sm:$0xff] %v8059_v58  ;;  %v2409_v18 = vmul.f32 %v1892_v33, %v1892_v33  ;;  %v1894_v30 = vsub.f32 %v7379_v59, %v8057_v37  ;;  %v1895_v51 = vsub.f32 %v7383_v63, %v8057_v37  ;;  %2724 = vadd.xlane.f32.xlu0 %v7911_v11  ;;  %v1272_v33 = vpop.xlane.xlu0 %1271  ;;  %v8101_v19 = vpop.f32.mrb[97].mxu1 }
 0x1dc   :  { %v1768_v13 = vsub.f32 %v7387_v1, %v8059_v58  ;;  %v1769_v44 = vsub.f32 %v7393_v8, %v8059_v58  ;;  %13772 = vst [vmem:[#allocation218_spill] sm:$0xff] %v8085_v21  ;;  %v1461_v9 = vpop.xlane.xlu1 %1460  ;;  %v8087_v45 = vadd.f32 %v2282_v60, %v2281_v31  ;;  %v2410_v5 = vmul.f32 %v2154_v0, %v2154_v0  ;;  %v8099_v58 = vpop.f32.mrb[97].mxu0 }
 0x1dd   :  { %v8091_v63 = vadd.f32 %v8051_v46, %v8038_v24  ;;  %v2028_v59 = vsel %vm2006_vm0, %v1767_v34, 0.0  ;;  %v8095_v37 = vmul.f32 0.0051020407, %v1461_v9  ;;  %v8097_v8 = vmul.f32 0.0051020407, %v1272_v33  ;;  %13775 = vst [vmem:[#allocation221_spill] sm:$0xff] %v8099_v58  ;;  %2535 = vadd.xlane.f32.xlu1 %v7916_v4 }
 0x1de   :  { %v2283_v11 = vmul.f32 %v1766_v15, %v1766_v15  ;;  %v2284_v1 = vmul.f32 %v2028_v59, %v2028_v59  ;;  %13776 = vst [vmem:[#allocation222_spill] sm:$0xff] %v8101_v19  ;;  %v8104_v31 = vadd.f32 %v2410_v5, %v2409_v18  ;;  %v2156_v60 = vsel %vm2006_vm0, %v1895_v51, 0.0  ;;  %v8112_v9 = vpop.f32.mrb[98].mxu0  ;;  %v8114_v15 = vpop.f32.mrb[98].mxu1  ;;  %v13779_v33 = vld [vmem:[#allocation49_spill] sm:$0xff]  ;;  %v13780_v18 = vld [vmem:[#allocation50_spill] sm:$0xff] }
 0x1df   :  { %13773 = vst [vmem:[#allocation219_spill] sm:$0xff] %v8095_v37  ;;  %13774 = vst [vmem:[#allocation220_spill] sm:$0xff] %v8097_v8  ;;  %v2411_v0 = vmul.f32 %v1894_v30, %v1894_v30  ;;  %v8110_v34 = vadd.f32 %v8099_v58, %v8083_v48  ;;  %v1896_v59 = vsub.f32 %v7389_v6, %v8095_v37  ;;  %v13781_v51 = vld [vmem:[#allocation52_spill] sm:$0xff]  ;;  %1361 = vadd.xlane.f32.xlu0 %v7899_v26  ;;  %v8125_v58 = vpop.f32.mrb[99].mxu0  ;;  %v8127_v48 = vpop.f32.mrb[99].mxu1 }
 0x1e0   :  { %13777 = vst [vmem:[#allocation223_spill] sm:$0xff] %v8112_v9  ;;  %13778 = vst [vmem:[#allocation224_spill] sm:$0xff] %v8114_v15  ;;  %v1897_v4 = vsub.f32 %v13779_v33, %v8095_v37  ;;  %v1770_v5 = vsub.f32 %v13780_v18, %v8097_v8  ;;  %v1771_v30 = vsub.f32 %v13781_v51, %v8097_v8  ;;  %v1464_v46 = vpop.xlane.xlu0 %1463  ;;  %v1275_v24 = vpop.xlane.xlu1 %1274  ;;  %v2030_v33 = vsel %vm2006_vm0, %v1769_v44, 0.0 }
 0x1e1   :  { %13782 = vst [vmem:[#allocation225_spill] sm:$0xff] %v8125_v58  ;;  %13783 = vst [vmem:[#allocation226_spill] sm:$0xff] %v8127_v48  ;;  %v8129_v12 = vadd.f32 %v2284_v1, %v2283_v11  ;;  %v2412_v6 = vmul.f32 %v2156_v60, %v2156_v60  ;;  %v2285_v37 = vmul.f32 %v1768_v13, %v1768_v13  ;;  %v8133_v40 = vmul.f32 0.0051020407, %v1464_v46  ;;  %v13787_v11 = vld [vmem:[#allocation53_spill] sm:$0xff] }
 0x1e2   :  { %v8135_v18 = vmul.f32 0.0051020407, %v1275_v24  ;;  %v2286_v51 = vmul.f32 %v2030_v33, %v2030_v33  ;;  %v8139_v26 = vadd.f32 %v8101_v19, %v8085_v21  ;;  %2727 = vadd.xlane.f32.xlu1 %v7977_v27  ;;  %v8146_v1 = vadd.f32 %v8125_v58, %v8112_v9  ;;  %v13786_v24 = vld [vmem:[#allocation51_spill] sm:$0xff]  ;;  %v13788_v33 = vld [vmem:[#allocation54_spill] sm:$0xff]  ;;  %v8161_v58 = vpop.f32.mrb[100].mxu1 }
 0x1e3   :  { %13784 = vst [vmem:[#allocation227_spill] sm:$0xff] %v8133_v40  ;;  %v8142_v8 = vadd.f32 %v2412_v6, %v2411_v0  ;;  %v2158_v13 = vsel %vm2006_vm0, %v1897_v4, 0.0  ;;  %v2413_v46 = vmul.f32 %v1896_v59, %v1896_v59  ;;  %v1898_v44 = vsub.f32 %v13786_v24, %v8133_v40  ;;  %v13789_v6 = vld [vmem:[#allocation56_spill] sm:$0xff]  ;;  %1553 = vadd.xlane.f32.xlu0 %v7903_v2  ;;  %v8159_v0 = vpop.f32.mrb[100].mxu0  ;;  %v8177_v56 = vpop.f32.mrb[101].mxu1 }
 0x1e4   :  { %13785 = vst [vmem:[#allocation228_spill] sm:$0xff] %v8135_v18  ;;  %v1899_v60 = vsub.f32 %v13787_v11, %v8133_v40  ;;  %v1772_v19 = vsub.f32 %v13788_v33, %v8135_v18  ;;  %v1773_v27 = vsub.f32 %v13789_v6, %v8135_v18  ;;  %13790 = vst [vmem:[#allocation229_spill] sm:$0xff] %v8159_v0  ;;  %v1467_v4 = vpop.xlane.xlu1 %1466  ;;  %v1278_v59 = vpop.xlane.xlu0 %1277  ;;  %v2032_v40 = vsel %vm2006_vm0, %v1771_v30, 0.0 }
 0x1e5   :  { %13791 = vst [vmem:[#allocation230_spill] sm:$0xff] %v8161_v58  ;;  %v8163_v9 = vadd.f32 %v2286_v51, %v2285_v37  ;;  %v2414_v24 = vmul.f32 %v2158_v13, %v2158_v13  ;;  %v8167_v11 = vadd.f32 %v8127_v48, %v8114_v15  ;;  %v8171_v33 = vmul.f32 0.0051020407, %v1467_v4  ;;  %v8175_v21 = vpop.f32.mrb[101].mxu0  ;;  %13795 = vst [vmem:[#allocation234_spill] sm:$0xff] %v8177_v56  ;;  %v13799_v48 = vld [vmem:[#allocation57_spill] sm:$0xff] }
 0x1e6   :  { %v8173_v6 = vmul.f32 0.0051020407, %v1278_v59  ;;  %v2287_v2 = vmul.f32 %v1770_v5, %v1770_v5  ;;  %v2288_v18 = vmul.f32 %v2032_v40, %v2032_v40  ;;  %13794 = vst [vmem:[#allocation233_spill] sm:$0xff] %v8175_v21  ;;  %1364 = vadd.xlane.f32.xlu1 %v7924_v42  ;;  %v2160_v51 = vsel %vm2006_vm0, %v1899_v60, 0.0  ;;  %v8188_v4 = vpop.f32.mrb[102].mxu0  ;;  %v8190_v5 = vpop.f32.mrb[102].mxu1 }
 0x1e7   :  { %13792 = vst [vmem:[#allocation231_spill] sm:$0xff] %v8171_v33  ;;  %v8180_v37 = vadd.f32 %v2414_v24, %v2413_v46  ;;  %v2415_v13 = vmul.f32 %v1898_v44, %v1898_v44  ;;  %v8186_v30 = vadd.f32 %v8175_v21, %v8159_v0  ;;  %13796 = vst [vmem:[#allocation235_spill] sm:$0xff] %v8188_v4  ;;  %v13798_v40 = vld [vmem:[#allocation55_spill] sm:$0xff]  ;;  %v13800_v46 = vld [vmem:[#allocation58_spill] sm:$0xff]  ;;  %2538 = vadd.xlane.f32.xlu0 %v7979_v14  ;;  %v8201_v21 = vpop.f32.mrb[103].mxu0  ;;  %v8203_v0 = vpop.f32.mrb[103].mxu1 }
 0x1e8   :  { %13793 = vst [vmem:[#allocation232_spill] sm:$0xff] %v8173_v6  ;;  %13797 = vst [vmem:[#allocation236_spill] sm:$0xff] %v8190_v5  ;;  %v1900_v59 = vsub.f32 %v13798_v40, %v8171_v33  ;;  %v1901_v42 = vsub.f32 %v13799_v48, %v8171_v33  ;;  %v1774_v24 = vsub.f32 %v13800_v46, %v8173_v6  ;;  %v13801_v60 = vld [vmem:[#allocation60_spill] sm:$0xff]  ;;  %v1470_v15 = vpop.xlane.xlu0 %1469  ;;  %v1281_v62 = vpop.xlane.xlu1 %1280  ;;  %v2034_v48 = vsel %vm2006_vm0, %v1773_v27, 0.0 }
 0x1e9   :  { %v1775_v44 = vsub.f32 %v13801_v60, %v8173_v6  ;;  %13802 = vst [vmem:[#allocation237_spill] sm:$0xff] %v8201_v21  ;;  %13803 = vst [vmem:[#allocation238_spill] sm:$0xff] %v8203_v0  ;;  %v8205_v3 = vadd.f32 %v2288_v18, %v2287_v2  ;;  %v2416_v40 = vmul.f32 %v2160_v51, %v2160_v51  ;;  %v8209_v23 = vmul.f32 0.0051020407, %v1470_v15  ;;  %v13808_v51 = vld [vmem:[#allocation62_spill] sm:$0xff] }
 0x1ea   :  { %v2289_v33 = vmul.f32 %v1772_v19, %v1772_v19  ;;  %v8211_v46 = vmul.f32 0.0051020407, %v1281_v62  ;;  %v2290_v60 = vmul.f32 %v2034_v48, %v2034_v48  ;;  %v8215_v14 = vadd.f32 %v8177_v56, %v8161_v58  ;;  %1556 = vadd.xlane.f32.xlu1 %v7920_v61  ;;  %v13806_v62 = vld [vmem:[#allocation59_spill] sm:$0xff]  ;;  %v13807_v48 = vld [vmem:[#allocation61_spill] sm:$0xff]  ;;  %v13809_v61 = vld [vmem:[#allocation64_spill] sm:$0xff] }
 0x1eb   :  { %13804 = vst [vmem:[#allocation239_spill] sm:$0xff] %v8209_v23  ;;  %v8218_v6 = vadd.f32 %v2416_v40, %v2415_v13  ;;  %v8222_v18 = vadd.f32 %v8201_v21, %v8188_v4  ;;  %v2162_v19 = vsel %vm2006_vm0, %v1901_v42, 0.0  ;;  %v2417_v15 = vmul.f32 %v1900_v59, %v1900_v59  ;;  %2730 = vadd.xlane.f32.xlu0 %v7990_v32  ;;  %v8235_v40 = vpop.f32.mrb[104].mxu0  ;;  %v8237_v21 = vpop.f32.mrb[104].mxu1 }
 0x1ec   :  { %13805 = vst [vmem:[#allocation240_spill] sm:$0xff] %v8211_v46  ;;  %v1902_v27 = vsub.f32 %v13806_v62, %v8209_v23  ;;  %v1903_v2 = vsub.f32 %v13807_v48, %v8209_v23  ;;  %v1776_v56 = vsub.f32 %v13808_v51, %v8211_v46  ;;  %v1777_v13 = vsub.f32 %v13809_v61, %v8211_v46  ;;  %v1473_v42 = vpop.xlane.xlu1 %1472  ;;  %v1284_v59 = vpop.xlane.xlu0 %1283 }
 0x1ed   :  { %13810 = vst [vmem:[#allocation241_spill] sm:$0xff] %v8235_v40  ;;  %13811 = vst [vmem:[#allocation242_spill] sm:$0xff] %v8237_v21  ;;  %v8239_v4 = vadd.f32 %v2290_v60, %v2289_v33  ;;  %v2418_v62 = vmul.f32 %v2162_v19, %v2162_v19  ;;  %v8243_v48 = vadd.f32 %v8203_v0, %v8190_v5  ;;  %v2036_v23 = vsel %vm2006_vm0, %v1775_v44, 0.0  ;;  %v8251_v58 = vpop.f32.mrb[105].mxu0  ;;  %v8253_v47 = vpop.f32.mrb[105].mxu1  ;;  %v13819_v0 = vld [vmem:[#allocation65_spill] sm:$0xff] }
 0x1ee   :  { %v8247_v51 = vmul.f32 0.0051020407, %v1473_v42  ;;  %v8249_v61 = vmul.f32 0.0051020407, %v1284_v59  ;;  %v2291_v32 = vmul.f32 %v1774_v24, %v1774_v24  ;;  %v2292_v46 = vmul.f32 %v2036_v23, %v2036_v23  ;;  %13814 = vst [vmem:[#allocation245_spill] sm:$0xff] %v8251_v58  ;;  %13815 = vst [vmem:[#allocation246_spill] sm:$0xff] %v8253_v47  ;;  %2541 = vadd.xlane.f32.xlu1 %v8011_v35 }
 0x1ef   :  { %v8256_v33 = vadd.f32 %v2418_v62, %v2417_v15  ;;  %v2164_v60 = vsel %vm2006_vm0, %v1903_v2, 0.0  ;;  %v2419_v19 = vmul.f32 %v1902_v27, %v1902_v27  ;;  %v8262_v44 = vadd.f32 %v8251_v58, %v8235_v40  ;;  %v8264_v42 = vpop.f32.mrb[106].mxu0  ;;  %v8266_v24 = vpop.f32.mrb[106].mxu1  ;;  %v13818_v23 = vld [vmem:[#allocation63_spill] sm:$0xff]  ;;  %v13820_v15 = vld [vmem:[#allocation66_spill] sm:$0xff]  ;;  %v13821_v2 = vld [vmem:[#allocation68_spill] sm:$0xff]  ;;  %1367 = vadd.xlane.f32.xlu0 %v7956_v52 }
 0x1f0   :  { %13812 = vst [vmem:[#allocation243_spill] sm:$0xff] %v8247_v51  ;;  %13813 = vst [vmem:[#allocation244_spill] sm:$0xff] %v8249_v61  ;;  %v1904_v59 = vsub.f32 %v13818_v23, %v8247_v51  ;;  %v1905_v35 = vsub.f32 %v13819_v0, %v8247_v51  ;;  %v1778_v62 = vsub.f32 %v13820_v15, %v8249_v61  ;;  %v8277_v58 = vpop.f32.mrb[107].mxu0  ;;  %v8279_v40 = vpop.f32.mrb[107].mxu1  ;;  %v2038_v0 = vsel %vm2006_vm0, %v1777_v13, 0.0 }
 0x1f1   :  { %13816 = vst [vmem:[#allocation247_spill] sm:$0xff] %v8264_v42  ;;  %13817 = vst [vmem:[#allocation248_spill] sm:$0xff] %v8266_v24  ;;  %v1779_v27 = vsub.f32 %v13821_v2, %v8249_v61  ;;  %v1476_v5 = vpop.xlane.xlu0 %1475  ;;  %v1287_v28 = vpop.xlane.xlu1 %1286  ;;  %v8281_v36 = vadd.f32 %v2292_v46, %v2291_v32  ;;  %v2420_v23 = vmul.f32 %v2164_v60, %v2164_v60  ;;  %v13828_v60 = vld [vmem:[#allocation70_spill] sm:$0xff] }
 0x1f2   :  { %13822 = vst [vmem:[#allocation249_spill] sm:$0xff] %v8277_v58  ;;  %13823 = vst [vmem:[#allocation250_spill] sm:$0xff] %v8279_v40  ;;  %v2293_v51 = vmul.f32 %v1776_v56, %v1776_v56  ;;  %v8285_v55 = vmul.f32 0.0051020407, %v1476_v5  ;;  %v8287_v15 = vmul.f32 0.0051020407, %v1287_v28  ;;  %v2294_v2 = vmul.f32 %v2038_v0, %v2038_v0  ;;  %2733 = vadd.xlane.f32.xlu1 %v8028_v41 }
 0x1f3   :  { %v8291_v52 = vadd.f32 %v8253_v47, %v8237_v21  ;;  %v8294_v61 = vadd.f32 %v2420_v23, %v2419_v19  ;;  %v8298_v46 = vadd.f32 %v8277_v58, %v8264_v42  ;;  %v2166_v56 = vsel %vm2006_vm0, %v1905_v35, 0.0  ;;  %v13826_v28 = vld [vmem:[#allocation67_spill] sm:$0xff]  ;;  %v13827_v0 = vld [vmem:[#allocation69_spill] sm:$0xff]  ;;  %v13829_v41 = vld [vmem:[#allocation72_spill] sm:$0xff]  ;;  %1559 = vadd.xlane.f32.xlu0 %v7987_v53  ;;  %v8311_v23 = vpop.f32.mrb[108].mxu0  ;;  %v8313_v58 = vpop.f32.mrb[108].mxu1 }
 0x1f4   :  { %13824 = vst [vmem:[#allocation251_spill] sm:$0xff] %v8285_v55  ;;  %13825 = vst [vmem:[#allocation252_spill] sm:$0xff] %v8287_v15  ;;  %v2421_v5 = vmul.f32 %v1904_v59, %v1904_v59  ;;  %v1906_v13 = vsub.f32 %v13826_v28, %v8285_v55  ;;  %v1907_v32 = vsub.f32 %v13827_v0, %v8285_v55  ;;  %v2040_v55 = vsel %vm2006_vm0, %v1779_v27, 0.0  ;;  %v8327_v21 = vpop.f32.mrb[109].mxu0  ;;  %v8329_v39 = vpop.f32.mrb[109].mxu1 }
 0x1f5   :  { %v1780_v47 = vsub.f32 %v13828_v60, %v8287_v15  ;;  %v1781_v19 = vsub.f32 %v13829_v41, %v8287_v15  ;;  %13830 = vst [vmem:[#allocation253_spill] sm:$0xff] %v8311_v23  ;;  %13831 = vst [vmem:[#allocation254_spill] sm:$0xff] %v8313_v58  ;;  %v1479_v35 = vpop.xlane.xlu1 %1478  ;;  %v1290_v59 = vpop.xlane.xlu0 %1289  ;;  %v8315_v42 = vadd.f32 %v2294_v2, %v2293_v51 }
 0x1f6   :  { %v2422_v28 = vmul.f32 %v2166_v56, %v2166_v56  ;;  %v8319_v0 = vadd.f32 %v8279_v40, %v8266_v24  ;;  %v8323_v60 = vmul.f32 0.0051020407, %v1479_v35  ;;  %v8325_v41 = vmul.f32 0.0051020407, %v1290_v59  ;;  %13834 = vst [vmem:[#allocation257_spill] sm:$0xff] %v8327_v21  ;;  %13835 = vst [vmem:[#allocation258_spill] sm:$0xff] %v8329_v39  ;;  %1370 = vadd.xlane.f32.xlu1 %v7994_v25 }
 0x1f7   :  { %v2295_v53 = vmul.f32 %v1778_v62, %v1778_v62  ;;  %v2296_v15 = vmul.f32 %v2040_v55, %v2040_v55  ;;  %v2168_v2 = vsel %vm2006_vm0, %v1907_v32, 0.0  ;;  %v2423_v56 = vmul.f32 %v1906_v13, %v1906_v13  ;;  %v8340_v35 = vpop.f32.mrb[110].mxu0  ;;  %v8342_v62 = vpop.f32.mrb[110].mxu1  ;;  %v13838_v55 = vld [vmem:[#allocation71_spill] sm:$0xff]  ;;  %v13839_v40 = vld [vmem:[#allocation73_spill] sm:$0xff]  ;;  %v13841_v32 = vld [vmem:[#allocation76_spill] sm:$0xff]  ;;  %2544 = vadd.xlane.f32.xlu0 %v8053_v43 }
 0x1f8   :  { %13832 = vst [vmem:[#allocation255_spill] sm:$0xff] %v8323_v60  ;;  %13833 = vst [vmem:[#allocation256_spill] sm:$0xff] %v8325_v41  ;;  %v8332_v51 = vadd.f32 %v2422_v28, %v2421_v5  ;;  %v8338_v27 = vadd.f32 %v8327_v21, %v8311_v23  ;;  %v1908_v59 = vsub.f32 %v13838_v55, %v8323_v60  ;;  %v13840_v5 = vld [vmem:[#allocation74_spill] sm:$0xff]  ;;  %v8353_v21 = vpop.f32.mrb[111].mxu0  ;;  %v8355_v23 = vpop.f32.mrb[111].mxu1 }
 0x1f9   :  { %13836 = vst [vmem:[#allocation259_spill] sm:$0xff] %v8340_v35  ;;  %13837 = vst [vmem:[#allocation260_spill] sm:$0xff] %v8342_v62  ;;  %v1909_v25 = vsub.f32 %v13839_v40, %v8323_v60  ;;  %v1782_v28 = vsub.f32 %v13840_v5, %v8325_v41  ;;  %v1783_v13 = vsub.f32 %v13841_v32, %v8325_v41  ;;  %v1482_v24 = vpop.xlane.xlu0 %1481  ;;  %v1293_v10 = vpop.xlane.xlu1 %1292  ;;  %v2042_v40 = vsel %vm2006_vm0, %v1781_v19, 0.0 }
 0x1fa   :  { %13842 = vst [vmem:[#allocation261_spill] sm:$0xff] %v8353_v21  ;;  %13843 = vst [vmem:[#allocation262_spill] sm:$0xff] %v8355_v23  ;;  %v8357_v49 = vadd.f32 %v2296_v15, %v2295_v53  ;;  %v2424_v55 = vmul.f32 %v2168_v2, %v2168_v2  ;;  %v2297_v60 = vmul.f32 %v1780_v47, %v1780_v47  ;;  %v8361_v7 = vmul.f32 0.0051020407, %v1482_v24  ;;  %v13848_v2 = vld [vmem:[#allocation78_spill] sm:$0xff] }
 0x1fb   :  { %v8363_v5 = vmul.f32 0.0051020407, %v1293_v10  ;;  %v2298_v32 = vmul.f32 %v2042_v40, %v2042_v40  ;;  %v8367_v43 = vadd.f32 %v8329_v39, %v8313_v58  ;;  %1562 = vadd.xlane.f32.xlu1 %v8015_v16  ;;  %v8374_v15 = vadd.f32 %v8353_v21, %v8340_v35  ;;  %v13846_v10 = vld [vmem:[#allocation75_spill] sm:$0xff]  ;;  %v13847_v40 = vld [vmem:[#allocation77_spill] sm:$0xff]  ;;  %v13849_v16 = vld [vmem:[#allocation80_spill] sm:$0xff]  ;;  %2736 = vadd.xlane.f32.xlu0 %v8066_v20  ;;  %v8389_v21 = vpop.f32.mrb[112].mxu1 }
 0x1fc   :  { %13844 = vst [vmem:[#allocation263_spill] sm:$0xff] %v8361_v7  ;;  %v8370_v41 = vadd.f32 %v2424_v55, %v2423_v56  ;;  %v2170_v47 = vsel %vm2006_vm0, %v1909_v25, 0.0  ;;  %v2425_v24 = vmul.f32 %v1908_v59, %v1908_v59  ;;  %v1910_v19 = vsub.f32 %v13846_v10, %v8361_v7  ;;  %v8387_v55 = vpop.f32.mrb[112].mxu0  ;;  %13851 = vst [vmem:[#allocation266_spill] sm:$0xff] %v8389_v21  ;;  %v8405_v29 = vpop.f32.mrb[113].mxu1 }
 0x1fd   :  { %13845 = vst [vmem:[#allocation264_spill] sm:$0xff] %v8363_v5  ;;  %v1911_v53 = vsub.f32 %v13847_v40, %v8361_v7  ;;  %v1784_v39 = vsub.f32 %v13848_v2, %v8363_v5  ;;  %v1785_v56 = vsub.f32 %v13849_v16, %v8363_v5  ;;  %13850 = vst [vmem:[#allocation265_spill] sm:$0xff] %v8387_v55  ;;  %v1485_v25 = vpop.xlane.xlu1 %1484  ;;  %v1296_v59 = vpop.xlane.xlu0 %1295  ;;  %v2044_v7 = vsel %vm2006_vm0, %v1783_v13, 0.0 }
 0x1fe   :  { %v8391_v35 = vadd.f32 %v2298_v32, %v2297_v60  ;;  %v2426_v10 = vmul.f32 %v2170_v47, %v2170_v47  ;;  %v8395_v40 = vadd.f32 %v8355_v23, %v8342_v62  ;;  %v8399_v2 = vmul.f32 0.0051020407, %v1485_v25  ;;  %v8403_v58 = vpop.f32.mrb[113].mxu0  ;;  %13855 = vst [vmem:[#allocation270_spill] sm:$0xff] %v8405_v29  ;;  %v13860_v23 = vld [vmem:[#allocation81_spill] sm:$0xff] }
 0x1ff   :  { %v8401_v16 = vmul.f32 0.0051020407, %v1296_v59  ;;  %v2299_v20 = vmul.f32 %v1782_v28, %v1782_v28  ;;  %v2300_v5 = vmul.f32 %v2044_v7, %v2044_v7  ;;  %13854 = vst [vmem:[#allocation269_spill] sm:$0xff] %v8403_v58  ;;  %2547 = vadd.xlane.f32.xlu1 %v8087_v45  ;;  %v2172_v32 = vsel %vm2006_vm0, %v1911_v53, 0.0  ;;  %v8416_v25 = vpop.f32.mrb[114].mxu0  ;;  %v8418_v28 = vpop.f32.mrb[114].mxu1  ;;  %1373 = vadd.xlane.f32.xlu0 %v8034_v22 }
 0x200   :  { %13852 = vst [vmem:[#allocation267_spill] sm:$0xff] %v8399_v2  ;;  %v8408_v60 = vadd.f32 %v2426_v10, %v2425_v24  ;;  %v2427_v47 = vmul.f32 %v1910_v19, %v1910_v19  ;;  %v8414_v13 = vadd.f32 %v8403_v58, %v8387_v55  ;;  %13857 = vst [vmem:[#allocation272_spill] sm:$0xff] %v8416_v25  ;;  %v13859_v7 = vld [vmem:[#allocation79_spill] sm:$0xff]  ;;  %v13861_v24 = vld [vmem:[#allocation82_spill] sm:$0xff]  ;;  %v8429_v58 = vpop.f32.mrb[115].mxu0  ;;  %v8431_v55 = vpop.f32.mrb[115].mxu1 }
 0x201   :  { %13853 = vst [vmem:[#allocation268_spill] sm:$0xff] %v8401_v16  ;;  %13858 = vst [vmem:[#allocation273_spill] sm:$0xff] %v8418_v28  ;;  %v1912_v59 = vsub.f32 %v13859_v7, %v8399_v2  ;;  %v1913_v45 = vsub.f32 %v13860_v23, %v8399_v2  ;;  %v1786_v10 = vsub.f32 %v13861_v24, %v8401_v16  ;;  %v13862_v53 = vld [vmem:[#allocation84_spill] sm:$0xff]  ;;  %v1488_v62 = vpop.xlane.xlu0 %1487  ;;  %v1299_v38 = vpop.xlane.xlu1 %1298  ;;  %v2046_v23 = vsel %vm2006_vm0, %v1785_v56, 0.0 }
 0x202   :  { %13856 = vst [vmem:[#allocation271_spill] sm:$0xff] %v8414_v13  ;;  %v1787_v19 = vsub.f32 %v13862_v53, %v8401_v16  ;;  %13863 = vst [vmem:[#allocation274_spill] sm:$0xff] %v8429_v58  ;;  %v8433_v17 = vadd.f32 %v2300_v5, %v2299_v20  ;;  %v2428_v7 = vmul.f32 %v2172_v32, %v2172_v32  ;;  %v8437_v13 = vmul.f32 0.0051020407, %v1488_v62  ;;  %v13871_v32 = vld [vmem:[#allocation86_spill] sm:$0xff] }
 0x203   :  { %13864 = vst [vmem:[#allocation275_spill] sm:$0xff] %v8431_v55  ;;  %v2301_v2 = vmul.f32 %v1784_v39, %v1784_v39  ;;  %v8439_v24 = vmul.f32 0.0051020407, %v1299_v38  ;;  %v2302_v53 = vmul.f32 %v2046_v23, %v2046_v23  ;;  %v8443_v22 = vadd.f32 %v8405_v29, %v8389_v21  ;;  %2739 = vadd.xlane.f32.xlu1 %v8104_v31  ;;  %v13869_v38 = vld [vmem:[#allocation83_spill] sm:$0xff]  ;;  %v13870_v23 = vld [vmem:[#allocation85_spill] sm:$0xff]  ;;  %v13872_v31 = vld [vmem:[#allocation88_spill] sm:$0xff] }
 0x204   :  { %13865 = vst [vmem:[#allocation276_spill] sm:$0xff] %v8437_v13  ;;  %v8446_v16 = vadd.f32 %v2428_v7, %v2427_v47  ;;  %v8450_v5 = vadd.f32 %v8429_v58, %v8416_v25  ;;  %v2174_v39 = vsel %vm2006_vm0, %v1913_v45, 0.0  ;;  %v2429_v62 = vmul.f32 %v1912_v59, %v1912_v59  ;;  %1565 = vadd.xlane.f32.xlu0 %v8063_v57  ;;  %v8463_v7 = vpop.f32.mrb[116].mxu0  ;;  %v8465_v58 = vpop.f32.mrb[116].mxu1 }
 0x205   :  { %13866 = vst [vmem:[#allocation277_spill] sm:$0xff] %v8439_v24  ;;  %13867 = vst [vmem:[#allocation278_spill] sm:$0xff] %v8443_v22  ;;  %v1914_v56 = vsub.f32 %v13869_v38, %v8437_v13  ;;  %v1915_v20 = vsub.f32 %v13870_v23, %v8437_v13  ;;  %v1788_v29 = vsub.f32 %v13871_v32, %v8439_v24  ;;  %v1491_v45 = vpop.xlane.xlu1 %1490  ;;  %v1302_v59 = vpop.xlane.xlu0 %1301  ;;  %v2048_v13 = vsel %vm2006_vm0, %v1787_v19, 0.0 }
 0x206   :  { %13868 = vst [vmem:[#allocation279_spill] sm:$0xff] %v8450_v5  ;;  %v1789_v47 = vsub.f32 %v13872_v31, %v8439_v24  ;;  %13873 = vst [vmem:[#allocation280_spill] sm:$0xff] %v8463_v7  ;;  %v8467_v25 = vadd.f32 %v2302_v53, %v2301_v2  ;;  %v2430_v38 = vmul.f32 %v2174_v39, %v2174_v39  ;;  %v8475_v32 = vmul.f32 0.0051020407, %v1491_v45  ;;  %v8479_v21 = vpop.f32.mrb[117].mxu0  ;;  %v8481_v5 = vpop.f32.mrb[117].mxu1 }
 0x207   :  { %13874 = vst [vmem:[#allocation281_spill] sm:$0xff] %v8465_v58  ;;  %v8471_v23 = vadd.f32 %v8431_v55, %v8418_v28  ;;  %v8477_v31 = vmul.f32 0.0051020407, %v1302_v59  ;;  %v2303_v57 = vmul.f32 %v1786_v10, %v1786_v10  ;;  %v2304_v24 = vmul.f32 %v2048_v13, %v2048_v13  ;;  %13878 = vst [vmem:[#allocation285_spill] sm:$0xff] %v8479_v21  ;;  %v8492_v45 = vpop.f32.mrb[118].mxu0  ;;  %v8494_v10 = vpop.f32.mrb[118].mxu1 }
 0x208   :  { %13876 = vst [vmem:[#allocation283_spill] sm:$0xff] %v8475_v32  ;;  %13879 = vst [vmem:[#allocation286_spill] sm:$0xff] %v8481_v5  ;;  %1376 = vadd.xlane.f32.xlu1 %v8070_v50  ;;  %v8484_v2 = vadd.f32 %v2430_v38, %v2429_v62  ;;  %v2176_v53 = vsel %vm2006_vm0, %v1915_v20, 0.0  ;;  %v2431_v39 = vmul.f32 %v1914_v56, %v1914_v56  ;;  %v13883_v13 = vld [vmem:[#allocation87_spill] sm:$0xff]  ;;  %v13884_v55 = vld [vmem:[#allocation89_spill] sm:$0xff]  ;;  %2550 = vadd.xlane.f32.xlu0 %v8129_v12 }
 0x209   :  { %13875 = vst [vmem:[#allocation282_spill] sm:$0xff] %v8471_v23  ;;  %13877 = vst [vmem:[#allocation284_spill] sm:$0xff] %v8477_v31  ;;  %v8490_v19 = vadd.f32 %v8479_v21, %v8463_v7  ;;  %v1916_v59 = vsub.f32 %v13883_v13, %v8475_v32  ;;  %v1917_v50 = vsub.f32 %v13884_v55, %v8475_v32  ;;  %v13885_v62 = vld [vmem:[#allocation90_spill] sm:$0xff]  ;;  %v13886_v20 = vld [vmem:[#allocation92_spill] sm:$0xff]  ;;  %v8505_v21 = vpop.f32.mrb[119].mxu0  ;;  %v8507_v7 = vpop.f32.mrb[119].mxu1 }
 0x20a   :  { %13881 = vst [vmem:[#allocation288_spill] sm:$0xff] %v8492_v45  ;;  %13882 = vst [vmem:[#allocation289_spill] sm:$0xff] %v8494_v10  ;;  %v1790_v38 = vsub.f32 %v13885_v62, %v8477_v31  ;;  %v1791_v56 = vsub.f32 %v13886_v20, %v8477_v31  ;;  %v1494_v28 = vpop.xlane.xlu0 %1493  ;;  %v8509_v23 = vadd.f32 %v2304_v24, %v2303_v57  ;;  %v2050_v55 = vsel %vm2006_vm0, %v1789_v47, 0.0  ;;  %v13893_v47 = vld [vmem:[#allocation91_spill] sm:$0xff] }
 0x20b   :  { %13880 = vst [vmem:[#allocation287_spill] sm:$0xff] %v8490_v19  ;;  %13887 = vst [vmem:[#allocation290_spill] sm:$0xff] %v8505_v21  ;;  %v1305_v19 = vpop.xlane.xlu1 %1304  ;;  %v2432_v13 = vmul.f32 %v2176_v53, %v2176_v53  ;;  %v2305_v32 = vmul.f32 %v1788_v29, %v1788_v29  ;;  %v8513_v22 = vmul.f32 0.0051020407, %v1494_v28  ;;  %v2306_v20 = vmul.f32 %v2050_v55, %v2050_v55  ;;  %v13894_v55 = vld [vmem:[#allocation93_spill] sm:$0xff] }
 0x20c   :  { %13888 = vst [vmem:[#allocation291_spill] sm:$0xff] %v8507_v7  ;;  %v8515_v62 = vmul.f32 0.0051020407, %v1305_v19  ;;  %v8519_v12 = vadd.f32 %v8481_v5, %v8465_v58  ;;  %1568 = vadd.xlane.f32.xlu1 %v8091_v63  ;;  %v8526_v24 = vadd.f32 %v8505_v21, %v8492_v45  ;;  %v2178_v29 = vsel %vm2006_vm0, %v1917_v50, 0.0  ;;  %v13895_v19 = vld [vmem:[#allocation94_spill] sm:$0xff]  ;;  %v13896_v63 = vld [vmem:[#allocation96_spill] sm:$0xff]  ;;  %2742 = vadd.xlane.f32.xlu0 %v8142_v8 }
 0x20d   :  { %13889 = vst [vmem:[#allocation292_spill] sm:$0xff] %v8513_v22  ;;  %v8522_v31 = vadd.f32 %v2432_v13, %v2431_v39  ;;  %v2433_v28 = vmul.f32 %v1916_v59, %v1916_v59  ;;  %v1918_v57 = vsub.f32 %v13893_v47, %v8513_v22  ;;  %v1919_v53 = vsub.f32 %v13894_v55, %v8513_v22  ;;  %v8539_v13 = vpop.f32.mrb[120].mxu0  ;;  %v8541_v21 = vpop.f32.mrb[120].mxu1 }
 0x20e   :  { %13890 = vst [vmem:[#allocation293_spill] sm:$0xff] %v8515_v62  ;;  %13891 = vst [vmem:[#allocation294_spill] sm:$0xff] %v8519_v12  ;;  %v1792_v5 = vsub.f32 %v13895_v19, %v8515_v62  ;;  %v1793_v39 = vsub.f32 %v13896_v63, %v8515_v62  ;;  %v1308_v59 = vpop.xlane.xlu0 %1307  ;;  %v8543_v45 = vadd.f32 %v2306_v20, %v2305_v32  ;;  %v2052_v22 = vsel %vm2006_vm0, %v1791_v56, 0.0  ;;  %v8555_v58 = vpop.f32.mrb[121].mxu0 }
 0x20f   :  { %13892 = vst [vmem:[#allocation295_spill] sm:$0xff] %v8526_v24  ;;  %13897 = vst [vmem:[#allocation296_spill] sm:$0xff] %v8539_v13  ;;  %v1497_v50 = vpop.xlane.xlu1 %1496  ;;  %v2434_v47 = vmul.f32 %v2178_v29, %v2178_v29  ;;  %v8547_v55 = vadd.f32 %v8507_v7, %v8494_v10  ;;  %v8553_v63 = vmul.f32 0.0051020407, %v1308_v59  ;;  %v2307_v8 = vmul.f32 %v1790_v38, %v1790_v38  ;;  %v8557_v24 = vpop.f32.mrb[121].mxu1  ;;  %v13908_v7 = vld [vmem:[#allocation97_spill] sm:$0xff] }
 0x210   :  { %13898 = vst [vmem:[#allocation297_spill] sm:$0xff] %v8541_v21  ;;  %v8551_v19 = vmul.f32 0.0051020407, %v1497_v50  ;;  %v2308_v62 = vmul.f32 %v2052_v22, %v2052_v22  ;;  %13902 = vst [vmem:[#allocation301_spill] sm:$0xff] %v8555_v58  ;;  %2553 = vadd.xlane.f32.xlu1 %v8163_v9  ;;  %v2180_v20 = vsel %vm2006_vm0, %v1919_v53, 0.0  ;;  %v2435_v29 = vmul.f32 %v1918_v57, %v1918_v57  ;;  %v8568_v50 = vpop.f32.mrb[122].mxu0 }
 0x211   :  { %13899 = vst [vmem:[#allocation298_spill] sm:$0xff] %v8547_v55  ;;  %13901 = vst [vmem:[#allocation300_spill] sm:$0xff] %v8553_v63  ;;  %v8560_v32 = vadd.f32 %v2434_v47, %v2433_v28  ;;  %v8566_v56 = vadd.f32 %v8555_v58, %v8539_v13  ;;  %v8570_v38 = vpop.f32.mrb[122].mxu1  ;;  %v13907_v22 = vld [vmem:[#allocation95_spill] sm:$0xff]  ;;  %v13909_v28 = vld [vmem:[#allocation98_spill] sm:$0xff]  ;;  %1379 = vadd.xlane.f32.xlu0 %v8110_v34  ;;  %v8581_v58 = vpop.f32.mrb[123].mxu0  ;;  %v8595_v34 = vadd.f32 %v8557_v24, %v8541_v21 }
 0x212   :  { %13900 = vst [vmem:[#allocation299_spill] sm:$0xff] %v8551_v19  ;;  %13903 = vst [vmem:[#allocation302_spill] sm:$0xff] %v8557_v24  ;;  %v1920_v59 = vsub.f32 %v13907_v22, %v8551_v19  ;;  %v1921_v9 = vsub.f32 %v13908_v7, %v8551_v19  ;;  %v1794_v47 = vsub.f32 %v13909_v28, %v8553_v63  ;;  %v13910_v53 = vld [vmem:[#allocation100_spill] sm:$0xff]  ;;  %v8583_v13 = vpop.f32.mrb[123].mxu1  ;;  %v1500_v10 = vpop.xlane.xlu0 %1499  ;;  %v2054_v7 = vsel %vm2006_vm0, %v1793_v39, 0.0  ;;  %v13917_v39 = vld [vmem:[#allocation99_spill] sm:$0xff] }
 0x213   :  { %13904 = vst [vmem:[#allocation303_spill] sm:$0xff] %v8566_v56  ;;  %13905 = vst [vmem:[#allocation304_spill] sm:$0xff] %v8568_v50  ;;  %v1795_v57 = vsub.f32 %v13910_v53, %v8553_v63  ;;  %v1311_v56 = vpop.xlane.xlu1 %1310  ;;  %v8585_v55 = vadd.f32 %v2308_v62, %v2307_v8  ;;  %v2436_v22 = vmul.f32 %v2180_v20, %v2180_v20  ;;  %v8589_v12 = vmul.f32 0.0051020407, %v1500_v10 }
 0x214   :  { %13906 = vst [vmem:[#allocation305_spill] sm:$0xff] %v8570_v38  ;;  %13911 = vst [vmem:[#allocation306_spill] sm:$0xff] %v8581_v58  ;;  %v2309_v19 = vmul.f32 %v1792_v5, %v1792_v5  ;;  %v8591_v28 = vmul.f32 0.0051020407, %v1311_v56  ;;  %v2310_v53 = vmul.f32 %v2054_v7, %v2054_v7  ;;  %2745 = vadd.xlane.f32.xlu1 %v8180_v37  ;;  %v2182_v5 = vsel %vm2006_vm0, %v1921_v9, 0.0  ;;  %v13918_v7 = vld [vmem:[#allocation101_spill] sm:$0xff] }
 0x215   :  { %13912 = vst [vmem:[#allocation307_spill] sm:$0xff] %v8583_v13  ;;  %13913 = vst [vmem:[#allocation308_spill] sm:$0xff] %v8589_v12  ;;  %v8598_v63 = vadd.f32 %v2436_v22, %v2435_v29  ;;  %v8602_v62 = vadd.f32 %v8581_v58, %v8568_v50  ;;  %v2437_v10 = vmul.f32 %v1920_v59, %v1920_v59  ;;  %v13919_v56 = vld [vmem:[#allocation102_spill] sm:$0xff]  ;;  %v13920_v37 = vld [vmem:[#allocation104_spill] sm:$0xff]  ;;  %1571 = vadd.xlane.f32.xlu0 %v8139_v26  ;;  %v8615_v22 = vpop.f32.mrb[124].mxu0  ;;  %v8617_v58 = vpop.f32.mrb[124].mxu1 }
 0x216   :  { %13914 = vst [vmem:[#allocation309_spill] sm:$0xff] %v8591_v28  ;;  %13915 = vst [vmem:[#allocation310_spill] sm:$0xff] %v8595_v34  ;;  %v1922_v8 = vsub.f32 %v13917_v39, %v8589_v12  ;;  %v1923_v20 = vsub.f32 %v13918_v7, %v8589_v12  ;;  %v1796_v24 = vsub.f32 %v13919_v56, %v8591_v28  ;;  %v1314_v59 = vpop.xlane.xlu0 %1313  ;;  %v2056_v12 = vsel %vm2006_vm0, %v1795_v57, 0.0  ;;  %v8631_v21 = vpop.f32.mrb[125].mxu0 }
 0x217   :  { %13916 = vst [vmem:[#allocation311_spill] sm:$0xff] %v8602_v62  ;;  %v1797_v29 = vsub.f32 %v13920_v37, %v8591_v28  ;;  %13921 = vst [vmem:[#allocation312_spill] sm:$0xff] %v8615_v22  ;;  %v1503_v9 = vpop.xlane.xlu1 %1502  ;;  %v8619_v50 = vadd.f32 %v2310_v53, %v2309_v19  ;;  %v2438_v39 = vmul.f32 %v2182_v5, %v2182_v5  ;;  %v8629_v37 = vmul.f32 0.0051020407, %v1314_v59  ;;  %v8633_v62 = vpop.f32.mrb[125].mxu1 }
 0x218   :  { %13922 = vst [vmem:[#allocation313_spill] sm:$0xff] %v8617_v58  ;;  %v8623_v7 = vadd.f32 %v8583_v13, %v8570_v38  ;;  %v8627_v56 = vmul.f32 0.0051020407, %v1503_v9  ;;  %v2311_v26 = vmul.f32 %v1794_v47, %v1794_v47  ;;  %v2312_v28 = vmul.f32 %v2056_v12, %v2056_v12  ;;  %13926 = vst [vmem:[#allocation317_spill] sm:$0xff] %v8631_v21  ;;  %v8644_v9 = vpop.f32.mrb[126].mxu0  ;;  %v8646_v47 = vpop.f32.mrb[126].mxu1 }
 0x219   :  { %13925 = vst [vmem:[#allocation316_spill] sm:$0xff] %v8629_v37  ;;  %13927 = vst [vmem:[#allocation318_spill] sm:$0xff] %v8633_v62  ;;  %1382 = vadd.xlane.f32.xlu1 %v8146_v1  ;;  %v8636_v19 = vadd.f32 %v2438_v39, %v2437_v10  ;;  %v2184_v53 = vsel %vm2006_vm0, %v1923_v20, 0.0  ;;  %v2439_v5 = vmul.f32 %v1922_v8, %v1922_v8  ;;  %v13931_v12 = vld [vmem:[#allocation103_spill] sm:$0xff]  ;;  %v13932_v13 = vld [vmem:[#allocation105_spill] sm:$0xff]  ;;  %2556 = vadd.xlane.f32.xlu0 %v8205_v3 }
 0x21a   :  { %13923 = vst [vmem:[#allocation314_spill] sm:$0xff] %v8623_v7  ;;  %13924 = vst [vmem:[#allocation315_spill] sm:$0xff] %v8627_v56  ;;  %v8642_v57 = vadd.f32 %v8631_v21, %v8615_v22  ;;  %v1924_v59 = vsub.f32 %v13931_v12, %v8627_v56  ;;  %v1925_v1 = vsub.f32 %v13932_v13, %v8627_v56  ;;  %v13933_v10 = vld [vmem:[#allocation106_spill] sm:$0xff]  ;;  %v13934_v20 = vld [vmem:[#allocation108_spill] sm:$0xff]  ;;  %v8657_v21 = vpop.f32.mrb[127].mxu0  ;;  %v8659_v22 = vpop.f32.mrb[127].mxu1 }
 0x21b   :  { %13929 = vst [vmem:[#allocation320_spill] sm:$0xff] %v8644_v9  ;;  %13930 = vst [vmem:[#allocation321_spill] sm:$0xff] %v8646_v47  ;;  %v1798_v39 = vsub.f32 %v13933_v10, %v8629_v37  ;;  %v1799_v8 = vsub.f32 %v13934_v20, %v8629_v37  ;;  %v1506_v38 = vpop.xlane.xlu0 %1505  ;;  %v8661_v7 = vadd.f32 %v2312_v28, %v2311_v26  ;;  %v2058_v13 = vsel %vm2006_vm0, %v1797_v29, 0.0  ;;  %v13939_v29 = vld [vmem:[#allocation107_spill] sm:$0xff] }
 0x21c   :  { %13928 = vst [vmem:[#allocation319_spill] sm:$0xff] %v8642_v57  ;;  %13935 = vst [vmem:[#allocation322_spill] sm:$0xff] %v8657_v21  ;;  %v1317_v57 = vpop.xlane.xlu1 %1316  ;;  %v2440_v12 = vmul.f32 %v2184_v53, %v2184_v53  ;;  %v2313_v56 = vmul.f32 %v1796_v24, %v1796_v24  ;;  %v8665_v34 = vmul.f32 0.0051020407, %v1506_v38  ;;  %v2314_v20 = vmul.f32 %v2058_v13, %v2058_v13  ;;  %v13940_v13 = vld [vmem:[#allocation109_spill] sm:$0xff] }
 0x21d   :  { %13936 = vst [vmem:[#allocation323_spill] sm:$0xff] %v8659_v22  ;;  %v8667_v10 = vmul.f32 0.0051020407, %v1317_v57  ;;  %v8671_v3 = vadd.f32 %v8633_v62, %v8617_v58  ;;  %1574 = vadd.xlane.f32.xlu1 %v8167_v11  ;;  %v8678_v28 = vadd.f32 %v8657_v21, %v8644_v9  ;;  %v2186_v24 = vsel %vm2006_vm0, %v1925_v1, 0.0  ;;  %v13941_v57 = vld [vmem:[#allocation110_spill] sm:$0xff]  ;;  %v13942_v11 = vld [vmem:[#allocation112_spill] sm:$0xff]  ;;  %2748 = vadd.xlane.f32.xlu0 %v8218_v6 }
 0x21e   :  { %13937 = vst [vmem:[#allocation324_spill] sm:$0xff] %v8665_v34  ;;  %v8674_v37 = vadd.f32 %v2440_v12, %v2439_v5  ;;  %v2441_v38 = vmul.f32 %v1924_v59, %v1924_v59  ;;  %v1926_v26 = vsub.f32 %v13939_v29, %v8665_v34  ;;  %v1927_v53 = vsub.f32 %v13940_v13, %v8665_v34 }
 0x21f   :  { %13938 = vst [vmem:[#allocation325_spill] sm:$0xff] %v8667_v10  ;;  %v1800_v62 = vsub.f32 %v13941_v57, %v8667_v10  ;;  %v1801_v5 = vsub.f32 %v13942_v11, %v8667_v10  ;;  %v1320_v21 = vpop.xlane.xlu0 %1319  ;;  %v8691_v9 = vadd.f32 %v2314_v20, %v2313_v56  ;;  %v2442_v1 = vmul.f32 %v2186_v24, %v2186_v24  ;;  %v13945_v10 = vld [vmem:[#allocation111_spill] sm:$0xff] }
 0x220   :  { %v1509_v12 = vpop.xlane.xlu1 %1508  ;;  %v8695_v59 = vadd.f32 %v8659_v22, %v8646_v47  ;;  %v2060_v13 = vsel %vm2006_vm0, %v1799_v8, 0.0  ;;  %v8701_v34 = vmul.f32 0.0051020407, %v1320_v21  ;;  %v2315_v57 = vmul.f32 %v1798_v39, %v1798_v39  ;;  %v13947_v39 = vld [vmem:[#allocation114_spill] sm:$0xff] }
 0x221   :  { %v8699_v29 = vmul.f32 0.0051020407, %v1509_v12  ;;  %v2316_v11 = vmul.f32 %v2060_v13, %v2060_v13  ;;  %2559 = vadd.xlane.f32.xlu1 %v8239_v4  ;;  %v8704_v6 = vadd.f32 %v2442_v1, %v2441_v38  ;;  %v2188_v56 = vsel %vm2006_vm0, %v1927_v53, 0.0  ;;  %v13946_v12 = vld [vmem:[#allocation113_spill] sm:$0xff]  ;;  %v13948_v4 = vld [vmem:[#allocation116_spill] sm:$0xff]  ;;  %1385 = vadd.xlane.f32.xlu0 %v8186_v30 }
 0x222   :  { %13944 = vst [vmem:[#allocation327_spill] sm:$0xff] %v8701_v34  ;;  %v2443_v20 = vmul.f32 %v1926_v26, %v1926_v26  ;;  %v2062_v24 = vsel %vm2006_vm0, %v1801_v5, 0.0  ;;  %v1802_v13 = vsub.f32 %v13947_v39, %v8701_v34  ;;  %v1803_v38 = vsub.f32 %v13948_v4, %v8701_v34 }
 0x223   :  { %13943 = vst [vmem:[#allocation326_spill] sm:$0xff] %v8699_v29  ;;  %v1928_v8 = vsub.f32 %v13945_v10, %v8699_v29  ;;  %v1929_v21 = vsub.f32 %v13946_v12, %v8699_v29  ;;  %v1512_v1 = vpop.xlane.xlu0 %1511  ;;  %v8719_v26 = vadd.f32 %v2316_v11, %v2315_v57  ;;  %v2444_v22 = vmul.f32 %v2188_v56, %v2188_v56  ;;  %v13952_v56 = vld [vmem:[#allocation117_spill] sm:$0xff] }
 0x224   :  { %v1323_v53 = vpop.xlane.xlu1 %1322  ;;  %v2317_v5 = vmul.f32 %v1800_v62, %v1800_v62  ;;  %v2318_v47 = vmul.f32 %v2062_v24, %v2062_v24  ;;  %v8721_v58 = vmul.f32 0.0051020407, %v1512_v1  ;;  %v2064_v12 = vsel %vm2006_vm0, %v1803_v38, 0.0  ;;  %v13951_v62 = vld [vmem:[#allocation115_spill] sm:$0xff]  ;;  %v13953_v1 = vld [vmem:[#allocation118_spill] sm:$0xff] }
 0x225   :  { %v8723_v10 = vmul.f32 0.0051020407, %v1323_v53  ;;  %v2319_v39 = vmul.f32 %v1802_v13, %v1802_v13  ;;  %2751 = vadd.xlane.f32.xlu1 %v8256_v33  ;;  %v8728_v4 = vadd.f32 %v2444_v22, %v2443_v20  ;;  %v2320_v29 = vmul.f32 %v2064_v12, %v2064_v12  ;;  %v13954_v13 = vld [vmem:[#allocation120_spill] sm:$0xff]  ;;  %1577 = vadd.xlane.f32.xlu0 %v8215_v14 }
 0x226   :  { %13949 = vst [vmem:[#allocation328_spill] sm:$0xff] %v8721_v58  ;;  %v8730_v30 = vadd.f32 %v2318_v47, %v2317_v5  ;;  %v2190_v57 = vsel %vm2006_vm0, %v1929_v21, 0.0  ;;  %v1930_v11 = vsub.f32 %v13951_v62, %v8721_v58  ;;  %v1931_v24 = vsub.f32 %v13952_v56, %v8721_v58 }
 0x227   :  { %13950 = vst [vmem:[#allocation329_spill] sm:$0xff] %v8723_v10  ;;  %v1804_v38 = vsub.f32 %v13953_v1, %v8723_v10  ;;  %v1805_v33 = vsub.f32 %v13954_v13, %v8723_v10  ;;  %v1326_v47 = vpop.xlane.xlu0 %1325  ;;  %v8743_v20 = vadd.f32 %v2320_v29, %v2319_v39  ;;  %v2445_v12 = vmul.f32 %v1928_v8, %v1928_v8  ;;  %v13957_v8 = vld [vmem:[#allocation119_spill] sm:$0xff] }
 0x228   :  { %v1515_v22 = vpop.xlane.xlu1 %1514  ;;  %v2446_v21 = vmul.f32 %v2190_v57, %v2190_v57  ;;  %v8747_v5 = vmul.f32 0.0051020407, %v1326_v47  ;;  %v2192_v56 = vsel %vm2006_vm0, %v1931_v24, 0.0  ;;  %v2447_v62 = vmul.f32 %v1930_v11, %v1930_v11  ;;  %v13958_v57 = vld [vmem:[#allocation121_spill] sm:$0xff]  ;;  %v13959_v47 = vld [vmem:[#allocation122_spill] sm:$0xff]  ;;  %v13960_v11 = vld [vmem:[#allocation124_spill] sm:$0xff] }
 0x229   :  { %v8745_v53 = vmul.f32 0.0051020407, %v1515_v22  ;;  %1388 = vadd.xlane.f32.xlu1 %v8222_v18  ;;  %v2448_v13 = vmul.f32 %v2192_v56, %v2192_v56  ;;  %v2066_v14 = vsel %vm2006_vm0, %v1805_v33, 0.0  ;;  %v2321_v29 = vmul.f32 %v1804_v38, %v1804_v38  ;;  %2562 = vadd.xlane.f32.xlu0 %v8281_v36 }
 0x22a   :  { %13956 = vst [vmem:[#allocation331_spill] sm:$0xff] %v8747_v5  ;;  %v8752_v58 = vadd.f32 %v2446_v21, %v2445_v12  ;;  %v1806_v1 = vsub.f32 %v13959_v47, %v8747_v5  ;;  %v1807_v24 = vsub.f32 %v13960_v11, %v8747_v5  ;;  %v2322_v33 = vmul.f32 %v2066_v14, %v2066_v14  ;;  %v13964_v14 = vld [vmem:[#allocation125_spill] sm:$0xff] }
 0x22b   :  { %13955 = vst [vmem:[#allocation330_spill] sm:$0xff] %v8745_v53  ;;  %v1932_v39 = vsub.f32 %v13957_v8, %v8745_v53  ;;  %v1933_v22 = vsub.f32 %v13958_v57, %v8745_v53  ;;  %v1518_v18 = vpop.xlane.xlu0 %1517  ;;  %v8765_v12 = vadd.f32 %v2448_v13, %v2447_v62  ;;  %v13963_v62 = vld [vmem:[#allocation123_spill] sm:$0xff] }
 0x22c   :  { %v1329_v56 = vpop.xlane.xlu1 %1328  ;;  %v8767_v38 = vmul.f32 0.0051020407, %v1518_v18  ;;  %v2068_v57 = vsel %vm2006_vm0, %v1807_v24, 0.0  ;;  %v2323_v8 = vmul.f32 %v1806_v1, %v1806_v1  ;;  %v8774_v47 = vadd.f32 %v2322_v33, %v2321_v29  ;;  %v13966_v1 = vld [vmem:[#allocation128_spill] sm:$0xff] }
 0x22d   :  { %v8769_v21 = vmul.f32 0.0051020407, %v1329_v56  ;;  %1580 = vadd.xlane.f32.xlu1 %v8243_v48  ;;  %v2324_v11 = vmul.f32 %v2068_v57, %v2068_v57  ;;  %v2194_v36 = vsel %vm2006_vm0, %v1933_v22, 0.0  ;;  %v2449_v53 = vmul.f32 %v1932_v39, %v1932_v39  ;;  %v13965_v56 = vld [vmem:[#allocation126_spill] sm:$0xff]  ;;  %2754 = vadd.xlane.f32.xlu0 %v8294_v61 }
 0x22e   :  { %13961 = vst [vmem:[#allocation332_spill] sm:$0xff] %v8767_v38  ;;  %v1934_v13 = vsub.f32 %v13963_v62, %v8767_v38  ;;  %v1935_v18 = vsub.f32 %v13964_v14, %v8767_v38  ;;  %v2450_v22 = vmul.f32 %v2194_v36, %v2194_v36  ;;  %v13970_v36 = vld [vmem:[#allocation129_spill] sm:$0xff] }
 0x22f   :  { %13962 = vst [vmem:[#allocation333_spill] sm:$0xff] %v8769_v21  ;;  %v1808_v5 = vsub.f32 %v13965_v56, %v8769_v21  ;;  %v1809_v24 = vsub.f32 %v13966_v1, %v8769_v21  ;;  %v1332_v29 = vpop.xlane.xlu0 %1331  ;;  %v8787_v57 = vadd.f32 %v2324_v11, %v2323_v8  ;;  %v13969_v8 = vld [vmem:[#allocation127_spill] sm:$0xff] }
 0x230   :  { %v1521_v48 = vpop.xlane.xlu1 %1520  ;;  %v8791_v33 = vmul.f32 0.0051020407, %v1332_v29  ;;  %v2196_v14 = vsel %vm2006_vm0, %v1935_v18, 0.0  ;;  %v2451_v62 = vmul.f32 %v1934_v13, %v1934_v13  ;;  %v8796_v38 = vadd.f32 %v2450_v22, %v2449_v53  ;;  %v13971_v29 = vld [vmem:[#allocation130_spill] sm:$0xff]  ;;  %v13972_v13 = vld [vmem:[#allocation132_spill] sm:$0xff] }
 0x231   :  { %v8789_v39 = vmul.f32 0.0051020407, %v1521_v48  ;;  %2565 = vadd.xlane.f32.xlu1 %v8315_v42  ;;  %v2452_v1 = vmul.f32 %v2196_v14, %v2196_v14  ;;  %v2070_v61 = vsel %vm2006_vm0, %v1809_v24, 0.0  ;;  %v2325_v56 = vmul.f32 %v1808_v5, %v1808_v5  ;;  %1391 = vadd.xlane.f32.xlu0 %v8262_v44 }
 0x232   :  { %13968 = vst [vmem:[#allocation335_spill] sm:$0xff] %v8791_v33  ;;  %v1810_v34 = vsub.f32 %v13971_v29, %v8791_v33  ;;  %v1811_v18 = vsub.f32 %v13972_v13, %v8791_v33  ;;  %v2326_v24 = vmul.f32 %v2070_v61, %v2070_v61  ;;  %v13976_v61 = vld [vmem:[#allocation133_spill] sm:$0xff] }
 0x233   :  { %13967 = vst [vmem:[#allocation334_spill] sm:$0xff] %v8789_v39  ;;  %v1936_v11 = vsub.f32 %v13969_v8, %v8789_v39  ;;  %v1937_v48 = vsub.f32 %v13970_v36, %v8789_v39  ;;  %v1524_v42 = vpop.xlane.xlu0 %1523  ;;  %v8809_v14 = vadd.f32 %v2452_v1, %v2451_v62  ;;  %v13975_v62 = vld [vmem:[#allocation131_spill] sm:$0xff] }
 0x234   :  { %v1335_v53 = vpop.xlane.xlu1 %1334  ;;  %v8811_v5 = vmul.f32 0.0051020407, %v1524_v42  ;;  %v2072_v36 = vsel %vm2006_vm0, %v1811_v18, 0.0  ;;  %v2327_v8 = vmul.f32 %v1810_v34, %v1810_v34  ;;  %v8818_v29 = vadd.f32 %v2326_v24, %v2325_v56  ;;  %v13978_v34 = vld [vmem:[#allocation136_spill] sm:$0xff] }
 0x235   :  { %v8813_v22 = vmul.f32 0.0051020407, %v1335_v53  ;;  %2757 = vadd.xlane.f32.xlu1 %v8332_v51  ;;  %v2328_v13 = vmul.f32 %v2072_v36, %v2072_v36  ;;  %v2198_v44 = vsel %vm2006_vm0, %v1937_v48, 0.0  ;;  %v2453_v39 = vmul.f32 %v1936_v11, %v1936_v11  ;;  %v13977_v53 = vld [vmem:[#allocation134_spill] sm:$0xff]  ;;  %1583 = vadd.xlane.f32.xlu0 %v8291_v52 }
 0x236   :  { %13973 = vst [vmem:[#allocation336_spill] sm:$0xff] %v8811_v5  ;;  %v1938_v1 = vsub.f32 %v13975_v62, %v8811_v5  ;;  %v1939_v42 = vsub.f32 %v13976_v61, %v8811_v5  ;;  %v2454_v48 = vmul.f32 %v2198_v44, %v2198_v44  ;;  %v13982_v44 = vld [vmem:[#allocation137_spill] sm:$0xff] }
 0x237   :  { %13974 = vst [vmem:[#allocation337_spill] sm:$0xff] %v8813_v22  ;;  %v1812_v33 = vsub.f32 %v13977_v53, %v8813_v22  ;;  %v1813_v18 = vsub.f32 %v13978_v34, %v8813_v22  ;;  %v1338_v56 = vpop.xlane.xlu0 %1337  ;;  %v8831_v36 = vadd.f32 %v2328_v13, %v2327_v8  ;;  %v13981_v8 = vld [vmem:[#allocation135_spill] sm:$0xff] }
 0x238   :  { %v1527_v51 = vpop.xlane.xlu1 %1526  ;;  %v8835_v24 = vmul.f32 0.0051020407, %v1338_v56  ;;  %v2200_v61 = vsel %vm2006_vm0, %v1939_v42, 0.0  ;;  %v2455_v62 = vmul.f32 %v1938_v1, %v1938_v1  ;;  %v8840_v5 = vadd.f32 %v2454_v48, %v2453_v39  ;;  %v13983_v56 = vld [vmem:[#allocation138_spill] sm:$0xff]  ;;  %v13984_v1 = vld [vmem:[#allocation140_spill] sm:$0xff] }
 0x239   :  { %v8833_v11 = vmul.f32 0.0051020407, %v1527_v51  ;;  %1394 = vadd.xlane.f32.xlu1 %v8298_v46  ;;  %v2456_v34 = vmul.f32 %v2200_v61, %v2200_v61  ;;  %v2074_v52 = vsel %vm2006_vm0, %v1813_v18, 0.0  ;;  %v2329_v53 = vmul.f32 %v1812_v33, %v1812_v33  ;;  %2568 = vadd.xlane.f32.xlu0 %v8357_v49 }
 0x23a   :  { %13980 = vst [vmem:[#allocation339_spill] sm:$0xff] %v8835_v24  ;;  %v1814_v22 = vsub.f32 %v13983_v56, %v8835_v24  ;;  %v1815_v42 = vsub.f32 %v13984_v1, %v8835_v24  ;;  %v2330_v18 = vmul.f32 %v2074_v52, %v2074_v52  ;;  %v13988_v52 = vld [vmem:[#allocation141_spill] sm:$0xff] }
 0x23b   :  { %13979 = vst [vmem:[#allocation338_spill] sm:$0xff] %v8833_v11  ;;  %v1940_v13 = vsub.f32 %v13981_v8, %v8833_v11  ;;  %v1941_v51 = vsub.f32 %v13982_v44, %v8833_v11  ;;  %v1530_v46 = vpop.xlane.xlu0 %1529  ;;  %v8853_v61 = vadd.f32 %v2456_v34, %v2455_v62  ;;  %v13987_v62 = vld [vmem:[#allocation139_spill] sm:$0xff] }
 0x23c   :  { %v1341_v39 = vpop.xlane.xlu1 %1340  ;;  %v8855_v33 = vmul.f32 0.0051020407, %v1530_v46  ;;  %v2076_v44 = vsel %vm2006_vm0, %v1815_v42, 0.0  ;;  %v2331_v8 = vmul.f32 %v1814_v22, %v1814_v22  ;;  %v8862_v56 = vadd.f32 %v2330_v18, %v2329_v53  ;;  %v13990_v22 = vld [vmem:[#allocation144_spill] sm:$0xff] }
 0x23d   :  { %v8857_v48 = vmul.f32 0.0051020407, %v1341_v39  ;;  %1586 = vadd.xlane.f32.xlu1 %v8319_v0  ;;  %v2332_v1 = vmul.f32 %v2076_v44, %v2076_v44  ;;  %v2202_v49 = vsel %vm2006_vm0, %v1941_v51, 0.0  ;;  %v2457_v11 = vmul.f32 %v1940_v13, %v1940_v13  ;;  %v13989_v39 = vld [vmem:[#allocation142_spill] sm:$0xff]  ;;  %2760 = vadd.xlane.f32.xlu0 %v8370_v41 }
 0x23e   :  { %13985 = vst [vmem:[#allocation340_spill] sm:$0xff] %v8855_v33  ;;  %v1942_v34 = vsub.f32 %v13987_v62, %v8855_v33  ;;  %v1943_v46 = vsub.f32 %v13988_v52, %v8855_v33  ;;  %v2458_v51 = vmul.f32 %v2202_v49, %v2202_v49  ;;  %v13994_v49 = vld [vmem:[#allocation145_spill] sm:$0xff] }
 0x23f   :  { %13986 = vst [vmem:[#allocation341_spill] sm:$0xff] %v8857_v48  ;;  %v1816_v24 = vsub.f32 %v13989_v39, %v8857_v48  ;;  %v1817_v42 = vsub.f32 %v13990_v22, %v8857_v48  ;;  %v1344_v53 = vpop.xlane.xlu0 %1343  ;;  %v8875_v44 = vadd.f32 %v2332_v1, %v2331_v8  ;;  %v13993_v8 = vld [vmem:[#allocation143_spill] sm:$0xff] }
 0x240   :  { %v1533_v0 = vpop.xlane.xlu1 %1532  ;;  %v8879_v18 = vmul.f32 0.0051020407, %v1344_v53  ;;  %v2204_v52 = vsel %vm2006_vm0, %v1943_v46, 0.0  ;;  %v2459_v62 = vmul.f32 %v1942_v34, %v1942_v34  ;;  %v8884_v33 = vadd.f32 %v2458_v51, %v2457_v11  ;;  %v13995_v53 = vld [vmem:[#allocation146_spill] sm:$0xff]  ;;  %v13996_v34 = vld [vmem:[#allocation148_spill] sm:$0xff] }
 0x241   :  { %v8877_v13 = vmul.f32 0.0051020407, %v1533_v0  ;;  %2571 = vadd.xlane.f32.xlu1 %v8391_v35  ;;  %v2460_v22 = vmul.f32 %v2204_v52, %v2204_v52  ;;  %v2078_v41 = vsel %vm2006_vm0, %v1817_v42, 0.0  ;;  %v2333_v39 = vmul.f32 %v1816_v24, %v1816_v24  ;;  %1397 = vadd.xlane.f32.xlu0 %v8338_v27 }
 0x242   :  { %13992 = vst [vmem:[#allocation343_spill] sm:$0xff] %v8879_v18  ;;  %v1818_v48 = vsub.f32 %v13995_v53, %v8879_v18  ;;  %v1819_v46 = vsub.f32 %v13996_v34, %v8879_v18  ;;  %v2334_v42 = vmul.f32 %v2078_v41, %v2078_v41  ;;  %v14000_v41 = vld [vmem:[#allocation151_spill] sm:$0xff] }
 0x243   :  { %13991 = vst [vmem:[#allocation342_spill] sm:$0xff] %v8877_v13  ;;  %v1944_v1 = vsub.f32 %v13993_v8, %v8877_v13  ;;  %v1945_v0 = vsub.f32 %v13994_v49, %v8877_v13  ;;  %v1536_v35 = vpop.xlane.xlu0 %1535  ;;  %v8897_v52 = vadd.f32 %v2460_v22, %v2459_v62  ;;  %v13999_v62 = vld [vmem:[#allocation147_spill] sm:$0xff] }
 0x244   :  { %v1347_v11 = vpop.xlane.xlu1 %1346  ;;  %v8899_v24 = vmul.f32 0.0051020407, %v1536_v35  ;;  %v2080_v49 = vsel %vm2006_vm0, %v1819_v46, 0.0  ;;  %v2335_v8 = vmul.f32 %v1818_v48, %v1818_v48  ;;  %v8906_v53 = vadd.f32 %v2334_v42, %v2333_v39  ;;  %v14002_v48 = vld [vmem:[#allocation152_spill] sm:$0xff] }
 0x245   :  { %v8901_v51 = vmul.f32 0.0051020407, %v1347_v11  ;;  %2763 = vadd.xlane.f32.xlu1 %v8408_v60  ;;  %v2336_v34 = vmul.f32 %v2080_v49, %v2080_v49  ;;  %v2206_v27 = vsel %vm2006_vm0, %v1945_v0, 0.0  ;;  %v2461_v13 = vmul.f32 %v1944_v1, %v1944_v1  ;;  %v14001_v11 = vld [vmem:[#allocation150_spill] sm:$0xff]  ;;  %1589 = vadd.xlane.f32.xlu0 %v8367_v43 }
 0x246   :  { %13997 = vst [vmem:[#allocation344_spill] sm:$0xff] %v8899_v24  ;;  %v1946_v22 = vsub.f32 %v13999_v62, %v8899_v24  ;;  %v1947_v35 = vsub.f32 %v14000_v41, %v8899_v24  ;;  %v2462_v1 = vmul.f32 %v2206_v27, %v2206_v27 }
 0x247   :  { %13998 = vst [vmem:[#allocation345_spill] sm:$0xff] %v8901_v51  ;;  %v1820_v18 = vsub.f32 %v14001_v11, %v8901_v51  ;;  %v1821_v46 = vsub.f32 %v14002_v48, %v8901_v51  ;;  %v8919_v60 = vpop.xlane.xlu0 %2520  ;;  %v8921_v49 = vadd.f32 %v2336_v34, %v2335_v8  ;;  %v14004_v11 = vld [vmem:[#allocation154_spill] sm:$0xff]  ;;  %v14005_v34 = vld [vmem:[#allocation155_spill] sm:$0xff]  ;;  %v14019_v51 = vld [vmem:[#allocation165_spill] sm:$0xff] }
 0x248   :  { %v1539_v39 = vpop.xlane.xlu1 %1538  ;;  %v2208_v42 = vsel %vm2006_vm0, %v1947_v35, 0.0  ;;  %v2463_v41 = vmul.f32 %v1946_v22, %v1946_v22  ;;  %v8928_v62 = vadd.f32 %v2462_v1, %v2461_v13 }
 0x249   :  { %v8923_v0 = vmul.f32 0.0051020407, %v1539_v39  ;;  %1400 = vadd.xlane.f32.xlu1 %v8374_v15  ;;  %v2464_v24 = vmul.f32 %v2208_v42, %v2208_v42  ;;  %v2082_v43 = vsel %vm2006_vm0, %v1821_v46, 0.0  ;;  %v2337_v48 = vmul.f32 %v1820_v18, %v1820_v18  ;;  %2574 = vadd.xlane.f32.xlu0 %v8433_v17 }
 0x24a   :  { %v2338_v39 = vmul.f32 %v2082_v43, %v2082_v43 }
 0x24b   :  { %14003 = vst [vmem:[#allocation346_spill] sm:$0xff] %v8923_v0  ;;  %v1948_v8 = vsub.f32 %v14004_v11, %v8923_v0  ;;  %v1949_v27 = vsub.f32 %v14005_v34, %v8923_v0  ;;  %v8937_v35 = vpop.xlane.xlu0 %2712  ;;  %v8939_v22 = vadd.f32 %v2464_v24, %v2463_v41  ;;  %v14007_v24 = vld [vmem:[#allocation157_spill] sm:$0xff]  ;;  %v14012_v34 = vld [vmem:[#allocation163_spill] sm:$0xff] }
 0x24c   :  { %v8941_v15 = vadd.f32 %v2338_v39, %v2337_v48  ;;  %v8946_v1 = vpop.xlane.xlu1 %2523  ;;  %v14008_v48 = vld [vmem:[#allocation161_spill] sm:$0xff] }
 0x24d   :  { %v2210_v13 = vsel %vm2006_vm0, %v1949_v27, 0.0  ;;  %1592 = vadd.xlane.f32.xlu1 %v8395_v40  ;;  %v2465_v18 = vmul.f32 %v1948_v8, %v1948_v8  ;;  %2766 = vadd.xlane.f32.xlu0 %v8446_v16  ;;  %v14009_v8 = vld [vmem:[#allocation271_spill] sm:$0xff] }
 0x24e   :  { %v2466_v46 = vmul.f32 %v2210_v13, %v2210_v13 }
 0x24f   :  { %v1350_v42 = vpop.xlane.xlu0 %1349 }
 0x250   :  { %v8949_v17 = vadd.f32 %v2466_v46, %v2465_v18  ;;  %v8951_v43 = vmul.f32 0.0051020407, %v1350_v42  ;;  %v8958_v40 = vpop.xlane.xlu1 %2715  ;;  %v14011_v46 = vld [vmem:[#allocation158_spill] sm:$0xff] }
 0x251   :  { %2577 = vadd.xlane.f32.xlu1 %v8467_v25  ;;  %1403 = vadd.xlane.f32.xlu0 %v14009_v8 }
 0x252   :  { %14006 = vst [vmem:[#allocation347_spill] sm:$0xff] %v8951_v43  ;;  %v1822_v41 = vsub.f32 %v14007_v24, %v8951_v43  ;;  %v1823_v27 = vsub.f32 %v14008_v48, %v8951_v43  ;;  %v14013_v24 = vld [vmem:[#allocation278_spill] sm:$0xff] }
 0x253   :  { %v1542_v39 = vpop.xlane.xlu0 %1541 }
 0x254   :  { %v8961_v13 = vmul.f32 0.0051020407, %v1542_v39  ;;  %v2084_v16 = vsel %vm2006_vm0, %v1823_v27, 0.0  ;;  %v2339_v18 = vmul.f32 %v1822_v41, %v1822_v41  ;;  %v1353_v48 = vpop.xlane.xlu1 %1352  ;;  %v6271_v27 = vmov 0  }
 0x255   :  { %2769 = vadd.xlane.f32.xlu1 %v8484_v2  ;;  %v2340_v25 = vmul.f32 %v2084_v16, %v2084_v16  ;;  %1595 = vadd.xlane.f32.xlu0 %v14013_v24  ;;  %v8971_v8 = vmul.f32 0.0051020407, %v1353_v48  ;;  %v14015_v16 = vld [vmem:[#allocation162_spill] sm:$0xff]  ;;  %v14017_v24 = vld [vmem:[#allocation279_spill] sm:$0xff] }
 0x256   :  { %14010 = vst [vmem:[#allocation271_spill] sm:$0xff] %v8961_v13  ;;  %v1950_v42 = vsub.f32 %v14011_v46, %v8961_v13  ;;  %v1951_v11 = vsub.f32 %v14012_v34, %v8961_v13  ;;  %6013 = vset.pattern.permute.xlu0 %v6271_v27  ;;  %6014 = vset.pattern.permute.xlu1 %v6271_v27  ;;  %v14016_v34 = vld [vmem:[#allocation164_spill] sm:$0xff] }
 0x257   :  { %14014 = vst [vmem:[#allocation278_spill] sm:$0xff] %v8971_v8  ;;  %v8973_v39 = vpop.xlane.xlu0 %2526  ;;  %v8975_v0 = vadd.f32 %v2340_v25, %v2339_v18  ;;  %v1824_v46 = vsub.f32 %v14015_v16, %v8971_v8  ;;  %v1825_v13 = vsub.f32 %v14016_v34, %v8971_v8  ;;  %v14021_v8 = vld [vmem:[#allocation282_spill] sm:$0xff] }
 0x258   :  { %v2212_v2 = vsel %vm2006_vm0, %v1951_v11, 0.0  ;;  %v2467_v41 = vmul.f32 %v1950_v42, %v1950_v42  ;;  %v1545_v43 = vpop.xlane.xlu1 %1544 }
 0x259   :  { %1406 = vadd.xlane.f32.xlu1 %v14017_v24  ;;  %v2468_v48 = vmul.f32 %v2212_v2, %v2212_v2  ;;  %2580 = vadd.xlane.f32.xlu0 %v8509_v23  ;;  %v8985_v18 = vmul.f32 0.0051020407, %v1545_v43  ;;  %v2086_v11 = vsel %vm2006_vm0, %v1825_v13, 0.0  ;;  %v2341_v42 = vmul.f32 %v1824_v46, %v1824_v46  ;;  %v14020_v24 = vld [vmem:[#allocation168_spill] sm:$0xff] }
 0x25a   :  { %v2342_v16 = vmul.f32 %v2086_v11, %v2086_v11 }
 0x25b   :  { %14018 = vst [vmem:[#allocation279_spill] sm:$0xff] %v8985_v18  ;;  %v8987_v25 = vpop.xlane.xlu0 %2718  ;;  %v8989_v27 = vadd.f32 %v2468_v48, %v2467_v41  ;;  %v1952_v34 = vsub.f32 %v14019_v51, %v8985_v18  ;;  %v1953_v2 = vsub.f32 %v14020_v24, %v8985_v18  ;;  %v14023_v24 = vld [vmem:[#allocation169_spill] sm:$0xff] }
 0x25c   :  { %v8998_v23 = vpop.xlane.xlu1 %2529  ;;  %v9001_v43 = vadd.f32 %v2342_v16, %v2341_v42 }
 0x25d   :  { %1598 = vadd.xlane.f32.xlu1 %v14021_v8  ;;  %2772 = vadd.xlane.f32.xlu0 %v8522_v31  ;;  %v2214_v13 = vsel %vm2006_vm0, %v1953_v2, 0.0  ;;  %v2469_v46 = vmul.f32 %v1952_v34, %v1952_v34  ;;  %v14024_v8 = vld [vmem:[#allocation173_spill] sm:$0xff]  ;;  %v14026_v31 = vld [vmem:[#allocation287_spill] sm:$0xff] }
 0x25e   :  { %v2470_v11 = vmul.f32 %v2214_v13, %v2214_v13  ;;  %v14028_v13 = vld [vmem:[#allocation170_spill] sm:$0xff] }
 0x25f   :  { %v1356_v41 = vpop.xlane.xlu0 %1355 }
 0x260   :  { %v9005_v48 = vmul.f32 0.0051020407, %v1356_v41  ;;  %v9012_v21 = vpop.xlane.xlu1 %2721  ;;  %v9015_v16 = vadd.f32 %v2470_v11, %v2469_v46 }
 0x261   :  { %2583 = vadd.xlane.f32.xlu1 %v8543_v45  ;;  %14025 = vst [vmem:[#allocation348_spill] sm:$0xff] %v9012_v21  ;;  %1409 = vadd.xlane.f32.xlu0 %v14026_v31  ;;  %v14030_v31 = vld [vmem:[#allocation294_spill] sm:$0xff] }
 0x262   :  { %14022 = vst [vmem:[#allocation282_spill] sm:$0xff] %v9005_v48  ;;  %v1826_v51 = vsub.f32 %v14023_v24, %v9005_v48  ;;  %v1827_v18 = vsub.f32 %v14024_v8, %v9005_v48  ;;  %v14029_v8 = vld [vmem:[#allocation175_spill] sm:$0xff] }
 0x263   :  { %v1548_v42 = vpop.xlane.xlu0 %1547 }
 0x264   :  { %v9017_v2 = vmul.f32 0.0051020407, %v1548_v42  ;;  %v2088_v34 = vsel %vm2006_vm0, %v1827_v18, 0.0  ;;  %v2343_v41 = vmul.f32 %v1826_v51, %v1826_v51  ;;  %v1359_v10 = vpop.xlane.xlu1 %1358  ;;  %v14033_v18 = vld [vmem:[#allocation174_spill] sm:$0xff] }
 0x265   :  { %2775 = vadd.xlane.f32.xlu1 %v8560_v32  ;;  %v2344_v45 = vmul.f32 %v2088_v34, %v2088_v34  ;;  %1601 = vadd.xlane.f32.xlu0 %v14030_v31  ;;  %v9027_v46 = vmul.f32 0.0051020407, %v1359_v10 }
 0x266   :  { %14027 = vst [vmem:[#allocation287_spill] sm:$0xff] %v9017_v2  ;;  %v1954_v24 = vsub.f32 %v14028_v13, %v9017_v2  ;;  %v1955_v48 = vsub.f32 %v14029_v8, %v9017_v2  ;;  %v14034_v13 = vld [vmem:[#allocation176_spill] sm:$0xff]  ;;  %v14035_v8 = vld [vmem:[#allocation295_spill] sm:$0xff] }
 0x267   :  { %14031 = vst [vmem:[#allocation294_spill] sm:$0xff] %v9027_v46  ;;  %v9029_v11 = vpop.xlane.xlu0 %2532  ;;  %v9031_v42 = vadd.f32 %v2344_v45, %v2343_v41  ;;  %v1828_v34 = vsub.f32 %v14033_v18, %v9027_v46  ;;  %v1829_v21 = vsub.f32 %v14034_v13, %v9027_v46  ;;  %v14040_v46 = vld [vmem:[#allocation298_spill] sm:$0xff] }
 0x268   :  { %14032 = vst [vmem:[#allocation349_spill] sm:$0xff] %v9029_v11  ;;  %v2216_v51 = vsel %vm2006_vm0, %v1955_v48, 0.0  ;;  %v2471_v32 = vmul.f32 %v1954_v24, %v1954_v24  ;;  %v1551_v31 = vpop.xlane.xlu1 %1550  ;;  %v14038_v11 = vld [vmem:[#allocation177_spill] sm:$0xff] }
 0x269   :  { %1412 = vadd.xlane.f32.xlu1 %v14035_v8  ;;  %v2472_v2 = vmul.f32 %v2216_v51, %v2216_v51  ;;  %2586 = vadd.xlane.f32.xlu0 %v8585_v55  ;;  %v9041_v10 = vmul.f32 0.0051020407, %v1551_v31  ;;  %v2090_v24 = vsel %vm2006_vm0, %v1829_v21, 0.0  ;;  %v2345_v48 = vmul.f32 %v1828_v34, %v1828_v34  ;;  %v14039_v8 = vld [vmem:[#allocation180_spill] sm:$0xff] }
 0x26a   :  { %v2346_v18 = vmul.f32 %v2090_v24, %v2090_v24 }
 0x26b   :  { %14036 = vst [vmem:[#allocation295_spill] sm:$0xff] %v9041_v10  ;;  %v9043_v41 = vpop.xlane.xlu0 %2724  ;;  %v9045_v45 = vadd.f32 %v2472_v2, %v2471_v32  ;;  %v1956_v13 = vsub.f32 %v14038_v11, %v9041_v10  ;;  %v1957_v51 = vsub.f32 %v14039_v8, %v9041_v10  ;;  %v14043_v8 = vld [vmem:[#allocation181_spill] sm:$0xff] }
 0x26c   :  { %14037 = vst [vmem:[#allocation350_spill] sm:$0xff] %v9043_v41  ;;  %v9054_v55 = vpop.xlane.xlu1 %2535  ;;  %v9057_v31 = vadd.f32 %v2346_v18, %v2345_v48 }
 0x26d   :  { %1604 = vadd.xlane.f32.xlu1 %v14040_v46  ;;  %14041 = vst [vmem:[#allocation298_spill] sm:$0xff] %v9054_v55  ;;  %2778 = vadd.xlane.f32.xlu0 %v8598_v63  ;;  %v2218_v21 = vsel %vm2006_vm0, %v1957_v51, 0.0  ;;  %v2473_v32 = vmul.f32 %v1956_v13, %v1956_v13  ;;  %v14044_v46 = vld [vmem:[#allocation185_spill] sm:$0xff]  ;;  %v14046_v63 = vld [vmem:[#allocation303_spill] sm:$0xff] }
 0x26e   :  { %v2474_v24 = vmul.f32 %v2218_v21, %v2218_v21  ;;  %v14048_v21 = vld [vmem:[#allocation182_spill] sm:$0xff] }
 0x26f   :  { %v1362_v2 = vpop.xlane.xlu0 %1361 }
 0x270   :  { %v9061_v34 = vmul.f32 0.0051020407, %v1362_v2  ;;  %v9068_v55 = vpop.xlane.xlu1 %2727  ;;  %v9071_v18 = vadd.f32 %v2474_v24, %v2473_v32 }
 0x271   :  { %2589 = vadd.xlane.f32.xlu1 %v8619_v50  ;;  %14045 = vst [vmem:[#allocation352_spill] sm:$0xff] %v9068_v55  ;;  %1415 = vadd.xlane.f32.xlu0 %v14046_v63  ;;  %v14050_v63 = vld [vmem:[#allocation310_spill] sm:$0xff] }
 0x272   :  { %14042 = vst [vmem:[#allocation351_spill] sm:$0xff] %v9061_v34  ;;  %v1830_v11 = vsub.f32 %v14043_v8, %v9061_v34  ;;  %v1831_v10 = vsub.f32 %v14044_v46, %v9061_v34  ;;  %v14049_v46 = vld [vmem:[#allocation186_spill] sm:$0xff] }
 0x273   :  { %v1554_v48 = vpop.xlane.xlu0 %1553 }
 0x274   :  { %v9073_v51 = vmul.f32 0.0051020407, %v1554_v48  ;;  %v2092_v13 = vsel %vm2006_vm0, %v1831_v10, 0.0  ;;  %v2347_v2 = vmul.f32 %v1830_v11, %v1830_v11  ;;  %v1365_v55 = vpop.xlane.xlu1 %1364  ;;  %v14053_v10 = vld [vmem:[#allocation187_spill] sm:$0xff] }
 0x275   :  { %2781 = vadd.xlane.f32.xlu1 %v8636_v19  ;;  %v2348_v50 = vmul.f32 %v2092_v13, %v2092_v13  ;;  %1607 = vadd.xlane.f32.xlu0 %v14050_v63  ;;  %v9083_v32 = vmul.f32 0.0051020407, %v1365_v55 }
 0x276   :  { %14047 = vst [vmem:[#allocation303_spill] sm:$0xff] %v9073_v51  ;;  %v1958_v8 = vsub.f32 %v14048_v21, %v9073_v51  ;;  %v1959_v34 = vsub.f32 %v14049_v46, %v9073_v51  ;;  %v14054_v21 = vld [vmem:[#allocation189_spill] sm:$0xff]  ;;  %v14055_v46 = vld [vmem:[#allocation311_spill] sm:$0xff] }
 0x277   :  { %14051 = vst [vmem:[#allocation310_spill] sm:$0xff] %v9083_v32  ;;  %v9085_v24 = vpop.xlane.xlu0 %2538  ;;  %v9087_v48 = vadd.f32 %v2348_v50, %v2347_v2  ;;  %v1832_v13 = vsub.f32 %v14053_v10, %v9083_v32  ;;  %v1833_v41 = vsub.f32 %v14054_v21, %v9083_v32  ;;  %v14059_v32 = vld [vmem:[#allocation314_spill] sm:$0xff] }
 0x278   :  { %14052 = vst [vmem:[#allocation353_spill] sm:$0xff] %v9085_v24  ;;  %v2220_v11 = vsel %vm2006_vm0, %v1959_v34, 0.0  ;;  %v2475_v19 = vmul.f32 %v1958_v8, %v1958_v8  ;;  %v1557_v63 = vpop.xlane.xlu1 %1556  ;;  %v14057_v24 = vld [vmem:[#allocation188_spill] sm:$0xff] }
 0x279   :  { %1418 = vadd.xlane.f32.xlu1 %v14055_v46  ;;  %v2476_v51 = vmul.f32 %v2220_v11, %v2220_v11  ;;  %2592 = vadd.xlane.f32.xlu0 %v8661_v7  ;;  %v9097_v55 = vmul.f32 0.0051020407, %v1557_v63  ;;  %v2094_v8 = vsel %vm2006_vm0, %v1833_v41, 0.0  ;;  %v2349_v34 = vmul.f32 %v1832_v13, %v1832_v13  ;;  %v14058_v46 = vld [vmem:[#allocation190_spill] sm:$0xff] }
 0x27a   :  { %v2350_v10 = vmul.f32 %v2094_v8, %v2094_v8 }
 0x27b   :  { %14056 = vst [vmem:[#allocation311_spill] sm:$0xff] %v9097_v55  ;;  %v9099_v2 = vpop.xlane.xlu0 %2730  ;;  %v9101_v50 = vadd.f32 %v2476_v51, %v2475_v19  ;;  %v1960_v21 = vsub.f32 %v14057_v24, %v9097_v55  ;;  %v1961_v11 = vsub.f32 %v14058_v46, %v9097_v55  ;;  %v14062_v46 = vld [vmem:[#allocation193_spill] sm:$0xff] }
 0x27c   :  { %v9110_v7 = vpop.xlane.xlu1 %2541  ;;  %v9113_v63 = vadd.f32 %v2350_v10, %v2349_v34 }
 0x27d   :  { %1610 = vadd.xlane.f32.xlu1 %v14059_v32  ;;  %14060 = vst [vmem:[#allocation314_spill] sm:$0xff] %v9110_v7  ;;  %2784 = vadd.xlane.f32.xlu0 %v8674_v37  ;;  %v2222_v41 = vsel %vm2006_vm0, %v1961_v11, 0.0  ;;  %v2477_v19 = vmul.f32 %v1960_v21, %v1960_v21  ;;  %v14063_v32 = vld [vmem:[#allocation197_spill] sm:$0xff]  ;;  %v14065_v37 = vld [vmem:[#allocation319_spill] sm:$0xff] }
 0x27e   :  { %v2478_v8 = vmul.f32 %v2222_v41, %v2222_v41  ;;  %v14067_v41 = vld [vmem:[#allocation194_spill] sm:$0xff] }
 0x27f   :  { %v1368_v51 = vpop.xlane.xlu0 %1367 }
 0x280   :  { %v9117_v13 = vmul.f32 0.0051020407, %v1368_v51  ;;  %v9124_v7 = vpop.xlane.xlu1 %2733  ;;  %v9127_v10 = vadd.f32 %v2478_v8, %v2477_v19 }
 0x281   :  { %2595 = vadd.xlane.f32.xlu1 %v8691_v9  ;;  %14064 = vst [vmem:[#allocation355_spill] sm:$0xff] %v9124_v7  ;;  %1421 = vadd.xlane.f32.xlu0 %v14065_v37 }
 0x282   :  { %14061 = vst [vmem:[#allocation354_spill] sm:$0xff] %v9117_v13  ;;  %v1834_v24 = vsub.f32 %v14062_v46, %v9117_v13  ;;  %v1835_v55 = vsub.f32 %v14063_v32, %v9117_v13  ;;  %v14068_v32 = vld [vmem:[#allocation198_spill] sm:$0xff] }
 0x283   :  { %v1560_v34 = vpop.xlane.xlu0 %1559 }
 0x284   :  { %v9129_v11 = vmul.f32 0.0051020407, %v1560_v34  ;;  %v2096_v21 = vsel %vm2006_vm0, %v1835_v55, 0.0  ;;  %v2351_v51 = vmul.f32 %v1834_v24, %v1834_v24  ;;  %v1371_v7 = vpop.xlane.xlu1 %1370  ;;  %v14070_v55 = vld [vmem:[#allocation199_spill] sm:$0xff] }
 0x285   :  { %2787 = vadd.xlane.f32.xlu1 %v8704_v6  ;;  %v2352_v9 = vmul.f32 %v2096_v21, %v2096_v21  ;;  %1613 = vadd.xlane.f32.xlu0 %v8671_v3  ;;  %v9139_v19 = vmul.f32 0.0051020407, %v1371_v7  ;;  %v14071_v21 = vld [vmem:[#allocation201_spill] sm:$0xff] }
 0x286   :  { %14066 = vst [vmem:[#allocation319_spill] sm:$0xff] %v9129_v11  ;;  %v1962_v46 = vsub.f32 %v14067_v41, %v9129_v11  ;;  %v1963_v13 = vsub.f32 %v14068_v32, %v9129_v11 }
 0x287   :  { %14069 = vst [vmem:[#allocation356_spill] sm:$0xff] %v9139_v19  ;;  %v9141_v8 = vpop.xlane.xlu0 %2544  ;;  %v9143_v37 = vadd.f32 %v2352_v9, %v2351_v51  ;;  %v1836_v34 = vsub.f32 %v14070_v55, %v9139_v19  ;;  %v1837_v41 = vsub.f32 %v14071_v21, %v9139_v19  ;;  %v14073_v55 = vld [vmem:[#allocation200_spill] sm:$0xff] }
 0x288   :  { %v2224_v24 = vsel %vm2006_vm0, %v1963_v13, 0.0  ;;  %v2479_v6 = vmul.f32 %v1962_v46, %v1962_v46  ;;  %v1563_v3 = vpop.xlane.xlu1 %1562 }
 0x289   :  { %1424 = vadd.xlane.f32.xlu1 %v8678_v28  ;;  %v2480_v32 = vmul.f32 %v2224_v24, %v2224_v24  ;;  %2598 = vadd.xlane.f32.xlu0 %v8719_v26  ;;  %v9153_v7 = vmul.f32 0.0051020407, %v1563_v3  ;;  %v2098_v46 = vsel %vm2006_vm0, %v1837_v41, 0.0  ;;  %v2353_v13 = vmul.f32 %v1836_v34, %v1836_v34  ;;  %v14074_v28 = vld [vmem:[#allocation202_spill] sm:$0xff] }
 0x28a   :  { %v2354_v11 = vmul.f32 %v2098_v46, %v2098_v46 }
 0x28b   :  { %14072 = vst [vmem:[#allocation357_spill] sm:$0xff] %v9153_v7  ;;  %v9155_v51 = vpop.xlane.xlu0 %2736  ;;  %v9157_v9 = vadd.f32 %v2480_v32, %v2479_v6  ;;  %v1964_v21 = vsub.f32 %v14073_v55, %v9153_v7  ;;  %v1965_v24 = vsub.f32 %v14074_v28, %v9153_v7  ;;  %v14076_v28 = vld [vmem:[#allocation205_spill] sm:$0xff] }
 0x28c   :  { %v9166_v26 = vpop.xlane.xlu1 %2547  ;;  %v9169_v3 = vadd.f32 %v2354_v11, %v2353_v13 }
 0x28d   :  { %1616 = vadd.xlane.f32.xlu1 %v8695_v59  ;;  %2790 = vadd.xlane.f32.xlu0 %v8728_v4  ;;  %v2226_v41 = vsel %vm2006_vm0, %v1965_v24, 0.0  ;;  %v2481_v6 = vmul.f32 %v1964_v21, %v1964_v21  ;;  %v14077_v59 = vld [vmem:[#allocation209_spill] sm:$0xff] }
 0x28e   :  { %v2482_v46 = vmul.f32 %v2226_v41, %v2226_v41 }
 0x28f   :  { %v1374_v32 = vpop.xlane.xlu0 %1373 }
 0x290   :  { %v9173_v34 = vmul.f32 0.0051020407, %v1374_v32  ;;  %v9180_v19 = vpop.xlane.xlu1 %2739  ;;  %v9183_v4 = vadd.f32 %v2482_v46, %v2481_v6  ;;  %v14079_v32 = vld [vmem:[#allocation206_spill] sm:$0xff] }
 0x291   :  { %2601 = vadd.xlane.f32.xlu1 %v8730_v30  ;;  %2604 = vadd.xlane.f32.xlu0 %v8743_v20 }
 0x292   :  { %14075 = vst [vmem:[#allocation358_spill] sm:$0xff] %v9173_v34  ;;  %v1838_v55 = vsub.f32 %v14076_v28, %v9173_v34  ;;  %v1839_v7 = vsub.f32 %v14077_v59, %v9173_v34  ;;  %v14080_v59 = vld [vmem:[#allocation210_spill] sm:$0xff] }
 0x293   :  { %v1566_v11 = vpop.xlane.xlu0 %1565 }
 0x294   :  { %v9185_v13 = vmul.f32 0.0051020407, %v1566_v11  ;;  %v2100_v21 = vsel %vm2006_vm0, %v1839_v7, 0.0  ;;  %v2355_v24 = vmul.f32 %v1838_v55, %v1838_v55  ;;  %v14082_v7 = vld [vmem:[#allocation211_spill] sm:$0xff] }
 0x295   :  { %2793 = vadd.xlane.f32.xlu1 %v8752_v58  ;;  %v2356_v30 = vmul.f32 %v2100_v21, %v2100_v21  ;;  %v1377_v34 = vpop.xlane.xlu1 %1376  ;;  %2796 = vadd.xlane.f32.xlu0 %v8765_v12  ;;  %v14083_v21 = vld [vmem:[#allocation213_spill] sm:$0xff] }
 0x296   :  { %14078 = vst [vmem:[#allocation359_spill] sm:$0xff] %v9185_v13  ;;  %v1966_v41 = vsub.f32 %v14079_v32, %v9185_v13  ;;  %v1967_v28 = vsub.f32 %v14080_v59, %v9185_v13  ;;  %v9195_v20 = vmul.f32 0.0051020407, %v1377_v34 }
 0x297   :  { %v9197_v6 = vpop.xlane.xlu0 %2550  ;;  %v9199_v46 = vadd.f32 %v2356_v30, %v2355_v24 }
 0x298   :  { %14081 = vst [vmem:[#allocation360_spill] sm:$0xff] %v9195_v20  ;;  %v2228_v55 = vsel %vm2006_vm0, %v1967_v28, 0.0  ;;  %v2483_v58 = vmul.f32 %v1966_v41, %v1966_v41  ;;  %v1840_v11 = vsub.f32 %v14082_v7, %v9195_v20  ;;  %v1841_v32 = vsub.f32 %v14083_v21, %v9195_v20  ;;  %v14085_v7 = vld [vmem:[#allocation212_spill] sm:$0xff] }
 0x299   :  { %2607 = vadd.xlane.f32.xlu1 %v8774_v47  ;;  %v2484_v59 = vmul.f32 %v2228_v55, %v2228_v55  ;;  %v1569_v12 = vpop.xlane.xlu1 %1568  ;;  %2610 = vadd.xlane.f32.xlu0 %v8787_v57  ;;  %v14086_v47 = vld [vmem:[#allocation214_spill] sm:$0xff] }
 0x29a   :  { %v9209_v34 = vmul.f32 0.0051020407, %v1569_v12  ;;  %v2102_v28 = vsel %vm2006_vm0, %v1841_v32, 0.0  ;;  %v2357_v41 = vmul.f32 %v1840_v11, %v1840_v11 }
 0x29b   :  { %v9211_v24 = vpop.xlane.xlu0 %2742  ;;  %v9213_v30 = vadd.f32 %v2484_v59, %v2483_v58  ;;  %v2358_v13 = vmul.f32 %v2102_v28, %v2102_v28 }
 0x29c   :  { %14084 = vst [vmem:[#allocation361_spill] sm:$0xff] %v9209_v34  ;;  %v1968_v21 = vsub.f32 %v14085_v7, %v9209_v34  ;;  %v1969_v55 = vsub.f32 %v14086_v47, %v9209_v34  ;;  %v14088_v47 = vld [vmem:[#allocation217_spill] sm:$0xff] }
 0x29d   :  { %2799 = vadd.xlane.f32.xlu1 %v8796_v38  ;;  %v9222_v57 = vpop.xlane.xlu1 %2553  ;;  %2802 = vadd.xlane.f32.xlu0 %v8809_v14  ;;  %v9225_v12 = vadd.f32 %v2358_v13, %v2357_v41  ;;  %v14089_v38 = vld [vmem:[#allocation221_spill] sm:$0xff] }
 0x29e   :  { %v2230_v32 = vsel %vm2006_vm0, %v1969_v55, 0.0  ;;  %v2485_v58 = vmul.f32 %v1968_v21, %v1968_v21 }
 0x29f   :  { %v1380_v59 = vpop.xlane.xlu0 %1379  ;;  %v2486_v28 = vmul.f32 %v2230_v32, %v2230_v32 }
 0x2a0   :  { %v9229_v11 = vmul.f32 0.0051020407, %v1380_v59  ;;  %v14091_v59 = vld [vmem:[#allocation218_spill] sm:$0xff] }
 0x2a1   :  { %2613 = vadd.xlane.f32.xlu1 %v8818_v29  ;;  %v9236_v20 = vpop.xlane.xlu1 %2745  ;;  %2616 = vadd.xlane.f32.xlu0 %v8831_v36  ;;  %v9239_v14 = vadd.f32 %v2486_v28, %v2485_v58 }
 0x2a2   :  { %14087 = vst [vmem:[#allocation362_spill] sm:$0xff] %v9229_v11  ;;  %v1842_v7 = vsub.f32 %v14088_v47, %v9229_v11  ;;  %v1843_v34 = vsub.f32 %v14089_v38, %v9229_v11  ;;  %v14092_v38 = vld [vmem:[#allocation222_spill] sm:$0xff] }
 0x2a3   :  { %v1572_v13 = vpop.xlane.xlu0 %1571 }
 0x2a4   :  { %v9241_v41 = vmul.f32 0.0051020407, %v1572_v13  ;;  %v2104_v21 = vsel %vm2006_vm0, %v1843_v34, 0.0  ;;  %v2359_v55 = vmul.f32 %v1842_v7, %v1842_v7  ;;  %v14094_v34 = vld [vmem:[#allocation223_spill] sm:$0xff] }
 0x2a5   :  { %2805 = vadd.xlane.f32.xlu1 %v8840_v5  ;;  %v2360_v29 = vmul.f32 %v2104_v21, %v2104_v21  ;;  %2808 = vadd.xlane.f32.xlu0 %v8853_v61  ;;  %v14095_v21 = vld [vmem:[#allocation225_spill] sm:$0xff] }
 0x2a6   :  { %14090 = vst [vmem:[#allocation363_spill] sm:$0xff] %v9241_v41  ;;  %v1970_v32 = vsub.f32 %v14091_v59, %v9241_v41  ;;  %v1971_v47 = vsub.f32 %v14092_v38, %v9241_v41  ;;  %v1383_v11 = vpop.xlane.xlu1 %1382 }
 0x2a7   :  { %v9251_v36 = vmul.f32 0.0051020407, %v1383_v11  ;;  %v9253_v58 = vpop.xlane.xlu0 %2556  ;;  %v9255_v28 = vadd.f32 %v2360_v29, %v2359_v55 }
 0x2a8   :  { %v2232_v7 = vsel %vm2006_vm0, %v1971_v47, 0.0  ;;  %v2487_v5 = vmul.f32 %v1970_v32, %v1970_v32 }
 0x2a9   :  { %14093 = vst [vmem:[#allocation364_spill] sm:$0xff] %v9251_v36  ;;  %v1844_v13 = vsub.f32 %v14094_v34, %v9251_v36  ;;  %v1845_v59 = vsub.f32 %v14095_v21, %v9251_v36  ;;  %2619 = vadd.xlane.f32.xlu1 %v8862_v56  ;;  %v2488_v38 = vmul.f32 %v2232_v7, %v2232_v7  ;;  %v14097_v34 = vld [vmem:[#allocation224_spill] sm:$0xff]  ;;  %v14098_v56 = vld [vmem:[#allocation226_spill] sm:$0xff] }
 0x2aa   :  { %v1575_v61 = vpop.xlane.xlu1 %1574  ;;  %2622 = vadd.xlane.f32.xlu0 %v8875_v44 }
 0x2ab   :  { %v9265_v11 = vmul.f32 0.0051020407, %v1575_v61  ;;  %v9267_v55 = vpop.xlane.xlu0 %2748  ;;  %v9269_v29 = vadd.f32 %v2488_v38, %v2487_v5  ;;  %v2106_v47 = vsel %vm2006_vm0, %v1845_v59, 0.0  ;;  %v2361_v32 = vmul.f32 %v1844_v13, %v1844_v13 }
 0x2ac   :  { %v2362_v41 = vmul.f32 %v2106_v47, %v2106_v47 }
 0x2ad   :  { %14096 = vst [vmem:[#allocation365_spill] sm:$0xff] %v9265_v11  ;;  %v1972_v21 = vsub.f32 %v14097_v34, %v9265_v11  ;;  %v1973_v7 = vsub.f32 %v14098_v56, %v9265_v11  ;;  %2811 = vadd.xlane.f32.xlu1 %v8884_v33  ;;  %v14100_v56 = vld [vmem:[#allocation229_spill] sm:$0xff] }
 0x2ae   :  { %v9278_v44 = vpop.xlane.xlu1 %2559  ;;  %2814 = vadd.xlane.f32.xlu0 %v8897_v52  ;;  %v9281_v61 = vadd.f32 %v2362_v41, %v2361_v32  ;;  %v14101_v33 = vld [vmem:[#allocation233_spill] sm:$0xff] }
 0x2af   :  { %v1386_v38 = vpop.xlane.xlu0 %1385  ;;  %v2234_v59 = vsel %vm2006_vm0, %v1973_v7, 0.0  ;;  %v2489_v5 = vmul.f32 %v1972_v21, %v1972_v21 }
 0x2b0   :  { %v9285_v13 = vmul.f32 0.0051020407, %v1386_v38  ;;  %v2490_v47 = vmul.f32 %v2234_v59, %v2234_v59  ;;  %v14103_v38 = vld [vmem:[#allocation230_spill] sm:$0xff] }
 0x2b1   :  { %2625 = vadd.xlane.f32.xlu1 %v8906_v53 }
 0x2b2   :  { %14099 = vst [vmem:[#allocation366_spill] sm:$0xff] %v9285_v13  ;;  %v1846_v34 = vsub.f32 %v14100_v56, %v9285_v13  ;;  %v1847_v11 = vsub.f32 %v14101_v33, %v9285_v13  ;;  %v9292_v36 = vpop.xlane.xlu1 %2751  ;;  %2628 = vadd.xlane.f32.xlu0 %v8921_v49  ;;  %v9295_v52 = vadd.f32 %v2490_v47, %v2489_v5  ;;  %v14104_v33 = vld [vmem:[#allocation234_spill] sm:$0xff] }
 0x2b3   :  { %v1578_v41 = vpop.xlane.xlu0 %1577 }
 0x2b4   :  { %v9297_v32 = vmul.f32 0.0051020407, %v1578_v41  ;;  %v2108_v21 = vsel %vm2006_vm0, %v1847_v11, 0.0  ;;  %v2363_v7 = vmul.f32 %v1846_v34, %v1846_v34  ;;  %v14107_v11 = vld [vmem:[#allocation235_spill] sm:$0xff] }
 0x2b5   :  { %2817 = vadd.xlane.f32.xlu1 %v8928_v62  ;;  %v2364_v53 = vmul.f32 %v2108_v21, %v2108_v21  ;;  %v14108_v21 = vld [vmem:[#allocation237_spill] sm:$0xff] }
 0x2b6   :  { %14102 = vst [vmem:[#allocation367_spill] sm:$0xff] %v9297_v32  ;;  %v1974_v59 = vsub.f32 %v14103_v38, %v9297_v32  ;;  %v1975_v56 = vsub.f32 %v14104_v33, %v9297_v32  ;;  %v1389_v13 = vpop.xlane.xlu1 %1388  ;;  %2820 = vadd.xlane.f32.xlu0 %v8939_v22 }
 0x2b7   :  { %v9307_v49 = vmul.f32 0.0051020407, %v1389_v13  ;;  %v9309_v5 = vpop.xlane.xlu0 %2562  ;;  %v9311_v47 = vadd.f32 %v2364_v53, %v2363_v7 }
 0x2b8   :  { %14106 = vst [vmem:[#allocation369_spill] sm:$0xff] %v9309_v5  ;;  %v2236_v34 = vsel %vm2006_vm0, %v1975_v56, 0.0  ;;  %v2491_v62 = vmul.f32 %v1974_v59, %v1974_v59 }
 0x2b9   :  { %14105 = vst [vmem:[#allocation368_spill] sm:$0xff] %v9307_v49  ;;  %v1848_v41 = vsub.f32 %v14107_v11, %v9307_v49  ;;  %v1849_v38 = vsub.f32 %v14108_v21, %v9307_v49  ;;  %2631 = vadd.xlane.f32.xlu1 %v8941_v15  ;;  %v2492_v33 = vmul.f32 %v2236_v34, %v2236_v34  ;;  %v2903_v11 = vmul.f32 0.0051020407, %v8919_v60  ;;  %v14111_v21 = vld [vmem:[#allocation236_spill] sm:$0xff]  ;;  %v14112_v34 = vld [vmem:[#allocation238_spill] sm:$0xff] }
 0x2ba   :  { %v1581_v22 = vpop.xlane.xlu1 %1580  ;;  %2634 = vadd.xlane.f32.xlu0 %v8975_v0 }
 0x2bb   :  { %v9321_v13 = vmul.f32 0.0051020407, %v1581_v22  ;;  %v9323_v7 = vpop.xlane.xlu0 %2754  ;;  %v9325_v53 = vadd.f32 %v2492_v33, %v2491_v62  ;;  %v2110_v56 = vsel %vm2006_vm0, %v1849_v38, 0.0  ;;  %v2365_v59 = vmul.f32 %v1848_v41, %v1848_v41 }
 0x2bc   :  { %14110 = vst [vmem:[#allocation371_spill] sm:$0xff] %v9323_v7  ;;  %v2366_v32 = vmul.f32 %v2110_v56, %v2110_v56  ;;  %v2967_v38 = vmul.f32 0.0051020407, %v8937_v35 }
 0x2bd   :  { %14109 = vst [vmem:[#allocation370_spill] sm:$0xff] %v9321_v13  ;;  %v1976_v15 = vsub.f32 %v14111_v21, %v9321_v13  ;;  %v1977_v49 = vsub.f32 %v14112_v34, %v9321_v13  ;;  %2823 = vadd.xlane.f32.xlu1 %v8949_v17  ;;  %v3031_v21 = vadd.f32 1e-05, %v2903_v11  ;;  %v2904_v17 = vmul.f32 0.0051020407, %v8946_v1  ;;  %v14115_v34 = vld [vmem:[#allocation241_spill] sm:$0xff] }
 0x2be   :  { %v9335_v0 = vpop.xlane.xlu1 %2565  ;;  %2826 = vadd.xlane.f32.xlu0 %v8989_v27  ;;  %v9338_v33 = vadd.f32 %v2366_v32, %v2365_v59  ;;  %v14116_v32 = vld [vmem:[#allocation245_spill] sm:$0xff] }
 0x2bf   :  { %14113 = vst [vmem:[#allocation372_spill] sm:$0xff] %v9335_v0  ;;  %v1392_v62 = vpop.xlane.xlu0 %1391  ;;  %v2238_v60 = vsel %vm2006_vm0, %v1977_v49, 0.0  ;;  %v2493_v41 = vmul.f32 %v1976_v15, %v1976_v15  ;;  %v3095_v49 = vadd.f32 1e-05, %v2967_v38  ;;  %6015 = vrsqrt.f32 %v3031_v21 }
 0x2c0   :  { %v9343_v22 = vmul.f32 0.0051020407, %v1392_v62  ;;  %v2494_v56 = vmul.f32 %v2238_v60, %v2238_v60  ;;  %v3032_v60 = vadd.f32 1e-05, %v2904_v17  ;;  %v14123_v17 = vld [vmem:[#allocation247_spill] sm:$0xff] }
 0x2c1   :  { %2637 = vadd.xlane.f32.xlu1 %v9001_v43  ;;  %6017 = vrsqrt.f32 %v3095_v49 }
 0x2c2   :  { %14114 = vst [vmem:[#allocation373_spill] sm:$0xff] %v9343_v22  ;;  %v1850_v27 = vsub.f32 %v14115_v34, %v9343_v22  ;;  %v1851_v59 = vsub.f32 %v14116_v32, %v9343_v22  ;;  %v9351_v35 = vpop.xlane.xlu1 %2757  ;;  %v9353_v13 = vadd.f32 %v2494_v56, %v2493_v41  ;;  %v14119_v34 = vld [vmem:[#allocation242_spill] sm:$0xff]  ;;  %6019 = vrsqrt.f32 %v3032_v60 }
 0x2c3   :  { %14117 = vst [vmem:[#allocation374_spill] sm:$0xff] %v9351_v35  ;;  %v1584_v15 = vpop.xlane.xlu0 %1583  ;;  %v14120_v22 = vld [vmem:[#allocation246_spill] sm:$0xff] }
 0x2c4   :  { %v9355_v62 = vmul.f32 0.0051020407, %v1584_v15  ;;  %v2112_v11 = vsel %vm2006_vm0, %v1851_v59, 0.0  ;;  %v2367_v43 = vmul.f32 %v1850_v27, %v1850_v27  ;;  %v14124_v59 = vld [vmem:[#allocation249_spill] sm:$0xff] }
 0x2c5   :  { %2829 = vadd.xlane.f32.xlu1 %v9015_v16  ;;  %v2368_v1 = vmul.f32 %v2112_v11, %v2112_v11 }
 0x2c6   :  { %14118 = vst [vmem:[#allocation375_spill] sm:$0xff] %v9355_v62  ;;  %v1978_v32 = vsub.f32 %v14119_v34, %v9355_v62  ;;  %v1979_v41 = vsub.f32 %v14120_v22, %v9355_v62  ;;  %v1395_v56 = vpop.xlane.xlu1 %1394 }
 0x2c7   :  { %v9364_v38 = vmul.f32 0.0051020407, %v1395_v56  ;;  %v9366_v15 = vpop.xlane.xlu0 %2568  ;;  %v9368_v35 = vadd.f32 %v2368_v1, %v2367_v43 }
 0x2c8   :  { %14122 = vst [vmem:[#allocation377_spill] sm:$0xff] %v9366_v15  ;;  %v2240_v21 = vsel %vm2006_vm0, %v1979_v41, 0.0  ;;  %v2495_v16 = vmul.f32 %v1978_v32, %v1978_v32  ;;  %v14127_v41 = vld [vmem:[#allocation248_spill] sm:$0xff]  ;;  %v14128_v15 = vld [vmem:[#allocation250_spill] sm:$0xff] }
 0x2c9   :  { %14121 = vst [vmem:[#allocation376_spill] sm:$0xff] %v9364_v38  ;;  %v1852_v27 = vsub.f32 %v14123_v17, %v9364_v38  ;;  %v1853_v11 = vsub.f32 %v14124_v59, %v9364_v38  ;;  %v2496_v34 = vmul.f32 %v2240_v21, %v2240_v21 }
 0x2ca   :  { %v1587_v22 = vpop.xlane.xlu1 %1586 }
 0x2cb   :  { %v9376_v49 = vmul.f32 0.0051020407, %v1587_v22  ;;  %v9378_v56 = vpop.xlane.xlu0 %2760  ;;  %v9380_v62 = vadd.f32 %v2496_v34, %v2495_v16  ;;  %v2114_v43 = vsel %vm2006_vm0, %v1853_v11, 0.0  ;;  %v2369_v1 = vmul.f32 %v1852_v27, %v1852_v27  ;;  %v6016_v22 = vpop.eup %6015  ;;  %v3287_v34 = vld [vmem:[%s12839_s2] sm:$0xff] }
 0x2cc   :  { %14126 = vst [vmem:[#allocation379_spill] sm:$0xff] %v9378_v56  ;;  %v2370_v32 = vmul.f32 %v2114_v43, %v2114_v43  ;;  %v9408_v0 = vmul.f32 %v6016_v22, %v3287_v34  ;;  %v14138_v34 = vld [vmem:[#allocation254_spill] sm:$0xff] }
 0x2cd   :  { %14125 = vst [vmem:[#allocation378_spill] sm:$0xff] %v9376_v49  ;;  %v1980_v17 = vsub.f32 %v14127_v41, %v9376_v49  ;;  %v1981_v59 = vsub.f32 %v14128_v15, %v9376_v49  ;;  %v6018_v41 = vpop.eup %6017  ;;  %v3351_v15 = vld [vmem:[%s12839_s2 + $0x200] sm:$0xff]  ;;  %v14133_v49 = vld [vmem:[#allocation257_spill] sm:$0xff] }
 0x2ce   :  { %v9388_v21 = vpop.xlane.xlu1 %2571  ;;  %v9390_v60 = vadd.f32 %v2370_v32, %v2369_v1  ;;  %v14132_v1 = vld [vmem:[#allocation253_spill] sm:$0xff]  ;;  %v9415_v7 = vmul.f32 %v6018_v41, %v3351_v15 }
 0x2cf   :  { %14129 = vst [vmem:[#allocation380_spill] sm:$0xff] %v9388_v21  ;;  %v1398_v38 = vpop.xlane.xlu0 %1397  ;;  %v2242_v16 = vsel %vm2006_vm0, %v1981_v59, 0.0  ;;  %v2497_v27 = vmul.f32 %v1980_v17, %v1980_v17  ;;  %v6020_v17 = vpop.eup %6019 }
 0x2d0   :  { %14130 = vst [vmem:[#allocation381_spill] sm:$0xff] %v9390_v60  ;;  %v9397_v11 = vmul.f32 0.0051020407, %v1398_v38  ;;  %v2498_v43 = vmul.f32 %v2242_v16, %v2242_v16  ;;  %14137 = vst [vmem:[#allocation386_spill] sm:$0xff] %v9415_v7 }
 0x2d2   :  { %14131 = vst [vmem:[#allocation382_spill] sm:$0xff] %v9397_v11  ;;  %v1854_v32 = vsub.f32 %v14132_v1, %v9397_v11  ;;  %v1855_v21 = vsub.f32 %v14133_v49, %v9397_v11  ;;  %v9406_v56 = vpop.xlane.xlu1 %2763  ;;  %v9410_v59 = vadd.f32 %v2498_v43, %v2497_v27  ;;  %v3288_v49 = vld [vmem:[%s12839_s2 + $0x8] sm:$0xff]  ;;  %v14139_v43 = vld [vmem:[#allocation258_spill] sm:$0xff] }
 0x2d3   :  { %14134 = vst [vmem:[#allocation383_spill] sm:$0xff] %v9406_v56  ;;  %v1590_v38 = vpop.xlane.xlu0 %1589 }
 0x2d4   :  { %14135 = vst [vmem:[#allocation384_spill] sm:$0xff] %v9410_v59  ;;  %v9412_v16 = vmul.f32 0.0051020407, %v1590_v38  ;;  %3929 = vperm.xlu0 %6013, %v9408_v0   ;;  %v2116_v1 = vsel %vm2006_vm0, %v1855_v21, 0.0  ;;  %v2371_v5 = vmul.f32 %v1854_v32, %v1854_v32  ;;  %v9433_v32 = vmul.f32 %v6020_v17, %v3288_v49 }
 0x2d5   :  { %v2372_v22 = vmul.f32 %v2116_v1, %v2116_v1 }
 0x2d6   :  { %14136 = vst [vmem:[#allocation385_spill] sm:$0xff] %v9412_v16  ;;  %v1982_v27 = vsub.f32 %v14138_v34, %v9412_v16  ;;  %v1983_v38 = vsub.f32 %v14139_v43, %v9412_v16  ;;  %v1401_v11 = vpop.xlane.xlu1 %1400  ;;  %4249 = vperm.xlu1 %6014, %v9415_v7   ;;  %v14143_v34 = vld [vmem:[#allocation259_spill] sm:$0xff]  ;;  %v14144_v43 = vld [vmem:[#allocation261_spill] sm:$0xff] }
 0x2d7   :  { %v9427_v15 = vmul.f32 0.0051020407, %v1401_v11  ;;  %v9429_v41 = vpop.xlane.xlu0 %2574  ;;  %v9431_v21 = vadd.f32 %v2372_v22, %v2371_v5 }
 0x2d8   :  { %14141 = vst [vmem:[#allocation388_spill] sm:$0xff] %v9429_v41  ;;  %v2244_v1 = vsel %vm2006_vm0, %v1983_v38, 0.0  ;;  %v2499_v56 = vmul.f32 %v1982_v27, %v1982_v27  ;;  %v14148_v38 = vld [vmem:[#allocation260_spill] sm:$0xff] }
 0x2d9   :  { %14140 = vst [vmem:[#allocation387_spill] sm:$0xff] %v9427_v15  ;;  %14142 = vst [vmem:[#allocation389_spill] sm:$0xff] %v9431_v21  ;;  %v1856_v59 = vsub.f32 %v14143_v34, %v9427_v15  ;;  %v1857_v16 = vsub.f32 %v14144_v43, %v9427_v15  ;;  %v2500_v60 = vmul.f32 %v2244_v1, %v2244_v1  ;;  %v14149_v43 = vld [vmem:[#allocation262_spill] sm:$0xff] }
 0x2da   :  { %v1593_v7 = vpop.xlane.xlu1 %1592  ;;  %3934 = vperm.xlu1 %6014, %v9433_v32  }
 0x2db   :  { %v9442_v11 = vmul.f32 0.0051020407, %v1593_v7  ;;  %v9444_v5 = vpop.xlane.xlu0 %2766  ;;  %v9446_v49 = vadd.f32 %v2500_v60, %v2499_v56  ;;  %v2118_v17 = vsel %vm2006_vm0, %v1857_v16, 0.0  ;;  %v2373_v22 = vmul.f32 %v1856_v59, %v1856_v59  ;;  %v14153_v59 = vld [vmem:[#allocation265_spill] sm:$0xff] }
 0x2dc   :  { %14146 = vst [vmem:[#allocation391_spill] sm:$0xff] %v9444_v5  ;;  %v2374_v27 = vmul.f32 %v2118_v17, %v2118_v17 }
 0x2dd   :  { %14145 = vst [vmem:[#allocation390_spill] sm:$0xff] %v9442_v11  ;;  %14147 = vst [vmem:[#allocation392_spill] sm:$0xff] %v9446_v49  ;;  %v1984_v34 = vsub.f32 %v14148_v38, %v9442_v11  ;;  %v1985_v1 = vsub.f32 %v14149_v43, %v9442_v11  ;;  %v14154_v38 = vld [vmem:[#allocation269_spill] sm:$0xff] }
 0x2de   :  { %v9454_v15 = vpop.xlane.xlu1 %2577  ;;  %v9456_v41 = vadd.f32 %v2374_v27, %v2373_v22 }
 0x2df   :  { %14150 = vst [vmem:[#allocation393_spill] sm:$0xff] %v9454_v15  ;;  %v1404_v7 = vpop.xlane.xlu0 %1403  ;;  %v2246_v56 = vsel %vm2006_vm0, %v1985_v1, 0.0  ;;  %v2501_v60 = vmul.f32 %v1984_v34, %v1984_v34 }
 0x2e0   :  { %14151 = vst [vmem:[#allocation394_spill] sm:$0xff] %v9456_v41  ;;  %v9460_v5 = vmul.f32 0.0051020407, %v1404_v7  ;;  %v2502_v16 = vmul.f32 %v2246_v56, %v2246_v56  ;;  %v14158_v56 = vld [vmem:[#allocation266_spill] sm:$0xff] }
 0x2e2   :  { %14152 = vst [vmem:[#allocation395_spill] sm:$0xff] %v9460_v5  ;;  %v1858_v17 = vsub.f32 %v14153_v59, %v9460_v5  ;;  %v1859_v49 = vsub.f32 %v14154_v38, %v9460_v5  ;;  %v9466_v21 = vpop.xlane.xlu1 %2769  ;;  %v9468_v43 = vadd.f32 %v2502_v16, %v2501_v60  ;;  %v14159_v59 = vld [vmem:[#allocation270_spill] sm:$0xff] }
 0x2e3   :  { %14155 = vst [vmem:[#allocation396_spill] sm:$0xff] %v9466_v21  ;;  %v1596_v22 = vpop.xlane.xlu0 %1595 }
 0x2e4   :  { %14156 = vst [vmem:[#allocation397_spill] sm:$0xff] %v9468_v43  ;;  %v9470_v27 = vmul.f32 0.0051020407, %v1596_v22  ;;  %v2120_v1 = vsel %vm2006_vm0, %v1859_v49, 0.0  ;;  %v2375_v34 = vmul.f32 %v1858_v17, %v1858_v17  ;;  %v14163_v49 = vld [vmem:[#allocation272_spill] sm:$0xff] }
 0x2e5   :  { %v2376_v7 = vmul.f32 %v2120_v1, %v2120_v1  ;;  %v14164_v1 = vld [vmem:[#allocation274_spill] sm:$0xff] }
 0x2e6   :  { %14157 = vst [vmem:[#allocation398_spill] sm:$0xff] %v9470_v27  ;;  %v1986_v11 = vsub.f32 %v14158_v56, %v9470_v27  ;;  %v1987_v15 = vsub.f32 %v14159_v59, %v9470_v27  ;;  %v1407_v41 = vpop.xlane.xlu1 %1406 }
 0x2e7   :  { %v9478_v38 = vmul.f32 0.0051020407, %v1407_v41  ;;  %v9480_v5 = vpop.xlane.xlu0 %2580  ;;  %v9482_v60 = vadd.f32 %v2376_v7, %v2375_v34 }
 0x2e8   :  { %14161 = vst [vmem:[#allocation400_spill] sm:$0xff] %v9480_v5  ;;  %v2248_v16 = vsel %vm2006_vm0, %v1987_v15, 0.0  ;;  %v2503_v22 = vmul.f32 %v1986_v11, %v1986_v11  ;;  %v14168_v11 = vld [vmem:[#allocation273_spill] sm:$0xff] }
 0x2e9   :  { %14160 = vst [vmem:[#allocation399_spill] sm:$0xff] %v9478_v38  ;;  %14162 = vst [vmem:[#allocation401_spill] sm:$0xff] %v9482_v60  ;;  %v1860_v17 = vsub.f32 %v14163_v49, %v9478_v38  ;;  %v1861_v56 = vsub.f32 %v14164_v1, %v9478_v38  ;;  %v2504_v21 = vmul.f32 %v2248_v16, %v2248_v16  ;;  %v14169_v49 = vld [vmem:[#allocation275_spill] sm:$0xff] }
 0x2ea   :  { %v1599_v43 = vpop.xlane.xlu1 %1598 }
 0x2eb   :  { %v9490_v59 = vmul.f32 0.0051020407, %v1599_v43  ;;  %v9492_v41 = vpop.xlane.xlu0 %2772  ;;  %v9494_v27 = vadd.f32 %v2504_v21, %v2503_v22  ;;  %v2122_v34 = vsel %vm2006_vm0, %v1861_v56, 0.0  ;;  %v2377_v7 = vmul.f32 %v1860_v17, %v1860_v17  ;;  %v14172_v17 = vld [vmem:[#allocation280_spill] sm:$0xff] }
 0x2ec   :  { %14166 = vst [vmem:[#allocation403_spill] sm:$0xff] %v9492_v41  ;;  %v2378_v15 = vmul.f32 %v2122_v34, %v2122_v34 }
 0x2ed   :  { %14165 = vst [vmem:[#allocation402_spill] sm:$0xff] %v9490_v59  ;;  %14167 = vst [vmem:[#allocation404_spill] sm:$0xff] %v9494_v27  ;;  %v1988_v5 = vsub.f32 %v14168_v11, %v9490_v59  ;;  %v1989_v60 = vsub.f32 %v14169_v49, %v9490_v59  ;;  %v14173_v11 = vld [vmem:[#allocation285_spill] sm:$0xff] }
 0x2ee   :  { %v9502_v1 = vpop.xlane.xlu1 %2583  ;;  %v9504_v16 = vadd.f32 %v2378_v15, %v2377_v7 }
 0x2ef   :  { %14170 = vst [vmem:[#allocation405_spill] sm:$0xff] %v9502_v1  ;;  %v1410_v43 = vpop.xlane.xlu0 %1409  ;;  %v2250_v21 = vsel %vm2006_vm0, %v1989_v60, 0.0  ;;  %v2505_v22 = vmul.f32 %v1988_v5, %v1988_v5 }
 0x2f0   :  { %v9508_v38 = vmul.f32 0.0051020407, %v1410_v43  ;;  %v2506_v56 = vmul.f32 %v2250_v21, %v2250_v21  ;;  %v2968_v43 = vmul.f32 0.0051020407, %v8958_v40 }
 0x2f2   :  { %14171 = vst [vmem:[#allocation406_spill] sm:$0xff] %v9508_v38  ;;  %v1862_v34 = vsub.f32 %v14172_v17, %v9508_v38  ;;  %v1863_v41 = vsub.f32 %v14173_v11, %v9508_v38  ;;  %v9514_v27 = vpop.xlane.xlu1 %2775  ;;  %v9516_v49 = vadd.f32 %v2506_v56, %v2505_v22  ;;  %v14176_v17 = vld [vmem:[#allocation281_spill] sm:$0xff]  ;;  %v14177_v11 = vld [vmem:[#allocation286_spill] sm:$0xff] }
 0x2f3   :  { %14174 = vst [vmem:[#allocation407_spill] sm:$0xff] %v9514_v27  ;;  %v1602_v7 = vpop.xlane.xlu0 %1601  ;;  %2640 = vadd.xlane.f32.xlu0 %v9031_v42 }
 0x2f4   :  { %v9519_v15 = vmul.f32 0.0051020407, %v1602_v7  ;;  %v2124_v5 = vsel %vm2006_vm0, %v1863_v41, 0.0  ;;  %v2379_v60 = vmul.f32 %v1862_v34, %v1862_v34  ;;  %v3096_v34 = vadd.f32 1e-05, %v2968_v43  ;;  %v14180_v7 = vld [vmem:[#allocation288_spill] sm:$0xff] }
 0x2f5   :  { %v2380_v21 = vmul.f32 %v2124_v5, %v2124_v5  ;;  %v14184_v43 = vld [vmem:[#allocation289_spill] sm:$0xff] }
 0x2f6   :  { %14175 = vst [vmem:[#allocation408_spill] sm:$0xff] %v9519_v15  ;;  %v1990_v59 = vsub.f32 %v14176_v17, %v9519_v15  ;;  %v1991_v38 = vsub.f32 %v14177_v11, %v9519_v15  ;;  %v1413_v22 = vpop.xlane.xlu1 %1412  ;;  %v14181_v17 = vld [vmem:[#allocation290_spill] sm:$0xff]  ;;  %6021 = vrsqrt.f32 %v3096_v34 }
 0x2f7   :  { %v9528_v56 = vmul.f32 0.0051020407, %v1413_v22  ;;  %v9530_v27 = vpop.xlane.xlu0 %2586  ;;  %2832 = vadd.xlane.f32.xlu0 %v9045_v45  ;;  %v9533_v42 = vadd.f32 %v2380_v21, %v2379_v60 }
 0x2f8   :  { %14179 = vst [vmem:[#allocation410_spill] sm:$0xff] %v9530_v27  ;;  %v2252_v41 = vsel %vm2006_vm0, %v1991_v38, 0.0  ;;  %v2507_v40 = vmul.f32 %v1990_v59, %v1990_v59 }
 0x2f9   :  { %14178 = vst [vmem:[#allocation409_spill] sm:$0xff] %v9528_v56  ;;  %v1864_v5 = vsub.f32 %v14180_v7, %v9528_v56  ;;  %v1865_v11 = vsub.f32 %v14181_v17, %v9528_v56  ;;  %v2508_v15 = vmul.f32 %v2252_v41, %v2252_v41  ;;  %v14185_v7 = vld [vmem:[#allocation291_spill] sm:$0xff] }
 0x2fa   :  { %v1605_v22 = vpop.xlane.xlu1 %1604 }
 0x2fb   :  { %v9541_v1 = vmul.f32 0.0051020407, %v1605_v22  ;;  %v9543_v27 = vpop.xlane.xlu0 %2778  ;;  %v9545_v45 = vadd.f32 %v2508_v15, %v2507_v40  ;;  %v2126_v60 = vsel %vm2006_vm0, %v1865_v11, 0.0  ;;  %v2381_v38 = vmul.f32 %v1864_v5, %v1864_v5 }
 0x2fc   :  { %14183 = vst [vmem:[#allocation412_spill] sm:$0xff] %v9543_v27  ;;  %v2382_v59 = vmul.f32 %v2126_v60, %v2126_v60  ;;  %v2905_v15 = vmul.f32 0.0051020407, %v8973_v39 }
 0x2fd   :  { %14182 = vst [vmem:[#allocation411_spill] sm:$0xff] %v9541_v1  ;;  %v1992_v21 = vsub.f32 %v14184_v43, %v9541_v1  ;;  %v1993_v17 = vsub.f32 %v14185_v7, %v9541_v1  ;;  %v14189_v43 = vld [vmem:[#allocation296_spill] sm:$0xff]  ;;  %v14190_v7 = vld [vmem:[#allocation301_spill] sm:$0xff] }
 0x2fe   :  { %v9553_v41 = vpop.xlane.xlu1 %2589  ;;  %2643 = vadd.xlane.f32.xlu1 %v9057_v31  ;;  %v9556_v22 = vadd.f32 %v2382_v59, %v2381_v38  ;;  %v3033_v39 = vadd.f32 1e-05, %v2905_v15 }
 0x2ff   :  { %14186 = vst [vmem:[#allocation413_spill] sm:$0xff] %v9553_v41  ;;  %v1416_v40 = vpop.xlane.xlu0 %1415  ;;  %v2254_v11 = vsel %vm2006_vm0, %v1993_v17, 0.0  ;;  %v2509_v5 = vmul.f32 %v1992_v21, %v1992_v21  ;;  %v2969_v17 = vmul.f32 0.0051020407, %v8987_v25  ;;  %v3352_v25 = vld [vmem:[%s12839_s2 + $0x208] sm:$0xff] }
 0x300   :  { %14187 = vst [vmem:[#allocation414_spill] sm:$0xff] %v9556_v22  ;;  %v9561_v34 = vmul.f32 0.0051020407, %v1416_v40  ;;  %v2510_v60 = vmul.f32 %v2254_v11, %v2254_v11  ;;  %6023 = vrsqrt.f32 %v3033_v39  ;;  %v14201_v22 = vld [vmem:[#allocation159_spill] sm:$0xff] }
 0x302   :  { %14188 = vst [vmem:[#allocation415_spill] sm:$0xff] %v9561_v34  ;;  %v1866_v56 = vsub.f32 %v14189_v43, %v9561_v34  ;;  %v1867_v1 = vsub.f32 %v14190_v7, %v9561_v34  ;;  %v9567_v41 = vpop.xlane.xlu1 %2781  ;;  %2835 = vadd.xlane.f32.xlu1 %v9071_v18  ;;  %v9570_v31 = vadd.f32 %v2510_v60, %v2509_v5  ;;  %v14194_v43 = vld [vmem:[#allocation297_spill] sm:$0xff]  ;;  %v14195_v34 = vld [vmem:[#allocation302_spill] sm:$0xff]  ;;  %v6022_v5 = vpop.eup %6021 }
 0x303   :  { %14191 = vst [vmem:[#allocation416_spill] sm:$0xff] %v9567_v41  ;;  %v1608_v38 = vpop.xlane.xlu0 %1607 }
 0x304   :  { %14192 = vst [vmem:[#allocation417_spill] sm:$0xff] %v9570_v31  ;;  %v9573_v59 = vmul.f32 0.0051020407, %v1608_v38  ;;  %v2128_v21 = vsel %vm2006_vm0, %v1867_v1, 0.0  ;;  %v2383_v40 = vmul.f32 %v1866_v56, %v1866_v56  ;;  %v3097_v56 = vadd.f32 1e-05, %v2969_v17 }
 0x305   :  { %v2384_v11 = vmul.f32 %v2128_v21, %v2128_v21  ;;  %v2906_v38 = vmul.f32 0.0051020407, %v8998_v23  ;;  %v9597_v31 = vmul.f32 %v6022_v5, %v3352_v25  ;;  %v3544_v5 = vld [vmem:[%s12840_s3 + $0x8] sm:$0xff] }
 0x306   :  { %14193 = vst [vmem:[#allocation418_spill] sm:$0xff] %v9573_v59  ;;  %v1994_v7 = vsub.f32 %v14194_v43, %v9573_v59  ;;  %v1995_v41 = vsub.f32 %v14195_v34, %v9573_v59  ;;  %v1419_v18 = vpop.xlane.xlu1 %1418  ;;  %v14198_v43 = vld [vmem:[#allocation304_spill] sm:$0xff]  ;;  %6025 = vrsqrt.f32 %v3097_v56  ;;  %v3543_v56 = vld [vmem:[%s12840_s3] sm:$0xff] }
 0x307   :  { %v9581_v15 = vmul.f32 0.0051020407, %v1419_v18  ;;  %v9583_v60 = vpop.xlane.xlu0 %2592  ;;  %v9588_v1 = vadd.f32 %v2384_v11, %v2383_v40  ;;  %v14199_v18 = vld [vmem:[#allocation306_spill] sm:$0xff]  ;;  %14200 = vst [vmem:[#allocation421_spill] sm:$0xff] %v9597_v31  ;;  %v3672_v40 = vmul.f32 %v9433_v32, %v14201_v22 }
 0x308   :  { %14197 = vst [vmem:[#allocation420_spill] sm:$0xff] %v9583_v60  ;;  %v2256_v21 = vsel %vm2006_vm0, %v1995_v41, 0.0  ;;  %v2511_v34 = vmul.f32 %v1994_v7, %v1994_v7 }
 0x309   :  { %14196 = vst [vmem:[#allocation419_spill] sm:$0xff] %v9581_v15  ;;  %v1868_v39 = vsub.f32 %v14198_v43, %v9581_v15  ;;  %v1869_v59 = vsub.f32 %v14199_v18, %v9581_v15  ;;  %v2512_v60 = vmul.f32 %v2256_v21, %v2256_v21  ;;  %v3034_v43 = vadd.f32 1e-05, %v2906_v38  ;;  %v14204_v21 = vld [vmem:[#allocation305_spill] sm:$0xff] }
 0x30a   :  { %v1611_v27 = vpop.xlane.xlu1 %1610 }
 0x30b   :  { %v9601_v17 = vmul.f32 0.0051020407, %v1611_v27  ;;  %v9603_v23 = vpop.xlane.xlu0 %2784  ;;  %v9605_v11 = vadd.f32 %v2512_v60, %v2511_v34  ;;  %v2130_v7 = vsel %vm2006_vm0, %v1869_v59, 0.0  ;;  %v2385_v41 = vmul.f32 %v1868_v39, %v1868_v39  ;;  %v14205_v27 = vld [vmem:[#allocation307_spill] sm:$0xff]  ;;  %v14206_v34 = vld [vmem:[#allocation149_spill] sm:$0xff] }
 0x30c   :  { %14203 = vst [vmem:[#allocation422_spill] sm:$0xff] %v9603_v23  ;;  %v2386_v25 = vmul.f32 %v2130_v7, %v2130_v7  ;;  %v3671_v60 = vmul.f32 %v9408_v0, %v14206_v34  ;;  %v3800_v7 = vsub.f32 %v3544_v5, %v3672_v40  ;;  %6027 = vrsqrt.f32 %v3034_v43  ;;  %v14209_v34 = vld [vmem:[#allocation312_spill] sm:$0xff]  ;;  %v14210_v23 = vld [vmem:[#allocation317_spill] sm:$0xff] }
 0x30d   :  { %14202 = vst [vmem:[#allocation159_spill] sm:$0xff] %v9601_v17  ;;  %v1996_v32 = vsub.f32 %v14204_v21, %v9601_v17  ;;  %v1997_v22 = vsub.f32 %v14205_v27, %v9601_v17  ;;  %4254 = vperm.xlu0 %6013, %v9597_v31   ;;  %v6024_v31 = vpop.eup %6023  ;;  %v3289_v40 = vld [vmem:[%s12839_s2 + $0x10] sm:$0xff] }
 0x30e   :  { %v9619_v59 = vpop.xlane.xlu1 %2595  ;;  %v9624_v38 = vadd.f32 %v2386_v25, %v2385_v41  ;;  %v3799_v0 = vsub.f32 %v3543_v56, %v3671_v60  ;;  %v9645_v60 = vmul.f32 %v6024_v31, %v3289_v40  ;;  %v14217_v40 = vld [vmem:[#allocation320_spill] sm:$0xff] }
 0x30f   :  { %14207 = vst [vmem:[#allocation149_spill] sm:$0xff] %v9619_v59  ;;  %v1422_v39 = vpop.xlane.xlu0 %1421  ;;  %v2258_v21 = vsel %vm2006_vm0, %v1997_v22, 0.0  ;;  %v2513_v18 = vmul.f32 %v1996_v32, %v1996_v32 }
 0x310   :  { %v9628_v27 = vmul.f32 0.0051020407, %v1422_v39  ;;  %v2514_v17 = vmul.f32 %v2258_v21, %v2258_v21  ;;  %v6026_v39 = vpop.eup %6025 }
 0x311   :  { %4830 = vperm.xlu0 %6013, %v3800_v7   ;;  %v14213_v7 = vld [vmem:[#allocation313_spill] sm:$0xff] }
 0x312   :  { %14208 = vst [vmem:[#allocation423_spill] sm:$0xff] %v9628_v27  ;;  %v1870_v15 = vsub.f32 %v14209_v34, %v9628_v27  ;;  %v1871_v41 = vsub.f32 %v14210_v23, %v9628_v27  ;;  %v9634_v25 = vpop.xlane.xlu1 %2787  ;;  %v9639_v5 = vadd.f32 %v2514_v17, %v2513_v18  ;;  %v14214_v34 = vld [vmem:[#allocation318_spill] sm:$0xff]  ;;  %v3353_v17 = vld [vmem:[%s12839_s2 + $0x210] sm:$0xff] }
 0x313   :  { %14211 = vst [vmem:[#allocation424_spill] sm:$0xff] %v9634_v25  ;;  %v1614_v43 = vpop.xlane.xlu0 %1613  ;;  %4825 = vperm.xlu1 %6014, %v3799_v0  }
 0x314   :  { %v9641_v21 = vmul.f32 0.0051020407, %v1614_v43  ;;  %v2132_v32 = vsel %vm2006_vm0, %v1871_v41, 0.0  ;;  %v2387_v22 = vmul.f32 %v1870_v15, %v1870_v15 }
 0x315   :  { %v2388_v56 = vmul.f32 %v2132_v32, %v2132_v32  ;;  %v14218_v32 = vld [vmem:[#allocation322_spill] sm:$0xff] }
 0x316   :  { %14212 = vst [vmem:[#allocation425_spill] sm:$0xff] %v9641_v21  ;;  %v1998_v23 = vsub.f32 %v14213_v7, %v9641_v21  ;;  %v1999_v27 = vsub.f32 %v14214_v34, %v9641_v21  ;;  %v1425_v18 = vpop.xlane.xlu1 %1424  ;;  %v9665_v7 = vmul.f32 %v6026_v39, %v3353_v17  ;;  %v6028_v25 = vpop.eup %6027  ;;  %v14221_v39 = vld [vmem:[#allocation321_spill] sm:$0xff] }
 0x317   :  { %v9654_v0 = vmul.f32 0.0051020407, %v1425_v18  ;;  %3939 = vperm.xlu1 %6014, %v9645_v60   ;;  %v9657_v15 = vadd.f32 %v2388_v56, %v2387_v22  ;;  %v3290_v22 = vld [vmem:[%s12839_s2 + $0x18] sm:$0xff] }
 0x318   :  { %v2260_v31 = vsel %vm2006_vm0, %v1999_v27, 0.0  ;;  %v2515_v41 = vmul.f32 %v1998_v23, %v1998_v23  ;;  %14219 = vst [vmem:[#allocation428_spill] sm:$0xff] %v9665_v7  ;;  %v3418_v59 = vmul.f32 %v6028_v25, %v3290_v22 }
 0x319   :  { %14215 = vst [vmem:[#allocation426_spill] sm:$0xff] %v9654_v0  ;;  %14216 = vst [vmem:[#allocation427_spill] sm:$0xff] %v9657_v15  ;;  %v1872_v43 = vsub.f32 %v14217_v40, %v9654_v0  ;;  %v1873_v34 = vsub.f32 %v14218_v32, %v9654_v0  ;;  %v2516_v21 = vmul.f32 %v2260_v31, %v2260_v31  ;;  %v14222_v31 = vld [vmem:[#allocation323_spill] sm:$0xff] }
 0x31a   :  { %v1617_v18 = vpop.xlane.xlu1 %1616 }
 0x31b   :  { %v9670_v56 = vmul.f32 0.0051020407, %v1617_v18  ;;  %4259 = vperm.xlu1 %6014, %v9665_v7   ;;  %v9673_v23 = vadd.f32 %v2516_v21, %v2515_v41  ;;  %v2134_v27 = vsel %vm2006_vm0, %v1873_v34, 0.0  ;;  %v2389_v40 = vmul.f32 %v1872_v43, %v1872_v43  ;;  %v9687_v34 = vpop.xlane.xlu0 %2598 }
 0x31c   :  { %v2390_v32 = vmul.f32 %v2134_v27, %v2134_v27  ;;  %14223 = vst [vmem:[#allocation430_spill] sm:$0xff] %v9687_v34 }
 0x31d   :  { %14220 = vst [vmem:[#allocation429_spill] sm:$0xff] %v9670_v56  ;;  %v2000_v17 = vsub.f32 %v14221_v39, %v9670_v56  ;;  %v2001_v0 = vsub.f32 %v14222_v31, %v9670_v56  ;;  %v14225_v31 = vld [vmem:[#allocation348_spill] sm:$0xff] }
 0x31e   :  { %v9681_v15 = vadd.f32 %v2390_v32, %v2389_v40  ;;  %v9689_v43 = vpop.xlane.xlu1 %2601  ;;  %v2970_v25 = vmul.f32 0.0051020407, %v14225_v31  ;;  %v14229_v31 = vld [vmem:[#allocation349_spill] sm:$0xff] }
 0x31f   :  { %3944 = vperm.xlu1 %6014, %v3418_v59   ;;  %v2262_v18 = vsel %vm2006_vm0, %v2001_v0, 0.0  ;;  %v2517_v21 = vmul.f32 %v2000_v17, %v2000_v17  ;;  %v9692_v27 = vpop.xlane.xlu0 %2790 }
 0x320   :  { %v2518_v41 = vmul.f32 %v2262_v18, %v2262_v18  ;;  %14224 = vst [vmem:[#allocation431_spill] sm:$0xff] %v9692_v27  ;;  %v3098_v54 = vadd.f32 1e-05, %v2970_v25 }
 0x322   :  { %v9685_v7 = vadd.f32 %v2518_v41, %v2517_v21  ;;  %v9695_v40 = vpop.xlane.xlu1 %2793  ;;  %6029 = vrsqrt.f32 %v3098_v54  ;;  %v2907_v21 = vmul.f32 0.0051020407, %v14229_v31  ;;  %v14231_v54 = vld [vmem:[#allocation167_spill] sm:$0xff] }
 0x323   :  { %v9698_v0 = vpop.xlane.xlu0 %2604  ;;  %v3674_v39 = vmul.f32 %v3418_v59, %v14231_v54  ;;  %v14237_v54 = vld [vmem:[#allocation160_spill] sm:$0xff] }
 0x324   :  { %14226 = vst [vmem:[#allocation348_spill] sm:$0xff] %v9698_v0  ;;  %v3035_v56 = vadd.f32 1e-05, %v2907_v21  ;;  %v3673_v34 = vmul.f32 %v9645_v60, %v14237_v54  ;;  %v3355_v60 = vld [vmem:[%s12839_s2 + $0x220] sm:$0xff]  ;;  %v3292_v54 = vld [vmem:[%s12839_s2 + $0x28] sm:$0xff] }
 0x326   :  { %v9700_v32 = vpop.xlane.xlu1 %2607  ;;  %6031 = vrsqrt.f32 %v3035_v56 }
 0x327   :  { %v9702_v22 = vpop.xlane.xlu0 %2796 }
 0x328   :  { %14227 = vst [vmem:[#allocation432_spill] sm:$0xff] %v9702_v22  ;;  %v14232_v22 = vld [vmem:[#allocation350_spill] sm:$0xff] }
 0x32a   :  { %v9704_v17 = vpop.xlane.xlu1 %2799 }
 0x32c   :  { %v6030_v18 = vpop.eup %6029 }
 0x32e   :  { %v9710_v41 = vpop.xlane.xlu1 %2613 }
 0x330   :  { %2646 = vadd.xlane.f32.xlu0 %v9087_v48  ;;  %v9707_v48 = vpop.xlane.xlu0 %2610 }
 0x331   :  { %14228 = vst [vmem:[#allocation433_spill] sm:$0xff] %v9707_v48  ;;  %v3546_v48 = vld [vmem:[%s12840_s3 + $0x18] sm:$0xff] }
 0x332   :  { %v9726_v0 = vpop.xlane.xlu1 %2805  ;;  %v3802_v27 = vsub.f32 %v3546_v48, %v3674_v39  ;;  %v6032_v48 = vpop.eup %6031 }
 0x334   :  { %2838 = vadd.xlane.f32.xlu0 %v9101_v50  ;;  %v3354_v50 = vld [vmem:[%s12839_s2 + $0x218] sm:$0xff]  ;;  %v9723_v31 = vpop.xlane.xlu0 %2802 }
 0x335   :  { %v9716_v25 = vmul.f32 %v6030_v18, %v3354_v50  ;;  %14233 = vst [vmem:[#allocation167_spill] sm:$0xff] %v9723_v31  ;;  %v14234_v18 = vld [vmem:[#allocation298_spill] sm:$0xff] }
 0x336   :  { %v2908_v50 = vmul.f32 0.0051020407, %v14234_v18  ;;  %v9731_v21 = vpop.xlane.xlu1 %2619 }
 0x337   :  { %14230 = vst [vmem:[#allocation349_spill] sm:$0xff] %v9716_v25  ;;  %14236 = vst [vmem:[#allocation298_spill] sm:$0xff] %v9731_v21 }
 0x338   :  { %v9729_v59 = vpop.xlane.xlu0 %2616 }
 0x339   :  { %14235 = vst [vmem:[#allocation350_spill] sm:$0xff] %v9729_v59  ;;  %v14249_v59 = vld [vmem:[#allocation352_spill] sm:$0xff] }
 0x33a   :  { %v2972_v31 = vmul.f32 0.0051020407, %v14249_v59  ;;  %v14257_v59 = vld [vmem:[#allocation179_spill] sm:$0xff] }
 0x33c   :  { %v9738_v39 = vpop.xlane.xlu0 %2808 }
 0x33d   :  { %14238 = vst [vmem:[#allocation160_spill] sm:$0xff] %v9738_v39 }
 0x343   :  { %2649 = vadd.xlane.f32.xlu1 %v9113_v63  ;;  %v2971_v63 = vmul.f32 0.0051020407, %v14232_v22  ;;  %v3036_v22 = vadd.f32 1e-05, %v2908_v50  ;;  %v9750_v50 = vpop.xlane.xlu0 %2622 }
 0x344   :  { %14240 = vst [vmem:[#allocation435_spill] sm:$0xff] %v9750_v50 }
 0x347   :  { %2841 = vadd.xlane.f32.xlu1 %v9127_v10  ;;  %v3099_v10 = vadd.f32 1e-05, %v2971_v63  ;;  %v9740_v63 = vpop.xlane.xlu1 %2811 }
 0x348   :  { %14239 = vst [vmem:[#allocation434_spill] sm:$0xff] %v9740_v63 }
 0x349   :  { %6033 = vrsqrt.f32 %v3099_v10 }
 0x34a   :  { %4264 = vperm.xlu0 %6013, %v9716_v25   ;;  %v3545_v25 = vld [vmem:[%s12840_s3 + $0x10] sm:$0xff]  ;;  %6035 = vrsqrt.f32 %v3036_v22 }
 0x34b   :  { %v3801_v56 = vsub.f32 %v3545_v25, %v3673_v34  ;;  %v9753_v34 = vpop.xlane.xlu1 %2625 }
 0x34c   :  { %14241 = vst [vmem:[#allocation436_spill] sm:$0xff] %v9753_v34 }
 0x34e   :  { %4840 = vperm.xlu0 %6013, %v3802_v27   ;;  %v3291_v27 = vld [vmem:[%s12839_s2 + $0x20] sm:$0xff] }
 0x34f   :  { %v9745_v10 = vmul.f32 %v6032_v48, %v3291_v27  ;;  %v9763_v27 = vpop.xlane.xlu1 %2817 }
 0x350   :  { %14244 = vst [vmem:[#allocation439_spill] sm:$0xff] %v9763_v27 }
 0x353   :  { %v6034_v18 = vpop.eup %6033  ;;  %v9767_v39 = vpop.xlane.xlu1 %2631 }
 0x354   :  { %v9755_v25 = vmul.f32 %v6034_v18, %v3355_v60  ;;  %v6036_v22 = vpop.eup %6035  ;;  %14246 = vst [vmem:[#allocation441_spill] sm:$0xff] %v9767_v39 }
 0x355   :  { %v3420_v48 = vmul.f32 %v6036_v22, %v3292_v54 }
 0x356   :  { %14242 = vst [vmem:[#allocation437_spill] sm:$0xff] %v9755_v25 }
 0x357   :  { %v9772_v60 = vpop.xlane.xlu1 %2823 }
 0x358   :  { %4835 = vperm.xlu1 %6014, %v3801_v56   ;;  %v9761_v56 = vpop.xlane.xlu0 %2814  ;;  %14248 = vst [vmem:[#allocation443_spill] sm:$0xff] %v9772_v60 }
 0x359   :  { %14243 = vst [vmem:[#allocation438_spill] sm:$0xff] %v9761_v56 }
 0x35b   :  { %v9778_v22 = vpop.xlane.xlu1 %2637 }
 0x35c   :  { %3949 = vperm.xlu1 %6014, %v9745_v10   ;;  %v9765_v50 = vpop.xlane.xlu0 %2628  ;;  %14251 = vst [vmem:[#allocation444_spill] sm:$0xff] %v9778_v22 }
 0x35d   :  { %14245 = vst [vmem:[#allocation440_spill] sm:$0xff] %v9765_v50 }
 0x35f   :  { %v9782_v50 = vpop.xlane.xlu1 %2829 }
 0x360   :  { %4269 = vperm.xlu1 %6014, %v9755_v25   ;;  %v9770_v18 = vpop.xlane.xlu0 %2820  ;;  %v3100_v25 = vadd.f32 1e-05, %v2972_v31  ;;  %14253 = vst [vmem:[#allocation446_spill] sm:$0xff] %v9782_v50 }
 0x361   :  { %14247 = vst [vmem:[#allocation442_spill] sm:$0xff] %v9770_v18 }
 0x362   :  { %6037 = vrsqrt.f32 %v3100_v25  ;;  %v3548_v25 = vld [vmem:[%s12840_s3 + $0x28] sm:$0xff] }
 0x364   :  { %3954 = vperm.xlu1 %6014, %v3420_v48   ;;  %v9776_v56 = vpop.xlane.xlu0 %2634 }
 0x365   :  { %14250 = vst [vmem:[#allocation352_spill] sm:$0xff] %v9776_v56  ;;  %v3676_v56 = vmul.f32 %v3420_v48, %v14257_v59  ;;  %v14262_v59 = vld [vmem:[#allocation6_spill] sm:$0xff] }
 0x367   :  { %v3804_v22 = vsub.f32 %v3548_v25, %v3676_v56  ;;  %v14264_v25 = vld [vmem:[#allocation314_spill] sm:$0xff] }
 0x368   :  { %v9780_v54 = vpop.xlane.xlu0 %2826 }
 0x369   :  { %14252 = vst [vmem:[#allocation445_spill] sm:$0xff] %v9780_v54 }
 0x36c   :  { %v3930_v39 = vpop.permute.xlu0 %3929  ;;  %v6038_v18 = vpop.eup %6037 }
 0x36d   :  { %2652 = vadd.xlane.f32.xlu0 %v9143_v37  ;;  %v9784_v37 = vpop.permute.xlu1 %4249 }
 0x36e   :  { %14254 = vst [vmem:[#allocation447_spill] sm:$0xff] %v9784_v37  ;;  %v14259_v37 = vld [vmem:[#allocation353_spill] sm:$0xff] }
 0x371   :  { %2844 = vadd.xlane.f32.xlu0 %v9157_v9  ;;  %v3356_v9 = vld [vmem:[%s12839_s2 + $0x228] sm:$0xff]  ;;  %v3935_v54 = vpop.permute.xlu1 %3934 }
 0x372   :  { %v9791_v31 = vmul.f32 %v6038_v18, %v3356_v9  ;;  %v2973_v9 = vmul.f32 0.0051020407, %v9099_v2  ;;  %v4569_v34 = vmul.f32 %v3935_v54, %v14262_v59 }
 0x374   :  { %14256 = vst [vmem:[#allocation449_spill] sm:$0xff] %v9791_v31 }
 0x380   :  { %v9786_v27 = vpop.xlane.xlu0 %2640 }
 0x381   :  { %14255 = vst [vmem:[#allocation448_spill] sm:$0xff] %v9786_v27  ;;  %v2909_v27 = vmul.f32 0.0051020407, %v14259_v37  ;;  %v3101_v37 = vadd.f32 1e-05, %v2973_v9 }
 0x383   :  { %v3037_v48 = vadd.f32 1e-05, %v2909_v27 }
 0x384   :  { %v9798_v50 = vpop.xlane.xlu0 %2832 }
 0x385   :  { %14258 = vst [vmem:[#allocation179_spill] sm:$0xff] %v9798_v50  ;;  %6039 = vrsqrt.f32 %v3037_v48 }
 0x386   :  { %6041 = vrsqrt.f32 %v3101_v37 }
 0x387   :  { %4274 = vperm.xlu0 %6013, %v9791_v31   ;;  %v14263_v31 = vld [vmem:[#allocation8_spill] sm:$0xff] }
 0x388   :  { %2655 = vadd.xlane.f32.xlu1 %v9169_v3  ;;  %v4570_v63 = vmul.f32 %v3935_v54, %v14263_v31 }
 0x38b   :  { %4850 = vperm.xlu0 %6013, %v3804_v22   ;;  %v9802_v60 = vpop.xlane.xlu1 %2643 }
 0x38c   :  { %14260 = vst [vmem:[#allocation353_spill] sm:$0xff] %v9802_v60  ;;  %v9804_v18 = vpop.permute.xlu0 %4254  ;;  %2847 = vadd.xlane.f32.xlu1 %v9183_v4  ;;  %v2910_v60 = vmul.f32 0.0051020407, %v14264_v25  ;;  %v14266_v4 = vld [vmem:[#allocation4_spill] sm:$0xff]  ;;  %v14269_v25 = vld [vmem:[#allocation355_spill] sm:$0xff] }
 0x38d   :  { %14261 = vst [vmem:[#allocation450_spill] sm:$0xff] %v9804_v18  ;;  %v14265_v18 = vld [vmem:[#allocation2_spill] sm:$0xff]  ;;  %v4568_v27 = vmul.f32 %v3930_v39, %v14266_v4  ;;  %v2974_v4 = vmul.f32 0.0051020407, %v14269_v25 }
 0x38e   :  { %v4567_v21 = vmul.f32 %v3930_v39, %v14265_v18  ;;  %v14267_v39 = vld [vmem:[#allocation172_spill] sm:$0xff]  ;;  %v3547_v18 = vld [vmem:[%s12840_s3 + $0x20] sm:$0xff] }
 0x38f   :  { %v9810_v50 = vpop.xlane.xlu1 %2835  ;;  %v3675_v31 = vmul.f32 %v9745_v10, %v14267_v39 }
 0x390   :  { %v4831_v3 = vpop.permute.xlu0 %4830 }
 0x391   :  { %v5465_v56 = vadd.f32 %v4831_v3, %v4569_v34  ;;  %v5466_v22 = vadd.f32 %v4831_v3, %v4570_v63  ;;  %v3038_v63 = vadd.f32 1e-05, %v2910_v60  ;;  %v3803_v48 = vsub.f32 %v3547_v18, %v3675_v31  ;;  %v3293_v60 = vld [vmem:[%s12839_s2 + $0x30] sm:$0xff] }
 0x392   :  { %v3357_v3 = vld [vmem:[%s12839_s2 + $0x230] sm:$0xff] }
 0x393   :  { %5722 = vst [vmem:[%s12841_s4 + $0x10] sm:$0xff] %v5465_v56  ;;  %5723 = vst.msk [vmem:[%s12841_s4 + $0x18] sm:$0xff] %vm5720_vm1, %v5466_v22  ;;  %v4826_v2 = vpop.permute.xlu1 %4825  ;;  %6043 = vrsqrt.f32 %v3038_v63  ;;  %v3294_v22 = vld [vmem:[%s12839_s2 + $0x38] sm:$0xff]  ;;  %v14271_v31 = vld [vmem:[#allocation192_spill] sm:$0xff] }
 0x394   :  { %v5463_v54 = vadd.f32 %v4826_v2, %v4567_v21  ;;  %v5464_v34 = vadd.f32 %v4826_v2, %v4568_v27  ;;  %v6040_v21 = vpop.eup %6039  ;;  %v3102_v27 = vadd.f32 1e-05, %v2974_v4  ;;  %v3358_v63 = vld [vmem:[%s12839_s2 + $0x238] sm:$0xff] }
 0x395   :  { %v3421_v9 = vmul.f32 %v6040_v21, %v3293_v60  ;;  %v6042_v59 = vpop.eup %6041 }
 0x396   :  { %5719 = vst [vmem:[%s12841_s4] sm:$0xff] %v5463_v54  ;;  %5721 = vst.msk [vmem:[%s12841_s4 + $0x8] sm:$0xff] %vm5720_vm1, %v5464_v34  ;;  %v9840_v10 = vmul.f32 %v6042_v59, %v3357_v3  ;;  %6045 = vrsqrt.f32 %v3102_v27  ;;  %v14274_v3 = vld [vmem:[#allocation14_spill] sm:$0xff] }
 0x397   :  { %v3940_v2 = vpop.permute.xlu1 %3939 }
 0x398   :  { %14268 = vst [vmem:[#allocation6_spill] sm:$0xff] %v9840_v10 }
 0x39b   :  { %v9857_v21 = vpop.permute.xlu1 %4259 }
 0x39c   :  { %14272 = vst [vmem:[#allocation314_spill] sm:$0xff] %v9857_v21  ;;  %v14322_v21 = vld [vmem:[#allocation48_spill] sm:$0xff] }
 0x39d   :  { %4845 = vperm.xlu1 %6014, %v3803_v48   ;;  %v6044_v56 = vpop.eup %6043 }
 0x39e   :  { %v3422_v37 = vmul.f32 %v6044_v56, %v3294_v22  ;;  %v14275_v22 = vld [vmem:[#allocation16_spill] sm:$0xff] }
 0x39f   :  { %v3945_v60 = vpop.permute.xlu1 %3944 }
 0x3a0   :  { %v6046_v54 = vpop.eup %6045  ;;  %v3678_v18 = vmul.f32 %v3422_v37, %v14271_v31  ;;  %v4573_v56 = vmul.f32 %v3945_v60, %v14274_v3  ;;  %v4574_v25 = vmul.f32 %v3945_v60, %v14275_v22  ;;  %v14277_v60 = vld [vmem:[#allocation12_spill] sm:$0xff] }
 0x3a1   :  { %3959 = vperm.xlu1 %6014, %v3421_v9   ;;  %v9854_v39 = vmul.f32 %v6046_v54, %v3358_v63  ;;  %v2911_v54 = vmul.f32 0.0051020407, %v9141_v8  ;;  %v4572_v3 = vmul.f32 %v3940_v2, %v14277_v60 }
 0x3a3   :  { %14270 = vst [vmem:[#allocation8_spill] sm:$0xff] %v9854_v39  ;;  %v3039_v31 = vadd.f32 1e-05, %v2911_v54 }
 0x3a5   :  { %4279 = vperm.xlu1 %6014, %v9840_v10   ;;  %6047 = vrsqrt.f32 %v3039_v31 }
 0x3a9   :  { %3964 = vperm.xlu1 %6014, %v3422_v37  }
 0x3aa   :  { %2658 = vadd.xlane.f32.xlu0 %v9199_v46  ;;  %v3550_v46 = vld [vmem:[%s12840_s3 + $0x38] sm:$0xff] }
 0x3ab   :  { %v3806_v48 = vsub.f32 %v3550_v46, %v3678_v18  ;;  %v14276_v46 = vld [vmem:[#allocation10_spill] sm:$0xff] }
 0x3ae   :  { %2850 = vadd.xlane.f32.xlu0 %v9213_v30 }
 0x3bd   :  { %v9849_v34 = vpop.xlane.xlu0 %2646 }
 0x3c1   :  { %v9863_v30 = vpop.xlane.xlu0 %2838 }
 0x3c4   :  { %4284 = vperm.xlu0 %6013, %v9854_v39  }
 0x3c8   :  { %4860 = vperm.xlu0 %6013, %v3806_v48   ;;  %v4571_v48 = vmul.f32 %v3940_v2, %v14276_v46 }
 0x3c9   :  { %v9865_v59 = vpop.permute.xlu0 %4264 }
 0x3ca   :  { %14273 = vst [vmem:[#allocation2_spill] sm:$0xff] %v9865_v59  ;;  %v14339_v59 = vld [vmem:[#allocation54_spill] sm:$0xff] }
 0x3cd   :  { %v4841_v37 = vpop.permute.xlu0 %4840  ;;  %2661 = vadd.xlane.f32.xlu1 %v9225_v12  ;;  %v2975_v12 = vmul.f32 0.0051020407, %v9155_v51  ;;  %v14278_v51 = vld [vmem:[#allocation184_spill] sm:$0xff] }
 0x3ce   :  { %v5469_v4 = vadd.f32 %v4841_v37, %v4573_v56  ;;  %v5470_v27 = vadd.f32 %v4841_v37, %v4574_v25  ;;  %v3549_v37 = vld [vmem:[%s12840_s3 + $0x30] sm:$0xff] }
 0x3cf   :  { %v3103_v8 = vadd.f32 1e-05, %v2975_v12  ;;  %v3359_v12 = vld [vmem:[%s12839_s2 + $0x240] sm:$0xff] }
 0x3d0   :  { %5726 = vst [vmem:[%s12841_s4 + $0x30] sm:$0xff] %v5469_v4  ;;  %5727 = vst.msk [vmem:[%s12841_s4 + $0x38] sm:$0xff] %vm5720_vm1, %v5470_v27  ;;  %v9878_v63 = vpop.xlane.xlu1 %2649  ;;  %v6048_v4 = vpop.eup %6047  ;;  %v3295_v27 = vld [vmem:[%s12839_s2 + $0x40] sm:$0xff] }
 0x3d1   :  { %2853 = vadd.xlane.f32.xlu1 %v9239_v14  ;;  %6049 = vrsqrt.f32 %v3103_v8  ;;  %v3677_v14 = vmul.f32 %v3421_v9, %v14278_v51  ;;  %v3423_v54 = vmul.f32 %v6048_v4, %v3295_v27  ;;  %v2912_v8 = vmul.f32 0.0051020407, %v9166_v26  ;;  %v3552_v4 = vld [vmem:[%s12840_s3 + $0x48] sm:$0xff] }
 0x3d3   :  { %v3805_v2 = vsub.f32 %v3549_v37, %v3677_v14  ;;  %v3040_v46 = vadd.f32 1e-05, %v2912_v8  ;;  %v14282_v37 = vld [vmem:[#allocation204_spill] sm:$0xff]  ;;  %v14284_v8 = vld [vmem:[#allocation22_spill] sm:$0xff] }
 0x3d4   :  { %v9882_v18 = vpop.xlane.xlu1 %2841 }
 0x3d5   :  { %6051 = vrsqrt.f32 %v3040_v46 }
 0x3d8   :  { %v4836_v56 = vpop.permute.xlu1 %4835 }
 0x3d9   :  { %v5467_v22 = vadd.f32 %v4836_v56, %v4571_v48  ;;  %v5468_v25 = vadd.f32 %v4836_v56, %v4572_v3  ;;  %v2976_v48 = vmul.f32 0.0051020407, %v9180_v19 }
 0x3db   :  { %5724 = vst [vmem:[%s12841_s4 + $0x20] sm:$0xff] %v5467_v22  ;;  %5725 = vst.msk [vmem:[%s12841_s4 + $0x28] sm:$0xff] %vm5720_vm1, %v5468_v25  ;;  %v6050_v31 = vpop.eup %6049  ;;  %v3104_v60 = vadd.f32 1e-05, %v2976_v48  ;;  %v14285_v48 = vld [vmem:[#allocation24_spill] sm:$0xff] }
 0x3dc   :  { %v9904_v9 = vmul.f32 %v6050_v31, %v3359_v12  ;;  %v3950_v3 = vpop.permute.xlu1 %3949 }
 0x3dd   :  { %6053 = vrsqrt.f32 %v3104_v60 }
 0x3de   :  { %14279 = vst [vmem:[#allocation4_spill] sm:$0xff] %v9904_v9 }
 0x3df   :  { %v6052_v56 = vpop.eup %6051 }
 0x3e0   :  { %v9915_v51 = vpop.permute.xlu1 %4269 }
 0x3e1   :  { %14280 = vst [vmem:[#allocation172_spill] sm:$0xff] %v9915_v51 }
 0x3e2   :  { %4855 = vperm.xlu1 %6014, %v3805_v2  }
 0x3e4   :  { %v3955_v27 = vpop.permute.xlu1 %3954 }
 0x3e5   :  { %v4577_v46 = vmul.f32 %v3955_v27, %v14284_v8  ;;  %v4578_v60 = vmul.f32 %v3955_v27, %v14285_v48 }
 0x3e6   :  { %3969 = vperm.xlu1 %6014, %v3423_v54  }
 0x3e7   :  { %2664 = vadd.xlane.f32.xlu0 %v9255_v28  ;;  %v3296_v28 = vld [vmem:[%s12839_s2 + $0x48] sm:$0xff]  ;;  %v6054_v26 = vpop.eup %6053 }
 0x3e8   :  { %v3424_v25 = vmul.f32 %v6052_v56, %v3296_v28 }
 0x3ea   :  { %4289 = vperm.xlu1 %6014, %v9904_v9   ;;  %v3680_v2 = vmul.f32 %v3424_v25, %v14282_v37  ;;  %v2977_v37 = vmul.f32 0.0051020407, %v9211_v24  ;;  %v3551_v24 = vld [vmem:[%s12840_s3 + $0x40] sm:$0xff] }
 0x3eb   :  { %2856 = vadd.xlane.f32.xlu0 %v9269_v29  ;;  %v3360_v29 = vld [vmem:[%s12839_s2 + $0x248] sm:$0xff] }
 0x3ec   :  { %v9922_v14 = vmul.f32 %v6054_v26, %v3360_v29  ;;  %v3808_v12 = vsub.f32 %v3552_v4, %v3680_v2  ;;  %v3105_v4 = vadd.f32 1e-05, %v2977_v37 }
 0x3ee   :  { %14281 = vst [vmem:[#allocation355_spill] sm:$0xff] %v9922_v14 }
 0x3fa   :  { %v9910_v22 = vpop.xlane.xlu0 %2652 }
 0x3fe   :  { %v9920_v19 = vpop.xlane.xlu0 %2844 }
 0x401   :  { %3974 = vperm.xlu0 %6013, %v3424_v25   ;;  %v2913_v25 = vmul.f32 0.0051020407, %v9197_v6 }
 0x403   :  { %v3041_v29 = vadd.f32 1e-05, %v2913_v25 }
 0x405   :  { %4294 = vperm.xlu0 %6013, %v9922_v14   ;;  %6055 = vrsqrt.f32 %v3041_v29  ;;  %v3361_v29 = vld [vmem:[%s12839_s2 + $0x250] sm:$0xff] }
 0x406   :  { %v9929_v31 = vpop.permute.xlu0 %4274  ;;  %6057 = vrsqrt.f32 %v3105_v4  ;;  %v2914_v4 = vmul.f32 0.0051020407, %v9222_v57  ;;  %v3298_v57 = vld [vmem:[%s12839_s2 + $0x58] sm:$0xff] }
 0x407   :  { %14283 = vst [vmem:[#allocation192_spill] sm:$0xff] %v9929_v31 }
 0x409   :  { %4870 = vperm.xlu0 %6013, %v3808_v12   ;;  %v14286_v12 = vld [vmem:[#allocation18_spill] sm:$0xff] }
 0x40a   :  { %v4851_v56 = vpop.permute.xlu0 %4850  ;;  %v4575_v8 = vmul.f32 %v3950_v3, %v14286_v12  ;;  %v3042_v12 = vadd.f32 1e-05, %v2914_v4 }
 0x40b   :  { %v5473_v28 = vadd.f32 %v4851_v56, %v4577_v46  ;;  %v5474_v26 = vadd.f32 %v4851_v56, %v4578_v60  ;;  %v14287_v46 = vld [vmem:[#allocation20_spill] sm:$0xff] }
 0x40c   :  { %v4576_v48 = vmul.f32 %v3950_v3, %v14287_v46  ;;  %6059 = vrsqrt.f32 %v3042_v12  ;;  %v14295_v12 = vld [vmem:[#allocation32_spill] sm:$0xff] }
 0x40d   :  { %5730 = vst [vmem:[%s12841_s4 + $0x50] sm:$0xff] %v5473_v28  ;;  %5731 = vst.msk [vmem:[%s12841_s4 + $0x58] sm:$0xff] %vm5720_vm1, %v5474_v26 }
 0x40e   :  { %2667 = vadd.xlane.f32.xlu1 %v9281_v61  ;;  %v14288_v61 = vld [vmem:[#allocation196_spill] sm:$0xff] }
 0x40f   :  { %v3679_v56 = vmul.f32 %v3423_v54, %v14288_v61  ;;  %v6056_v3 = vpop.eup %6055  ;;  %v3297_v54 = vld [vmem:[%s12839_s2 + $0x50] sm:$0xff] }
 0x410   :  { %v3425_v26 = vmul.f32 %v6056_v3, %v3297_v54  ;;  %v6058_v25 = vpop.eup %6057  ;;  %v14293_v3 = vld [vmem:[#allocation216_spill] sm:$0xff] }
 0x411   :  { %v9968_v37 = vmul.f32 %v6058_v25, %v3361_v29  ;;  %v3554_v25 = vld [vmem:[%s12840_s3 + $0x58] sm:$0xff]  ;;  %v14294_v29 = vld [vmem:[#allocation30_spill] sm:$0xff] }
 0x412   :  { %2859 = vadd.xlane.f32.xlu1 %v9295_v52  ;;  %v3807_v52 = vsub.f32 %v3551_v24, %v3679_v56 }
 0x413   :  { %14289 = vst [vmem:[#allocation14_spill] sm:$0xff] %v9968_v37 }
 0x415   :  { %v9944_v2 = vpop.xlane.xlu1 %2655 }
 0x416   :  { %v6060_v61 = vpop.eup %6059 }
 0x419   :  { %v9946_v27 = vpop.xlane.xlu1 %2847 }
 0x41d   :  { %v4846_v60 = vpop.permute.xlu1 %4845 }
 0x41e   :  { %v5471_v6 = vadd.f32 %v4846_v60, %v4575_v8  ;;  %v5472_v28 = vadd.f32 %v4846_v60, %v4576_v48  ;;  %v2978_v8 = vmul.f32 0.0051020407, %v9236_v20  ;;  %v3362_v20 = vld [vmem:[%s12839_s2 + $0x258] sm:$0xff] }
 0x420   :  { %5728 = vst [vmem:[%s12841_s4 + $0x40] sm:$0xff] %v5471_v6  ;;  %5729 = vst.msk [vmem:[%s12841_s4 + $0x48] sm:$0xff] %vm5720_vm1, %v5472_v28  ;;  %v3106_v46 = vadd.f32 1e-05, %v2978_v8  ;;  %v3426_v6 = vmul.f32 %v6060_v61, %v3298_v57 }
 0x421   :  { %v3960_v48 = vpop.permute.xlu1 %3959 }
 0x422   :  { %6061 = vrsqrt.f32 %v3106_v46  ;;  %v3682_v54 = vmul.f32 %v3426_v6, %v14293_v3 }
 0x423   :  { %4865 = vperm.xlu1 %6014, %v3807_v52  }
 0x425   :  { %v9976_v56 = vpop.permute.xlu1 %4279 }
 0x426   :  { %14290 = vst [vmem:[#allocation16_spill] sm:$0xff] %v9976_v56  ;;  %v3810_v56 = vsub.f32 %v3554_v25, %v3682_v54  ;;  %v14296_v25 = vld [vmem:[#allocation208_spill] sm:$0xff] }
 0x427   :  { %3979 = vperm.xlu1 %6014, %v3425_v26  }
 0x428   :  { %2670 = vadd.xlane.f32.xlu0 %v9311_v47 }
 0x429   :  { %v3965_v28 = vpop.permute.xlu1 %3964 }
 0x42a   :  { %v4581_v4 = vmul.f32 %v3965_v28, %v14294_v29  ;;  %v4582_v8 = vmul.f32 %v3965_v28, %v14295_v12  ;;  %v3681_v29 = vmul.f32 %v3425_v26, %v14296_v25  ;;  %v2980_v25 = vmul.f32 0.0051020407, %v9292_v36 }
 0x42b   :  { %4299 = vperm.xlu1 %6014, %v9968_v37  }
 0x42c   :  { %2862 = vadd.xlane.f32.xlu0 %v9325_v53  ;;  %v6062_v53 = vpop.eup %6061 }
 0x42d   :  { %v9988_v52 = vmul.f32 %v6062_v53, %v3362_v20  ;;  %v2979_v20 = vmul.f32 0.0051020407, %v9267_v55 }
 0x42f   :  { %14292 = vst [vmem:[#allocation12_spill] sm:$0xff] %v9988_v52  ;;  %v3107_v28 = vadd.f32 1e-05, %v2979_v20  ;;  %v2916_v20 = vmul.f32 0.0051020407, %v9278_v44 }
 0x437   :  { %v9974_v60 = vpop.xlane.xlu0 %2658 }
 0x43b   :  { %v9981_v47 = vpop.xlane.xlu0 %2850 }
 0x442   :  { %3984 = vperm.xlu0 %6013, %v3426_v6   ;;  %v2915_v6 = vmul.f32 0.0051020407, %v9253_v58 }
 0x443   :  { %v9986_v24 = vpop.permute.xlu0 %4284 }
 0x444   :  { %14291 = vst [vmem:[#allocation10_spill] sm:$0xff] %v9986_v24  ;;  %v3043_v53 = vadd.f32 1e-05, %v2915_v6  ;;  %v3363_v6 = vld [vmem:[%s12839_s2 + $0x260] sm:$0xff] }
 0x446   :  { %4304 = vperm.xlu0 %6013, %v9988_v52   ;;  %6063 = vrsqrt.f32 %v3043_v53 }
 0x447   :  { %v4861_v46 = vpop.permute.xlu0 %4860  ;;  %6065 = vrsqrt.f32 %v3107_v28  ;;  %v3044_v28 = vadd.f32 1e-05, %v2916_v20 }
 0x448   :  { %v5477_v61 = vadd.f32 %v4861_v46, %v4581_v4  ;;  %v5478_v57 = vadd.f32 %v4861_v46, %v4582_v8  ;;  %v14298_v4 = vld [vmem:[#allocation28_spill] sm:$0xff] }
 0x449   :  { %6067 = vrsqrt.f32 %v3044_v28 }
 0x44a   :  { %5734 = vst [vmem:[%s12841_s4 + $0x70] sm:$0xff] %v5477_v61  ;;  %5735 = vst.msk [vmem:[%s12841_s4 + $0x78] sm:$0xff] %vm5720_vm1, %v5478_v57  ;;  %4880 = vperm.xlu0 %6013, %v3810_v56   ;;  %v14297_v56 = vld [vmem:[#allocation26_spill] sm:$0xff] }
 0x44b   :  { %v4579_v58 = vmul.f32 %v3960_v48, %v14297_v56  ;;  %v3299_v57 = vld [vmem:[%s12839_s2 + $0x60] sm:$0xff] }
 0x44f   :  { %2673 = vadd.xlane.f32.xlu1 %v9338_v33  ;;  %v3553_v33 = vld [vmem:[%s12840_s3 + $0x50] sm:$0xff] }
 0x450   :  { %v3809_v8 = vsub.f32 %v3553_v33, %v3681_v29  ;;  %v6064_v55 = vpop.eup %6063  ;;  %v3108_v29 = vadd.f32 1e-05, %v2980_v25 }
 0x451   :  { %v3427_v26 = vmul.f32 %v6064_v55, %v3299_v57 }
 0x452   :  { %6069 = vrsqrt.f32 %v3108_v29 }
 0x453   :  { %2865 = vadd.xlane.f32.xlu1 %v9353_v13  ;;  %v4580_v13 = vmul.f32 %v3960_v48, %v14298_v4  ;;  %v6066_v48 = vpop.eup %6065 }
 0x454   :  { %v10032_v53 = vmul.f32 %v6066_v48, %v3363_v6  ;;  %v14304_v48 = vld [vmem:[#allocation40_spill] sm:$0xff] }
 0x456   :  { %14299 = vst [vmem:[#allocation184_spill] sm:$0xff] %v10032_v53 }
 0x45a   :  { %v10008_v3 = vpop.xlane.xlu1 %2661 }
 0x45e   :  { %v10010_v54 = vpop.xlane.xlu1 %2853 }
 0x462   :  { %v4856_v12 = vpop.permute.xlu1 %4855 }
 0x463   :  { %v5475_v46 = vadd.f32 %v4856_v12, %v4579_v58  ;;  %v5476_v61 = vadd.f32 %v4856_v12, %v4580_v13  ;;  %v6068_v58 = vpop.eup %6067 }
 0x464   :  { %4875 = vperm.xlu1 %6014, %v3809_v8   ;;  %v6070_v13 = vpop.eup %6069  ;;  %v14302_v8 = vld [vmem:[#allocation228_spill] sm:$0xff] }
 0x465   :  { %5732 = vst [vmem:[%s12841_s4 + $0x60] sm:$0xff] %v5475_v46  ;;  %5733 = vst.msk [vmem:[%s12841_s4 + $0x68] sm:$0xff] %vm5720_vm1, %v5476_v61  ;;  %v3556_v46 = vld [vmem:[%s12840_s3 + $0x68] sm:$0xff]  ;;  %v14303_v61 = vld [vmem:[#allocation38_spill] sm:$0xff] }
 0x468   :  { %3989 = vperm.xlu1 %6014, %v3427_v26  }
 0x469   :  { %2676 = vadd.xlane.f32.xlu0 %v9368_v35  ;;  %v3300_v35 = vld [vmem:[%s12839_s2 + $0x68] sm:$0xff] }
 0x46a   :  { %v3428_v4 = vmul.f32 %v6068_v58, %v3300_v35  ;;  %v14305_v58 = vld [vmem:[#allocation381_spill] sm:$0xff]  ;;  %v3970_v35 = vpop.permute.xlu1 %3969 }
 0x46c   :  { %4309 = vperm.xlu1 %6014, %v10032_v53   ;;  %v3684_v55 = vmul.f32 %v3428_v4, %v14302_v8  ;;  %v14308_v8 = vld [vmem:[#allocation371_spill] sm:$0xff] }
 0x46d   :  { %2868 = vadd.xlane.f32.xlu0 %v9380_v62  ;;  %v3364_v62 = vld [vmem:[%s12839_s2 + $0x268] sm:$0xff] }
 0x46e   :  { %v10050_v12 = vmul.f32 %v6070_v13, %v3364_v62  ;;  %v3812_v29 = vsub.f32 %v3556_v46, %v3684_v55  ;;  %v14307_v13 = vld [vmem:[#allocation384_spill] sm:$0xff]  ;;  %v2981_v55 = vmul.f32 0.0051020407, %v14308_v8  ;;  %v10070_v46 = vpop.permute.xlu1 %4289 }
 0x46f   :  { %14309 = vst [vmem:[#allocation24_spill] sm:$0xff] %v10070_v46  ;;  %v14321_v46 = vld [vmem:[#allocation46_spill] sm:$0xff] }
 0x470   :  { %14301 = vst [vmem:[#allocation22_spill] sm:$0xff] %v10050_v12 }
 0x474   :  { %v10038_v33 = vpop.xlane.xlu0 %2664 }
 0x478   :  { %v10040_v56 = vpop.xlane.xlu0 %2856 }
 0x480   :  { %v3975_v44 = vpop.permute.xlu0 %3974 }
 0x481   :  { %v4585_v57 = vmul.f32 %v3975_v44, %v14303_v61  ;;  %v4586_v6 = vmul.f32 %v3975_v44, %v14304_v48  ;;  %v14306_v44 = vld [vmem:[#allocation369_spill] sm:$0xff]  ;;  %v3109_v61 = vadd.f32 1e-05, %v2981_v55 }
 0x483   :  { %3994 = vperm.xlu0 %6013, %v3428_v4   ;;  %v2917_v4 = vmul.f32 0.0051020407, %v14306_v44 }
 0x484   :  { %v10048_v36 = vpop.permute.xlu0 %4294 }
 0x485   :  { %14300 = vst [vmem:[#allocation204_spill] sm:$0xff] %v10048_v36  ;;  %v3045_v62 = vadd.f32 1e-05, %v2917_v4 }
 0x487   :  { %4314 = vperm.xlu0 %6013, %v10050_v12   ;;  %6071 = vrsqrt.f32 %v3045_v62 }
 0x488   :  { %v4871_v20 = vpop.permute.xlu0 %4870  ;;  %6073 = vrsqrt.f32 %v3109_v61  ;;  %v3301_v61 = vld [vmem:[%s12839_s2 + $0x70] sm:$0xff] }
 0x489   :  { %v5481_v28 = vadd.f32 %v4871_v20, %v4585_v57  ;;  %v5482_v25 = vadd.f32 %v4871_v20, %v4586_v6  ;;  %v14310_v6 = vld [vmem:[#allocation220_spill] sm:$0xff] }
 0x48a   :  { %v3683_v20 = vmul.f32 %v3427_v26, %v14310_v6  ;;  %v3365_v6 = vld [vmem:[%s12839_s2 + $0x270] sm:$0xff] }
 0x48b   :  { %5738 = vst [vmem:[%s12841_s4 + $0x90] sm:$0xff] %v5481_v28  ;;  %5739 = vst.msk [vmem:[%s12841_s4 + $0x98] sm:$0xff] %vm5720_vm1, %v5482_v25  ;;  %4890 = vperm.xlu0 %6013, %v3812_v29   ;;  %v3555_v28 = vld [vmem:[%s12840_s3 + $0x60] sm:$0xff] }
 0x48c   :  { %v14311_v25 = vld [vmem:[#allocation34_spill] sm:$0xff] }
 0x48d   :  { %v4583_v29 = vmul.f32 %v3970_v35, %v14311_v25  ;;  %v14315_v25 = vld [vmem:[#allocation372_spill] sm:$0xff] }
 0x490   :  { %2679 = vadd.xlane.f32.xlu1 %v14305_v58  ;;  %v14312_v58 = vld [vmem:[#allocation36_spill] sm:$0xff] }
 0x491   :  { %v4584_v44 = vmul.f32 %v3970_v35, %v14312_v58  ;;  %v6072_v8 = vpop.eup %6071  ;;  %v14316_v58 = vld [vmem:[#allocation392_spill] sm:$0xff] }
 0x492   :  { %v3429_v26 = vmul.f32 %v6072_v8, %v3301_v61  ;;  %v6074_v35 = vpop.eup %6073 }
 0x494   :  { %2871 = vadd.xlane.f32.xlu1 %v14307_v13  ;;  %v3811_v13 = vsub.f32 %v3555_v28, %v3683_v20  ;;  %v14313_v20 = vld [vmem:[#allocation389_spill] sm:$0xff]  ;;  %v10096_v28 = vmul.f32 %v6074_v35, %v3365_v6 }
 0x495   :  { %v3302_v35 = vld [vmem:[%s12839_s2 + $0x78] sm:$0xff] }
 0x496   :  { %14314 = vst [vmem:[#allocation18_spill] sm:$0xff] %v10096_v28 }
 0x49b   :  { %v10072_v57 = vpop.xlane.xlu1 %2667 }
 0x49f   :  { %v10074_v48 = vpop.xlane.xlu1 %2859 }
 0x4a3   :  { %v4866_v4 = vpop.permute.xlu1 %4865 }
 0x4a4   :  { %v5479_v62 = vadd.f32 %v4866_v4, %v4583_v29  ;;  %v5480_v55 = vadd.f32 %v4866_v4, %v4584_v44  ;;  %v2918_v29 = vmul.f32 0.0051020407, %v14315_v25  ;;  %v14317_v4 = vld [vmem:[#allocation374_spill] sm:$0xff] }
 0x4a5   :  { %4885 = vperm.xlu1 %6014, %v3811_v13   ;;  %v2982_v13 = vmul.f32 0.0051020407, %v14317_v4  ;;  %v14320_v4 = vld [vmem:[#allocation240_spill] sm:$0xff] }
 0x4a6   :  { %5736 = vst [vmem:[%s12841_s4 + $0x80] sm:$0xff] %v5479_v62  ;;  %5737 = vst.msk [vmem:[%s12841_s4 + $0x88] sm:$0xff] %vm5720_vm1, %v5480_v55  ;;  %v3046_v44 = vadd.f32 1e-05, %v2918_v29  ;;  %v3366_v29 = vld [vmem:[%s12839_s2 + $0x278] sm:$0xff] }
 0x4a7   :  { %v3110_v8 = vadd.f32 1e-05, %v2982_v13 }
 0x4a8   :  { %6075 = vrsqrt.f32 %v3046_v44 }
 0x4a9   :  { %3999 = vperm.xlu1 %6014, %v3429_v26   ;;  %6077 = vrsqrt.f32 %v3110_v8  ;;  %v3558_v8 = vld [vmem:[%s12840_s3 + $0x78] sm:$0xff] }
 0x4aa   :  { %2682 = vadd.xlane.f32.xlu0 %v14313_v20 }
 0x4ad   :  { %4319 = vperm.xlu1 %6014, %v10096_v28   ;;  %v14340_v28 = vld [vmem:[#allocation56_spill] sm:$0xff] }
 0x4ae   :  { %2874 = vadd.xlane.f32.xlu0 %v14316_v58 }
 0x4b2   :  { %v6076_v61 = vpop.eup %6075 }
 0x4b3   :  { %v3430_v20 = vmul.f32 %v6076_v61, %v3302_v35  ;;  %v6078_v25 = vpop.eup %6077 }
 0x4b4   :  { %v10114_v44 = vmul.f32 %v6078_v25, %v3366_v29  ;;  %v14325_v25 = vld [vmem:[#allocation397_spill] sm:$0xff]  ;;  %v14326_v29 = vld [vmem:[#allocation379_spill] sm:$0xff] }
 0x4b5   :  { %v10102_v62 = vpop.xlane.xlu0 %2670  ;;  %v3686_v13 = vmul.f32 %v3430_v20, %v14320_v4  ;;  %v2983_v4 = vmul.f32 0.0051020407, %v14326_v29 }
 0x4b6   :  { %14319 = vst [vmem:[#allocation196_spill] sm:$0xff] %v10114_v44 }
 0x4b7   :  { %v3814_v31 = vsub.f32 %v3558_v8, %v3686_v13 }
 0x4b9   :  { %v10104_v55 = vpop.xlane.xlu0 %2862 }
 0x4c1   :  { %v3985_v6 = vpop.permute.xlu0 %3984 }
 0x4c2   :  { %v4589_v51 = vmul.f32 %v3985_v6, %v14321_v46  ;;  %v4590_v61 = vmul.f32 %v3985_v6, %v14322_v21  ;;  %v3980_v46 = vpop.permute.xlu1 %3979  ;;  %v14324_v21 = vld [vmem:[#allocation377_spill] sm:$0xff] }
 0x4c3   :  { %v2919_v6 = vmul.f32 0.0051020407, %v14324_v21 }
 0x4c4   :  { %4004 = vperm.xlu0 %6013, %v3430_v20   ;;  %v14323_v20 = vld [vmem:[#allocation394_spill] sm:$0xff] }
 0x4c5   :  { %v10112_v58 = vpop.permute.xlu0 %4304 }
 0x4c6   :  { %14318 = vst [vmem:[#allocation20_spill] sm:$0xff] %v10112_v58  ;;  %v10134_v13 = vpop.permute.xlu1 %4299 }
 0x4c7   :  { %14327 = vst [vmem:[#allocation216_spill] sm:$0xff] %v10134_v13 }
 0x4c8   :  { %4324 = vperm.xlu0 %6013, %v10114_v44  }
 0x4c9   :  { %v4881_v35 = vpop.permute.xlu0 %4880 }
 0x4ca   :  { %v5485_v36 = vadd.f32 %v4881_v35, %v4589_v51  ;;  %v5486_v24 = vadd.f32 %v4881_v35, %v4590_v61  ;;  %v3047_v51 = vadd.f32 1e-05, %v2919_v6  ;;  %v3557_v35 = vld [vmem:[%s12840_s3 + $0x70] sm:$0xff] }
 0x4cb   :  { %v14330_v6 = vld [vmem:[#allocation44_spill] sm:$0xff] }
 0x4cc   :  { %5742 = vst [vmem:[%s12841_s4 + $0xb0] sm:$0xff] %v5485_v36  ;;  %5743 = vst.msk [vmem:[%s12841_s4 + $0xb8] sm:$0xff] %vm5720_vm1, %v5486_v24  ;;  %4900 = vperm.xlu0 %6013, %v3814_v31   ;;  %6079 = vrsqrt.f32 %v3047_v51  ;;  %v3111_v36 = vadd.f32 1e-05, %v2983_v4  ;;  %v14328_v31 = vld [vmem:[#allocation232_spill] sm:$0xff] }
 0x4cd   :  { %v3685_v24 = vmul.f32 %v3429_v26, %v14328_v31  ;;  %v3367_v31 = vld [vmem:[%s12839_s2 + $0x280] sm:$0xff] }
 0x4ce   :  { %6081 = vrsqrt.f32 %v3111_v36  ;;  %v3303_v36 = vld [vmem:[%s12839_s2 + $0x80] sm:$0xff] }
 0x4cf   :  { %v3813_v58 = vsub.f32 %v3557_v35, %v3685_v24  ;;  %v14331_v24 = vld [vmem:[#allocation401_spill] sm:$0xff] }
 0x4d1   :  { %2685 = vadd.xlane.f32.xlu1 %v14323_v20  ;;  %v14329_v20 = vld [vmem:[#allocation42_spill] sm:$0xff] }
 0x4d2   :  { %v4587_v21 = vmul.f32 %v3980_v46, %v14329_v20 }
 0x4d5   :  { %2877 = vadd.xlane.f32.xlu1 %v14325_v25  ;;  %v4588_v25 = vmul.f32 %v3980_v46, %v14330_v6 }
 0x4d6   :  { %v6080_v13 = vpop.eup %6079 }
 0x4d7   :  { %v3431_v26 = vmul.f32 %v6080_v13, %v3303_v36 }
 0x4d8   :  { %v6082_v46 = vpop.eup %6081 }
 0x4d9   :  { %v10160_v35 = vmul.f32 %v6082_v46, %v3367_v31  ;;  %v3304_v46 = vld [vmem:[%s12839_s2 + $0x88] sm:$0xff] }
 0x4db   :  { %14332 = vst [vmem:[#allocation30_spill] sm:$0xff] %v10160_v35 }
 0x4dc   :  { %v10136_v8 = vpop.xlane.xlu1 %2673 }
 0x4e0   :  { %v10138_v61 = vpop.xlane.xlu1 %2865 }
 0x4e4   :  { %v4876_v29 = vpop.permute.xlu1 %4875 }
 0x4e5   :  { %v5483_v51 = vadd.f32 %v4876_v29, %v4587_v21  ;;  %v5484_v4 = vadd.f32 %v4876_v29, %v4588_v25  ;;  %v14334_v21 = vld [vmem:[#allocation404_spill] sm:$0xff]  ;;  %v14335_v25 = vld [vmem:[#allocation383_spill] sm:$0xff] }
 0x4e6   :  { %4895 = vperm.xlu1 %6014, %v3813_v58   ;;  %v14333_v58 = vld [vmem:[#allocation380_spill] sm:$0xff]  ;;  %v2984_v29 = vmul.f32 0.0051020407, %v14335_v25 }
 0x4e7   :  { %5740 = vst [vmem:[%s12841_s4 + $0xa0] sm:$0xff] %v5483_v51  ;;  %5741 = vst.msk [vmem:[%s12841_s4 + $0xa8] sm:$0xff] %vm5720_vm1, %v5484_v4  ;;  %v2920_v20 = vmul.f32 0.0051020407, %v14333_v58  ;;  %v14338_v25 = vld [vmem:[#allocation252_spill] sm:$0xff] }
 0x4e8   :  { %v3112_v13 = vadd.f32 1e-05, %v2984_v29 }
 0x4e9   :  { %v3048_v6 = vadd.f32 1e-05, %v2920_v20  ;;  %v3368_v20 = vld [vmem:[%s12839_s2 + $0x288] sm:$0xff] }
 0x4ea   :  { %4009 = vperm.xlu1 %6014, %v3431_v26  }
 0x4eb   :  { %2688 = vadd.xlane.f32.xlu0 %v14331_v24  ;;  %6083 = vrsqrt.f32 %v3048_v6 }
 0x4ec   :  { %6085 = vrsqrt.f32 %v3112_v13  ;;  %v3560_v13 = vld [vmem:[%s12840_s3 + $0x88] sm:$0xff] }
 0x4ee   :  { %4329 = vperm.xlu1 %6014, %v10160_v35  }
 0x4ef   :  { %2880 = vadd.xlane.f32.xlu0 %v14334_v21 }
 0x4f5   :  { %v6084_v36 = vpop.eup %6083 }
 0x4f6   :  { %v10166_v51 = vpop.xlane.xlu0 %2676  ;;  %v3432_v24 = vmul.f32 %v6084_v36, %v3304_v46  ;;  %v6086_v58 = vpop.eup %6085 }
 0x4f7   :  { %v10178_v6 = vmul.f32 %v6086_v58, %v3368_v20 }
 0x4f8   :  { %v3688_v29 = vmul.f32 %v3432_v24, %v14338_v25 }
 0x4f9   :  { %14337 = vst [vmem:[#allocation208_spill] sm:$0xff] %v10178_v6 }
 0x4fa   :  { %v10168_v4 = vpop.xlane.xlu0 %2868  ;;  %v3816_v9 = vsub.f32 %v3560_v13, %v3688_v29  ;;  %v14345_v13 = vld [vmem:[#allocation50_spill] sm:$0xff] }
 0x502   :  { %v3995_v31 = vpop.permute.xlu0 %3994 }
 0x503   :  { %v4593_v35 = vmul.f32 %v3995_v31, %v14339_v59  ;;  %v4594_v36 = vmul.f32 %v3995_v31, %v14340_v28  ;;  %v3990_v59 = vpop.permute.xlu1 %3989  ;;  %v14341_v28 = vld [vmem:[#allocation388_spill] sm:$0xff] }
 0x504   :  { %v2921_v31 = vmul.f32 0.0051020407, %v14341_v28 }
 0x505   :  { %4014 = vperm.xlu0 %6013, %v3432_v24   ;;  %v14342_v24 = vld [vmem:[#allocation391_spill] sm:$0xff] }
 0x506   :  { %v10176_v21 = vpop.permute.xlu0 %4314  ;;  %v2985_v58 = vmul.f32 0.0051020407, %v14342_v24 }
 0x507   :  { %14336 = vst [vmem:[#allocation32_spill] sm:$0xff] %v10176_v21  ;;  %v10198_v20 = vpop.permute.xlu1 %4309 }
 0x508   :  { %14343 = vst [vmem:[#allocation26_spill] sm:$0xff] %v10198_v20  ;;  %v14354_v20 = vld [vmem:[#allocation64_spill] sm:$0xff] }
 0x509   :  { %4334 = vperm.xlu0 %6013, %v10178_v6  }
 0x50a   :  { %v4891_v46 = vpop.permute.xlu0 %4890 }
 0x50b   :  { %v5489_v53 = vadd.f32 %v4891_v46, %v4593_v35  ;;  %v5490_v37 = vadd.f32 %v4891_v46, %v4594_v36  ;;  %v3049_v35 = vadd.f32 1e-05, %v2921_v31  ;;  %v14346_v36 = vld [vmem:[#allocation52_spill] sm:$0xff] }
 0x50c   :  { %v4592_v46 = vmul.f32 %v3990_v59, %v14346_v36  ;;  %v14349_v36 = vld [vmem:[#allocation396_spill] sm:$0xff] }
 0x50d   :  { %5746 = vst [vmem:[%s12841_s4 + $0xd0] sm:$0xff] %v5489_v53  ;;  %5747 = vst.msk [vmem:[%s12841_s4 + $0xd8] sm:$0xff] %vm5720_vm1, %v5490_v37  ;;  %4910 = vperm.xlu0 %6013, %v3816_v9   ;;  %6087 = vrsqrt.f32 %v3049_v35  ;;  %v3113_v53 = vadd.f32 1e-05, %v2985_v58  ;;  %v14344_v9 = vld [vmem:[#allocation244_spill] sm:$0xff] }
 0x50e   :  { %v3687_v37 = vmul.f32 %v3431_v26, %v14344_v9  ;;  %v3369_v9 = vld [vmem:[%s12839_s2 + $0x290] sm:$0xff] }
 0x50f   :  { %6089 = vrsqrt.f32 %v3113_v53  ;;  %v3305_v53 = vld [vmem:[%s12839_s2 + $0x90] sm:$0xff] }
 0x512   :  { %2691 = vadd.xlane.f32.xlu1 %v9504_v16  ;;  %v3559_v16 = vld [vmem:[%s12840_s3 + $0x80] sm:$0xff] }
 0x513   :  { %v3815_v31 = vsub.f32 %v3559_v16, %v3687_v37  ;;  %v14348_v16 = vld [vmem:[#allocation393_spill] sm:$0xff] }
 0x516   :  { %2883 = vadd.xlane.f32.xlu1 %v9516_v49  ;;  %v4591_v49 = vmul.f32 %v3990_v59, %v14345_v13  ;;  %v2922_v13 = vmul.f32 0.0051020407, %v14348_v16 }
 0x517   :  { %v6088_v24 = vpop.eup %6087 }
 0x518   :  { %v3433_v26 = vmul.f32 %v6088_v24, %v3305_v53 }
 0x519   :  { %v6090_v59 = vpop.eup %6089 }
 0x51a   :  { %v10224_v37 = vmul.f32 %v6090_v59, %v3369_v9 }
 0x51c   :  { %14347 = vst [vmem:[#allocation28_spill] sm:$0xff] %v10224_v37 }
 0x51d   :  { %v10200_v25 = vpop.xlane.xlu1 %2679 }
 0x521   :  { %v10202_v29 = vpop.xlane.xlu1 %2871 }
 0x525   :  { %v4886_v28 = vpop.permute.xlu1 %4885 }
 0x526   :  { %v5487_v35 = vadd.f32 %v4886_v28, %v4591_v49  ;;  %v5488_v58 = vadd.f32 %v4886_v28, %v4592_v46  ;;  %v3050_v49 = vadd.f32 1e-05, %v2922_v13  ;;  %v2986_v46 = vmul.f32 0.0051020407, %v14349_v36  ;;  %v14352_v13 = vld [vmem:[#allocation264_spill] sm:$0xff]  ;;  %v3562_v36 = vld [vmem:[%s12840_s3 + $0x98] sm:$0xff] }
 0x527   :  { %4905 = vperm.xlu1 %6014, %v3815_v31  }
 0x528   :  { %5744 = vst [vmem:[%s12841_s4 + $0xc0] sm:$0xff] %v5487_v35  ;;  %5745 = vst.msk [vmem:[%s12841_s4 + $0xc8] sm:$0xff] %vm5720_vm1, %v5488_v58  ;;  %6091 = vrsqrt.f32 %v3050_v49  ;;  %v3114_v28 = vadd.f32 1e-05, %v2986_v46  ;;  %v14353_v46 = vld [vmem:[#allocation62_spill] sm:$0xff] }
 0x52a   :  { %6093 = vrsqrt.f32 %v3114_v28 }
 0x52b   :  { %4019 = vperm.xlu1 %6014, %v3433_v26  }
 0x52c   :  { %2694 = vadd.xlane.f32.xlu0 %v9533_v42  ;;  %v3306_v42 = vld [vmem:[%s12839_s2 + $0x98] sm:$0xff] }
 0x52f   :  { %4339 = vperm.xlu1 %6014, %v10224_v37  }
 0x530   :  { %2886 = vadd.xlane.f32.xlu0 %v9545_v45  ;;  %v3370_v45 = vld [vmem:[%s12839_s2 + $0x298] sm:$0xff] }
 0x532   :  { %v6092_v35 = vpop.eup %6091 }
 0x533   :  { %v3434_v53 = vmul.f32 %v6092_v35, %v3306_v42 }
 0x534   :  { %v6094_v59 = vpop.eup %6093 }
 0x535   :  { %v10242_v16 = vmul.f32 %v6094_v59, %v3370_v45  ;;  %v3690_v49 = vmul.f32 %v3434_v53, %v14352_v13  ;;  %v4000_v59 = vpop.permute.xlu1 %3999  ;;  %v14357_v45 = vld [vmem:[#allocation417_spill] sm:$0xff] }
 0x537   :  { %v10230_v31 = vpop.xlane.xlu0 %2682  ;;  %14351 = vst [vmem:[#allocation38_spill] sm:$0xff] %v10242_v16  ;;  %v3818_v10 = vsub.f32 %v3562_v36, %v3690_v49 }
 0x539   :  { %v10262_v36 = vpop.permute.xlu1 %4319 }
 0x53a   :  { %14359 = vst [vmem:[#allocation40_spill] sm:$0xff] %v10262_v36 }
 0x53b   :  { %v10232_v24 = vpop.xlane.xlu0 %2874 }
 0x543   :  { %v4005_v58 = vpop.permute.xlu0 %4004 }
 0x544   :  { %v4597_v28 = vmul.f32 %v4005_v58, %v14353_v46  ;;  %v4598_v35 = vmul.f32 %v4005_v58, %v14354_v20  ;;  %v14356_v20 = vld [vmem:[#allocation400_spill] sm:$0xff]  ;;  %v14358_v46 = vld [vmem:[#allocation403_spill] sm:$0xff] }
 0x545   :  { %v2923_v58 = vmul.f32 0.0051020407, %v14356_v20  ;;  %v2987_v49 = vmul.f32 0.0051020407, %v14358_v46 }
 0x546   :  { %4024 = vperm.xlu0 %6013, %v3434_v53   ;;  %v14355_v53 = vld [vmem:[#allocation414_spill] sm:$0xff] }
 0x547   :  { %v10240_v9 = vpop.permute.xlu0 %4324  ;;  %v3051_v13 = vadd.f32 1e-05, %v2923_v58  ;;  %v14362_v58 = vld [vmem:[#allocation60_spill] sm:$0xff] }
 0x548   :  { %14350 = vst [vmem:[#allocation228_spill] sm:$0xff] %v10240_v9 }
 0x549   :  { %6095 = vrsqrt.f32 %v3051_v13 }
 0x54a   :  { %4344 = vperm.xlu0 %6013, %v10242_v16  }
 0x54b   :  { %v4901_v42 = vpop.permute.xlu0 %4900 }
 0x54c   :  { %v5493_v21 = vadd.f32 %v4901_v42, %v4597_v28  ;;  %v5494_v37 = vadd.f32 %v4901_v42, %v4598_v35  ;;  %v3561_v42 = vld [vmem:[%s12840_s3 + $0x90] sm:$0xff] }
 0x54e   :  { %5750 = vst [vmem:[%s12841_s4 + $0xf0] sm:$0xff] %v5493_v21  ;;  %5751 = vst.msk [vmem:[%s12841_s4 + $0xf8] sm:$0xff] %vm5720_vm1, %v5494_v37  ;;  %4920 = vperm.xlu0 %6013, %v3818_v10   ;;  %v3115_v21 = vadd.f32 1e-05, %v2987_v49  ;;  %v14360_v10 = vld [vmem:[#allocation256_spill] sm:$0xff] }
 0x54f   :  { %v3689_v37 = vmul.f32 %v3433_v26, %v14360_v10  ;;  %v3371_v10 = vld [vmem:[%s12839_s2 + $0x2a0] sm:$0xff] }
 0x550   :  { %6097 = vrsqrt.f32 %v3115_v21  ;;  %v3307_v21 = vld [vmem:[%s12839_s2 + $0xa0] sm:$0xff] }
 0x551   :  { %v3817_v9 = vsub.f32 %v3561_v42, %v3689_v37 }
 0x553   :  { %2697 = vadd.xlane.f32.xlu1 %v14355_v53  ;;  %v14361_v53 = vld [vmem:[#allocation58_spill] sm:$0xff]  ;;  %v6096_v36 = vpop.eup %6095 }
 0x554   :  { %v4595_v20 = vmul.f32 %v4000_v59, %v14361_v53  ;;  %v3435_v26 = vmul.f32 %v6096_v36, %v3307_v21 }
 0x557   :  { %2889 = vadd.xlane.f32.xlu1 %v14357_v45  ;;  %v4596_v45 = vmul.f32 %v4000_v59, %v14362_v58 }
 0x55a   :  { %v6098_v59 = vpop.eup %6097 }
 0x55b   :  { %v10288_v37 = vmul.f32 %v6098_v59, %v3371_v10 }
 0x55d   :  { %14363 = vst [vmem:[#allocation381_spill] sm:$0xff] %v10288_v37 }
 0x55e   :  { %v10264_v28 = vpop.xlane.xlu1 %2685 }
 0x562   :  { %v10266_v35 = vpop.xlane.xlu1 %2877 }
 0x566   :  { %v4896_v46 = vpop.permute.xlu1 %4895 }
 0x567   :  { %v5491_v13 = vadd.f32 %v4896_v46, %v4595_v20  ;;  %v5492_v49 = vadd.f32 %v4896_v46, %v4596_v45  ;;  %v14365_v20 = vld [vmem:[#allocation407_spill] sm:$0xff] }
 0x568   :  { %4915 = vperm.xlu1 %6014, %v3817_v9   ;;  %v14364_v9 = vld [vmem:[#allocation405_spill] sm:$0xff]  ;;  %v2988_v58 = vmul.f32 0.0051020407, %v14365_v20  ;;  %v3564_v20 = vld [vmem:[%s12840_s3 + $0xa8] sm:$0xff] }
 0x569   :  { %5748 = vst [vmem:[%s12841_s4 + $0xe0] sm:$0xff] %v5491_v13  ;;  %5749 = vst.msk [vmem:[%s12841_s4 + $0xe8] sm:$0xff] %vm5720_vm1, %v5492_v49  ;;  %v2924_v42 = vmul.f32 0.0051020407, %v14364_v9 }
 0x56a   :  { %v3116_v36 = vadd.f32 1e-05, %v2988_v58  ;;  %v14369_v58 = vld [vmem:[#allocation70_spill] sm:$0xff] }
 0x56b   :  { %v3052_v53 = vadd.f32 1e-05, %v2924_v42  ;;  %v14368_v42 = vld [vmem:[#allocation277_spill] sm:$0xff] }
 0x56c   :  { %4029 = vperm.xlu1 %6014, %v3435_v26  }
 0x56d   :  { %2700 = vadd.xlane.f32.xlu0 %v9588_v1  ;;  %6099 = vrsqrt.f32 %v3052_v53  ;;  %v3308_v1 = vld [vmem:[%s12839_s2 + $0xa8] sm:$0xff] }
 0x56e   :  { %6101 = vrsqrt.f32 %v3116_v36 }
 0x570   :  { %4349 = vperm.xlu1 %6014, %v10288_v37   ;;  %v14370_v37 = vld [vmem:[#allocation72_spill] sm:$0xff] }
 0x571   :  { %2892 = vadd.xlane.f32.xlu0 %v9605_v11  ;;  %v3372_v11 = vld [vmem:[%s12839_s2 + $0x2a8] sm:$0xff] }
 0x577   :  { %v6100_v13 = vpop.eup %6099 }
 0x578   :  { %v10294_v45 = vpop.xlane.xlu0 %2688  ;;  %v3436_v21 = vmul.f32 %v6100_v13, %v3308_v1  ;;  %v6102_v59 = vpop.eup %6101 }
 0x579   :  { %v10306_v9 = vmul.f32 %v6102_v59, %v3372_v11  ;;  %v14372_v11 = vld [vmem:[#allocation412_spill] sm:$0xff] }
 0x57a   :  { %v3692_v53 = vmul.f32 %v3436_v21, %v14368_v42  ;;  %v2989_v42 = vmul.f32 0.0051020407, %v14372_v11 }
 0x57b   :  { %14367 = vst [vmem:[#allocation384_spill] sm:$0xff] %v10306_v9 }
 0x57c   :  { %v10296_v46 = vpop.xlane.xlu0 %2880  ;;  %v3820_v44 = vsub.f32 %v3564_v20, %v3692_v53 }
 0x584   :  { %v4015_v49 = vpop.permute.xlu0 %4014 }
 0x585   :  { %v4601_v36 = vmul.f32 %v4015_v49, %v14369_v58  ;;  %v4602_v13 = vmul.f32 %v4015_v49, %v14370_v37  ;;  %v14371_v37 = vld [vmem:[#allocation410_spill] sm:$0xff] }
 0x586   :  { %v2925_v49 = vmul.f32 0.0051020407, %v14371_v37 }
 0x587   :  { %4034 = vperm.xlu0 %6013, %v3436_v21   ;;  %v4010_v21 = vpop.permute.xlu1 %4009 }
 0x588   :  { %v10304_v10 = vpop.permute.xlu0 %4334  ;;  %v3053_v59 = vadd.f32 1e-05, %v2925_v49 }
 0x589   :  { %14366 = vst [vmem:[#allocation369_spill] sm:$0xff] %v10304_v10 }
 0x58a   :  { %6103 = vrsqrt.f32 %v3053_v59 }
 0x58b   :  { %4354 = vperm.xlu0 %6013, %v10306_v9   ;;  %v10326_v53 = vpop.permute.xlu1 %4329 }
 0x58c   :  { %v4911_v1 = vpop.permute.xlu0 %4910  ;;  %14373 = vst [vmem:[#allocation371_spill] sm:$0xff] %v10326_v53  ;;  %v14385_v53 = vld [vmem:[#allocation293_spill] sm:$0xff] }
 0x58d   :  { %v5497_v16 = vadd.f32 %v4911_v1, %v4601_v36  ;;  %v5498_v6 = vadd.f32 %v4911_v1, %v4602_v13  ;;  %v14375_v36 = vld [vmem:[#allocation66_spill] sm:$0xff]  ;;  %v14376_v13 = vld [vmem:[#allocation68_spill] sm:$0xff] }
 0x58e   :  { %v4600_v1 = vmul.f32 %v4010_v21, %v14376_v13 }
 0x58f   :  { %5754 = vst [vmem:[%s12841_s4 + $0x110] sm:$0xff] %v5497_v16  ;;  %5755 = vst.msk [vmem:[%s12841_s4 + $0x118] sm:$0xff] %vm5720_vm1, %v5498_v6  ;;  %4930 = vperm.xlu0 %6013, %v3820_v44   ;;  %v3117_v16 = vadd.f32 1e-05, %v2989_v42  ;;  %v14374_v44 = vld [vmem:[#allocation268_spill] sm:$0xff] }
 0x590   :  { %v3691_v6 = vmul.f32 %v3435_v26, %v14374_v44  ;;  %v3373_v44 = vld [vmem:[%s12839_s2 + $0x2b0] sm:$0xff] }
 0x591   :  { %6105 = vrsqrt.f32 %v3117_v16  ;;  %v3309_v16 = vld [vmem:[%s12839_s2 + $0xb0] sm:$0xff] }
 0x594   :  { %2703 = vadd.xlane.f32.xlu1 %v9624_v38  ;;  %v3563_v38 = vld [vmem:[%s12840_s3 + $0xa0] sm:$0xff]  ;;  %v6104_v11 = vpop.eup %6103 }
 0x595   :  { %v3819_v49 = vsub.f32 %v3563_v38, %v3691_v6  ;;  %v10348_v26 = vmul.f32 %v6104_v11, %v3309_v16  ;;  %v14377_v6 = vld [vmem:[#allocation427_spill] sm:$0xff] }
 0x598   :  { %2895 = vadd.xlane.f32.xlu1 %v9639_v5  ;;  %v4599_v5 = vmul.f32 %v4010_v21, %v14375_v36  ;;  %v14379_v36 = vld [vmem:[#allocation413_spill] sm:$0xff] }
 0x59b   :  { %v6106_v21 = vpop.eup %6105 }
 0x59c   :  { %v10355_v38 = vmul.f32 %v6106_v21, %v3373_v44 }
 0x59e   :  { %14378 = vst [vmem:[#allocation220_spill] sm:$0xff] %v10355_v38 }
 0x59f   :  { %v10328_v20 = vpop.xlane.xlu1 %2691 }
 0x5a3   :  { %v10330_v58 = vpop.xlane.xlu1 %2883 }
 0x5a7   :  { %v4906_v37 = vpop.permute.xlu1 %4905 }
 0x5a8   :  { %v5495_v59 = vadd.f32 %v4906_v37, %v4599_v5  ;;  %v5496_v42 = vadd.f32 %v4906_v37, %v4600_v1  ;;  %v2926_v5 = vmul.f32 0.0051020407, %v14379_v36  ;;  %v14380_v1 = vld [vmem:[#allocation416_spill] sm:$0xff] }
 0x5a9   :  { %4925 = vperm.xlu1 %6014, %v3819_v49   ;;  %v2990_v37 = vmul.f32 0.0051020407, %v14380_v1 }
 0x5aa   :  { %5752 = vst [vmem:[%s12841_s4 + $0x100] sm:$0xff] %v5495_v59  ;;  %5753 = vst.msk [vmem:[%s12841_s4 + $0x108] sm:$0xff] %vm5720_vm1, %v5496_v42  ;;  %v3054_v13 = vadd.f32 1e-05, %v2926_v5  ;;  %v14381_v59 = vld [vmem:[#allocation149_spill] sm:$0xff] }
 0x5ab   :  { %v3118_v49 = vadd.f32 1e-05, %v2990_v37  ;;  %v2928_v42 = vmul.f32 0.0051020407, %v14381_v59  ;;  %v2930_v59 = vmul.f32 0.0051020407, %v9689_v43 }
 0x5ac   :  { %6107 = vrsqrt.f32 %v3054_v13 }
 0x5ad   :  { %4039 = vperm.xlu1 %6014, %v10348_v26   ;;  %6109 = vrsqrt.f32 %v3118_v49  ;;  %v3056_v16 = vadd.f32 1e-05, %v2928_v42  ;;  %v3374_v49 = vld [vmem:[%s12839_s2 + $0x2b8] sm:$0xff]  ;;  %v3058_v9 = vadd.f32 1e-05, %v2930_v59 }
 0x5ae   :  { %2706 = vadd.xlane.f32.xlu0 %v14377_v6  ;;  %v14382_v6 = vld [vmem:[#allocation424_spill] sm:$0xff] }
 0x5af   :  { %v2992_v21 = vmul.f32 0.0051020407, %v14382_v6  ;;  %6111 = vrsqrt.f32 %v3056_v16  ;;  %v3566_v16 = vld [vmem:[%s12840_s3 + $0xb8] sm:$0xff] }
 0x5b1   :  { %4359 = vperm.xlu1 %6014, %v10355_v38   ;;  %v3120_v5 = vadd.f32 1e-05, %v2992_v21  ;;  %v14386_v21 = vld [vmem:[#allocation78_spill] sm:$0xff] }
 0x5b2   :  { %2898 = vadd.xlane.f32.xlu0 %v9673_v23  ;;  %v3310_v23 = vld [vmem:[%s12839_s2 + $0xb8] sm:$0xff] }
 0x5b3   :  { %6113 = vrsqrt.f32 %v3120_v5  ;;  %v2994_v5 = vmul.f32 0.0051020407, %v9695_v40 }
 0x5b4   :  { %6115 = vrsqrt.f32 %v3058_v9  ;;  %v14389_v9 = vld [vmem:[#allocation309_spill] sm:$0xff] }
 0x5b5   :  { %v3122_v40 = vadd.f32 1e-05, %v2994_v5 }
 0x5b6   :  { %v6108_v36 = vpop.eup %6107 }
 0x5b7   :  { %v3438_v13 = vmul.f32 %v6108_v36, %v3310_v23  ;;  %v6110_v37 = vpop.eup %6109  ;;  %v14387_v23 = vld [vmem:[#allocation80_spill] sm:$0xff]  ;;  %6117 = vrsqrt.f32 %v3122_v40  ;;  %v3314_v40 = vld [vmem:[%s12839_s2 + $0xd8] sm:$0xff] }
 0x5b8   :  { %v10376_v6 = vmul.f32 %v6110_v37, %v3374_v49 }
 0x5b9   :  { %v10361_v11 = vpop.xlane.xlu0 %2694  ;;  %v3694_v10 = vmul.f32 %v3438_v13, %v14385_v53  ;;  %v6112_v49 = vpop.eup %6111  ;;  %v3312_v53 = vld [vmem:[%s12839_s2 + $0xc8] sm:$0xff] }
 0x5ba   :  { %14384 = vst [vmem:[#allocation36_spill] sm:$0xff] %v10376_v6 }
 0x5bb   :  { %v3822_v37 = vsub.f32 %v3566_v16, %v3694_v10  ;;  %v3440_v10 = vmul.f32 %v6112_v49, %v3312_v53  ;;  %v4020_v16 = vpop.permute.xlu1 %4019  ;;  %v14391_v49 = vld [vmem:[#allocation422_spill] sm:$0xff] }
 0x5bc   :  { %v2991_v53 = vmul.f32 0.0051020407, %v14391_v49 }
 0x5bd   :  { %v10365_v44 = vpop.xlane.xlu0 %2886 }
 0x5c5   :  { %v4025_v1 = vpop.permute.xlu0 %4024 }
 0x5c6   :  { %v4605_v36 = vmul.f32 %v4025_v1, %v14386_v21  ;;  %v4606_v38 = vmul.f32 %v4025_v1, %v14387_v23  ;;  %v6114_v1 = vpop.eup %6113  ;;  %v3696_v21 = vmul.f32 %v3440_v10, %v14389_v9  ;;  %v3568_v23 = vld [vmem:[%s12840_s3 + $0xc8] sm:$0xff] }
 0x5c8   :  { %4044 = vperm.xlu0 %6013, %v3438_v13   ;;  %v3376_v13 = vld [vmem:[%s12839_s2 + $0x2c8] sm:$0xff] }
 0x5c9   :  { %v10374_v42 = vpop.permute.xlu0 %4344 }
 0x5ca   :  { %14383 = vst [vmem:[#allocation34_spill] sm:$0xff] %v10374_v42 }
 0x5cc   :  { %4364 = vperm.xlu0 %6013, %v10376_v6  }
 0x5cd   :  { %v4921_v43 = vpop.permute.xlu0 %4920 }
 0x5ce   :  { %v5501_v12 = vadd.f32 %v4921_v43, %v4605_v36  ;;  %v5502_v42 = vadd.f32 %v4921_v43, %v4606_v38  ;;  %v2932_v38 = vmul.f32 0.0051020407, %v9700_v32  ;;  %v14390_v36 = vld [vmem:[#allocation420_spill] sm:$0xff]  ;;  %v2934_v43 = vmul.f32 0.0051020407, %v9710_v41 }
 0x5cf   :  { %v2927_v32 = vmul.f32 0.0051020407, %v14390_v36 }
 0x5d0   :  { %5758 = vst [vmem:[%s12841_s4 + $0x130] sm:$0xff] %v5501_v12  ;;  %5759 = vst.msk [vmem:[%s12841_s4 + $0x138] sm:$0xff] %vm5720_vm1, %v5502_v42  ;;  %4940 = vperm.xlu0 %6013, %v3822_v37   ;;  %v3060_v59 = vadd.f32 1e-05, %v2932_v38  ;;  %v2996_v12 = vmul.f32 0.0051020407, %v9704_v17  ;;  %v10402_v42 = vmul.f32 %v6114_v1, %v3376_v13  ;;  %v6116_v17 = vpop.eup %6115  ;;  %v10416_v38 = vpop.permute.xlu1 %4339 }
 0x5d1   :  { %v3055_v37 = vadd.f32 1e-05, %v2927_v32  ;;  %14392 = vst [vmem:[#allocation372_spill] sm:$0xff] %v10416_v38  ;;  %v2998_v1 = vmul.f32 0.0051020407, %v9726_v0  ;;  %v10419_v13 = vmul.f32 %v6116_v17, %v3314_v40  ;;  %v6118_v41 = vpop.eup %6117  ;;  %v14400_v38 = vld [vmem:[#allocation76_spill] sm:$0xff] }
 0x5d2   :  { %14388 = vst [vmem:[#allocation389_spill] sm:$0xff] %v10402_v42  ;;  %6119 = vrsqrt.f32 %v3060_v59  ;;  %v3124_v5 = vadd.f32 1e-05, %v2996_v12  ;;  %v3378_v59 = vld [vmem:[%s12839_s2 + $0x2d8] sm:$0xff]  ;;  %v14393_v12 = vld [vmem:[#allocation298_spill] sm:$0xff] }
 0x5d3   :  { %v2936_v9 = vmul.f32 0.0051020407, %v14393_v12  ;;  %v3126_v36 = vadd.f32 1e-05, %v2998_v1  ;;  %v10428_v32 = vmul.f32 %v6118_v41, %v3378_v59  ;;  %v14398_v59 = vld [vmem:[#allocation431_spill] sm:$0xff] }
 0x5d4   :  { %4054 = vperm.xlu0 %6013, %v3440_v10   ;;  %6121 = vrsqrt.f32 %v3124_v5  ;;  %v3062_v10 = vadd.f32 1e-05, %v2934_v43  ;;  %v3316_v43 = vld [vmem:[%s12839_s2 + $0xe8] sm:$0xff]  ;;  %v2993_v12 = vmul.f32 0.0051020407, %v14398_v59  ;;  %v3311_v59 = vld [vmem:[%s12839_s2 + $0xc0] sm:$0xff] }
 0x5d5   :  { %2709 = vadd.xlane.f32.xlu1 %v9681_v15  ;;  %v3824_v15 = vsub.f32 %v3568_v23, %v3696_v21  ;;  %6123 = vrsqrt.f32 %v3055_v37  ;;  %14394 = vst [vmem:[#allocation392_spill] sm:$0xff] %v10428_v32  ;;  %v14395_v23 = vld [vmem:[#allocation430_spill] sm:$0xff]  ;;  %v14396_v37 = vld [vmem:[#allocation284_spill] sm:$0xff] }
 0x5d6   :  { %6125 = vrsqrt.f32 %v3062_v10  ;;  %v2929_v5 = vmul.f32 0.0051020407, %v14395_v23  ;;  %v3693_v49 = vmul.f32 %v10348_v26, %v14396_v37  ;;  %v3565_v10 = vld [vmem:[%s12840_s3 + $0xb0] sm:$0xff]  ;;  %v3380_v26 = vld [vmem:[%s12839_s2 + $0x2e8] sm:$0xff] }
 0x5d8   :  { %4374 = vperm.xlu0 %6013, %v10402_v42   ;;  %v3821_v37 = vsub.f32 %v3565_v10, %v3693_v49 }
 0x5d9   :  { %2901 = vadd.xlane.f32.xlu1 %v9685_v7  ;;  %v3119_v7 = vadd.f32 1e-05, %v2991_v53  ;;  %v14397_v53 = vld [vmem:[#allocation434_spill] sm:$0xff] }
 0x5da   :  { %v3000_v40 = vmul.f32 0.0051020407, %v14397_v53 }
 0x5db   :  { %6127 = vrsqrt.f32 %v3119_v7  ;;  %v3057_v7 = vadd.f32 1e-05, %v2929_v5 }
 0x5dc   :  { %4950 = vperm.xlu0 %6013, %v3824_v15   ;;  %v6120_v0 = vpop.eup %6119  ;;  %v3064_v15 = vadd.f32 1e-05, %v2936_v9  ;;  %6129 = vrsqrt.f32 %v3126_v36  ;;  %v14399_v9 = vld [vmem:[#allocation74_spill] sm:$0xff] }
 0x5dd   :  { %v10443_v1 = vmul.f32 %v6120_v0, %v3316_v43  ;;  %v4603_v23 = vmul.f32 %v4020_v16, %v14399_v9  ;;  %v3128_v0 = vadd.f32 1e-05, %v3000_v40  ;;  %v14401_v43 = vld [vmem:[#allocation436_spill] sm:$0xff] }
 0x5de   :  { %v6122_v41 = vpop.eup %6121  ;;  %6131 = vrsqrt.f32 %v3064_v15  ;;  %v2938_v42 = vmul.f32 0.0051020407, %v14401_v43  ;;  %v3121_v15 = vadd.f32 1e-05, %v2993_v12  ;;  %v14403_v9 = vld [vmem:[#allocation348_spill] sm:$0xff]  ;;  %v3375_v12 = vld [vmem:[%s12839_s2 + $0x2c0] sm:$0xff] }
 0x5df   :  { %v6124_v53 = vpop.eup %6123  ;;  %6133 = vrsqrt.f32 %v3057_v7  ;;  %v2931_v52 = vmul.f32 0.0051020407, %v14403_v9 }
 0x5e0   :  { %4064 = vperm.xlu0 %6013, %v10419_v13   ;;  %v10426_v21 = vpop.xlane.xlu1 %2697  ;;  %v3439_v49 = vmul.f32 %v6124_v53, %v3311_v59  ;;  %6135 = vrsqrt.f32 %v3128_v0  ;;  %v3066_v10 = vadd.f32 1e-05, %v2938_v42  ;;  %v3382_v53 = vld [vmem:[%s12839_s2 + $0x2f8] sm:$0xff]  ;;  %v14407_v0 = vld [vmem:[#allocation300_spill] sm:$0xff] }
 0x5e1   :  { %6137 = vrsqrt.f32 %v3121_v15  ;;  %v14408_v59 = vld [vmem:[#allocation441_spill] sm:$0xff] }
 0x5e2   :  { %v3695_v43 = vmul.f32 %v3439_v49, %v14407_v0  ;;  %6139 = vrsqrt.f32 %v3066_v10 }
 0x5e4   :  { %4384 = vperm.xlu0 %6013, %v10428_v32   ;;  %v10435_v17 = vpop.xlane.xlu1 %2889  ;;  %v4604_v32 = vmul.f32 %v4020_v16, %v14400_v38  ;;  %v10456_v16 = vmul.f32 %v6122_v41, %v3380_v26  ;;  %v6126_v38 = vpop.eup %6125  ;;  %v14404_v41 = vld [vmem:[#allocation439_spill] sm:$0xff]  ;;  %v3059_v26 = vadd.f32 1e-05, %v2931_v52  ;;  %v3567_v52 = vld [vmem:[%s12840_s3 + $0xc0] sm:$0xff] }
 0x5e5   :  { %v6128_v40 = vpop.eup %6127  ;;  %v3002_v7 = vmul.f32 0.0051020407, %v14404_v41  ;;  %v14410_v41 = vld [vmem:[#allocation433_spill] sm:$0xff]  ;;  %v3823_v10 = vsub.f32 %v3567_v52, %v3695_v43  ;;  %v3384_v43 = vld [vmem:[%s12839_s2 + $0x308] sm:$0xff] }
 0x5e6   :  { %14402 = vst [vmem:[#allocation374_spill] sm:$0xff] %v10456_v16  ;;  %v10481_v42 = vmul.f32 %v6128_v40, %v3375_v12  ;;  %6141 = vrsqrt.f32 %v3059_v26  ;;  %v2933_v40 = vmul.f32 0.0051020407, %v14410_v41 }
 0x5e8   :  { %4074 = vperm.xlu0 %6013, %v10443_v1   ;;  %v4916_v36 = vpop.permute.xlu1 %4915  ;;  %14406 = vst [vmem:[#allocation240_spill] sm:$0xff] %v10481_v42 }
 0x5e9   :  { %v5499_v5 = vadd.f32 %v4916_v36, %v4603_v23  ;;  %v5500_v6 = vadd.f32 %v4916_v36, %v4604_v32  ;;  %v3318_v32 = vld [vmem:[%s12839_s2 + $0xf8] sm:$0xff]  ;;  %v14405_v36 = vld [vmem:[#allocation432_spill] sm:$0xff] }
 0x5ea   :  { %4935 = vperm.xlu1 %6014, %v3821_v37   ;;  %v10474_v23 = vmul.f32 %v6126_v38, %v3318_v32  ;;  %v2995_v37 = vmul.f32 0.0051020407, %v14405_v36  ;;  %v2940_v38 = vmul.f32 0.0051020407, %v14408_v59  ;;  %v14411_v36 = vld [vmem:[#allocation443_spill] sm:$0xff] }
 0x5eb   :  { %5756 = vst [vmem:[%s12841_s4 + $0x120] sm:$0xff] %v5499_v5  ;;  %5757 = vst.msk [vmem:[%s12841_s4 + $0x128] sm:$0xff] %vm5720_vm1, %v5500_v6  ;;  %v6130_v6 = vpop.eup %6129  ;;  %v3130_v5 = vadd.f32 1e-05, %v3002_v7  ;;  %v3004_v0 = vmul.f32 0.0051020407, %v14411_v36 }
 0x5ec   :  { %4394 = vperm.xlu0 %6013, %v10456_v16   ;;  %v6132_v15 = vpop.eup %6131  ;;  %v10489_v9 = vmul.f32 %v6130_v6, %v3382_v53  ;;  %v3123_v32 = vadd.f32 1e-05, %v2995_v37  ;;  %v3068_v12 = vadd.f32 1e-05, %v2940_v38  ;;  %v3313_v6 = vld [vmem:[%s12839_s2 + $0xd0] sm:$0xff]  ;;  %v14412_v59 = vld [vmem:[#allocation167_spill] sm:$0xff] }
 0x5ed   :  { %v6134_v7 = vpop.eup %6133  ;;  %6143 = vrsqrt.f32 %v3130_v5  ;;  %v3061_v53 = vadd.f32 1e-05, %v2933_v40  ;;  %v2997_v41 = vmul.f32 0.0051020407, %v14412_v59  ;;  %v3132_v52 = vadd.f32 1e-05, %v3004_v0 }
 0x5ee   :  { %4049 = vperm.xlu1 %6014, %v3439_v49   ;;  %14409 = vst [vmem:[#allocation46_spill] sm:$0xff] %v10489_v9  ;;  %v3320_v49 = vld [vmem:[%s12839_s2 + $0x108] sm:$0xff]  ;;  %v6136_v37 = vpop.eup %6135  ;;  %6145 = vrsqrt.f32 %v3123_v32  ;;  %v10507_v5 = vmul.f32 %v6134_v7, %v3313_v6  ;;  %v14414_v36 = vld [vmem:[#allocation444_spill] sm:$0xff]  ;;  %v14416_v59 = vld [vmem:[#allocation350_spill] sm:$0xff] }
 0x5ef   :  { %v10500_v26 = vmul.f32 %v6132_v15, %v3320_v49  ;;  %v6138_v38 = vpop.eup %6137  ;;  %6147 = vrsqrt.f32 %v3068_v12  ;;  %v3377_v15 = vld [vmem:[%s12839_s2 + $0x2d0] sm:$0xff]  ;;  %v10514_v32 = vmul.f32 %v6136_v37, %v3384_v43  ;;  %v3125_v49 = vadd.f32 1e-05, %v2997_v41  ;;  %v3322_v7 = vld [vmem:[%s12839_s2 + $0x118] sm:$0xff]  ;;  %v14418_v37 = vld [vmem:[#allocation446_spill] sm:$0xff] }
 0x5f0   :  { %4084 = vperm.xlu0 %6013, %v10474_v23   ;;  %14413 = vst [vmem:[#allocation48_spill] sm:$0xff] %v10507_v5  ;;  %v6140_v40 = vpop.eup %6139  ;;  %6149 = vrsqrt.f32 %v3061_v53  ;;  %v10523_v0 = vmul.f32 %v6138_v38, %v3377_v15  ;;  %v3006_v43 = vmul.f32 0.0051020407, %v14418_v37  ;;  %v3315_v53 = vld [vmem:[%s12839_s2 + $0xe0] sm:$0xff]  ;;  %v14419_v16 = vld [vmem:[#allocation160_spill] sm:$0xff]  ;;  %v3386_v38 = vld [vmem:[%s12839_s2 + $0x318] sm:$0xff] }
 0x5f1   :  { %14415 = vst [vmem:[#allocation394_spill] sm:$0xff] %v10514_v32  ;;  %v6142_v6 = vpop.eup %6141  ;;  %6151 = vrsqrt.f32 %v3132_v52  ;;  %v10530_v41 = vmul.f32 %v6140_v40, %v3322_v7  ;;  %v14421_v37 = vld [vmem:[#allocation353_spill] sm:$0xff]  ;;  %v3379_v40 = vld [vmem:[%s12839_s2 + $0x2e0] sm:$0xff] }
 0x5f2   :  { %4369 = vperm.xlu1 %6014, %v10481_v42   ;;  %v2935_v42 = vmul.f32 0.0051020407, %v14416_v59  ;;  %14417 = vst [vmem:[#allocation377_spill] sm:$0xff] %v10523_v0  ;;  %6153 = vrsqrt.f32 %v3125_v49  ;;  %v10537_v52 = vmul.f32 %v6142_v6, %v3315_v53  ;;  %v3134_v15 = vadd.f32 1e-05, %v3006_v43  ;;  %v14423_v6 = vld [vmem:[#allocation435_spill] sm:$0xff] }
 0x5f3   :  { %v2937_v53 = vmul.f32 0.0051020407, %v14423_v6  ;;  %v3008_v43 = vmul.f32 0.0051020407, %v9810_v50 }
 0x5f4   :  { %4404 = vperm.xlu0 %6013, %v10489_v9   ;;  %v3063_v9 = vadd.f32 1e-05, %v2935_v42  ;;  %14420 = vst [vmem:[#allocation397_spill] sm:$0xff] %v10537_v52 }
 0x5f5   :  { %v3065_v50 = vadd.f32 1e-05, %v2937_v53 }
 0x5f6   :  { %4945 = vperm.xlu1 %6014, %v3823_v10   ;;  %v2942_v10 = vmul.f32 0.0051020407, %v14414_v36 }
 0x5f7   :  { %v6144_v59 = vpop.eup %6143 }
 0x5f8   :  { %4094 = vperm.xlu0 %6013, %v10500_v26   ;;  %v3070_v36 = vadd.f32 1e-05, %v2942_v10  ;;  %v6146_v10 = vpop.eup %6145 }
 0x5f9   :  { %v6148_v49 = vpop.eup %6147 }
 0x5fa   :  { %4059 = vperm.xlu1 %6014, %v10507_v5   ;;  %v10520_v12 = vpop.xlane.xlu0 %2700  ;;  %6155 = vrsqrt.f32 %v3070_v36  ;;  %v3324_v36 = vld [vmem:[%s12839_s2 + $0x128] sm:$0xff]  ;;  %v6150_v14 = vpop.eup %6149 }
 0x5fb   :  { %6157 = vrsqrt.f32 %v3063_v9  ;;  %v3317_v9 = vld [vmem:[%s12839_s2 + $0xf0] sm:$0xff]  ;;  %v10561_v6 = vmul.f32 %v6148_v49, %v3324_v36 }
 0x5fc   :  { %4414 = vperm.xlu0 %6013, %v10514_v32   ;;  %v2999_v32 = vmul.f32 0.0051020407, %v14419_v16  ;;  %v10546_v16 = vmul.f32 %v6144_v59, %v3386_v38  ;;  %6159 = vrsqrt.f32 %v3134_v15  ;;  %v3136_v15 = vadd.f32 1e-05, %v3008_v43  ;;  %v3381_v49 = vld [vmem:[%s12839_s2 + $0x2f0] sm:$0xff] }
 0x5fe   :  { %4379 = vperm.xlu1 %6014, %v10523_v0   ;;  %v2944_v0 = vmul.f32 0.0051020407, %v14421_v37  ;;  %v10543_v42 = vpop.xlane.xlu0 %2892  ;;  %14422 = vst [vmem:[#allocation379_spill] sm:$0xff] %v10546_v16  ;;  %v3127_v7 = vadd.f32 1e-05, %v2999_v32  ;;  %v10554_v37 = vmul.f32 %v6146_v10, %v3379_v40  ;;  %v14425_v32 = vld [vmem:[#allocation438_spill] sm:$0xff] }
 0x5ff   :  { %v3001_v59 = vmul.f32 0.0051020407, %v14425_v32  ;;  %v3388_v10 = vld [vmem:[%s12839_s2 + $0x328] sm:$0xff]  ;;  %v2946_v32 = vmul.f32 0.0051020407, %v9878_v63 }
 0x600   :  { %4104 = vperm.xlu0 %6013, %v10530_v41   ;;  %14424 = vst [vmem:[#allocation232_spill] sm:$0xff] %v10554_v37  ;;  %v3072_v39 = vadd.f32 1e-05, %v2944_v0  ;;  %6161 = vrsqrt.f32 %v3127_v7  ;;  %v10567_v0 = vmul.f32 %v6150_v14, %v3317_v9 }
 0x601   :  { %v3129_v36 = vadd.f32 1e-05, %v3001_v59  ;;  %v3074_v59 = vadd.f32 1e-05, %v2946_v32 }
 0x602   :  { %4069 = vperm.xlu1 %6014, %v10537_v52   ;;  %v6152_v52 = vpop.eup %6151  ;;  %14426 = vst [vmem:[#allocation42_spill] sm:$0xff] %v10567_v0  ;;  %6163 = vrsqrt.f32 %v3072_v39  ;;  %v3326_v39 = vld [vmem:[%s12839_s2 + $0x138] sm:$0xff] }
 0x603   :  { %v6154_v40 = vpop.eup %6153  ;;  %v10576_v53 = vmul.f32 %v6152_v52, %v3388_v10  ;;  %6165 = vrsqrt.f32 %v3065_v50  ;;  %v14432_v10 = vld [vmem:[#allocation88_spill] sm:$0xff] }
 0x604   :  { %4424 = vperm.xlu0 %6013, %v10546_v16   ;;  %v6156_v43 = vpop.eup %6155  ;;  %6167 = vrsqrt.f32 %v3136_v15  ;;  %v10583_v63 = vmul.f32 %v6154_v40, %v3381_v49  ;;  %v14431_v16 = vld [vmem:[#allocation86_spill] sm:$0xff] }
 0x605   :  { %14428 = vst [vmem:[#allocation401_spill] sm:$0xff] %v10576_v53  ;;  %v6158_v9 = vpop.eup %6157  ;;  %6169 = vrsqrt.f32 %v3129_v36  ;;  %v10592_v15 = vmul.f32 %v6156_v43, %v3326_v39  ;;  %v2948_v43 = vmul.f32 0.0051020407, %v9944_v2 }
 0x606   :  { %v4035_v38 = vpop.permute.xlu0 %4034  ;;  %4389 = vperm.xlu1 %6014, %v10554_v37   ;;  %v14429_v37 = vld [vmem:[#allocation440_spill] sm:$0xff]  ;;  %14430 = vst [vmem:[#allocation380_spill] sm:$0xff] %v10583_v63  ;;  %v6160_v40 = vpop.eup %6159  ;;  %6171 = vrsqrt.f32 %v3074_v59 }
 0x607   :  { %v2939_v14 = vmul.f32 0.0051020407, %v14429_v37  ;;  %v4609_v52 = vmul.f32 %v4035_v38, %v14431_v16  ;;  %v3319_v37 = vld [vmem:[%s12839_s2 + $0x100] sm:$0xff]  ;;  %v3390_v16 = vld [vmem:[%s12839_s2 + $0x338] sm:$0xff] }
 0x608   :  { %4114 = vperm.xlu0 %6013, %v10561_v6  }
 0x609   :  { %v3067_v49 = vadd.f32 1e-05, %v2939_v14  ;;  %v14435_v14 = vld [vmem:[#allocation352_spill] sm:$0xff] }
 0x60a   :  { %v10573_v7 = vpop.permute.xlu0 %4354  ;;  %4079 = vperm.xlu1 %6014, %v10567_v0   ;;  %v4610_v0 = vmul.f32 %v4035_v38, %v14432_v10  ;;  %v10599_v38 = vmul.f32 %v6158_v9, %v3319_v37  ;;  %v6162_v36 = vpop.eup %6161  ;;  %v2941_v39 = vmul.f32 0.0051020407, %v14435_v14  ;;  %v3012_v37 = vmul.f32 0.0051020407, %v9946_v27 }
 0x60b   :  { %14427 = vst [vmem:[#allocation44_spill] sm:$0xff] %v10573_v7  ;;  %v3010_v7 = vmul.f32 0.0051020407, %v9882_v18  ;;  %6173 = vrsqrt.f32 %v3067_v49  ;;  %v2950_v14 = vmul.f32 0.0051020407, %v10008_v3 }
 0x60c   :  { %4434 = vperm.xlu0 %6013, %v10576_v53   ;;  %v14433_v53 = vld [vmem:[#allocation442_spill] sm:$0xff] }
 0x60d   :  { %v3003_v32 = vmul.f32 0.0051020407, %v14433_v53  ;;  %v3138_v10 = vadd.f32 1e-05, %v3010_v7  ;;  %v10613_v53 = vmul.f32 %v6160_v40, %v3390_v16  ;;  %v6164_v7 = vpop.eup %6163 }
 0x60e   :  { %v4931_v50 = vpop.permute.xlu0 %4930  ;;  %4399 = vperm.xlu1 %6014, %v10583_v63   ;;  %v6166_v59 = vpop.eup %6165  ;;  %v3016_v63 = vmul.f32 0.0051020407, %v10074_v48  ;;  %v14445_v48 = vld [vmem:[#allocation82_spill] sm:$0xff] }
 0x60f   :  { %v5505_v5 = vadd.f32 %v4931_v50, %v4609_v52  ;;  %v5506_v18 = vadd.f32 %v4931_v50, %v4610_v0  ;;  %v3383_v0 = vld [vmem:[%s12839_s2 + $0x300] sm:$0xff]  ;;  %14434 = vst [vmem:[#allocation404_spill] sm:$0xff] %v10613_v53  ;;  %v3131_v2 = vadd.f32 1e-05, %v3003_v32  ;;  %6175 = vrsqrt.f32 %v3138_v10  ;;  %v3321_v50 = vld [vmem:[%s12839_s2 + $0x110] sm:$0xff]  ;;  %v6168_v40 = vpop.eup %6167  ;;  %v3392_v10 = vld [vmem:[%s12839_s2 + $0x348] sm:$0xff] }
 0x610   :  { %4124 = vperm.xlu0 %6013, %v10592_v15   ;;  %v10620_v9 = vmul.f32 %v6162_v36, %v3383_v0  ;;  %v3076_v52 = vadd.f32 1e-05, %v2948_v43  ;;  %v3069_v32 = vadd.f32 1e-05, %v2941_v39  ;;  %v4030_v36 = vpop.permute.xlu1 %4029  ;;  %v6170_v43 = vpop.eup %6169  ;;  %v10634_v27 = vmul.f32 %v6166_v59, %v3321_v50  ;;  %v3330_v59 = vld [vmem:[%s12839_s2 + $0x158] sm:$0xff] }
 0x611   :  { %5762 = vst [vmem:[%s12841_s4 + $0x150] sm:$0xff] %v5505_v5  ;;  %5763 = vst.msk [vmem:[%s12841_s4 + $0x158] sm:$0xff] %vm5720_vm1, %v5506_v18  ;;  %v3328_v5 = vld [vmem:[%s12839_s2 + $0x148] sm:$0xff]  ;;  %6177 = vrsqrt.f32 %v3131_v2  ;;  %v14437_v18 = vld [vmem:[#allocation445_spill] sm:$0xff]  ;;  %v3140_v0 = vadd.f32 1e-05, %v3012_v37  ;;  %v10641_v2 = vmul.f32 %v6168_v40, %v3392_v10  ;;  %v6172_v39 = vpop.eup %6171 }
 0x612   :  { %4089 = vperm.xlu1 %6014, %v10599_v38   ;;  %14436 = vst [vmem:[#allocation383_spill] sm:$0xff] %v10620_v9  ;;  %v10627_v49 = vmul.f32 %v6164_v7, %v3328_v5  ;;  %v3005_v16 = vmul.f32 0.0051020407, %v14437_v18  ;;  %6179 = vrsqrt.f32 %v3076_v52  ;;  %v3385_v7 = vld [vmem:[%s12839_s2 + $0x310] sm:$0xff]  ;;  %v3078_v37 = vadd.f32 1e-05, %v2950_v14 }
 0x613   :  { %14438 = vst [vmem:[#allocation252_spill] sm:$0xff] %v10641_v2  ;;  %6181 = vrsqrt.f32 %v3069_v32  ;;  %v14439_v18 = vld [vmem:[#allocation448_spill] sm:$0xff]  ;;  %v10648_v3 = vmul.f32 %v6170_v43, %v3385_v7  ;;  %v3014_v50 = vmul.f32 0.0051020407, %v10010_v54  ;;  %v3323_v32 = vld [vmem:[%s12839_s2 + $0x120] sm:$0xff]  ;;  %v14442_v43 = vld [vmem:[#allocation179_spill] sm:$0xff] }
 0x614   :  { %4444 = vperm.xlu0 %6013, %v10613_v53   ;;  %v3133_v5 = vadd.f32 1e-05, %v3005_v16  ;;  %6183 = vrsqrt.f32 %v3140_v0  ;;  %v10651_v40 = vpop.permute.xlu1 %4349  ;;  %v10657_v16 = vmul.f32 %v6172_v39, %v3330_v59  ;;  %v3007_v7 = vmul.f32 0.0051020407, %v14442_v43  ;;  %v3394_v0 = vld [vmem:[%s12839_s2 + $0x358] sm:$0xff] }
 0x615   :  { %14440 = vst [vmem:[#allocation54_spill] sm:$0xff] %v10648_v3  ;;  %v6174_v52 = vpop.eup %6173  ;;  %14441 = vst [vmem:[#allocation56_spill] sm:$0xff] %v10651_v40  ;;  %v3142_v40 = vadd.f32 1e-05, %v3014_v50 }
 0x616   :  { %4409 = vperm.xlu1 %6014, %v10620_v9   ;;  %v2943_v9 = vmul.f32 0.0051020407, %v14439_v18  ;;  %6185 = vrsqrt.f32 %v3133_v5  ;;  %v10664_v54 = vmul.f32 %v6174_v52, %v3323_v32  ;;  %v3135_v43 = vadd.f32 1e-05, %v3007_v7 }
 0x617   :  { %6187 = vrsqrt.f32 %v3078_v37  ;;  %v2945_v52 = vmul.f32 0.0051020407, %v9849_v34  ;;  %v3332_v37 = vld [vmem:[%s12839_s2 + $0x168] sm:$0xff] }
 0x618   :  { %4134 = vperm.xlu0 %6013, %v10627_v49   ;;  %v3071_v18 = vadd.f32 1e-05, %v2943_v9  ;;  %v3387_v9 = vld [vmem:[%s12839_s2 + $0x320] sm:$0xff] }
 0x619   :  { %v6176_v10 = vpop.eup %6175 }
 0x61a   :  { %4099 = vperm.xlu1 %6014, %v10634_v27   ;;  %v10673_v5 = vmul.f32 %v6176_v10, %v3394_v0  ;;  %6189 = vrsqrt.f32 %v3071_v18  ;;  %v3325_v18 = vld [vmem:[%s12839_s2 + $0x130] sm:$0xff]  ;;  %v3073_v0 = vadd.f32 1e-05, %v2945_v52 }
 0x61b   :  { %v6178_v14 = vpop.eup %6177  ;;  %6191 = vrsqrt.f32 %v3142_v40  ;;  %v4607_v40 = vmul.f32 %v4030_v36, %v14445_v48 }
 0x61c   :  { %4454 = vperm.xlu0 %6013, %v10641_v2   ;;  %14443 = vst [vmem:[#allocation388_spill] sm:$0xff] %v10673_v5  ;;  %v6180_v59 = vpop.eup %6179  ;;  %6193 = vrsqrt.f32 %v3135_v43  ;;  %v2954_v43 = vmul.f32 0.0051020407, %v10136_v8  ;;  %v3334_v8 = vld [vmem:[%s12839_s2 + $0x178] sm:$0xff] }
 0x61d   :  { %v6182_v50 = vpop.eup %6181  ;;  %v10689_v34 = vmul.f32 %v6180_v59, %v3332_v37  ;;  %v3144_v59 = vadd.f32 1e-05, %v3016_v63 }
 0x61e   :  { %4419 = vperm.xlu1 %6014, %v10648_v3   ;;  %v2952_v3 = vmul.f32 0.0051020407, %v10072_v57  ;;  %v10680_v57 = vmul.f32 %v6178_v14, %v3387_v9  ;;  %v6184_v7 = vpop.eup %6183  ;;  %v3009_v14 = vmul.f32 0.0051020407, %v9863_v30  ;;  %v14446_v9 = vld [vmem:[#allocation84_spill] sm:$0xff]  ;;  %v10698_v2 = vmul.f32 %v6182_v50, %v3325_v18 }
 0x61f   :  { %v3389_v30 = vld [vmem:[%s12839_s2 + $0x330] sm:$0xff]  ;;  %v2947_v18 = vmul.f32 0.0051020407, %v9910_v22  ;;  %v3082_v22 = vadd.f32 1e-05, %v2954_v43  ;;  %v3391_v43 = vld [vmem:[%s12839_s2 + $0x340] sm:$0xff] }
 0x620   :  { %4144 = vperm.xlu0 %6013, %v10657_v16   ;;  %14444 = vst [vmem:[#allocation391_spill] sm:$0xff] %v10680_v57  ;;  %v3080_v32 = vadd.f32 1e-05, %v2952_v3  ;;  %v3396_v3 = vld [vmem:[%s12839_s2 + $0x368] sm:$0xff]  ;;  %v3137_v50 = vadd.f32 1e-05, %v3009_v14 }
 0x621   :  { %v10667_v39 = vpop.xlane.xlu1 %2703  ;;  %v10705_v48 = vmul.f32 %v6184_v7, %v3396_v3  ;;  %v3327_v7 = vld [vmem:[%s12839_s2 + $0x140] sm:$0xff]  ;;  %v3011_v3 = vmul.f32 0.0051020407, %v9920_v19 }
 0x622   :  { %4109 = vperm.xlu1 %6014, %v10664_v54   ;;  %6195 = vrsqrt.f32 %v3080_v32  ;;  %v3018_v32 = vmul.f32 0.0051020407, %v10138_v61 }
 0x623   :  { %6197 = vrsqrt.f32 %v3073_v0 }
 0x624   :  { %4464 = vperm.xlu0 %6013, %v10673_v5   ;;  %v4608_v5 = vmul.f32 %v4030_v36, %v14446_v9  ;;  %6199 = vrsqrt.f32 %v3144_v59  ;;  %v3146_v9 = vadd.f32 1e-05, %v3018_v32  ;;  %v2956_v59 = vmul.f32 0.0051020407, %v10200_v25 }
 0x625   :  { %v10683_v10 = vpop.xlane.xlu1 %2895  ;;  %6201 = vrsqrt.f32 %v3137_v50 }
 0x626   :  { %4429 = vperm.xlu1 %6014, %v10680_v57   ;;  %v6186_v57 = vpop.eup %6185  ;;  %6203 = vrsqrt.f32 %v3082_v22 }
 0x627   :  { %v6188_v36 = vpop.eup %6187  ;;  %v10719_v63 = vmul.f32 %v6186_v57, %v3389_v30  ;;  %v3398_v57 = vld [vmem:[%s12839_s2 + $0x378] sm:$0xff]  ;;  %v3139_v30 = vadd.f32 1e-05, %v3011_v3 }
 0x628   :  { %4154 = vperm.xlu0 %6013, %v10689_v34   ;;  %v10726_v0 = vmul.f32 %v6188_v36, %v3334_v8  ;;  %v3336_v36 = vld [vmem:[%s12839_s2 + $0x188] sm:$0xff]  ;;  %v3020_v8 = vmul.f32 0.0051020407, %v10202_v29 }
 0x629   :  { %v4926_v52 = vpop.permute.xlu1 %4925 }
 0x62a   :  { %v5503_v37 = vadd.f32 %v4926_v52, %v4607_v40  ;;  %v5504_v53 = vadd.f32 %v4926_v52, %v4608_v5  ;;  %4119 = vperm.xlu1 %6014, %v10698_v2   ;;  %v6190_v5 = vpop.eup %6189  ;;  %v3148_v3 = vadd.f32 1e-05, %v3020_v8 }
 0x62b   :  { %v6192_v14 = vpop.eup %6191  ;;  %v10733_v61 = vmul.f32 %v6190_v5, %v3327_v7  ;;  %v3329_v5 = vld [vmem:[%s12839_s2 + $0x150] sm:$0xff]  ;;  %v3013_v7 = vmul.f32 0.0051020407, %v9981_v47 }
 0x62c   :  { %5760 = vst [vmem:[%s12841_s4 + $0x140] sm:$0xff] %v5503_v37  ;;  %5761 = vst.msk [vmem:[%s12841_s4 + $0x148] sm:$0xff] %vm5720_vm1, %v5504_v53  ;;  %4474 = vperm.xlu0 %6013, %v10705_v48   ;;  %v3075_v53 = vadd.f32 1e-05, %v2947_v18  ;;  %v6194_v40 = vpop.eup %6193  ;;  %v10740_v19 = vmul.f32 %v6192_v14, %v3398_v57  ;;  %v2949_v37 = vmul.f32 0.0051020407, %v9974_v60 }
 0x62d   :  { %v6196_v52 = vpop.eup %6195  ;;  %v10747_v25 = vmul.f32 %v6194_v40, %v3391_v43  ;;  %v3084_v18 = vadd.f32 1e-05, %v2956_v59  ;;  %v3400_v14 = vld [vmem:[%s12839_s2 + $0x388] sm:$0xff]  ;;  %v2958_v57 = vmul.f32 0.0051020407, %v10264_v28  ;;  %v3393_v40 = vld [vmem:[%s12839_s2 + $0x350] sm:$0xff] }
 0x62e   :  { %4439 = vperm.xlu1 %6014, %v10719_v63   ;;  %6205 = vrsqrt.f32 %v3075_v53  ;;  %v6198_v50 = vpop.eup %6197  ;;  %v10754_v60 = vmul.f32 %v6196_v52, %v3336_v36  ;;  %v3077_v32 = vadd.f32 1e-05, %v2949_v37  ;;  %v3141_v59 = vadd.f32 1e-05, %v3013_v7  ;;  %v3338_v52 = vld [vmem:[%s12839_s2 + $0x198] sm:$0xff] }
 0x62f   :  { %6207 = vrsqrt.f32 %v3146_v9  ;;  %v6200_v22 = vpop.eup %6199  ;;  %v10761_v29 = vmul.f32 %v6198_v50, %v3329_v5  ;;  %v2951_v43 = vmul.f32 0.0051020407, %v10038_v33  ;;  %v3086_v37 = vadd.f32 1e-05, %v2958_v57 }
 0x630   :  { %4164 = vperm.xlu0 %6013, %v10726_v0   ;;  %6209 = vrsqrt.f32 %v3139_v30  ;;  %v6202_v53 = vpop.eup %6201  ;;  %v10768_v47 = vmul.f32 %v6200_v22, %v3400_v14  ;;  %v3022_v36 = vmul.f32 0.0051020407, %v10266_v35  ;;  %v3015_v22 = vmul.f32 0.0051020407, %v10040_v56 }
 0x631   :  { %6211 = vrsqrt.f32 %v3084_v18  ;;  %v6204_v9 = vpop.eup %6203  ;;  %v10775_v28 = vmul.f32 %v6202_v53, %v3393_v40  ;;  %v3331_v18 = vld [vmem:[%s12839_s2 + $0x160] sm:$0xff]  ;;  %v3079_v5 = vadd.f32 1e-05, %v2951_v43  ;;  %v2960_v53 = vmul.f32 0.0051020407, %v10328_v20  ;;  %v3340_v43 = vld [vmem:[%s12839_s2 + $0x1a8] sm:$0xff] }
 0x632   :  { %4129 = vperm.xlu1 %6014, %v10733_v61   ;;  %6213 = vrsqrt.f32 %v3077_v32  ;;  %v10784_v33 = vmul.f32 %v6204_v9, %v3338_v52  ;;  %v3402_v32 = vld [vmem:[%s12839_s2 + $0x398] sm:$0xff]  ;;  %v3150_v14 = vadd.f32 1e-05, %v3022_v36  ;;  %v3143_v40 = vadd.f32 1e-05, %v3015_v22  ;;  %v3333_v36 = vld [vmem:[%s12839_s2 + $0x170] sm:$0xff] }
 0x633   :  { %14447 = vst [vmem:[#allocation244_spill] sm:$0xff] %v10775_v28  ;;  %6215 = vrsqrt.f32 %v3148_v3  ;;  %v3395_v3 = vld [vmem:[%s12839_s2 + $0x360] sm:$0xff]  ;;  %v2953_v9 = vmul.f32 0.0051020407, %v10102_v62 }
 0x634   :  { %4484 = vperm.xlu0 %6013, %v10740_v19   ;;  %6217 = vrsqrt.f32 %v3141_v59 }
 0x635   :  { %6219 = vrsqrt.f32 %v3086_v37  ;;  %v3024_v37 = vmul.f32 0.0051020407, %v10330_v58 }
 0x636   :  { %4449 = vperm.xlu1 %6014, %v10747_v25   ;;  %6221 = vrsqrt.f32 %v3079_v5  ;;  %v3017_v5 = vmul.f32 0.0051020407, %v10104_v55 }
 0x637   :  { %6223 = vrsqrt.f32 %v3150_v14  ;;  %v3152_v14 = vadd.f32 1e-05, %v3024_v37 }
 0x638   :  { %4174 = vperm.xlu0 %6013, %v10754_v60   ;;  %v6206_v30 = vpop.eup %6205  ;;  %6225 = vrsqrt.f32 %v3143_v40  ;;  %v3145_v40 = vadd.f32 1e-05, %v3017_v5  ;;  %v14452_v5 = vld [vmem:[#allocation96_spill] sm:$0xff] }
 0x639   :  { %v6208_v8 = vpop.eup %6207  ;;  %v10791_v35 = vmul.f32 %v6206_v30, %v3331_v18  ;;  %v3088_v30 = vadd.f32 1e-05, %v2960_v53  ;;  %v2962_v53 = vmul.f32 0.0051020407, %v10426_v21 }
 0x63a   :  { %4139 = vperm.xlu1 %6014, %v10761_v29   ;;  %v6210_v7 = vpop.eup %6209  ;;  %v10798_v56 = vmul.f32 %v6208_v8, %v3402_v32  ;;  %v3081_v8 = vadd.f32 1e-05, %v2953_v9  ;;  %v3404_v32 = vld [vmem:[%s12839_s2 + $0x3a8] sm:$0xff]  ;;  %v2955_v9 = vmul.f32 0.0051020407, %v10166_v51  ;;  %v14451_v51 = vld [vmem:[#allocation94_spill] sm:$0xff] }
 0x63b   :  { %v10778_v50 = vpop.xlane.xlu0 %2706  ;;  %v6212_v57 = vpop.eup %6211  ;;  %v10807_v20 = vmul.f32 %v6210_v7, %v3395_v3  ;;  %6227 = vrsqrt.f32 %v3088_v30  ;;  %v3397_v3 = vld [vmem:[%s12839_s2 + $0x370] sm:$0xff]  ;;  %v3090_v37 = vadd.f32 1e-05, %v2962_v53 }
 0x63c   :  { %4494 = vperm.xlu0 %6013, %v10768_v47   ;;  %v6214_v52 = vpop.eup %6213  ;;  %v10814_v62 = vmul.f32 %v6212_v57, %v3340_v43  ;;  %6229 = vrsqrt.f32 %v3081_v8 }
 0x63d   :  { %14448 = vst [vmem:[#allocation50_spill] sm:$0xff] %v10807_v20  ;;  %v6216_v18 = vpop.eup %6215  ;;  %v10821_v58 = vmul.f32 %v6214_v52, %v3333_v36  ;;  %v3342_v52 = vld [vmem:[%s12839_s2 + $0x1b8] sm:$0xff]  ;;  %6231 = vrsqrt.f32 %v3152_v14  ;;  %v3026_v36 = vmul.f32 0.0051020407, %v10435_v17  ;;  %v3019_v14 = vmul.f32 0.0051020407, %v10168_v4 }
 0x63e   :  { %4459 = vperm.xlu1 %6014, %v10775_v28   ;;  %v6218_v7 = vpop.eup %6217  ;;  %v10828_v55 = vmul.f32 %v6216_v18, %v3404_v32  ;;  %v3335_v18 = vld [vmem:[%s12839_s2 + $0x180] sm:$0xff]  ;;  %6233 = vrsqrt.f32 %v3145_v40  ;;  %v3406_v17 = vld [vmem:[%s12839_s2 + $0x3b8] sm:$0xff] }
 0x63f   :  { %v10801_v59 = vpop.xlane.xlu0 %2898  ;;  %v6220_v57 = vpop.eup %6219  ;;  %v10837_v21 = vmul.f32 %v6218_v7, %v3397_v3  ;;  %v3083_v7 = vadd.f32 1e-05, %v2955_v9  ;;  %6235 = vrsqrt.f32 %v3090_v37  ;;  %v3399_v4 = vld [vmem:[%s12839_s2 + $0x380] sm:$0xff] }
 0x640   :  { %4184 = vperm.xlu0 %6013, %v10784_v33   ;;  %v6222_v30 = vpop.eup %6221 }
 0x641   :  { %14450 = vst [vmem:[#allocation393_spill] sm:$0xff] %v10837_v21  ;;  %6237 = vrsqrt.f32 %v3083_v7 }
 0x642   :  { %4149 = vperm.xlu1 %6014, %v10791_v35  }
 0x644   :  { %4504 = vperm.xlu0 %6013, %v10798_v56  }
 0x646   :  { %4469 = vperm.xlu1 %6014, %v10807_v20   ;;  %v6224_v20 = vpop.eup %6223 }
 0x647   :  { %v4045_v22 = vpop.permute.xlu0 %4044  ;;  %v10867_v40 = vmul.f32 %v6224_v20, %v3406_v17  ;;  %v3028_v20 = vmul.f32 0.0051020407, %v10683_v10  ;;  %v3408_v17 = vld [vmem:[%s12839_s2 + $0x3c8] sm:$0xff]  ;;  %v10889_v10 = vpop.permute.xlu1 %4039 }
 0x648   :  { %4194 = vperm.xlu0 %6013, %v10814_v62   ;;  %v4613_v8 = vmul.f32 %v4045_v22, %v14451_v51  ;;  %v4614_v32 = vmul.f32 %v4045_v22, %v14452_v5  ;;  %v10853_v51 = vmul.f32 %v6222_v30, %v3335_v18  ;;  %v6226_v22 = vpop.eup %6225  ;;  %v2957_v30 = vmul.f32 0.0051020407, %v10230_v31  ;;  %v3337_v5 = vld [vmem:[%s12839_s2 + $0x190] sm:$0xff] }
 0x649   :  { %v6228_v9 = vpop.eup %6227  ;;  %v10874_v18 = vmul.f32 %v6226_v22, %v3399_v4 }
 0x64a   :  { %4159 = vperm.xlu1 %6014, %v10821_v58   ;;  %v3085_v7 = vadd.f32 1e-05, %v2957_v30 }
 0x64b   :  { %v10831_v43 = vpop.permute.xlu0 %4364  ;;  %14453 = vst [vmem:[#allocation396_spill] sm:$0xff] %v10874_v18 }
 0x64c   :  { %14449 = vst [vmem:[#allocation52_spill] sm:$0xff] %v10831_v43  ;;  %4514 = vperm.xlu0 %6013, %v10828_v55   ;;  %v10846_v43 = vmul.f32 %v6220_v57, %v3342_v52  ;;  %v3154_v57 = vadd.f32 1e-05, %v3026_v36  ;;  %v2964_v52 = vmul.f32 0.0051020407, %v10667_v39  ;;  %v3344_v36 = vld [vmem:[%s12839_s2 + $0x1c8] sm:$0xff] }
 0x64d   :  { %v3147_v39 = vadd.f32 1e-05, %v3019_v14  ;;  %v10881_v31 = vmul.f32 %v6228_v9, %v3344_v36  ;;  %v3021_v14 = vmul.f32 0.0051020407, %v10232_v24  ;;  %v14455_v24 = vld [vmem:[#allocation102_spill] sm:$0xff]  ;;  %v14456_v9 = vld [vmem:[#allocation104_spill] sm:$0xff] }
 0x64e   :  { %4479 = vperm.xlu1 %6014, %v10837_v21   ;;  %6239 = vrsqrt.f32 %v3154_v57  ;;  %v3156_v57 = vadd.f32 1e-05, %v3028_v20 }
 0x64f   :  { %v4941_v53 = vpop.permute.xlu0 %4940  ;;  %6241 = vrsqrt.f32 %v3147_v39 }
 0x650   :  { %v5509_v3 = vadd.f32 %v4941_v53, %v4613_v8  ;;  %v5510_v28 = vadd.f32 %v4941_v53, %v4614_v32  ;;  %4204 = vperm.xlu0 %6013, %v10846_v43   ;;  %v6230_v8 = vpop.eup %6229 }
 0x651   :  { %v6232_v32 = vpop.eup %6231 }
 0x652   :  { %5766 = vst [vmem:[%s12841_s4 + $0x170] sm:$0xff] %v5509_v3  ;;  %5767 = vst.msk [vmem:[%s12841_s4 + $0x178] sm:$0xff] %vm5720_vm1, %v5510_v28  ;;  %4169 = vperm.xlu1 %6014, %v10853_v51   ;;  %v3092_v28 = vadd.f32 1e-05, %v2964_v52  ;;  %v10892_v3 = vmul.f32 %v6230_v8, %v3337_v5  ;;  %v6234_v22 = vpop.eup %6233  ;;  %v3401_v52 = vld [vmem:[%s12839_s2 + $0x390] sm:$0xff]  ;;  %v10900_v30 = vmul.f32 %v6232_v32, %v3408_v17  ;;  %v3339_v32 = vld [vmem:[%s12839_s2 + $0x1a0] sm:$0xff] }
 0x653   :  { %v4055_v37 = vpop.permute.xlu0 %4054  ;;  %v6236_v36 = vpop.eup %6235  ;;  %v2959_v8 = vmul.f32 0.0051020407, %v10294_v45 }
 0x654   :  { %4524 = vperm.xlu0 %6013, %v10867_v40   ;;  %6243 = vrsqrt.f32 %v3092_v28  ;;  %v4617_v4 = vmul.f32 %v4055_v37, %v14455_v24  ;;  %v4618_v39 = vmul.f32 %v4055_v37, %v14456_v9  ;;  %14457 = vst [vmem:[#allocation62_spill] sm:$0xff] %v10900_v30  ;;  %v3346_v28 = vld [vmem:[%s12839_s2 + $0x1d8] sm:$0xff]  ;;  %v10907_v24 = vmul.f32 %v6234_v22, %v3401_v52  ;;  %v6238_v37 = vpop.eup %6237  ;;  %v10913_v45 = vpop.permute.xlu1 %4359 }
 0x655   :  { %6245 = vrsqrt.f32 %v3085_v7  ;;  %v3023_v7 = vmul.f32 0.0051020407, %v10296_v46  ;;  %14459 = vst [vmem:[#allocation414_spill] sm:$0xff] %v10913_v45  ;;  %v3087_v22 = vadd.f32 1e-05, %v2959_v8  ;;  %v3410_v46 = vld [vmem:[%s12839_s2 + $0x3d8] sm:$0xff]  ;;  %v10931_v52 = vmul.f32 %v6238_v37, %v3339_v32 }
 0x656   :  { %4489 = vperm.xlu1 %6014, %v10874_v18   ;;  %14458 = vst [vmem:[#allocation64_spill] sm:$0xff] %v10907_v24  ;;  %6247 = vrsqrt.f32 %v3156_v57 }
 0x657   :  { %v10884_v53 = vpop.permute.xlu0 %4374  ;;  %v3151_v9 = vadd.f32 1e-05, %v3023_v7  ;;  %v3341_v7 = vld [vmem:[%s12839_s2 + $0x1b0] sm:$0xff] }
 0x658   :  { %14454 = vst [vmem:[#allocation264_spill] sm:$0xff] %v10884_v53  ;;  %4214 = vperm.xlu0 %6013, %v10881_v31   ;;  %v3149_v53 = vadd.f32 1e-05, %v3021_v14  ;;  %v10923_v14 = vmul.f32 %v6236_v36, %v3346_v28  ;;  %v6240_v17 = vpop.eup %6239 }
 0x659   :  { %v10938_v36 = vmul.f32 %v6240_v17, %v3410_v46 }
 0x65a   :  { %4179 = vperm.xlu1 %6014, %v10892_v3   ;;  %6249 = vrsqrt.f32 %v3149_v53 }
 0x65b   :  { %v4951_v5 = vpop.permute.xlu0 %4950  ;;  %14460 = vst [vmem:[#allocation400_spill] sm:$0xff] %v10938_v36  ;;  %6251 = vrsqrt.f32 %v3087_v22  ;;  %v3025_v22 = vmul.f32 0.0051020407, %v10365_v44  ;;  %v14463_v44 = vld [vmem:[#allocation90_spill] sm:$0xff] }
 0x65c   :  { %v5513_v20 = vadd.f32 %v4951_v5, %v4617_v4  ;;  %v5514_v18 = vadd.f32 %v4951_v5, %v4618_v39  ;;  %4534 = vperm.xlu0 %6013, %v10900_v30   ;;  %v6242_v4 = vpop.eup %6241  ;;  %v2961_v39 = vmul.f32 0.0051020407, %v10361_v11  ;;  %6253 = vrsqrt.f32 %v3151_v9 }
 0x65e   :  { %5770 = vst [vmem:[%s12841_s4 + $0x190] sm:$0xff] %v5513_v20  ;;  %5771 = vst.msk [vmem:[%s12841_s4 + $0x198] sm:$0xff] %vm5720_vm1, %v5514_v18  ;;  %4499 = vperm.xlu1 %6014, %v10907_v24   ;;  %v3403_v18 = vld [vmem:[%s12839_s2 + $0x3a0] sm:$0xff]  ;;  %v6244_v8 = vpop.eup %6243  ;;  %v3348_v20 = vld [vmem:[%s12839_s2 + $0x1e8] sm:$0xff]  ;;  %v3089_v17 = vadd.f32 1e-05, %v2961_v39 }
 0x65f   :  { %v10925_v57 = vpop.permute.xlu0 %4064  ;;  %v10946_v37 = vmul.f32 %v6242_v4, %v3403_v18  ;;  %v6246_v32 = vpop.eup %6245  ;;  %v3412_v18 = vld [vmem:[%s12839_s2 + $0x3e8] sm:$0xff] }
 0x660   :  { %4224 = vperm.xlu0 %6013, %v10923_v14   ;;  %v6248_v45 = vpop.eup %6247  ;;  %v10961_v9 = vmul.f32 %v6246_v32, %v3341_v7  ;;  %v2963_v32 = vmul.f32 0.0051020407, %v10520_v12  ;;  %v3343_v12 = vld [vmem:[%s12839_s2 + $0x1c0] sm:$0xff] }
 0x661   :  { %14462 = vst [vmem:[#allocation403_spill] sm:$0xff] %v10946_v37 }
 0x662   :  { %4189 = vperm.xlu1 %6014, %v10931_v52   ;;  %v2710_v53 = vpop.xlane.xlu1 %2709 }
 0x663   :  { %v2966_v5 = vmul.f32 0.0051020407, %v2710_v53  ;;  %v10940_v28 = vpop.permute.xlu0 %4384  ;;  %v10953_v53 = vmul.f32 %v6244_v8, %v3348_v20 }
 0x664   :  { %14461 = vst [vmem:[#allocation417_spill] sm:$0xff] %v10940_v28  ;;  %4544 = vperm.xlu0 %6013, %v10938_v36   ;;  %v6250_v39 = vpop.eup %6249  ;;  %v10971_v36 = vmul.f32 %v6248_v45, %v3412_v18 }
 0x665   :  { %v3094_v11 = vadd.f32 1e-05, %v2966_v5  ;;  %v4611_v5 = vmul.f32 %v10889_v10, %v14463_v44 }
 0x666   :  { %4509 = vperm.xlu1 %6014, %v10946_v37   ;;  %v2902_v46 = vpop.xlane.xlu1 %2901  ;;  %v14464_v37 = vld [vmem:[#allocation92_spill] sm:$0xff]  ;;  %14465 = vst [vmem:[#allocation256_spill] sm:$0xff] %v10971_v36 }
 0x667   :  { %6255 = vrsqrt.f32 %v3094_v11  ;;  %v3030_v28 = vmul.f32 0.0051020407, %v2902_v46  ;;  %v10955_v4 = vpop.permute.xlu0 %4074  ;;  %v4612_v8 = vmul.f32 %v10889_v10, %v14464_v37  ;;  %v3405_v11 = vld [vmem:[%s12839_s2 + $0x3b0] sm:$0xff]  ;;  %v3153_v46 = vadd.f32 1e-05, %v3025_v22  ;;  %v3350_v22 = vld [vmem:[%s12839_s2 + $0x1f8] sm:$0xff] }
 0x668   :  { %4234 = vperm.xlu0 %6013, %v10953_v53   ;;  %6257 = vrsqrt.f32 %v3089_v17  ;;  %v10977_v10 = vmul.f32 %v6250_v39, %v3405_v11  ;;  %v3091_v37 = vadd.f32 1e-05, %v2963_v32 }
 0x669   :  { %v3158_v20 = vadd.f32 1e-05, %v3030_v28  ;;  %v6252_v28 = vpop.eup %6251 }
 0x66a   :  { %4199 = vperm.xlu1 %6014, %v10961_v9   ;;  %v4936_v24 = vpop.permute.xlu1 %4935  ;;  %14467 = vst [vmem:[#allocation60_spill] sm:$0xff] %v10977_v10  ;;  %v6254_v18 = vpop.eup %6253  ;;  %v10996_v39 = vmul.f32 %v6252_v28, %v3343_v12 }
 0x66b   :  { %6259 = vrsqrt.f32 %v3158_v20  ;;  %v5507_v7 = vadd.f32 %v4936_v24, %v4611_v5  ;;  %v5508_v44 = vadd.f32 %v4936_v24, %v4612_v8  ;;  %v10974_v21 = vpop.permute.xlu0 %4394  ;;  %v3027_v24 = vmul.f32 0.0051020407, %v10543_v42  ;;  %v3407_v8 = vld [vmem:[%s12839_s2 + $0x3c0] sm:$0xff] }
 0x66c   :  { %14466 = vst [vmem:[#allocation58_spill] sm:$0xff] %v10974_v21  ;;  %4554 = vperm.xlu0 %6013, %v10971_v36   ;;  %6261 = vrsqrt.f32 %v3153_v46  ;;  %v2965_v46 = vmul.f32 0.0051020407, %v10778_v50  ;;  %v11013_v28 = vmul.f32 %v6254_v18, %v3407_v8  ;;  %v3345_v50 = vld [vmem:[%s12839_s2 + $0x1d0] sm:$0xff]  ;;  %v3029_v8 = vmul.f32 0.0051020407, %v10801_v59 }
 0x66d   :  { %5764 = vst [vmem:[%s12841_s4 + $0x160] sm:$0xff] %v5507_v7  ;;  %5765 = vst.msk [vmem:[%s12841_s4 + $0x168] sm:$0xff] %vm5720_vm1, %v5508_v44  ;;  %v3155_v42 = vadd.f32 1e-05, %v3027_v24  ;;  %6263 = vrsqrt.f32 %v3091_v37  ;;  %v3414_v7 = vld [vmem:[%s12839_s2 + $0x3f8] sm:$0xff]  ;;  %v14470_v24 = vld [vmem:[#allocation98_spill] sm:$0xff] }
 0x66e   :  { %4519 = vperm.xlu1 %6014, %v10977_v10   ;;  %v4050_v45 = vpop.permute.xlu1 %4049  ;;  %v3093_v18 = vadd.f32 1e-05, %v2965_v46  ;;  %v14473_v46 = vld [vmem:[#allocation329_spill] sm:$0xff] }
 0x66f   :  { %v10991_v17 = vpop.permute.xlu0 %4084  ;;  %v4615_v21 = vmul.f32 %v4050_v45, %v14470_v24  ;;  %6265 = vrsqrt.f32 %v3155_v42 }
 0x670   :  { %6267 = vrsqrt.f32 %v3093_v18 }
 0x671   :  { %v6256_v5 = vpop.eup %6255 }
 0x672   :  { %4209 = vperm.xlu1 %6014, %v10996_v39   ;;  %v11002_v20 = vpop.permute.xlu1 %4369  ;;  %v11004_v11 = vmul.f32 %v6256_v5, %v3350_v22  ;;  %v6258_v44 = vpop.eup %6257 }
 0x673   :  { %14468 = vst [vmem:[#allocation405_spill] sm:$0xff] %v11002_v20  ;;  %v11007_v32 = vpop.permute.xlu0 %4404  ;;  %v14471_v20 = vld [vmem:[#allocation100_spill] sm:$0xff]  ;;  %v11032_v42 = vmul.f32 %v6258_v44, %v3345_v50  ;;  %v3572_v44 = vld [vmem:[%s12840_s3 + $0xe8] sm:$0xff]  ;;  %v3347_v50 = vld [vmem:[%s12839_s2 + $0x1e0] sm:$0xff] }
 0x674   :  { %14469 = vst [vmem:[#allocation407_spill] sm:$0xff] %v11007_v32  ;;  %4244 = vperm.xlu0 %6013, %v11004_v11   ;;  %v4616_v22 = vmul.f32 %v4050_v45, %v14471_v20  ;;  %v14472_v32 = vld [vmem:[#allocation325_spill] sm:$0xff] }
 0x675   :  { %v6260_v12 = vpop.eup %6259  ;;  %v3698_v10 = vmul.f32 %v10419_v13, %v14472_v32  ;;  %v3570_v45 = vld [vmem:[%s12840_s3 + $0xd8] sm:$0xff]  ;;  %v3409_v13 = vld [vmem:[%s12839_s2 + $0x3d0] sm:$0xff]  ;;  %v3700_v32 = vmul.f32 %v10443_v1, %v14473_v46 }
 0x676   :  { %4529 = vperm.xlu1 %6014, %v11013_v28   ;;  %v4946_v37 = vpop.permute.xlu1 %4945  ;;  %v11021_v5 = vmul.f32 %v6260_v12, %v3414_v7  ;;  %v6262_v20 = vpop.eup %6261  ;;  %v3157_v7 = vadd.f32 1e-05, %v3029_v8  ;;  %v14478_v46 = vld [vmem:[#allocation337_spill] sm:$0xff] }
 0x677   :  { %v5511_v36 = vadd.f32 %v4946_v37, %v4615_v21  ;;  %v5512_v24 = vadd.f32 %v4946_v37, %v4616_v22  ;;  %v11026_v30 = vpop.permute.xlu0 %4094  ;;  %v3826_v21 = vsub.f32 %v3570_v45, %v3698_v10  ;;  %v11054_v12 = vmul.f32 %v6262_v20, %v3409_v13  ;;  %v6264_v22 = vpop.eup %6263  ;;  %v14477_v37 = vld [vmem:[#allocation333_spill] sm:$0xff]  ;;  %v3411_v13 = vld [vmem:[%s12839_s2 + $0x3e0] sm:$0xff] }
 0x678   :  { %4564 = vperm.xlu0 %6013, %v11021_v5   ;;  %v3828_v1 = vsub.f32 %v3572_v44, %v3700_v32  ;;  %v3702_v18 = vmul.f32 %v10474_v23, %v14477_v37  ;;  %6269 = vrsqrt.f32 %v3157_v7  ;;  %v11069_v20 = vmul.f32 %v6264_v22, %v3347_v50  ;;  %v3576_v44 = vld [vmem:[%s12840_s3 + $0x108] sm:$0xff] }
 0x679   :  { %5768 = vst [vmem:[%s12841_s4 + $0x180] sm:$0xff] %v5511_v36  ;;  %5769 = vst.msk [vmem:[%s12841_s4 + $0x188] sm:$0xff] %vm5720_vm1, %v5512_v24  ;;  %v3574_v24 = vld [vmem:[%s12840_s3 + $0xf8] sm:$0xff]  ;;  %v6266_v45 = vpop.eup %6265  ;;  %v3704_v32 = vmul.f32 %v10500_v26, %v14478_v46 }
 0x67a   :  { %4219 = vperm.xlu1 %6014, %v11032_v42   ;;  %v11045_v59 = vpop.permute.xlu1 %4059  ;;  %14475 = vst [vmem:[#allocation70_spill] sm:$0xff] %v11054_v12  ;;  %v3830_v23 = vsub.f32 %v3574_v24, %v3702_v18  ;;  %v11084_v22 = vmul.f32 %v6266_v45, %v3411_v13  ;;  %v6268_v50 = vpop.eup %6267  ;;  %v14482_v26 = vld [vmem:[#allocation341_spill] sm:$0xff] }
 0x67b   :  { %v11049_v36 = vpop.permute.xlu0 %4414  ;;  %v3832_v18 = vsub.f32 %v3576_v44, %v3704_v32  ;;  %v3706_v24 = vmul.f32 %v10530_v41, %v14482_v26  ;;  %v3578_v45 = vld [vmem:[%s12840_s3 + $0x118] sm:$0xff] }
 0x67c   :  { %14474 = vst [vmem:[#allocation277_spill] sm:$0xff] %v11049_v36  ;;  %4960 = vperm.xlu0 %6013, %v3826_v21   ;;  %14480 = vst [vmem:[#allocation412_spill] sm:$0xff] %v11084_v22  ;;  %v14483_v41 = vld [vmem:[#allocation345_spill] sm:$0xff] }
 0x67d   :  { %v3834_v44 = vsub.f32 %v3578_v45, %v3706_v24  ;;  %v3708_v26 = vmul.f32 %v10561_v6, %v14483_v41  ;;  %v14489_v45 = vld [vmem:[#allocation278_spill] sm:$0xff] }
 0x67e   :  { %4539 = vperm.xlu1 %6014, %v11054_v12   ;;  %v11060_v10 = vpop.permute.xlu1 %4379  ;;  %v3710_v41 = vmul.f32 %v10592_v15, %v14489_v45  ;;  %v14492_v15 = vld [vmem:[#allocation294_spill] sm:$0xff]  ;;  %v14601_v12 = vld [vmem:[#allocation28_spill] sm:$0xff] }
 0x67f   :  { %14476 = vst [vmem:[#allocation72_spill] sm:$0xff] %v11060_v10  ;;  %v11064_v8 = vpop.permute.xlu0 %4104  ;;  %v3413_v10 = vld [vmem:[%s12839_s2 + $0x3f0] sm:$0xff]  ;;  %v3712_v45 = vmul.f32 %v10627_v49, %v14492_v15  ;;  %v14497_v49 = vld [vmem:[#allocation310_spill] sm:$0xff] }
 0x680   :  { %4970 = vperm.xlu0 %6013, %v3828_v1   ;;  %v3349_v1 = vld [vmem:[%s12839_s2 + $0x1f0] sm:$0xff]  ;;  %v3714_v15 = vmul.f32 %v10657_v16, %v14497_v49 }
 0x681   :  { %v11099_v13 = vmul.f32 %v6268_v50, %v3349_v1  ;;  %v3580_v50 = vld [vmem:[%s12840_s3 + $0x128] sm:$0xff]  ;;  %v14499_v16 = vld [vmem:[#allocation356_spill] sm:$0xff] }
 0x682   :  { %4229 = vperm.xlu1 %6014, %v11069_v20   ;;  %v11075_v21 = vpop.permute.xlu1 %4069  ;;  %v3836_v6 = vsub.f32 %v3580_v50, %v3708_v26 }
 0x683   :  { %v11079_v7 = vpop.permute.xlu0 %4424 }
 0x684   :  { %14479 = vst [vmem:[#allocation410_spill] sm:$0xff] %v11079_v7  ;;  %4980 = vperm.xlu0 %6013, %v3830_v23   ;;  %v6270_v23 = vpop.eup %6269  ;;  %v14487_v7 = vld [vmem:[#allocation48_spill] sm:$0xff] }
 0x685   :  { %v11114_v1 = vmul.f32 %v6270_v23, %v3413_v10  ;;  %v3582_v10 = vld [vmem:[%s12840_s3 + $0x138] sm:$0xff]  ;;  %v14490_v23 = vld [vmem:[#allocation327_spill] sm:$0xff] }
 0x686   :  { %4549 = vperm.xlu1 %6014, %v11084_v22   ;;  %v11090_v37 = vpop.permute.xlu1 %4389  ;;  %v3569_v22 = vld [vmem:[%s12840_s3 + $0xd0] sm:$0xff]  ;;  %v3838_v50 = vsub.f32 %v3582_v10, %v3710_v41 }
 0x687   :  { %14481 = vst [vmem:[#allocation268_spill] sm:$0xff] %v11090_v37  ;;  %v11094_v46 = vpop.permute.xlu0 %4114  ;;  %14485 = vst [vmem:[#allocation68_spill] sm:$0xff] %v11114_v1 }
 0x688   :  { %4990 = vperm.xlu0 %6013, %v3832_v18   ;;  %v14486_v18 = vld [vmem:[#allocation316_spill] sm:$0xff] }
 0x689   :  { %v3697_v36 = vmul.f32 %v14487_v7, %v14486_v18 }
 0x68a   :  { %4239 = vperm.xlu1 %6014, %v11099_v13   ;;  %v11105_v32 = vpop.permute.xlu1 %4079 }
 0x68b   :  { %v11109_v37 = vpop.permute.xlu0 %4434  ;;  %v3825_v7 = vsub.f32 %v3569_v22, %v3697_v36  ;;  %v3584_v36 = vld [vmem:[%s12840_s3 + $0x148] sm:$0xff] }
 0x68c   :  { %14484 = vst [vmem:[#allocation66_spill] sm:$0xff] %v11109_v37  ;;  %5000 = vperm.xlu0 %6013, %v3834_v44   ;;  %v14491_v44 = vld [vmem:[#allocation397_spill] sm:$0xff]  ;;  %v3840_v10 = vsub.f32 %v3584_v36, %v3712_v45 }
 0x68d   :  { %v3699_v18 = vmul.f32 %v14491_v44, %v14490_v23  ;;  %v14495_v23 = vld [vmem:[#allocation42_spill] sm:$0xff] }
 0x68e   :  { %4559 = vperm.xlu1 %6014, %v11114_v1   ;;  %v11122_v24 = vpop.permute.xlu1 %4399  ;;  %v3571_v1 = vld [vmem:[%s12840_s3 + $0xe0] sm:$0xff] }
 0x68f   :  { %14488 = vst [vmem:[#allocation427_spill] sm:$0xff] %v11122_v24  ;;  %v11126_v37 = vpop.permute.xlu0 %4124  ;;  %v3827_v22 = vsub.f32 %v3571_v1, %v3699_v18  ;;  %v3586_v1 = vld [vmem:[%s12840_s3 + $0x158] sm:$0xff] }
 0x690   :  { %5010 = vperm.xlu0 %6013, %v3836_v6   ;;  %v14494_v6 = vld [vmem:[#allocation331_spill] sm:$0xff]  ;;  %v3842_v36 = vsub.f32 %v3586_v1, %v3714_v15 }
 0x691   :  { %v3701_v44 = vmul.f32 %v14495_v23, %v14494_v6  ;;  %v3716_v23 = vmul.f32 %v10689_v34, %v14499_v16  ;;  %v14503_v34 = vld [vmem:[#allocation360_spill] sm:$0xff] }
 0x692   :  { %4955 = vperm.xlu1 %6014, %v3825_v7   ;;  %v11136_v26 = vpop.permute.xlu1 %4089  ;;  %v3573_v7 = vld [vmem:[%s12840_s3 + $0xf0] sm:$0xff] }
 0x693   :  { %v11140_v24 = vpop.permute.xlu0 %4444  ;;  %v3829_v18 = vsub.f32 %v3573_v7, %v3701_v44  ;;  %v3588_v44 = vld [vmem:[%s12840_s3 + $0x168] sm:$0xff] }
 0x694   :  { %14493 = vst [vmem:[#allocation413_spill] sm:$0xff] %v11140_v24  ;;  %5020 = vperm.xlu0 %6013, %v3838_v50   ;;  %v14498_v50 = vld [vmem:[#allocation335_spill] sm:$0xff]  ;;  %v3844_v1 = vsub.f32 %v3588_v44, %v3716_v23 }
 0x695   :  { %v3703_v6 = vmul.f32 %v10599_v38, %v14498_v50  ;;  %v14501_v38 = vld [vmem:[#allocation339_spill] sm:$0xff]  ;;  %v3718_v50 = vmul.f32 %v10726_v0, %v14503_v34  ;;  %v14505_v0 = vld [vmem:[#allocation364_spill] sm:$0xff] }
 0x696   :  { %4965 = vperm.xlu1 %6014, %v3827_v22   ;;  %v11150_v41 = vpop.permute.xlu1 %4409  ;;  %v3575_v22 = vld [vmem:[%s12840_s3 + $0x100] sm:$0xff] }
 0x697   :  { %14496 = vst [vmem:[#allocation416_spill] sm:$0xff] %v11150_v41  ;;  %v11154_v24 = vpop.permute.xlu0 %4134  ;;  %v3831_v7 = vsub.f32 %v3575_v22, %v3703_v6  ;;  %v3590_v6 = vld [vmem:[%s12840_s3 + $0x178] sm:$0xff] }
 0x698   :  { %5030 = vperm.xlu0 %6013, %v3840_v10   ;;  %v3705_v10 = vmul.f32 %v10634_v27, %v14501_v38  ;;  %v14504_v27 = vld [vmem:[#allocation343_spill] sm:$0xff]  ;;  %v3846_v44 = vsub.f32 %v3590_v6, %v3718_v50  ;;  %v3720_v38 = vmul.f32 %v10754_v60, %v14505_v0  ;;  %v14509_v60 = vld [vmem:[#allocation368_spill] sm:$0xff] }
 0x69a   :  { %4975 = vperm.xlu1 %6014, %v3829_v18   ;;  %v11164_v45 = vpop.permute.xlu1 %4099  ;;  %v3577_v18 = vld [vmem:[%s12840_s3 + $0x110] sm:$0xff] }
 0x69b   :  { %v11168_v49 = vpop.permute.xlu0 %4454  ;;  %v3833_v22 = vsub.f32 %v3577_v18, %v3705_v10  ;;  %v3592_v10 = vld [vmem:[%s12840_s3 + $0x188] sm:$0xff] }
 0x69c   :  { %14500 = vst [vmem:[#allocation149_spill] sm:$0xff] %v11168_v49  ;;  %5040 = vperm.xlu0 %6013, %v3842_v36   ;;  %v3707_v36 = vmul.f32 %v10664_v54, %v14504_v27  ;;  %v14507_v54 = vld [vmem:[#allocation347_spill] sm:$0xff]  ;;  %v3848_v6 = vsub.f32 %v3592_v10, %v3720_v38  ;;  %v3722_v27 = vmul.f32 %v10784_v33, %v14509_v60  ;;  %v14511_v33 = vld [vmem:[#allocation376_spill] sm:$0xff] }
 0x69e   :  { %4985 = vperm.xlu1 %6014, %v3831_v7   ;;  %v11178_v15 = vpop.permute.xlu1 %4419  ;;  %v3579_v7 = vld [vmem:[%s12840_s3 + $0x120] sm:$0xff] }
 0x69f   :  { %14502 = vst [vmem:[#allocation424_spill] sm:$0xff] %v11178_v15  ;;  %v11182_v16 = vpop.permute.xlu0 %4144  ;;  %v3835_v18 = vsub.f32 %v3579_v7, %v3707_v36  ;;  %v3594_v36 = vld [vmem:[%s12840_s3 + $0x198] sm:$0xff]  ;;  %v14581_v15 = vld [vmem:[#allocation36_spill] sm:$0xff] }
 0x6a0   :  { %5050 = vperm.xlu0 %6013, %v3844_v1   ;;  %v3709_v1 = vmul.f32 %v10698_v2, %v14507_v54  ;;  %v14510_v2 = vld [vmem:[#allocation282_spill] sm:$0xff]  ;;  %v3850_v10 = vsub.f32 %v3594_v36, %v3722_v27  ;;  %v3724_v54 = vmul.f32 %v10814_v62, %v14511_v33  ;;  %v14515_v62 = vld [vmem:[#allocation387_spill] sm:$0xff] }
 0x6a2   :  { %4995 = vperm.xlu1 %6014, %v3833_v22   ;;  %v11192_v23 = vpop.permute.xlu1 %4109  ;;  %v3581_v22 = vld [vmem:[%s12840_s3 + $0x130] sm:$0xff] }
 0x6a3   :  { %v11196_v34 = vpop.permute.xlu0 %4464  ;;  %v3837_v7 = vsub.f32 %v3581_v22, %v3709_v1  ;;  %v3596_v1 = vld [vmem:[%s12840_s3 + $0x1a8] sm:$0xff] }
 0x6a4   :  { %14506 = vst [vmem:[#allocation293_spill] sm:$0xff] %v11196_v34  ;;  %5060 = vperm.xlu0 %6013, %v3846_v44   ;;  %v3711_v44 = vmul.f32 %v10733_v61, %v14510_v2  ;;  %v14513_v61 = vld [vmem:[#allocation351_spill] sm:$0xff]  ;;  %v3852_v36 = vsub.f32 %v3596_v1, %v3724_v54  ;;  %v3726_v2 = vmul.f32 %v10846_v43, %v14515_v62  ;;  %v14598_v34 = vld [vmem:[#allocation330_spill] sm:$0xff] }
 0x6a5   :  { %v14517_v43 = vld [vmem:[#allocation399_spill] sm:$0xff] }
 0x6a6   :  { %5005 = vperm.xlu1 %6014, %v3835_v18   ;;  %v11206_v50 = vpop.permute.xlu1 %4429  ;;  %v3583_v18 = vld [vmem:[%s12840_s3 + $0x140] sm:$0xff] }
 0x6a7   :  { %14508 = vst [vmem:[#allocation78_spill] sm:$0xff] %v11206_v50  ;;  %v11210_v0 = vpop.permute.xlu0 %4154  ;;  %v3839_v22 = vsub.f32 %v3583_v18, %v3711_v44  ;;  %v3598_v44 = vld [vmem:[%s12840_s3 + $0x1b8] sm:$0xff] }
 0x6a8   :  { %5070 = vperm.xlu0 %6013, %v3848_v6   ;;  %v3713_v6 = vmul.f32 %v10761_v29, %v14513_v61  ;;  %v14516_v29 = vld [vmem:[#allocation354_spill] sm:$0xff]  ;;  %v3854_v1 = vsub.f32 %v3598_v44, %v3726_v2  ;;  %v3728_v61 = vmul.f32 %v10881_v31, %v14517_v43  ;;  %v14521_v31 = vld [vmem:[#allocation409_spill] sm:$0xff] }
 0x6a9   :  { %v3626_v50 = vld [vmem:[%s12840_s3 + $0x298] sm:$0xff] }
 0x6aa   :  { %5015 = vperm.xlu1 %6014, %v3837_v7   ;;  %v11220_v38 = vpop.permute.xlu1 %4119  ;;  %v3585_v7 = vld [vmem:[%s12840_s3 + $0x150] sm:$0xff] }
 0x6ab   :  { %v11224_v60 = vpop.permute.xlu0 %4474  ;;  %v3841_v18 = vsub.f32 %v3585_v7, %v3713_v6  ;;  %v3600_v6 = vld [vmem:[%s12840_s3 + $0x1c8] sm:$0xff] }
 0x6ac   :  { %14512 = vst [vmem:[#allocation80_spill] sm:$0xff] %v11224_v60  ;;  %5080 = vperm.xlu0 %6013, %v3850_v10   ;;  %v3715_v10 = vmul.f32 %v10791_v35, %v14516_v29  ;;  %v14519_v35 = vld [vmem:[#allocation358_spill] sm:$0xff]  ;;  %v3856_v44 = vsub.f32 %v3600_v6, %v3728_v61  ;;  %v3730_v29 = vmul.f32 %v10923_v14, %v14521_v31  ;;  %v14523_v14 = vld [vmem:[#allocation419_spill] sm:$0xff] }
 0x6ae   :  { %5025 = vperm.xlu1 %6014, %v3839_v22   ;;  %v11234_v27 = vpop.permute.xlu1 %4439  ;;  %v3587_v22 = vld [vmem:[%s12840_s3 + $0x160] sm:$0xff] }
 0x6af   :  { %14514 = vst [vmem:[#allocation309_spill] sm:$0xff] %v11234_v27  ;;  %v11238_v33 = vpop.permute.xlu0 %4164  ;;  %v3843_v7 = vsub.f32 %v3587_v22, %v3715_v10  ;;  %v3602_v10 = vld [vmem:[%s12840_s3 + $0x1d8] sm:$0xff] }
 0x6b0   :  { %5090 = vperm.xlu0 %6013, %v3852_v36   ;;  %v3717_v36 = vmul.f32 %v10821_v58, %v14519_v35  ;;  %v14522_v58 = vld [vmem:[#allocation362_spill] sm:$0xff]  ;;  %v3858_v6 = vsub.f32 %v3602_v10, %v3730_v29  ;;  %v3732_v35 = vmul.f32 %v10953_v53, %v14523_v14 }
 0x6b1   :  { %v14527_v53 = vld [vmem:[#allocation426_spill] sm:$0xff] }
 0x6b2   :  { %5035 = vperm.xlu1 %6014, %v3841_v18   ;;  %v11248_v54 = vpop.permute.xlu1 %4129  ;;  %v3589_v18 = vld [vmem:[%s12840_s3 + $0x170] sm:$0xff] }
 0x6b3   :  { %v11252_v62 = vpop.permute.xlu0 %4484  ;;  %v3845_v22 = vsub.f32 %v3589_v18, %v3717_v36  ;;  %v3604_v36 = vld [vmem:[%s12840_s3 + $0x1e8] sm:$0xff] }
 0x6b4   :  { %14518 = vst [vmem:[#allocation420_spill] sm:$0xff] %v11252_v62  ;;  %5100 = vperm.xlu0 %6013, %v3854_v1   ;;  %v3719_v1 = vmul.f32 %v10853_v51, %v14522_v58  ;;  %v14525_v51 = vld [vmem:[#allocation366_spill] sm:$0xff]  ;;  %v3860_v10 = vsub.f32 %v3604_v36, %v3732_v35  ;;  %v3734_v58 = vmul.f32 %v11004_v11, %v14527_v53  ;;  %v14529_v11 = vld [vmem:[#allocation153_spill] sm:$0xff]  ;;  %v3617_v62 = vld [vmem:[%s12840_s3 + $0x250] sm:$0xff] }
 0x6b6   :  { %5045 = vperm.xlu1 %6014, %v3843_v7   ;;  %v11262_v2 = vpop.permute.xlu1 %4449  ;;  %v3591_v7 = vld [vmem:[%s12840_s3 + $0x180] sm:$0xff] }
 0x6b7   :  { %14520 = vst [vmem:[#allocation422_spill] sm:$0xff] %v11262_v2  ;;  %v11266_v43 = vpop.permute.xlu0 %4174  ;;  %v3847_v18 = vsub.f32 %v3591_v7, %v3719_v1  ;;  %v3606_v1 = vld [vmem:[%s12840_s3 + $0x1f8] sm:$0xff] }
 0x6b8   :  { %5110 = vperm.xlu0 %6013, %v3856_v44   ;;  %v3721_v44 = vmul.f32 %v10892_v3, %v14525_v51  ;;  %v14528_v3 = vld [vmem:[#allocation373_spill] sm:$0xff]  ;;  %v3862_v36 = vsub.f32 %v3606_v1, %v3734_v58 }
 0x6b9   :  { %v14530_v51 = vld [vmem:[#allocation421_spill] sm:$0xff] }
 0x6ba   :  { %5055 = vperm.xlu1 %6014, %v3845_v22   ;;  %v11276_v61 = vpop.permute.xlu1 %4139  ;;  %v3593_v22 = vld [vmem:[%s12840_s3 + $0x190] sm:$0xff]  ;;  %v3736_v53 = vmul.f32 %v14530_v51, %v14529_v11  ;;  %v14535_v11 = vld [vmem:[#allocation349_spill] sm:$0xff] }
 0x6bb   :  { %v11280_v31 = vpop.permute.xlu0 %4494  ;;  %v3849_v7 = vsub.f32 %v3593_v22, %v3721_v44  ;;  %v3608_v44 = vld [vmem:[%s12840_s3 + $0x208] sm:$0xff] }
 0x6bc   :  { %14524 = vst [vmem:[#allocation298_spill] sm:$0xff] %v11280_v31  ;;  %5120 = vperm.xlu0 %6013, %v3858_v6   ;;  %v3723_v6 = vmul.f32 %v10931_v52, %v14528_v3  ;;  %v14532_v52 = vld [vmem:[#allocation382_spill] sm:$0xff]  ;;  %v3864_v1 = vsub.f32 %v3608_v44, %v3736_v53  ;;  %v14534_v3 = vld [vmem:[#allocation171_spill] sm:$0xff] }
 0x6bd   :  { %v3738_v51 = vmul.f32 %v14535_v11, %v14534_v3  ;;  %v14538_v3 = vld [vmem:[#allocation449_spill] sm:$0xff] }
 0x6be   :  { %5065 = vperm.xlu1 %6014, %v3847_v18   ;;  %v11290_v29 = vpop.permute.xlu1 %4459  ;;  %v3595_v18 = vld [vmem:[%s12840_s3 + $0x1a0] sm:$0xff] }
 0x6bf   :  { %14526 = vst [vmem:[#allocation430_spill] sm:$0xff] %v11290_v29  ;;  %v11294_v14 = vpop.permute.xlu0 %4184  ;;  %v3851_v22 = vsub.f32 %v3595_v18, %v3723_v6  ;;  %v3610_v6 = vld [vmem:[%s12840_s3 + $0x218] sm:$0xff] }
 0x6c0   :  { %5130 = vperm.xlu0 %6013, %v3860_v10   ;;  %v3725_v10 = vmul.f32 %v10961_v9, %v14532_v52  ;;  %v14536_v9 = vld [vmem:[#allocation395_spill] sm:$0xff]  ;;  %v3866_v44 = vsub.f32 %v3610_v6, %v3738_v51 }
 0x6c1   :  { %v14537_v52 = vld [vmem:[#allocation183_spill] sm:$0xff] }
 0x6c2   :  { %5075 = vperm.xlu1 %6014, %v3849_v7   ;;  %v11304_v35 = vpop.permute.xlu1 %4149  ;;  %v3597_v7 = vld [vmem:[%s12840_s3 + $0x1b0] sm:$0xff]  ;;  %v3740_v11 = vmul.f32 %v14538_v3, %v14537_v52 }
 0x6c3   :  { %v11308_v29 = vpop.permute.xlu0 %4504  ;;  %v3853_v18 = vsub.f32 %v3597_v7, %v3725_v10  ;;  %v3612_v10 = vld [vmem:[%s12840_s3 + $0x228] sm:$0xff]  ;;  %v14543_v52 = vld [vmem:[#allocation8_spill] sm:$0xff] }
 0x6c4   :  { %14531 = vst [vmem:[#allocation284_spill] sm:$0xff] %v11308_v29  ;;  %5140 = vperm.xlu0 %6013, %v3862_v36   ;;  %v3727_v36 = vmul.f32 %v10996_v39, %v14536_v9  ;;  %v14540_v39 = vld [vmem:[#allocation406_spill] sm:$0xff]  ;;  %v3868_v6 = vsub.f32 %v3612_v10, %v3740_v11  ;;  %v14542_v9 = vld [vmem:[#allocation195_spill] sm:$0xff] }
 0x6c5   :  { %v3742_v3 = vmul.f32 %v14543_v52, %v14542_v9  ;;  %v14546_v9 = vld [vmem:[#allocation355_spill] sm:$0xff] }
 0x6c6   :  { %5085 = vperm.xlu1 %6014, %v3851_v22   ;;  %v11318_v58 = vpop.permute.xlu1 %4469  ;;  %v3599_v22 = vld [vmem:[%s12840_s3 + $0x1c0] sm:$0xff] }
 0x6c7   :  { %14533 = vst [vmem:[#allocation434_spill] sm:$0xff] %v11318_v58  ;;  %v11322_v2 = vpop.permute.xlu0 %4194  ;;  %v3855_v7 = vsub.f32 %v3599_v22, %v3727_v36  ;;  %v3614_v36 = vld [vmem:[%s12840_s3 + $0x238] sm:$0xff] }
 0x6c8   :  { %5150 = vperm.xlu0 %6013, %v3864_v1   ;;  %v3729_v1 = vmul.f32 %v11032_v42, %v14540_v39  ;;  %v14544_v42 = vld [vmem:[#allocation415_spill] sm:$0xff]  ;;  %v3870_v10 = vsub.f32 %v3614_v36, %v3742_v3 }
 0x6c9   :  { %v14545_v39 = vld [vmem:[#allocation207_spill] sm:$0xff] }
 0x6ca   :  { %5095 = vperm.xlu1 %6014, %v3853_v18   ;;  %v11332_v53 = vpop.permute.xlu1 %4159  ;;  %v3601_v18 = vld [vmem:[%s12840_s3 + $0x1d0] sm:$0xff]  ;;  %v3744_v52 = vmul.f32 %v14546_v9, %v14545_v39 }
 0x6cb   :  { %v11336_v58 = vpop.permute.xlu0 %4514  ;;  %v3857_v22 = vsub.f32 %v3601_v18, %v3729_v1  ;;  %v3616_v1 = vld [vmem:[%s12840_s3 + $0x248] sm:$0xff]  ;;  %v14551_v39 = vld [vmem:[#allocation12_spill] sm:$0xff] }
 0x6cc   :  { %14539 = vst [vmem:[#allocation431_spill] sm:$0xff] %v11336_v58  ;;  %5160 = vperm.xlu0 %6013, %v3866_v44   ;;  %v3731_v44 = vmul.f32 %v11069_v20, %v14544_v42  ;;  %v14548_v20 = vld [vmem:[#allocation423_spill] sm:$0xff]  ;;  %v3872_v36 = vsub.f32 %v3616_v1, %v3744_v52 }
 0x6cd   :  { %v14550_v42 = vld [vmem:[#allocation219_spill] sm:$0xff] }
 0x6ce   :  { %5105 = vperm.xlu1 %6014, %v3855_v7   ;;  %v11346_v51 = vpop.permute.xlu1 %4479  ;;  %v3603_v7 = vld [vmem:[%s12840_s3 + $0x1e0] sm:$0xff]  ;;  %v3746_v9 = vmul.f32 %v14551_v39, %v14550_v42  ;;  %v14554_v42 = vld [vmem:[#allocation231_spill] sm:$0xff] }
 0x6cf   :  { %14541 = vst [vmem:[#allocation74_spill] sm:$0xff] %v11346_v51  ;;  %v11350_v58 = vpop.permute.xlu0 %4204  ;;  %v3859_v18 = vsub.f32 %v3603_v7, %v3731_v44  ;;  %v3618_v44 = vld [vmem:[%s12840_s3 + $0x258] sm:$0xff]  ;;  %v14555_v39 = vld [vmem:[#allocation22_spill] sm:$0xff] }
 0x6d0   :  { %5170 = vperm.xlu0 %6013, %v3868_v6   ;;  %v3733_v6 = vmul.f32 %v11099_v13, %v14548_v20  ;;  %v14552_v13 = vld [vmem:[#allocation156_spill] sm:$0xff]  ;;  %v3874_v1 = vsub.f32 %v3618_v44, %v3746_v9 }
 0x6d2   :  { %5115 = vperm.xlu1 %6014, %v3857_v22   ;;  %v11360_v11 = vpop.permute.xlu1 %4169  ;;  %v3605_v22 = vld [vmem:[%s12840_s3 + $0x1f0] sm:$0xff] }
 0x6d3   :  { %v11364_v51 = vpop.permute.xlu0 %4524  ;;  %v3861_v7 = vsub.f32 %v3605_v22, %v3733_v6  ;;  %v3620_v6 = vld [vmem:[%s12840_s3 + $0x268] sm:$0xff] }
 0x6d4   :  { %14547 = vst [vmem:[#allocation76_spill] sm:$0xff] %v11364_v51  ;;  %5180 = vperm.xlu0 %6013, %v3870_v10   ;;  %v14553_v10 = vld [vmem:[#allocation386_spill] sm:$0xff] }
 0x6d5   :  { %v3735_v20 = vmul.f32 %v14553_v10, %v14552_v13  ;;  %v14558_v13 = vld [vmem:[#allocation428_spill] sm:$0xff] }
 0x6d6   :  { %5125 = vperm.xlu1 %6014, %v3859_v18   ;;  %v11374_v3 = vpop.permute.xlu1 %4489  ;;  %v3607_v18 = vld [vmem:[%s12840_s3 + $0x200] sm:$0xff] }
 0x6d7   :  { %14549 = vst [vmem:[#allocation436_spill] sm:$0xff] %v11374_v3  ;;  %v11378_v51 = vpop.permute.xlu0 %4214  ;;  %v3748_v3 = vmul.f32 %v14555_v39, %v14554_v42  ;;  %v3863_v22 = vsub.f32 %v3607_v18, %v3735_v20  ;;  %v14560_v42 = vld [vmem:[#allocation243_spill] sm:$0xff]  ;;  %v14561_v39 = vld [vmem:[#allocation196_spill] sm:$0xff]  ;;  %v3622_v20 = vld [vmem:[%s12840_s3 + $0x278] sm:$0xff] }
 0x6d8   :  { %5190 = vperm.xlu0 %6013, %v3872_v36   ;;  %v14557_v36 = vld [vmem:[#allocation166_spill] sm:$0xff] }
 0x6d9   :  { %v3737_v10 = vmul.f32 %v14558_v13, %v14557_v36  ;;  %v3876_v44 = vsub.f32 %v3620_v6, %v3748_v3  ;;  %v14563_v36 = vld [vmem:[#allocation437_spill] sm:$0xff] }
 0x6da   :  { %5135 = vperm.xlu1 %6014, %v3861_v7   ;;  %v11388_v52 = vpop.permute.xlu1 %4179  ;;  %v3609_v7 = vld [vmem:[%s12840_s3 + $0x210] sm:$0xff] }
 0x6db   :  { %v11392_v29 = vpop.permute.xlu0 %4534  ;;  %v3865_v18 = vsub.f32 %v3609_v7, %v3737_v10  ;;  %v3624_v10 = vld [vmem:[%s12840_s3 + $0x288] sm:$0xff] }
 0x6dc   :  { %14556 = vst [vmem:[#allocation348_spill] sm:$0xff] %v11392_v29  ;;  %5200 = vperm.xlu0 %6013, %v3874_v1   ;;  %v3750_v29 = vmul.f32 %v14561_v39, %v14560_v42  ;;  %v14562_v1 = vld [vmem:[#allocation178_spill] sm:$0xff]  ;;  %v14564_v42 = vld [vmem:[#allocation255_spill] sm:$0xff]  ;;  %v14565_v39 = vld [vmem:[#allocation208_spill] sm:$0xff] }
 0x6dd   :  { %v3739_v13 = vmul.f32 %v14563_v36, %v14562_v1  ;;  %v14568_v1 = vld [vmem:[#allocation6_spill] sm:$0xff] }
 0x6de   :  { %5145 = vperm.xlu1 %6014, %v3863_v22   ;;  %v11402_v9 = vpop.permute.xlu1 %4499  ;;  %v3611_v22 = vld [vmem:[%s12840_s3 + $0x220] sm:$0xff]  ;;  %v3878_v6 = vsub.f32 %v3622_v20, %v3750_v29 }
 0x6df   :  { %14559 = vst [vmem:[#allocation439_spill] sm:$0xff] %v11402_v9  ;;  %v11406_v27 = vpop.permute.xlu0 %4224  ;;  %v3752_v9 = vmul.f32 %v14565_v39, %v14564_v42  ;;  %v3867_v7 = vsub.f32 %v3611_v22, %v3739_v13  ;;  %v14570_v42 = vld [vmem:[#allocation267_spill] sm:$0xff]  ;;  %v14571_v39 = vld [vmem:[#allocation38_spill] sm:$0xff] }
 0x6e0   :  { %5210 = vperm.xlu0 %6013, %v3876_v44   ;;  %v14567_v44 = vld [vmem:[#allocation191_spill] sm:$0xff] }
 0x6e1   :  { %v3741_v36 = vmul.f32 %v14568_v1, %v14567_v44  ;;  %v3880_v20 = vsub.f32 %v3624_v10, %v3752_v9  ;;  %v14572_v22 = vld [vmem:[#allocation203_spill] sm:$0xff] }
 0x6e2   :  { %5155 = vperm.xlu1 %6014, %v3865_v18   ;;  %v11416_v3 = vpop.permute.xlu1 %4189  ;;  %v3613_v18 = vld [vmem:[%s12840_s3 + $0x230] sm:$0xff] }
 0x6e3   :  { %v11420_v31 = vpop.permute.xlu0 %4544  ;;  %v3869_v13 = vsub.f32 %v3613_v18, %v3741_v36  ;;  %v3628_v36 = vld [vmem:[%s12840_s3 + $0x2a8] sm:$0xff] }
 0x6e4   :  { %14566 = vst [vmem:[#allocation432_spill] sm:$0xff] %v11420_v31  ;;  %5220 = vperm.xlu0 %6013, %v3878_v6   ;;  %v3754_v31 = vmul.f32 %v14571_v39, %v14570_v42  ;;  %v14573_v6 = vld [vmem:[#allocation4_spill] sm:$0xff]  ;;  %v14575_v42 = vld [vmem:[#allocation283_spill] sm:$0xff] }
 0x6e5   :  { %v3743_v44 = vmul.f32 %v14573_v6, %v14572_v22  ;;  %v14576_v39 = vld [vmem:[#allocation384_spill] sm:$0xff]  ;;  %v14578_v22 = vld [vmem:[#allocation14_spill] sm:$0xff] }
 0x6e6   :  { %5165 = vperm.xlu1 %6014, %v3867_v7   ;;  %v11430_v29 = vpop.permute.xlu1 %4509  ;;  %v3615_v7 = vld [vmem:[%s12840_s3 + $0x240] sm:$0xff]  ;;  %v3882_v10 = vsub.f32 %v3626_v50, %v3754_v31  ;;  %v14580_v31 = vld [vmem:[#allocation299_spill] sm:$0xff] }
 0x6e7   :  { %14569 = vst [vmem:[#allocation300_spill] sm:$0xff] %v11430_v29  ;;  %v11439_v1 = vpop.permute.xlu0 %4234  ;;  %v3756_v29 = vmul.f32 %v14576_v39, %v14575_v42  ;;  %v3871_v18 = vsub.f32 %v3615_v7, %v3743_v44  ;;  %v3758_v42 = vmul.f32 %v14581_v15, %v14580_v31  ;;  %v3630_v44 = vld [vmem:[%s12840_s3 + $0x2b8] sm:$0xff]  ;;  %v14586_v15 = vld [vmem:[#allocation315_spill] sm:$0xff] }
 0x6e8   :  { %5230 = vperm.xlu0 %6013, %v3880_v20   ;;  %v14577_v20 = vld [vmem:[#allocation215_spill] sm:$0xff]  ;;  %v14587_v31 = vld [vmem:[#allocation389_spill] sm:$0xff] }
 0x6e9   :  { %v3745_v6 = vmul.f32 %v14578_v22, %v14577_v20  ;;  %v3884_v50 = vsub.f32 %v3628_v36, %v3756_v29  ;;  %v14584_v20 = vld [vmem:[#allocation184_spill] sm:$0xff]  ;;  %v3886_v36 = vsub.f32 %v3630_v44, %v3758_v42 }
 0x6ea   :  { %5175 = vperm.xlu1 %6014, %v3869_v13   ;;  %v11444_v9 = vpop.permute.xlu1 %4199 }
 0x6eb   :  { %14574 = vst [vmem:[#allocation441_spill] sm:$0xff] %v11444_v9  ;;  %v11460_v39 = vpop.permute.xlu0 %4554  ;;  %v3873_v7 = vsub.f32 %v3617_v62, %v3745_v6  ;;  %v3632_v62 = vld [vmem:[%s12840_s3 + $0x2c8] sm:$0xff] }
 0x6ec   :  { %5240 = vperm.xlu0 %6013, %v3882_v10   ;;  %14582 = vst [vmem:[#allocation443_spill] sm:$0xff] %v11460_v39  ;;  %v14583_v10 = vld [vmem:[#allocation227_spill] sm:$0xff] }
 0x6ed   :  { %v3747_v22 = vmul.f32 %v14584_v20, %v14583_v10  ;;  %v14589_v10 = vld [vmem:[#allocation18_spill] sm:$0xff] }
 0x6ee   :  { %5185 = vperm.xlu1 %6014, %v3871_v18   ;;  %v11456_v13 = vpop.permute.xlu1 %4519  ;;  %v3619_v18 = vld [vmem:[%s12840_s3 + $0x260] sm:$0xff] }
 0x6ef   :  { %14579 = vst [vmem:[#allocation433_spill] sm:$0xff] %v11456_v13  ;;  %v3760_v13 = vmul.f32 %v14587_v31, %v14586_v15  ;;  %v3875_v6 = vsub.f32 %v3619_v18, %v3747_v22  ;;  %v14591_v15 = vld [vmem:[#allocation326_spill] sm:$0xff]  ;;  %v14592_v31 = vld [vmem:[#allocation392_spill] sm:$0xff]  ;;  %v3634_v22 = vld [vmem:[%s12840_s3 + $0x2d8] sm:$0xff] }
 0x6f0   :  { %5250 = vperm.xlu0 %6013, %v3884_v50   ;;  %v14588_v50 = vld [vmem:[#allocation239_spill] sm:$0xff]  ;;  %v3762_v60 = vmul.f32 %v14592_v31, %v14591_v15 }
 0x6f1   :  { %v3749_v20 = vmul.f32 %v14589_v10, %v14588_v50  ;;  %v3888_v44 = vsub.f32 %v3632_v62, %v3760_v13  ;;  %v14595_v50 = vld [vmem:[#allocation30_spill] sm:$0xff]  ;;  %v14597_v62 = vld [vmem:[#allocation112_spill] sm:$0xff] }
 0x6f2   :  { %5195 = vperm.xlu1 %6014, %v3873_v7   ;;  %v11470_v29 = vpop.permute.xlu1 %4209  ;;  %v3621_v7 = vld [vmem:[%s12840_s3 + $0x270] sm:$0xff]  ;;  %v4622_v15 = vmul.f32 %v10925_v57, %v14597_v62 }
 0x6f3   :  { %14585 = vst [vmem:[#allocation167_spill] sm:$0xff] %v11470_v29  ;;  %v11474_v39 = vpop.permute.xlu0 %4244  ;;  %v3877_v18 = vsub.f32 %v3621_v7, %v3749_v20 }
 0x6f4   :  { %5260 = vperm.xlu0 %6013, %v3886_v36   ;;  %v14594_v36 = vld [vmem:[#allocation251_spill] sm:$0xff] }
 0x6f5   :  { %v3751_v10 = vmul.f32 %v14595_v50, %v14594_v36  ;;  %v3636_v36 = vld [vmem:[%s12840_s3 + $0x2e8] sm:$0xff] }
 0x6f6   :  { %5205 = vperm.xlu1 %6014, %v3875_v6   ;;  %v11484_v42 = vpop.permute.xlu1 %4529  ;;  %v3623_v6 = vld [vmem:[%s12840_s3 + $0x280] sm:$0xff] }
 0x6f7   :  { %14590 = vst [vmem:[#allocation444_spill] sm:$0xff] %v11484_v42  ;;  %v11488_v41 = vpop.permute.xlu0 %4564  ;;  %v14596_v42 = vld [vmem:[#allocation110_spill] sm:$0xff]  ;;  %v3879_v29 = vsub.f32 %v3623_v6, %v3751_v10 }
 0x6f8   :  { %14593 = vst [vmem:[#allocation350_spill] sm:$0xff] %v11488_v41  ;;  %5270 = vperm.xlu0 %6013, %v3888_v44   ;;  %v4621_v13 = vmul.f32 %v10925_v57, %v14596_v42  ;;  %v3890_v41 = vsub.f32 %v3634_v22, %v3762_v60  ;;  %v14599_v44 = vld [vmem:[#allocation374_spill] sm:$0xff]  ;;  %v14600_v42 = vld [vmem:[#allocation263_spill] sm:$0xff]  ;;  %v3625_v57 = vld [vmem:[%s12840_s3 + $0x290] sm:$0xff] }
 0x6f9   :  { %v3764_v20 = vmul.f32 %v14599_v44, %v14598_v34  ;;  %v3753_v9 = vmul.f32 %v14601_v12, %v14600_v42  ;;  %v14602_v60 = vld [vmem:[#allocation118_spill] sm:$0xff]  ;;  %v14603_v34 = vld [vmem:[#allocation120_spill] sm:$0xff]  ;;  %v14607_v42 = vld [vmem:[#allocation381_spill] sm:$0xff] }
 0x6fa   :  { %5215 = vperm.xlu1 %6014, %v3877_v18   ;;  %v11502_v31 = vpop.permute.xlu1 %4219  ;;  %v4625_v22 = vmul.f32 %v10955_v4, %v14602_v60  ;;  %v4626_v18 = vmul.f32 %v10955_v4, %v14603_v34  ;;  %v14604_v10 = vld [vmem:[#allocation334_spill] sm:$0xff]  ;;  %v3638_v4 = vld [vmem:[%s12840_s3 + $0x2f8] sm:$0xff] }
 0x6fb   :  { %v4961_v7 = vpop.permute.xlu0 %4960  ;;  %v14605_v6 = vld [vmem:[#allocation46_spill] sm:$0xff] }
 0x6fc   :  { %v5517_v50 = vadd.f32 %v4961_v7, %v4621_v13  ;;  %v5518_v49 = vadd.f32 %v4961_v7, %v4622_v15  ;;  %5280 = vperm.xlu0 %6013, %v3890_v41   ;;  %v3892_v41 = vsub.f32 %v3636_v36, %v3764_v20  ;;  %v3766_v13 = vmul.f32 %v14605_v6, %v14604_v10  ;;  %v14609_v36 = vld [vmem:[#allocation128_spill] sm:$0xff] }
 0x6fd   :  { %v3881_v7 = vsub.f32 %v3625_v57, %v3753_v9  ;;  %v4630_v34 = vmul.f32 %v10991_v17, %v14609_v36 }
 0x6fe   :  { %5774 = vst [vmem:[%s12841_s4 + $0x1b0] sm:$0xff] %v5517_v50  ;;  %5775 = vst.msk [vmem:[%s12841_s4 + $0x1b8] sm:$0xff] %vm5720_vm1, %v5518_v49  ;;  %5225 = vperm.xlu1 %6014, %v3879_v29   ;;  %v11525_v12 = vpop.permute.xlu1 %4539  ;;  %v14606_v50 = vld [vmem:[#allocation276_spill] sm:$0xff]  ;;  %v3627_v49 = vld [vmem:[%s12840_s3 + $0x2a0] sm:$0xff]  ;;  %v3894_v57 = vsub.f32 %v3638_v4, %v3766_v13 }
 0x6ff   :  { %v4971_v62 = vpop.permute.xlu0 %4970  ;;  %v3755_v60 = vmul.f32 %v14607_v42, %v14606_v50  ;;  %v14608_v29 = vld [vmem:[#allocation126_spill] sm:$0xff]  ;;  %v14612_v50 = vld [vmem:[#allocation292_spill] sm:$0xff] }
 0x700   :  { %v5521_v15 = vadd.f32 %v4971_v62, %v4625_v22  ;;  %v5522_v44 = vadd.f32 %v4971_v62, %v4626_v18  ;;  %5290 = vperm.xlu0 %6013, %v3892_v41   ;;  %v4629_v20 = vmul.f32 %v10991_v17, %v14608_v29  ;;  %v14610_v22 = vld [vmem:[#allocation338_spill] sm:$0xff]  ;;  %v3640_v17 = vld [vmem:[%s12840_s3 + $0x308] sm:$0xff]  ;;  %v14613_v42 = vld [vmem:[#allocation220_spill] sm:$0xff] }
 0x701   :  { %v14611_v18 = vld [vmem:[#allocation394_spill] sm:$0xff]  ;;  %v3757_v29 = vmul.f32 %v14613_v42, %v14612_v50  ;;  %v14618_v50 = vld [vmem:[#allocation308_spill] sm:$0xff] }
 0x702   :  { %5778 = vst [vmem:[%s12841_s4 + $0x1d0] sm:$0xff] %v5521_v15  ;;  %5779 = vst.msk [vmem:[%s12841_s4 + $0x1d8] sm:$0xff] %vm5720_vm1, %v5522_v44  ;;  %5235 = vperm.xlu1 %6014, %v3881_v7   ;;  %v11548_v9 = vpop.permute.xlu1 %4229  ;;  %v3768_v41 = vmul.f32 %v14611_v18, %v14610_v22  ;;  %v3883_v15 = vsub.f32 %v3627_v49, %v3755_v60  ;;  %v3629_v44 = vld [vmem:[%s12840_s3 + $0x2b0] sm:$0xff]  ;;  %v14614_v13 = vld [vmem:[#allocation134_spill] sm:$0xff] }
 0x703   :  { %v4981_v10 = vpop.permute.xlu0 %4980  ;;  %v4633_v4 = vmul.f32 %v11026_v30, %v14614_v13  ;;  %v14615_v7 = vld [vmem:[#allocation136_spill] sm:$0xff] }
 0x704   :  { %v5525_v6 = vadd.f32 %v4981_v10, %v4629_v20  ;;  %v5526_v62 = vadd.f32 %v4981_v10, %v4630_v34  ;;  %5300 = vperm.xlu0 %6013, %v3894_v57   ;;  %v4634_v36 = vmul.f32 %v11026_v30, %v14615_v7  ;;  %v3896_v49 = vsub.f32 %v3640_v17, %v3768_v41  ;;  %v14616_v20 = vld [vmem:[#allocation342_spill] sm:$0xff]  ;;  %v14617_v34 = vld [vmem:[#allocation379_spill] sm:$0xff]  ;;  %v3642_v30 = vld [vmem:[%s12840_s3 + $0x318] sm:$0xff] }
 0x705   :  { %v3770_v57 = vmul.f32 %v14617_v34, %v14616_v20  ;;  %v14619_v42 = vld [vmem:[#allocation240_spill] sm:$0xff]  ;;  %v14620_v41 = vld [vmem:[#allocation142_spill] sm:$0xff] }
 0x706   :  { %5782 = vst [vmem:[%s12841_s4 + $0x1f0] sm:$0xff] %v5525_v6  ;;  %5783 = vst.msk [vmem:[%s12841_s4 + $0x1f8] sm:$0xff] %vm5720_vm1, %v5526_v62  ;;  %5245 = vperm.xlu1 %6014, %v3883_v15   ;;  %v11571_v60 = vpop.permute.xlu1 %4549  ;;  %v3885_v6 = vsub.f32 %v3629_v44, %v3757_v29  ;;  %v3759_v13 = vmul.f32 %v14619_v42, %v14618_v50  ;;  %v3631_v62 = vld [vmem:[%s12840_s3 + $0x2c0] sm:$0xff]  ;;  %v4637_v17 = vmul.f32 %v11064_v8, %v14620_v41  ;;  %v14621_v15 = vld [vmem:[#allocation144_spill] sm:$0xff] }
 0x707   :  { %v4991_v22 = vpop.permute.xlu0 %4990  ;;  %v4638_v7 = vmul.f32 %v11064_v8, %v14621_v15  ;;  %v3898_v44 = vsub.f32 %v3642_v30, %v3770_v57  ;;  %v3644_v8 = vld [vmem:[%s12840_s3 + $0x328] sm:$0xff]  ;;  %v14624_v50 = vld [vmem:[#allocation324_spill] sm:$0xff]  ;;  %v14625_v42 = vld [vmem:[#allocation377_spill] sm:$0xff] }
 0x708   :  { %v5529_v18 = vadd.f32 %v4991_v22, %v4633_v4  ;;  %v5530_v10 = vadd.f32 %v4991_v22, %v4634_v36  ;;  %5310 = vperm.xlu0 %6013, %v3896_v49   ;;  %v14622_v4 = vld [vmem:[#allocation346_spill] sm:$0xff]  ;;  %v14623_v36 = vld [vmem:[#allocation401_spill] sm:$0xff]  ;;  %v3761_v41 = vmul.f32 %v14625_v42, %v14624_v50  ;;  %v14631_v50 = vld [vmem:[#allocation328_spill] sm:$0xff] }
 0x709   :  { %v3772_v49 = vmul.f32 %v14623_v36, %v14622_v4  ;;  %v14626_v57 = vld [vmem:[#allocation150_spill] sm:$0xff]  ;;  %v14632_v42 = vld [vmem:[#allocation232_spill] sm:$0xff] }
 0x70a   :  { %5786 = vst [vmem:[%s12841_s4 + $0x210] sm:$0xff] %v5529_v18  ;;  %5787 = vst.msk [vmem:[%s12841_s4 + $0x218] sm:$0xff] %vm5720_vm1, %v5530_v10  ;;  %5255 = vperm.xlu1 %6014, %v3885_v6   ;;  %v11594_v29 = vpop.permute.xlu1 %4239  ;;  %v3887_v18 = vsub.f32 %v3631_v62, %v3759_v13  ;;  %v3633_v10 = vld [vmem:[%s12840_s3 + $0x2d0] sm:$0xff]  ;;  %v4641_v30 = vmul.f32 %v11094_v46, %v14626_v57  ;;  %v3763_v57 = vmul.f32 %v14632_v42, %v14631_v50 }
 0x70b   :  { %v5001_v20 = vpop.permute.xlu0 %5000  ;;  %v14627_v6 = vld [vmem:[#allocation152_spill] sm:$0xff]  ;;  %v3900_v62 = vsub.f32 %v3644_v8, %v3772_v49  ;;  %v3635_v8 = vld [vmem:[%s12840_s3 + $0x2e0] sm:$0xff] }
 0x70c   :  { %v5533_v34 = vadd.f32 %v5001_v20, %v4637_v17  ;;  %v5534_v22 = vadd.f32 %v5001_v20, %v4638_v7  ;;  %5320 = vperm.xlu0 %6013, %v3898_v44   ;;  %v4642_v15 = vmul.f32 %v11094_v46, %v14627_v6  ;;  %v14629_v17 = vld [vmem:[#allocation279_spill] sm:$0xff]  ;;  %v14630_v7 = vld [vmem:[#allocation404_spill] sm:$0xff]  ;;  %v3646_v46 = vld [vmem:[%s12840_s3 + $0x338] sm:$0xff] }
 0x70d   :  { %v3774_v44 = vmul.f32 %v14630_v7, %v14629_v17  ;;  %v14634_v6 = vld [vmem:[#allocation108_spill] sm:$0xff]  ;;  %v14635_v17 = vld [vmem:[#allocation162_spill] sm:$0xff] }
 0x70e   :  { %5790 = vst [vmem:[%s12841_s4 + $0x230] sm:$0xff] %v5533_v34  ;;  %5791 = vst.msk [vmem:[%s12841_s4 + $0x238] sm:$0xff] %vm5720_vm1, %v5534_v22  ;;  %5265 = vperm.xlu1 %6014, %v3887_v18   ;;  %v11617_v13 = vpop.permute.xlu1 %4559  ;;  %v3889_v34 = vsub.f32 %v3633_v10, %v3761_v41  ;;  %v14633_v22 = vld [vmem:[#allocation106_spill] sm:$0xff]  ;;  %v4620_v49 = vmul.f32 %v11045_v59, %v14634_v6  ;;  %v4645_v7 = vmul.f32 %v11126_v37, %v14635_v17  ;;  %v14637_v10 = vld [vmem:[#allocation295_spill] sm:$0xff] }
 0x70f   :  { %14628 = vst [vmem:[#allocation446_spill] sm:$0xff] %v11617_v13  ;;  %v5011_v4 = vpop.permute.xlu0 %5010  ;;  %v4619_v18 = vmul.f32 %v11045_v59, %v14633_v22  ;;  %v3902_v41 = vsub.f32 %v3646_v46, %v3774_v44  ;;  %v3891_v17 = vsub.f32 %v3635_v8, %v3763_v57  ;;  %v14640_v13 = vld [vmem:[#allocation380_spill] sm:$0xff] }
 0x710   :  { %v5537_v36 = vadd.f32 %v5011_v4, %v4641_v30  ;;  %v5538_v20 = vadd.f32 %v5011_v4, %v4642_v15  ;;  %5330 = vperm.xlu0 %6013, %v3900_v62   ;;  %v14636_v30 = vld [vmem:[#allocation164_spill] sm:$0xff] }
 0x711   :  { %v4646_v15 = vmul.f32 %v11126_v37, %v14636_v30  ;;  %v14638_v62 = vld [vmem:[#allocation252_spill] sm:$0xff]  ;;  %v3648_v37 = vld [vmem:[%s12840_s3 + $0x348] sm:$0xff] }
 0x712   :  { %5794 = vst [vmem:[%s12841_s4 + $0x250] sm:$0xff] %v5537_v36  ;;  %5795 = vst.msk [vmem:[%s12841_s4 + $0x258] sm:$0xff] %vm5720_vm1, %v5538_v20  ;;  %5275 = vperm.xlu1 %6014, %v3889_v34   ;;  %v4956_v59 = vpop.permute.xlu1 %4955  ;;  %v3776_v4 = vmul.f32 %v14638_v62, %v14637_v10  ;;  %v14639_v30 = vld [vmem:[#allocation332_spill] sm:$0xff]  ;;  %v14641_v34 = vld [vmem:[#allocation114_spill] sm:$0xff] }
 0x713   :  { %v5515_v50 = vadd.f32 %v4956_v59, %v4619_v18  ;;  %v5516_v42 = vadd.f32 %v4956_v59, %v4620_v49  ;;  %v5021_v22 = vpop.permute.xlu0 %5020  ;;  %v3765_v20 = vmul.f32 %v14640_v13, %v14639_v30  ;;  %v4623_v44 = vmul.f32 %v11075_v21, %v14641_v34  ;;  %v14642_v46 = vld [vmem:[#allocation116_spill] sm:$0xff]  ;;  %v14643_v13 = vld [vmem:[#allocation174_spill] sm:$0xff] }
 0x714   :  { %v5541_v6 = vadd.f32 %v5021_v22, %v4645_v7  ;;  %v5542_v36 = vadd.f32 %v5021_v22, %v4646_v15  ;;  %5340 = vperm.xlu0 %6013, %v3902_v41   ;;  %v4624_v10 = vmul.f32 %v11075_v21, %v14642_v46  ;;  %v3637_v57 = vld [vmem:[%s12840_s3 + $0x2f0] sm:$0xff]  ;;  %v4649_v18 = vmul.f32 %v11154_v24, %v14643_v13  ;;  %v14645_v15 = vld [vmem:[#allocation311_spill] sm:$0xff] }
 0x715   :  { %5772 = vst [vmem:[%s12841_s4 + $0x1a0] sm:$0xff] %v5515_v50  ;;  %5773 = vst.msk [vmem:[%s12841_s4 + $0x1a8] sm:$0xff] %vm5720_vm1, %v5516_v42  ;;  %v14644_v49 = vld [vmem:[#allocation176_spill] sm:$0xff]  ;;  %v3904_v7 = vsub.f32 %v3648_v37, %v3776_v4  ;;  %v3893_v30 = vsub.f32 %v3637_v57, %v3765_v20  ;;  %v14648_v46 = vld [vmem:[#allocation383_spill] sm:$0xff] }
 0x716   :  { %v4650_v8 = vmul.f32 %v11154_v24, %v14644_v49  ;;  %5798 = vst [vmem:[%s12841_s4 + $0x270] sm:$0xff] %v5541_v6  ;;  %5799 = vst.msk [vmem:[%s12841_s4 + $0x278] sm:$0xff] %vm5720_vm1, %v5542_v36  ;;  %5285 = vperm.xlu1 %6014, %v3891_v17   ;;  %v4966_v21 = vpop.permute.xlu1 %4965  ;;  %v14646_v59 = vld [vmem:[#allocation388_spill] sm:$0xff]  ;;  %v3650_v24 = vld [vmem:[%s12840_s3 + $0x358] sm:$0xff] }
 0x717   :  { %v3778_v41 = vmul.f32 %v14646_v59, %v14645_v15  ;;  %v5519_v62 = vadd.f32 %v4966_v21, %v4623_v44  ;;  %v5520_v50 = vadd.f32 %v4966_v21, %v4624_v10  ;;  %v5031_v42 = vpop.permute.xlu0 %5030  ;;  %v14647_v34 = vld [vmem:[#allocation336_spill] sm:$0xff]  ;;  %v14649_v17 = vld [vmem:[#allocation122_spill] sm:$0xff]  ;;  %v14651_v44 = vld [vmem:[#allocation187_spill] sm:$0xff] }
 0x718   :  { %v5545_v22 = vadd.f32 %v5031_v42, %v4649_v18  ;;  %v5546_v6 = vadd.f32 %v5031_v42, %v4650_v8  ;;  %5350 = vperm.xlu0 %6013, %v3904_v7   ;;  %v3767_v36 = vmul.f32 %v14648_v46, %v14647_v34  ;;  %v4627_v4 = vmul.f32 %v11105_v32, %v14649_v17  ;;  %v14650_v37 = vld [vmem:[#allocation124_spill] sm:$0xff]  ;;  %v3639_v20 = vld [vmem:[%s12840_s3 + $0x300] sm:$0xff]  ;;  %v14652_v57 = vld [vmem:[#allocation189_spill] sm:$0xff] }
 0x719   :  { %v4628_v13 = vmul.f32 %v11105_v32, %v14650_v37  ;;  %5776 = vst [vmem:[%s12841_s4 + $0x1c0] sm:$0xff] %v5519_v62  ;;  %5777 = vst.msk [vmem:[%s12841_s4 + $0x1c8] sm:$0xff] %vm5720_vm1, %v5520_v50  ;;  %v4653_v10 = vmul.f32 %v11182_v16, %v14651_v44  ;;  %v4654_v18 = vmul.f32 %v11182_v16, %v14652_v57  ;;  %v14653_v8 = vld [vmem:[#allocation357_spill] sm:$0xff]  ;;  %v3652_v16 = vld [vmem:[%s12840_s3 + $0x368] sm:$0xff] }
 0x71a   :  { %5802 = vst [vmem:[%s12841_s4 + $0x290] sm:$0xff] %v5545_v22  ;;  %5803 = vst.msk [vmem:[%s12841_s4 + $0x298] sm:$0xff] %vm5720_vm1, %v5546_v6  ;;  %5295 = vperm.xlu1 %6014, %v3893_v30   ;;  %v4976_v32 = vpop.permute.xlu1 %4975  ;;  %v3906_v49 = vsub.f32 %v3650_v24, %v3778_v41  ;;  %v3780_v21 = vmul.f32 %v10705_v48, %v14653_v8  ;;  %v3895_v42 = vsub.f32 %v3639_v20, %v3767_v36  ;;  %v14654_v22 = vld [vmem:[#allocation340_spill] sm:$0xff]  ;;  %v14655_v34 = vld [vmem:[#allocation54_spill] sm:$0xff] }
 0x71b   :  { %v5523_v7 = vadd.f32 %v4976_v32, %v4627_v4  ;;  %v5524_v15 = vadd.f32 %v4976_v32, %v4628_v13  ;;  %v5041_v59 = vpop.permute.xlu0 %5040  ;;  %v3769_v6 = vmul.f32 %v14655_v34, %v14654_v22  ;;  %v14656_v30 = vld [vmem:[#allocation130_spill] sm:$0xff]  ;;  %v14657_v24 = vld [vmem:[#allocation132_spill] sm:$0xff]  ;;  %v14658_v36 = vld [vmem:[#allocation199_spill] sm:$0xff] }
 0x71c   :  { %v5549_v62 = vadd.f32 %v5041_v59, %v4653_v10  ;;  %v5550_v50 = vadd.f32 %v5041_v59, %v4654_v18  ;;  %5360 = vperm.xlu0 %6013, %v3906_v49   ;;  %v4631_v41 = vmul.f32 %v11136_v26, %v14656_v30  ;;  %v4632_v48 = vmul.f32 %v11136_v26, %v14657_v24  ;;  %v3641_v46 = vld [vmem:[%s12840_s3 + $0x310] sm:$0xff]  ;;  %v14659_v4 = vld [vmem:[#allocation201_spill] sm:$0xff] }
 0x71d   :  { %5780 = vst [vmem:[%s12841_s4 + $0x1e0] sm:$0xff] %v5523_v7  ;;  %5781 = vst.msk [vmem:[%s12841_s4 + $0x1e8] sm:$0xff] %vm5720_vm1, %v5524_v15  ;;  %v4657_v17 = vmul.f32 %v11210_v0, %v14658_v36  ;;  %v4658_v37 = vmul.f32 %v11210_v0, %v14659_v4  ;;  %v3908_v13 = vsub.f32 %v3652_v16, %v3780_v21  ;;  %v14660_v20 = vld [vmem:[#allocation361_spill] sm:$0xff]  ;;  %v14661_v7 = vld [vmem:[#allocation344_spill] sm:$0xff] }
 0x71e   :  { %5806 = vst [vmem:[%s12841_s4 + $0x2b0] sm:$0xff] %v5549_v62  ;;  %5807 = vst.msk [vmem:[%s12841_s4 + $0x2b8] sm:$0xff] %vm5720_vm1, %v5550_v50  ;;  %5305 = vperm.xlu1 %6014, %v3895_v42   ;;  %v4986_v26 = vpop.permute.xlu1 %4985  ;;  %v3782_v44 = vmul.f32 %v10740_v19, %v14660_v20  ;;  %v3654_v0 = vld [vmem:[%s12840_s3 + $0x378] sm:$0xff]  ;;  %v3897_v8 = vsub.f32 %v3641_v46, %v3769_v6  ;;  %v14662_v15 = vld [vmem:[#allocation391_spill] sm:$0xff] }
 0x71f   :  { %v5527_v10 = vadd.f32 %v4986_v26, %v4631_v41  ;;  %v5528_v57 = vadd.f32 %v4986_v26, %v4632_v48  ;;  %v5051_v18 = vpop.permute.xlu0 %5050  ;;  %v3771_v59 = vmul.f32 %v14662_v15, %v14661_v7  ;;  %v14663_v62 = vld [vmem:[#allocation138_spill] sm:$0xff]  ;;  %v14664_v16 = vld [vmem:[#allocation140_spill] sm:$0xff]  ;;  %v14665_v42 = vld [vmem:[#allocation211_spill] sm:$0xff] }
 0x720   :  { %v5553_v32 = vadd.f32 %v5051_v18, %v4657_v17  ;;  %v5554_v49 = vadd.f32 %v5051_v18, %v4658_v37  ;;  %5370 = vperm.xlu0 %6013, %v3908_v13   ;;  %v4635_v21 = vmul.f32 %v11164_v45, %v14663_v62  ;;  %v4636_v19 = vmul.f32 %v11164_v45, %v14664_v16  ;;  %v3643_v50 = vld [vmem:[%s12840_s3 + $0x320] sm:$0xff]  ;;  %v14666_v34 = vld [vmem:[#allocation213_spill] sm:$0xff]  ;;  %v14668_v26 = vld [vmem:[#allocation271_spill] sm:$0xff] }
 0x721   :  { %5784 = vst [vmem:[%s12841_s4 + $0x200] sm:$0xff] %v5527_v10  ;;  %5785 = vst.msk [vmem:[%s12841_s4 + $0x208] sm:$0xff] %vm5720_vm1, %v5528_v57  ;;  %v4661_v22 = vmul.f32 %v11238_v33, %v14665_v42  ;;  %v4662_v6 = vmul.f32 %v11238_v33, %v14666_v34  ;;  %v3910_v30 = vsub.f32 %v3654_v0, %v3782_v44  ;;  %v14667_v41 = vld [vmem:[#allocation365_spill] sm:$0xff]  ;;  %v3656_v33 = vld [vmem:[%s12840_s3 + $0x388] sm:$0xff] }
 0x722   :  { %5810 = vst [vmem:[%s12841_s4 + $0x2d0] sm:$0xff] %v5553_v32  ;;  %5811 = vst.msk [vmem:[%s12841_s4 + $0x2d8] sm:$0xff] %vm5720_vm1, %v5554_v49  ;;  %5315 = vperm.xlu1 %6014, %v3897_v8   ;;  %v4996_v45 = vpop.permute.xlu1 %4995  ;;  %v3784_v24 = vmul.f32 %v10768_v47, %v14667_v41  ;;  %v3899_v37 = vsub.f32 %v3643_v50, %v3771_v59  ;;  %v3773_v13 = vmul.f32 %v10719_v63, %v14668_v26  ;;  %v14669_v20 = vld [vmem:[#allocation146_spill] sm:$0xff]  ;;  %v14670_v10 = vld [vmem:[#allocation148_spill] sm:$0xff] }
 0x723   :  { %v5531_v48 = vadd.f32 %v4996_v45, %v4635_v21  ;;  %v5532_v46 = vadd.f32 %v4996_v45, %v4636_v19  ;;  %v5061_v36 = vpop.permute.xlu0 %5060  ;;  %v4639_v44 = vmul.f32 %v11192_v23, %v14669_v20  ;;  %v4640_v47 = vmul.f32 %v11192_v23, %v14670_v10  ;;  %v3645_v57 = vld [vmem:[%s12840_s3 + $0x330] sm:$0xff]  ;;  %v14671_v63 = vld [vmem:[#allocation223_spill] sm:$0xff]  ;;  %v14672_v0 = vld [vmem:[#allocation225_spill] sm:$0xff] }
 0x724   :  { %v5557_v17 = vadd.f32 %v5061_v36, %v4661_v22  ;;  %v5558_v4 = vadd.f32 %v5061_v36, %v4662_v6  ;;  %5380 = vperm.xlu0 %6013, %v3910_v30   ;;  %v4665_v18 = vmul.f32 %v11266_v43, %v14671_v63  ;;  %v4666_v32 = vmul.f32 %v11266_v43, %v14672_v0  ;;  %v14673_v8 = vld [vmem:[#allocation370_spill] sm:$0xff]  ;;  %v3658_v43 = vld [vmem:[%s12840_s3 + $0x398] sm:$0xff]  ;;  %v14674_v50 = vld [vmem:[#allocation287_spill] sm:$0xff] }
 0x725   :  { %5788 = vst [vmem:[%s12841_s4 + $0x220] sm:$0xff] %v5531_v48  ;;  %5789 = vst.msk [vmem:[%s12841_s4 + $0x228] sm:$0xff] %vm5720_vm1, %v5532_v46  ;;  %v3912_v49 = vsub.f32 %v3656_v33, %v3784_v24  ;;  %v3786_v7 = vmul.f32 %v10798_v56, %v14673_v8  ;;  %v3901_v19 = vsub.f32 %v3645_v57, %v3773_v13  ;;  %v14675_v22 = vld [vmem:[#allocation157_spill] sm:$0xff]  ;;  %v3647_v45 = vld [vmem:[%s12840_s3 + $0x340] sm:$0xff] }
 0x726   :  { %5814 = vst [vmem:[%s12841_s4 + $0x2f0] sm:$0xff] %v5557_v17  ;;  %5815 = vst.msk [vmem:[%s12841_s4 + $0x2f8] sm:$0xff] %vm5720_vm1, %v5558_v4  ;;  %5325 = vperm.xlu1 %6014, %v3899_v37   ;;  %v5006_v23 = vpop.permute.xlu1 %5005  ;;  %v3775_v42 = vmul.f32 %v10747_v25, %v14674_v50  ;;  %v4643_v34 = vmul.f32 %v11220_v38, %v14675_v22  ;;  %v14676_v6 = vld [vmem:[#allocation161_spill] sm:$0xff]  ;;  %v14677_v25 = vld [vmem:[#allocation235_spill] sm:$0xff] }
 0x727   :  { %v5535_v15 = vadd.f32 %v5006_v23, %v4639_v44  ;;  %v5536_v59 = vadd.f32 %v5006_v23, %v4640_v47  ;;  %v5071_v62 = vpop.permute.xlu0 %5070  ;;  %v4644_v56 = vmul.f32 %v11220_v38, %v14676_v6  ;;  %v4669_v30 = vmul.f32 %v11294_v14, %v14677_v25  ;;  %v14678_v41 = vld [vmem:[#allocation237_spill] sm:$0xff]  ;;  %v14679_v46 = vld [vmem:[#allocation378_spill] sm:$0xff]  ;;  %v14680_v20 = vld [vmem:[#allocation303_spill] sm:$0xff] }
 0x728   :  { %v5561_v21 = vadd.f32 %v5071_v62, %v4665_v18  ;;  %v5562_v16 = vadd.f32 %v5071_v62, %v4666_v32  ;;  %5390 = vperm.xlu0 %6013, %v3912_v49   ;;  %v4670_v24 = vmul.f32 %v11294_v14, %v14678_v41  ;;  %v3914_v48 = vsub.f32 %v3658_v43, %v3786_v7  ;;  %v3660_v14 = vld [vmem:[%s12840_s3 + $0x3a8] sm:$0xff]  ;;  %v14681_v44 = vld [vmem:[#allocation244_spill] sm:$0xff]  ;;  %v14682_v47 = vld [vmem:[#allocation169_spill] sm:$0xff] }
 0x729   :  { %5792 = vst [vmem:[%s12841_s4 + $0x240] sm:$0xff] %v5535_v15  ;;  %5793 = vst.msk [vmem:[%s12841_s4 + $0x248] sm:$0xff] %vm5720_vm1, %v5536_v59  ;;  %v3788_v36 = vmul.f32 %v10828_v55, %v14679_v46  ;;  %v3903_v13 = vsub.f32 %v3647_v45, %v3775_v42  ;;  %v3777_v10 = vmul.f32 %v14681_v44, %v14680_v20  ;;  %v14683_v63 = vld [vmem:[#allocation173_spill] sm:$0xff]  ;;  %v3649_v18 = vld [vmem:[%s12840_s3 + $0x350] sm:$0xff] }
 0x72a   :  { %5818 = vst [vmem:[%s12841_s4 + $0x310] sm:$0xff] %v5561_v21  ;;  %5819 = vst.msk [vmem:[%s12841_s4 + $0x318] sm:$0xff] %vm5720_vm1, %v5562_v16  ;;  %5335 = vperm.xlu1 %6014, %v3901_v19   ;;  %v5016_v38 = vpop.permute.xlu1 %5015  ;;  %v4647_v57 = vmul.f32 %v11248_v54, %v14682_v47  ;;  %v4648_v55 = vmul.f32 %v11248_v54, %v14683_v63  ;;  %v14684_v0 = vld [vmem:[#allocation247_spill] sm:$0xff]  ;;  %v14685_v23 = vld [vmem:[#allocation249_spill] sm:$0xff] }
 0x72b   :  { %v5539_v33 = vadd.f32 %v5016_v38, %v4643_v34  ;;  %v5540_v17 = vadd.f32 %v5016_v38, %v4644_v56  ;;  %v5081_v4 = vpop.permute.xlu0 %5080  ;;  %v4673_v32 = vmul.f32 %v11322_v2, %v14684_v0  ;;  %v4674_v49 = vmul.f32 %v11322_v2, %v14685_v23  ;;  %v14686_v7 = vld [vmem:[#allocation390_spill] sm:$0xff]  ;;  %v3662_v2 = vld [vmem:[%s12840_s3 + $0x3b8] sm:$0xff]  ;;  %v14687_v50 = vld [vmem:[#allocation319_spill] sm:$0xff] }
 0x72c   :  { %v5565_v37 = vadd.f32 %v5081_v4, %v4669_v30  ;;  %v5566_v26 = vadd.f32 %v5081_v4, %v4670_v24  ;;  %5400 = vperm.xlu0 %6013, %v3914_v48   ;;  %v3916_v8 = vsub.f32 %v3660_v14, %v3788_v36  ;;  %v3790_v15 = vmul.f32 %v10867_v40, %v14686_v7  ;;  %v14688_v42 = vld [vmem:[#allocation50_spill] sm:$0xff]  ;;  %v14689_v34 = vld [vmem:[#allocation181_spill] sm:$0xff]  ;;  %v14691_v25 = vld [vmem:[#allocation259_spill] sm:$0xff] }
 0x72d   :  { %5796 = vst [vmem:[%s12841_s4 + $0x260] sm:$0xff] %v5539_v33  ;;  %5797 = vst.msk [vmem:[%s12841_s4 + $0x268] sm:$0xff] %vm5720_vm1, %v5540_v17  ;;  %v3905_v19 = vsub.f32 %v3649_v18, %v3777_v10  ;;  %v3779_v22 = vmul.f32 %v14688_v42, %v14687_v50  ;;  %v4651_v6 = vmul.f32 %v11276_v61, %v14689_v34  ;;  %v14690_v56 = vld [vmem:[#allocation185_spill] sm:$0xff]  ;;  %v3651_v45 = vld [vmem:[%s12840_s3 + $0x360] sm:$0xff] }
 0x72e   :  { %5822 = vst [vmem:[%s12841_s4 + $0x330] sm:$0xff] %v5565_v37  ;;  %5823 = vst.msk [vmem:[%s12841_s4 + $0x338] sm:$0xff] %vm5720_vm1, %v5566_v26  ;;  %5345 = vperm.xlu1 %6014, %v3903_v13   ;;  %v5026_v54 = vpop.permute.xlu1 %5025  ;;  %v4652_v40 = vmul.f32 %v11276_v61, %v14690_v56  ;;  %v4677_v30 = vmul.f32 %v11350_v58, %v14691_v25  ;;  %v14692_v41 = vld [vmem:[#allocation261_spill] sm:$0xff]  ;;  %v3918_v38 = vsub.f32 %v3662_v2, %v3790_v15  ;;  %v14693_v48 = vld [vmem:[#allocation402_spill] sm:$0xff] }
 0x72f   :  { %v5543_v59 = vadd.f32 %v5026_v54, %v4647_v57  ;;  %v5544_v62 = vadd.f32 %v5026_v54, %v4648_v55  ;;  %v5091_v43 = vpop.permute.xlu0 %5090  ;;  %v4678_v24 = vmul.f32 %v11350_v58, %v14692_v41  ;;  %v14694_v46 = vld [vmem:[#allocation62_spill] sm:$0xff]  ;;  %v3664_v58 = vld [vmem:[%s12840_s3 + $0x3c8] sm:$0xff]  ;;  %v3907_v26 = vsub.f32 %v3651_v45, %v3779_v22  ;;  %v14696_v20 = vld [vmem:[#allocation393_spill] sm:$0xff] }
 0x730   :  { %v5569_v21 = vadd.f32 %v5091_v43, %v4673_v32  ;;  %v5570_v16 = vadd.f32 %v5091_v43, %v4674_v49  ;;  %5410 = vperm.xlu0 %6013, %v3916_v8   ;;  %v3792_v36 = vmul.f32 %v14694_v46, %v14693_v48  ;;  %v14695_v13 = vld [vmem:[#allocation359_spill] sm:$0xff]  ;;  %v14697_v10 = vld [vmem:[#allocation193_spill] sm:$0xff]  ;;  %v3653_v55 = vld [vmem:[%s12840_s3 + $0x370] sm:$0xff] }
 0x731   :  { %5800 = vst [vmem:[%s12841_s4 + $0x280] sm:$0xff] %v5543_v59  ;;  %5801 = vst.msk [vmem:[%s12841_s4 + $0x288] sm:$0xff] %vm5720_vm1, %v5544_v62  ;;  %v3781_v44 = vmul.f32 %v14696_v20, %v14695_v13  ;;  %v4655_v47 = vmul.f32 %v11304_v35, %v14697_v10  ;;  %v14698_v57 = vld [vmem:[#allocation197_spill] sm:$0xff]  ;;  %v14699_v18 = vld [vmem:[#allocation272_spill] sm:$0xff] }
 0x732   :  { %5826 = vst [vmem:[%s12841_s4 + $0x350] sm:$0xff] %v5569_v21  ;;  %5827 = vst.msk [vmem:[%s12841_s4 + $0x358] sm:$0xff] %vm5720_vm1, %v5570_v16  ;;  %5355 = vperm.xlu1 %6014, %v3905_v19   ;;  %v5036_v61 = vpop.permute.xlu1 %5035  ;;  %v4656_v63 = vmul.f32 %v11304_v35, %v14698_v57  ;;  %v4681_v0 = vmul.f32 %v11378_v51, %v14699_v18  ;;  %v14700_v32 = vld [vmem:[#allocation274_spill] sm:$0xff]  ;;  %v3920_v49 = vsub.f32 %v3664_v58, %v3792_v36  ;;  %v14701_v54 = vld [vmem:[#allocation411_spill] sm:$0xff] }
 0x733   :  { %v5547_v33 = vadd.f32 %v5036_v61, %v4651_v6  ;;  %v5548_v17 = vadd.f32 %v5036_v61, %v4652_v40  ;;  %v5101_v4 = vpop.permute.xlu0 %5100  ;;  %v4682_v23 = vmul.f32 %v11378_v51, %v14700_v32  ;;  %v14702_v8 = vld [vmem:[#allocation400_spill] sm:$0xff]  ;;  %v3666_v51 = vld [vmem:[%s12840_s3 + $0x3d8] sm:$0xff]  ;;  %v3909_v21 = vsub.f32 %v3653_v55, %v3781_v44  ;;  %v14703_v16 = vld [vmem:[#allocation363_spill] sm:$0xff] }
 0x734   :  { %v5573_v14 = vadd.f32 %v5101_v4, %v4677_v30  ;;  %v5574_v37 = vadd.f32 %v5101_v4, %v4678_v24  ;;  %5420 = vperm.xlu0 %6013, %v3918_v38   ;;  %v3794_v7 = vmul.f32 %v14702_v8, %v14701_v54  ;;  %v14704_v19 = vld [vmem:[#allocation396_spill] sm:$0xff]  ;;  %v14705_v42 = vld [vmem:[#allocation205_spill] sm:$0xff]  ;;  %v3655_v56 = vld [vmem:[%s12840_s3 + $0x380] sm:$0xff] }
 0x735   :  { %5804 = vst [vmem:[%s12841_s4 + $0x2a0] sm:$0xff] %v5547_v33  ;;  %5805 = vst.msk [vmem:[%s12841_s4 + $0x2a8] sm:$0xff] %vm5720_vm1, %v5548_v17  ;;  %v3783_v50 = vmul.f32 %v14704_v19, %v14703_v16  ;;  %v4659_v22 = vmul.f32 %v11332_v53, %v14705_v42  ;;  %v14706_v34 = vld [vmem:[#allocation209_spill] sm:$0xff]  ;;  %v14707_v40 = vld [vmem:[#allocation288_spill] sm:$0xff] }
 0x736   :  { %5830 = vst [vmem:[%s12841_s4 + $0x370] sm:$0xff] %v5573_v14  ;;  %5831 = vst.msk [vmem:[%s12841_s4 + $0x378] sm:$0xff] %vm5720_vm1, %v5574_v37  ;;  %5365 = vperm.xlu1 %6014, %v3907_v26   ;;  %v5046_v35 = vpop.permute.xlu1 %5045  ;;  %v4660_v6 = vmul.f32 %v11332_v53, %v14706_v34  ;;  %v4685_v45 = vmul.f32 %v11406_v27, %v14707_v40  ;;  %v14708_v25 = vld [vmem:[#allocation290_spill] sm:$0xff]  ;;  %v3922_v41 = vsub.f32 %v3666_v51, %v3794_v7  ;;  %v14709_v24 = vld [vmem:[#allocation159_spill] sm:$0xff] }
 0x737   :  { %v5551_v15 = vadd.f32 %v5046_v35, %v4655_v47  ;;  %v5552_v59 = vadd.f32 %v5046_v35, %v4656_v63  ;;  %v5111_v62 = vpop.permute.xlu0 %5110  ;;  %v4686_v30 = vmul.f32 %v11406_v27, %v14708_v25  ;;  %v14710_v61 = vld [vmem:[#allocation256_spill] sm:$0xff]  ;;  %v3668_v27 = vld [vmem:[%s12840_s3 + $0x3e8] sm:$0xff]  ;;  %v3911_v4 = vsub.f32 %v3655_v56, %v3783_v50  ;;  %v14713_v26 = vld [vmem:[#allocation217_spill] sm:$0xff] }
 0x738   :  { %v5577_v43 = vadd.f32 %v5111_v62, %v4681_v0  ;;  %v5578_v2 = vadd.f32 %v5111_v62, %v4682_v23  ;;  %5430 = vperm.xlu0 %6013, %v3920_v49   ;;  %v3796_v38 = vmul.f32 %v14710_v61, %v14709_v24  ;;  %v14711_v58 = vld [vmem:[#allocation367_spill] sm:$0xff]  ;;  %v14712_v14 = vld [vmem:[#allocation64_spill] sm:$0xff]  ;;  %v4663_v13 = vmul.f32 %v11360_v11, %v14713_v26  ;;  %v14714_v20 = vld [vmem:[#allocation221_spill] sm:$0xff] }
 0x739   :  { %5808 = vst [vmem:[%s12841_s4 + $0x2c0] sm:$0xff] %v5551_v15  ;;  %5809 = vst.msk [vmem:[%s12841_s4 + $0x2c8] sm:$0xff] %vm5720_vm1, %v5552_v59  ;;  %v3785_v37 = vmul.f32 %v14712_v14, %v14711_v58  ;;  %v4664_v44 = vmul.f32 %v11360_v11, %v14714_v20  ;;  %v3657_v10 = vld [vmem:[%s12840_s3 + $0x390] sm:$0xff]  ;;  %v14716_v63 = vld [vmem:[#allocation306_spill] sm:$0xff] }
 0x73a   :  { %5834 = vst [vmem:[%s12841_s4 + $0x390] sm:$0xff] %v5577_v43  ;;  %5835 = vst.msk [vmem:[%s12841_s4 + $0x398] sm:$0xff] %vm5720_vm1, %v5578_v2  ;;  %5375 = vperm.xlu1 %6014, %v3909_v21   ;;  %v5056_v53 = vpop.permute.xlu1 %5055  ;;  %v14715_v47 = vld [vmem:[#allocation304_spill] sm:$0xff]  ;;  %v4690_v55 = vmul.f32 %v11439_v1, %v14716_v63  ;;  %v3924_v18 = vsub.f32 %v3668_v27, %v3796_v38  ;;  %v14717_v0 = vld [vmem:[#allocation429_spill] sm:$0xff] }
 0x73b   :  { %v5555_v48 = vadd.f32 %v5056_v53, %v4659_v22  ;;  %v5556_v46 = vadd.f32 %v5056_v53, %v4660_v6  ;;  %v5121_v36 = vpop.permute.xlu0 %5120  ;;  %v4689_v57 = vmul.f32 %v11439_v1, %v14715_v47  ;;  %v3798_v32 = vmul.f32 %v11021_v5, %v14717_v0  ;;  %v3670_v1 = vld [vmem:[%s12840_s3 + $0x3f8] sm:$0xff]  ;;  %v14718_v15 = vld [vmem:[#allocation375_spill] sm:$0xff]  ;;  %v3659_v21 = vld [vmem:[%s12840_s3 + $0x3a0] sm:$0xff] }
 0x73c   :  { %v5581_v33 = vadd.f32 %v5121_v36, %v4685_v45  ;;  %v5582_v17 = vadd.f32 %v5121_v36, %v4686_v30  ;;  %5440 = vperm.xlu0 %6013, %v3922_v41   ;;  %v3913_v7 = vsub.f32 %v3657_v10, %v3785_v37  ;;  %v14719_v59 = vld [vmem:[#allocation403_spill] sm:$0xff]  ;;  %v14720_v51 = vld [vmem:[#allocation229_spill] sm:$0xff]  ;;  %v14722_v16 = vld [vmem:[#allocation320_spill] sm:$0xff] }
 0x73d   :  { %5812 = vst [vmem:[%s12841_s4 + $0x2e0] sm:$0xff] %v5555_v48  ;;  %5813 = vst.msk [vmem:[%s12841_s4 + $0x2e8] sm:$0xff] %vm5720_vm1, %v5556_v46  ;;  %v3787_v62 = vmul.f32 %v14719_v59, %v14718_v15  ;;  %v4667_v43 = vmul.f32 %v11388_v52, %v14720_v51  ;;  %v14721_v2 = vld [vmem:[#allocation233_spill] sm:$0xff]  ;;  %v4693_v19 = vmul.f32 %v11474_v39, %v14722_v16  ;;  %v14723_v50 = vld [vmem:[#allocation322_spill] sm:$0xff] }
 0x73e   :  { %5838 = vst [vmem:[%s12841_s4 + $0x3b0] sm:$0xff] %v5581_v33  ;;  %5839 = vst.msk [vmem:[%s12841_s4 + $0x3b8] sm:$0xff] %vm5720_vm1, %v5582_v17  ;;  %5385 = vperm.xlu1 %6014, %v3911_v4   ;;  %v5066_v11 = vpop.permute.xlu1 %5065  ;;  %v4668_v5 = vmul.f32 %v11388_v52, %v14721_v2  ;;  %v4694_v42 = vmul.f32 %v11474_v39, %v14723_v50  ;;  %v3926_v22 = vsub.f32 %v3670_v1, %v3798_v32  ;;  %v14724_v39 = vld [vmem:[#allocation385_spill] sm:$0xff]  ;;  %v14725_v30 = vld [vmem:[#allocation60_spill] sm:$0xff] }
 0x73f   :  { %v5559_v23 = vadd.f32 %v5066_v11, %v4663_v13  ;;  %v5560_v35 = vadd.f32 %v5066_v11, %v4664_v44  ;;  %v5131_v49 = vpop.permute.xlu0 %5130  ;;  %v3915_v25 = vsub.f32 %v3659_v21, %v3787_v62  ;;  %v3789_v53 = vmul.f32 %v14725_v30, %v14724_v39  ;;  %v14726_v41 = vld [vmem:[#allocation241_spill] sm:$0xff]  ;;  %v3661_v48 = vld [vmem:[%s12840_s3 + $0x3b0] sm:$0xff]  ;;  %v14728_v46 = vld [vmem:[#allocation7_spill] sm:$0xff] }
 0x740   :  { %v5585_v54 = vadd.f32 %v5131_v49, %v4689_v57  ;;  %v5586_v8 = vadd.f32 %v5131_v49, %v4690_v55  ;;  %5450 = vperm.xlu0 %6013, %v3924_v18   ;;  %v4671_v24 = vmul.f32 %v11416_v3, %v14726_v41  ;;  %v14727_v61 = vld [vmem:[#allocation245_spill] sm:$0xff]  ;;  %v14729_v36 = vld [vmem:[#allocation450_spill] sm:$0xff]  ;;  %v14738_v59 = vld [vmem:[#allocation408_spill] sm:$0xff] }
 0x741   :  { %5816 = vst [vmem:[%s12841_s4 + $0x300] sm:$0xff] %v5559_v23  ;;  %5817 = vst.msk [vmem:[%s12841_s4 + $0x308] sm:$0xff] %vm5720_vm1, %v5560_v35  ;;  %v4672_v38 = vmul.f32 %v11416_v3, %v14727_v61  ;;  %v4697_v27 = vmul.f32 %v14729_v36, %v14728_v46  ;;  %v14730_v33 = vld [vmem:[#allocation9_spill] sm:$0xff]  ;;  %v3917_v13 = vsub.f32 %v3661_v48, %v3789_v53  ;;  %v14731_v20 = vld [vmem:[#allocation398_spill] sm:$0xff] }
 0x742   :  { %5842 = vst [vmem:[%s12841_s4 + $0x3d0] sm:$0xff] %v5585_v54  ;;  %5843 = vst.msk [vmem:[%s12841_s4 + $0x3d8] sm:$0xff] %vm5720_vm1, %v5586_v8  ;;  %5395 = vperm.xlu1 %6014, %v3913_v7   ;;  %v5076_v52 = vpop.permute.xlu1 %5075  ;;  %v4698_v17 = vmul.f32 %v14729_v36, %v14730_v33  ;;  %v3791_v44 = vmul.f32 %v11013_v28, %v14731_v20  ;;  %v14732_v10 = vld [vmem:[#allocation253_spill] sm:$0xff]  ;;  %v3663_v11 = vld [vmem:[%s12840_s3 + $0x3c0] sm:$0xff] }
 0x743   :  { %v5563_v34 = vadd.f32 %v5076_v52, %v4667_v43  ;;  %v5564_v6 = vadd.f32 %v5076_v52, %v4668_v5  ;;  %v5141_v56 = vpop.permute.xlu0 %5140  ;;  %v14733_v47 = vld [vmem:[#allocation441_spill] sm:$0xff]  ;;  %v14735_v28 = vld [vmem:[#allocation15_spill] sm:$0xff]  ;;  %v14736_v18 = vld [vmem:[#allocation2_spill] sm:$0xff] }
 0x744   :  { %v5589_v40 = vadd.f32 %v5141_v56, %v4693_v19  ;;  %v5590_v45 = vadd.f32 %v5141_v56, %v4694_v42  ;;  %5460 = vperm.xlu0 %6013, %v3926_v22   ;;  %v4675_v57 = vmul.f32 %v14733_v47, %v14732_v10  ;;  %v14734_v63 = vld [vmem:[#allocation257_spill] sm:$0xff]  ;;  %v4701_v0 = vmul.f32 %v14736_v18, %v14735_v28  ;;  %v14739_v62 = vld [vmem:[#allocation70_spill] sm:$0xff]  ;;  %v14741_v2 = vld [vmem:[#allocation167_spill] sm:$0xff] }
 0x745   :  { %5820 = vst [vmem:[%s12841_s4 + $0x320] sm:$0xff] %v5563_v34  ;;  %5821 = vst.msk [vmem:[%s12841_s4 + $0x328] sm:$0xff] %vm5720_vm1, %v5564_v6  ;;  %v4676_v55 = vmul.f32 %v14733_v47, %v14734_v63  ;;  %v14737_v32 = vld [vmem:[#allocation17_spill] sm:$0xff]  ;;  %v3919_v15 = vsub.f32 %v3663_v11, %v3791_v44  ;;  %v3793_v51 = vmul.f32 %v14739_v62, %v14738_v59  ;;  %v3665_v19 = vld [vmem:[%s12840_s3 + $0x3d0] sm:$0xff] }
 0x746   :  { %5846 = vst [vmem:[%s12841_s4 + $0x3f0] sm:$0xff] %v5589_v40  ;;  %5847 = vst.msk [vmem:[%s12841_s4 + $0x3f8] sm:$0xff] %vm5720_vm1, %v5590_v45  ;;  %5405 = vperm.xlu1 %6014, %v3915_v25   ;;  %v5086_v3 = vpop.permute.xlu1 %5085  ;;  %v4702_v23 = vmul.f32 %v14736_v18, %v14737_v32  ;;  %v14740_v43 = vld [vmem:[#allocation265_spill] sm:$0xff]  ;;  %v14743_v50 = vld [vmem:[#allocation23_spill] sm:$0xff] }
 0x747   :  { %v5567_v4 = vadd.f32 %v5086_v3, %v4671_v24  ;;  %v5568_v58 = vadd.f32 %v5086_v3, %v4672_v38  ;;  %v5151_v14 = vpop.permute.xlu0 %5150  ;;  %v4679_v5 = vmul.f32 %v14741_v2, %v14740_v43  ;;  %v14742_v21 = vld [vmem:[#allocation269_spill] sm:$0xff]  ;;  %v14744_v42 = vld [vmem:[#allocation192_spill] sm:$0xff]  ;;  %v3921_v30 = vsub.f32 %v3665_v19, %v3793_v51  ;;  %v14746_v53 = vld [vmem:[#allocation418_spill] sm:$0xff] }
 0x748   :  { %v5593_v37 = vadd.f32 %v5151_v14, %v4697_v27  ;;  %v5594_v26 = vadd.f32 %v5151_v14, %v4698_v17  ;;  %v4680_v16 = vmul.f32 %v14741_v2, %v14742_v21  ;;  %v4705_v52 = vmul.f32 %v14744_v42, %v14743_v50  ;;  %v14745_v22 = vld [vmem:[#allocation25_spill] sm:$0xff]  ;;  %v14747_v41 = vld [vmem:[#allocation412_spill] sm:$0xff]  ;;  %v3667_v36 = vld [vmem:[%s12840_s3 + $0x3e0] sm:$0xff] }
 0x749   :  { %5824 = vst [vmem:[%s12841_s4 + $0x340] sm:$0xff] %v5567_v4  ;;  %5825 = vst.msk [vmem:[%s12841_s4 + $0x348] sm:$0xff] %vm5720_vm1, %v5568_v58  ;;  %v4706_v34 = vmul.f32 %v14744_v42, %v14745_v22  ;;  %v3795_v24 = vmul.f32 %v14747_v41, %v14746_v53  ;;  %v14748_v61 = vld [vmem:[#allocation280_spill] sm:$0xff]  ;;  %v14749_v48 = vld [vmem:[#allocation285_spill] sm:$0xff] }
 0x74a   :  { %5850 = vst [vmem:[%s12841_s4 + $0x410] sm:$0xff] %v5593_v37  ;;  %5851 = vst.msk [vmem:[%s12841_s4 + $0x418] sm:$0xff] %vm5720_vm1, %v5594_v26  ;;  %5415 = vperm.xlu1 %6014, %v3917_v13   ;;  %v5096_v35 = vpop.permute.xlu1 %5095  ;;  %v4683_v38 = vmul.f32 %v11502_v31, %v14748_v61  ;;  %v4684_v46 = vmul.f32 %v11502_v31, %v14749_v48  ;;  %v14750_v27 = vld [vmem:[#allocation31_spill] sm:$0xff]  ;;  %v14751_v33 = vld [vmem:[#allocation10_spill] sm:$0xff] }
 0x74b   :  { %v5571_v49 = vadd.f32 %v5096_v35, %v4675_v57  ;;  %v5572_v1 = vadd.f32 %v5096_v35, %v4676_v55  ;;  %v5161_v54 = vpop.permute.xlu0 %5160  ;;  %v4709_v17 = vmul.f32 %v14751_v33, %v14750_v27  ;;  %v14752_v3 = vld [vmem:[#allocation33_spill] sm:$0xff]  ;;  %v3923_v20 = vsub.f32 %v3667_v36, %v3795_v24  ;;  %v14754_v10 = vld [vmem:[#allocation68_spill] sm:$0xff]  ;;  %v14757_v18 = vld [vmem:[#allocation39_spill] sm:$0xff] }
 0x74c   :  { %v5597_v8 = vadd.f32 %v5161_v54, %v4701_v0  ;;  %v5598_v7 = vadd.f32 %v5161_v54, %v4702_v23  ;;  %v4710_v4 = vmul.f32 %v14751_v33, %v14752_v3  ;;  %v14753_v44 = vld [vmem:[#allocation425_spill] sm:$0xff]  ;;  %v14755_v57 = vld [vmem:[#allocation296_spill] sm:$0xff]  ;;  %v14762_v2 = vld [vmem:[#allocation47_spill] sm:$0xff] }
 0x74d   :  { %5828 = vst [vmem:[%s12841_s4 + $0x360] sm:$0xff] %v5571_v49  ;;  %5829 = vst.msk [vmem:[%s12841_s4 + $0x368] sm:$0xff] %vm5720_vm1, %v5572_v1  ;;  %v3797_v47 = vmul.f32 %v14754_v10, %v14753_v44  ;;  %v4687_v63 = vmul.f32 %v11548_v9, %v14755_v57  ;;  %v14756_v55 = vld [vmem:[#allocation301_spill] sm:$0xff]  ;;  %v3669_v28 = vld [vmem:[%s12840_s3 + $0x3f0] sm:$0xff] }
 0x74e   :  { %5854 = vst [vmem:[%s12841_s4 + $0x430] sm:$0xff] %v5597_v8  ;;  %5855 = vst.msk [vmem:[%s12841_s4 + $0x438] sm:$0xff] %vm5720_vm1, %v5598_v7  ;;  %5425 = vperm.xlu1 %6014, %v3919_v15   ;;  %v5106_v6 = vpop.permute.xlu1 %5105  ;;  %v4688_v11 = vmul.f32 %v11548_v9, %v14756_v55  ;;  %v14758_v0 = vld [vmem:[#allocation204_spill] sm:$0xff]  ;;  %v14759_v23 = vld [vmem:[#allocation41_spill] sm:$0xff] }
 0x74f   :  { %v5575_v56 = vadd.f32 %v5106_v6, %v4679_v5  ;;  %v5576_v40 = vadd.f32 %v5106_v6, %v4680_v16  ;;  %v5171_v45 = vpop.permute.xlu0 %5170  ;;  %v4713_v32 = vmul.f32 %v14758_v0, %v14757_v18  ;;  %v4714_v35 = vmul.f32 %v14758_v0, %v14759_v23  ;;  %v14760_v59 = vld [vmem:[#allocation312_spill] sm:$0xff]  ;;  %v14761_v51 = vld [vmem:[#allocation317_spill] sm:$0xff]  ;;  %v14765_v6 = vld [vmem:[#allocation3_spill] sm:$0xff] }
 0x750   :  { %v5601_v25 = vadd.f32 %v5171_v45, %v4705_v52  ;;  %v5602_v39 = vadd.f32 %v5171_v45, %v4706_v34  ;;  %v3925_v15 = vsub.f32 %v3669_v28, %v3797_v47  ;;  %v4691_v62 = vmul.f32 %v11594_v29, %v14760_v59  ;;  %v14763_v5 = vld [vmem:[#allocation20_spill] sm:$0xff]  ;;  %v14764_v16 = vld [vmem:[#allocation49_spill] sm:$0xff]  ;;  %v14771_v33 = vld [vmem:[#allocation11_spill] sm:$0xff] }
 0x751   :  { %5832 = vst [vmem:[%s12841_s4 + $0x380] sm:$0xff] %v5575_v56  ;;  %5833 = vst.msk [vmem:[%s12841_s4 + $0x388] sm:$0xff] %vm5720_vm1, %v5576_v40  ;;  %v4692_v43 = vmul.f32 %v11594_v29, %v14761_v51  ;;  %v4717_v21 = vmul.f32 %v14763_v5, %v14762_v2  ;;  %v4718_v19 = vmul.f32 %v14763_v5, %v14764_v16  ;;  %v14766_v56 = vld [vmem:[#allocation447_spill] sm:$0xff]  ;;  %v14767_v45 = vld [vmem:[#allocation5_spill] sm:$0xff] }
 0x752   :  { %5858 = vst [vmem:[%s12841_s4 + $0x450] sm:$0xff] %v5601_v25  ;;  %5859 = vst.msk [vmem:[%s12841_s4 + $0x458] sm:$0xff] %vm5720_vm1, %v5602_v39  ;;  %5435 = vperm.xlu1 %6014, %v3921_v30   ;;  %v5116_v31 = vpop.permute.xlu1 %5115  ;;  %v4695_v40 = vmul.f32 %v14766_v56, %v14765_v6  ;;  %v4696_v25 = vmul.f32 %v14766_v56, %v14767_v45  ;;  %v14768_v39 = vld [vmem:[#allocation55_spill] sm:$0xff]  ;;  %v14769_v30 = vld [vmem:[#allocation32_spill] sm:$0xff] }
 0x753   :  { %v5579_v58 = vadd.f32 %v5116_v31, %v4683_v38  ;;  %v5580_v14 = vadd.f32 %v5116_v31, %v4684_v46  ;;  %v5181_v37 = vpop.permute.xlu0 %5180  ;;  %v4721_v53 = vmul.f32 %v14769_v30, %v14768_v39  ;;  %v14770_v41 = vld [vmem:[#allocation57_spill] sm:$0xff]  ;;  %v14777_v55 = vld [vmem:[#allocation19_spill] sm:$0xff]  ;;  %v14784_v51 = vld [vmem:[#allocation16_spill] sm:$0xff] }
 0x754   :  { %v5605_v26 = vadd.f32 %v5181_v37, %v4709_v17  ;;  %v5606_v13 = vadd.f32 %v5181_v37, %v4710_v4  ;;  %v4722_v24 = vmul.f32 %v14769_v30, %v14770_v41  ;;  %v14772_v17 = vld [vmem:[#allocation314_spill] sm:$0xff]  ;;  %v14773_v4 = vld [vmem:[#allocation13_spill] sm:$0xff]  ;;  %v14790_v45 = vld [vmem:[#allocation24_spill] sm:$0xff] }
 0x755   :  { %5836 = vst [vmem:[%s12841_s4 + $0x3a0] sm:$0xff] %v5579_v58  ;;  %5837 = vst.msk [vmem:[%s12841_s4 + $0x3a8] sm:$0xff] %vm5720_vm1, %v5580_v14  ;;  %v4699_v3 = vmul.f32 %v14772_v17, %v14771_v33  ;;  %v4700_v31 = vmul.f32 %v14772_v17, %v14773_v4  ;;  %v14774_v58 = vld [vmem:[#allocation63_spill] sm:$0xff]  ;;  %v14775_v14 = vld [vmem:[#allocation228_spill] sm:$0xff] }
 0x756   :  { %5862 = vst [vmem:[%s12841_s4 + $0x470] sm:$0xff] %v5605_v26  ;;  %5863 = vst.msk [vmem:[%s12841_s4 + $0x478] sm:$0xff] %vm5720_vm1, %v5606_v13  ;;  %5445 = vperm.xlu1 %6014, %v3923_v20   ;;  %v5126_v9 = vpop.permute.xlu1 %5125  ;;  %v4725_v37 = vmul.f32 %v14775_v14, %v14774_v58  ;;  %v14776_v26 = vld [vmem:[#allocation65_spill] sm:$0xff]  ;;  %v14787_v16 = vld [vmem:[#allocation34_spill] sm:$0xff] }
 0x757   :  { %v5583_v49 = vadd.f32 %v5126_v9, %v4687_v63  ;;  %v5584_v1 = vadd.f32 %v5126_v9, %v4688_v11  ;;  %v5191_v54 = vpop.permute.xlu0 %5190  ;;  %v4726_v13 = vmul.f32 %v14775_v14, %v14776_v26  ;;  %v14778_v11 = vld [vmem:[#allocation172_spill] sm:$0xff]  ;;  %v14779_v18 = vld [vmem:[#allocation21_spill] sm:$0xff] }
 0x758   :  { %v5609_v8 = vadd.f32 %v5191_v54, %v4713_v32  ;;  %v5610_v7 = vadd.f32 %v5191_v54, %v4714_v35  ;;  %v4703_v28 = vmul.f32 %v14778_v11, %v14777_v55  ;;  %v4704_v0 = vmul.f32 %v14778_v11, %v14779_v18  ;;  %v14780_v32 = vld [vmem:[#allocation71_spill] sm:$0xff]  ;;  %v14781_v23 = vld [vmem:[#allocation369_spill] sm:$0xff]  ;;  %v14793_v41 = vld [vmem:[#allocation44_spill] sm:$0xff] }
 0x759   :  { %5840 = vst [vmem:[%s12841_s4 + $0x3c0] sm:$0xff] %v5583_v49  ;;  %5841 = vst.msk [vmem:[%s12841_s4 + $0x3c8] sm:$0xff] %vm5720_vm1, %v5584_v1  ;;  %v4729_v35 = vmul.f32 %v14781_v23, %v14780_v32  ;;  %v14782_v9 = vld [vmem:[#allocation73_spill] sm:$0xff]  ;;  %v14796_v4 = vld [vmem:[#allocation216_spill] sm:$0xff] }
 0x75a   :  { %5866 = vst [vmem:[%s12841_s4 + $0x490] sm:$0xff] %v5609_v8  ;;  %5867 = vst.msk [vmem:[%s12841_s4 + $0x498] sm:$0xff] %vm5720_vm1, %v5610_v7  ;;  %5455 = vperm.xlu1 %6014, %v3925_v15   ;;  %v5136_v29 = vpop.permute.xlu1 %5135  ;;  %v4730_v49 = vmul.f32 %v14781_v23, %v14782_v9  ;;  %v14785_v2 = vld [vmem:[#allocation29_spill] sm:$0xff]  ;;  %v14799_v26 = vld [vmem:[#allocation52_spill] sm:$0xff] }
 0x75b   :  { %v5587_v50 = vadd.f32 %v5136_v29, %v4691_v62  ;;  %v5588_v42 = vadd.f32 %v5136_v29, %v4692_v43  ;;  %v5201_v52 = vpop.permute.xlu0 %5200  ;;  %v14783_v62 = vld [vmem:[#allocation27_spill] sm:$0xff]  ;;  %v4708_v5 = vmul.f32 %v14784_v51, %v14785_v2  ;;  %v14788_v29 = vld [vmem:[#allocation81_spill] sm:$0xff]  ;;  %v14802_v18 = vld [vmem:[#allocation26_spill] sm:$0xff] }
 0x75c   :  { %v5613_v22 = vadd.f32 %v5201_v52, %v4717_v21  ;;  %v5614_v34 = vadd.f32 %v5201_v52, %v4718_v19  ;;  %v4707_v43 = vmul.f32 %v14784_v51, %v14783_v62  ;;  %v14786_v21 = vld [vmem:[#allocation79_spill] sm:$0xff]  ;;  %v14791_v39 = vld [vmem:[#allocation37_spill] sm:$0xff]  ;;  %v14805_v9 = vld [vmem:[#allocation264_spill] sm:$0xff] }
 0x75d   :  { %5844 = vst [vmem:[%s12841_s4 + $0x3e0] sm:$0xff] %v5587_v50  ;;  %5845 = vst.msk [vmem:[%s12841_s4 + $0x3e8] sm:$0xff] %vm5720_vm1, %v5588_v42  ;;  %v4733_v19 = vmul.f32 %v14787_v16, %v14786_v21  ;;  %v4734_v50 = vmul.f32 %v14787_v16, %v14788_v29  ;;  %v4712_v30 = vmul.f32 %v14790_v45, %v14791_v39  ;;  %v14797_v58 = vld [vmem:[#allocation45_spill] sm:$0xff]  ;;  %v14808_v2 = vld [vmem:[#allocation40_spill] sm:$0xff] }
 0x75e   :  { %5870 = vst [vmem:[%s12841_s4 + $0x4b0] sm:$0xff] %v5613_v22  ;;  %5871 = vst.msk [vmem:[%s12841_s4 + $0x4b8] sm:$0xff] %vm5720_vm1, %v5614_v34  ;;  %v5146_v61 = vpop.permute.xlu1 %5145  ;;  %v4716_v14 = vmul.f32 %v14796_v4, %v14797_v58  ;;  %v14803_v32 = vld [vmem:[#allocation53_spill] sm:$0xff]  ;;  %v14814_v39 = vld [vmem:[#allocation371_spill] sm:$0xff] }
 0x75f   :  { %v5591_v38 = vadd.f32 %v5146_v61, %v4695_v40  ;;  %v5592_v48 = vadd.f32 %v5146_v61, %v4696_v25  ;;  %v5211_v46 = vpop.permute.xlu0 %5210  ;;  %v14789_v40 = vld [vmem:[#allocation35_spill] sm:$0xff]  ;;  %v14794_v61 = vld [vmem:[#allocation89_spill] sm:$0xff]  ;;  %v4720_v23 = vmul.f32 %v14802_v18, %v14803_v32  ;;  %v14820_v58 = vld [vmem:[#allocation372_spill] sm:$0xff] }
 0x760   :  { %v5617_v36 = vadd.f32 %v5211_v46, %v4721_v53  ;;  %v5618_v27 = vadd.f32 %v5211_v46, %v4722_v24  ;;  %v4711_v25 = vmul.f32 %v14790_v45, %v14789_v40  ;;  %v14792_v53 = vld [vmem:[#allocation87_spill] sm:$0xff]  ;;  %v14809_v21 = vld [vmem:[#allocation61_spill] sm:$0xff]  ;;  %v14826_v32 = vld [vmem:[#allocation56_spill] sm:$0xff] }
 0x761   :  { %5848 = vst [vmem:[%s12841_s4 + $0x400] sm:$0xff] %v5591_v38  ;;  %5849 = vst.msk [vmem:[%s12841_s4 + $0x408] sm:$0xff] %vm5720_vm1, %v5592_v48  ;;  %v4737_v24 = vmul.f32 %v14793_v41, %v14792_v53  ;;  %v4738_v38 = vmul.f32 %v14793_v41, %v14794_v61  ;;  %v4724_v16 = vmul.f32 %v14808_v2, %v14809_v21  ;;  %v14811_v29 = vld [vmem:[#allocation417_spill] sm:$0xff]  ;;  %v14817_v61 = vld [vmem:[#allocation58_spill] sm:$0xff] }
 0x762   :  { %5874 = vst [vmem:[%s12841_s4 + $0x4d0] sm:$0xff] %v5617_v36  ;;  %5875 = vst.msk [vmem:[%s12841_s4 + $0x4d8] sm:$0xff] %vm5720_vm1, %v5618_v27  ;;  %v5156_v20 = vpop.permute.xlu1 %5155  ;;  %v14815_v53 = vld [vmem:[#allocation69_spill] sm:$0xff]  ;;  %v14832_v21 = vld [vmem:[#allocation414_spill] sm:$0xff] }
 0x763   :  { %v5595_v44 = vadd.f32 %v5156_v20, %v4699_v3  ;;  %v5596_v10 = vadd.f32 %v5156_v20, %v4700_v31  ;;  %v5221_v47 = vpop.permute.xlu0 %5220  ;;  %v14795_v3 = vld [vmem:[#allocation43_spill] sm:$0xff]  ;;  %v14800_v20 = vld [vmem:[#allocation97_spill] sm:$0xff]  ;;  %v4728_v41 = vmul.f32 %v14814_v39, %v14815_v53 }
 0x764   :  { %v5621_v57 = vadd.f32 %v5221_v47, %v4725_v37  ;;  %v5622_v63 = vadd.f32 %v5221_v47, %v4726_v13  ;;  %v4715_v31 = vmul.f32 %v14796_v4, %v14795_v3  ;;  %v14798_v37 = vld [vmem:[#allocation95_spill] sm:$0xff]  ;;  %v14838_v53 = vld [vmem:[#allocation405_spill] sm:$0xff] }
 0x765   :  { %5852 = vst [vmem:[%s12841_s4 + $0x420] sm:$0xff] %v5595_v44  ;;  %5853 = vst.msk [vmem:[%s12841_s4 + $0x428] sm:$0xff] %vm5720_vm1, %v5596_v10  ;;  %v4741_v13 = vmul.f32 %v14799_v26, %v14798_v37  ;;  %v4742_v44 = vmul.f32 %v14799_v26, %v14800_v20  ;;  %v14821_v37 = vld [vmem:[#allocation77_spill] sm:$0xff]  ;;  %v14823_v20 = vld [vmem:[#allocation407_spill] sm:$0xff] }
 0x766   :  { %5878 = vst [vmem:[%s12841_s4 + $0x4f0] sm:$0xff] %v5621_v57  ;;  %5879 = vst.msk [vmem:[%s12841_s4 + $0x4f8] sm:$0xff] %vm5720_vm1, %v5622_v63  ;;  %v5166_v1 = vpop.permute.xlu1 %5165  ;;  %v4732_v26 = vmul.f32 %v14820_v58, %v14821_v37  ;;  %v14844_v37 = vld [vmem:[#allocation72_spill] sm:$0xff] }
 0x767   :  { %v5599_v54 = vadd.f32 %v5166_v1, %v4703_v28  ;;  %v5600_v8 = vadd.f32 %v5166_v1, %v4704_v0  ;;  %v5231_v7 = vpop.permute.xlu0 %5230  ;;  %v14801_v28 = vld [vmem:[#allocation51_spill] sm:$0xff]  ;;  %v14806_v1 = vld [vmem:[#allocation105_spill] sm:$0xff] }
 0x768   :  { %v5625_v15 = vadd.f32 %v5231_v7, %v4729_v35  ;;  %v5626_v59 = vadd.f32 %v5231_v7, %v4730_v49  ;;  %v4719_v0 = vmul.f32 %v14802_v18, %v14801_v28  ;;  %v14804_v35 = vld [vmem:[#allocation103_spill] sm:$0xff] }
 0x769   :  { %5856 = vst [vmem:[%s12841_s4 + $0x440] sm:$0xff] %v5599_v54  ;;  %5857 = vst.msk [vmem:[%s12841_s4 + $0x448] sm:$0xff] %vm5720_vm1, %v5600_v8  ;;  %v4745_v49 = vmul.f32 %v14805_v9, %v14804_v35  ;;  %v4746_v54 = vmul.f32 %v14805_v9, %v14806_v1  ;;  %v14827_v35 = vld [vmem:[#allocation85_spill] sm:$0xff] }
 0x76a   :  { %5882 = vst [vmem:[%s12841_s4 + $0x510] sm:$0xff] %v5625_v15  ;;  %5883 = vst.msk [vmem:[%s12841_s4 + $0x518] sm:$0xff] %vm5720_vm1, %v5626_v59  ;;  %v5176_v42 = vpop.permute.xlu1 %5175  ;;  %v4736_v9 = vmul.f32 %v14826_v32, %v14827_v35  ;;  %v14829_v1 = vld [vmem:[#allocation277_spill] sm:$0xff]  ;;  %v14850_v35 = vld [vmem:[#allocation268_spill] sm:$0xff] }
 0x76b   :  { %v5603_v52 = vadd.f32 %v5176_v42, %v4707_v43  ;;  %v5604_v22 = vadd.f32 %v5176_v42, %v4708_v5  ;;  %v5241_v34 = vpop.permute.xlu0 %5240  ;;  %v14807_v43 = vld [vmem:[#allocation59_spill] sm:$0xff]  ;;  %v14812_v42 = vld [vmem:[#allocation113_spill] sm:$0xff] }
 0x76c   :  { %v5629_v6 = vadd.f32 %v5241_v34, %v4733_v19  ;;  %v5630_v56 = vadd.f32 %v5241_v34, %v4734_v50  ;;  %v4723_v5 = vmul.f32 %v14808_v2, %v14807_v43  ;;  %v14810_v19 = vld [vmem:[#allocation111_spill] sm:$0xff] }
 0x76d   :  { %5860 = vst [vmem:[%s12841_s4 + $0x460] sm:$0xff] %v5603_v52  ;;  %5861 = vst.msk [vmem:[%s12841_s4 + $0x468] sm:$0xff] %vm5720_vm1, %v5604_v22  ;;  %v4749_v50 = vmul.f32 %v14811_v29, %v14810_v19  ;;  %v4750_v52 = vmul.f32 %v14811_v29, %v14812_v42  ;;  %v14833_v19 = vld [vmem:[#allocation93_spill] sm:$0xff]  ;;  %v14835_v42 = vld [vmem:[#allocation410_spill] sm:$0xff] }
 0x76e   :  { %5886 = vst [vmem:[%s12841_s4 + $0x530] sm:$0xff] %v5629_v6  ;;  %5887 = vst.msk [vmem:[%s12841_s4 + $0x538] sm:$0xff] %vm5720_vm1, %v5630_v56  ;;  %v5186_v48 = vpop.permute.xlu1 %5185  ;;  %v4740_v29 = vmul.f32 %v14832_v21, %v14833_v19  ;;  %v14856_v19 = vld [vmem:[#allocation427_spill] sm:$0xff] }
 0x76f   :  { %v5607_v46 = vadd.f32 %v5186_v48, %v4711_v25  ;;  %v5608_v36 = vadd.f32 %v5186_v48, %v4712_v30  ;;  %v5251_v27 = vpop.permute.xlu0 %5250  ;;  %v14813_v25 = vld [vmem:[#allocation67_spill] sm:$0xff]  ;;  %v14818_v48 = vld [vmem:[#allocation121_spill] sm:$0xff] }
 0x770   :  { %v5633_v33 = vadd.f32 %v5251_v27, %v4737_v24  ;;  %v5634_v17 = vadd.f32 %v5251_v27, %v4738_v38  ;;  %v4727_v30 = vmul.f32 %v14814_v39, %v14813_v25  ;;  %v14816_v24 = vld [vmem:[#allocation119_spill] sm:$0xff] }
 0x771   :  { %5864 = vst [vmem:[%s12841_s4 + $0x480] sm:$0xff] %v5607_v46  ;;  %5865 = vst.msk [vmem:[%s12841_s4 + $0x488] sm:$0xff] %vm5720_vm1, %v5608_v36  ;;  %v4753_v38 = vmul.f32 %v14817_v61, %v14816_v24  ;;  %v4754_v46 = vmul.f32 %v14817_v61, %v14818_v48  ;;  %v14839_v24 = vld [vmem:[#allocation101_spill] sm:$0xff]  ;;  %v14841_v48 = vld [vmem:[#allocation66_spill] sm:$0xff] }
 0x772   :  { %5890 = vst [vmem:[%s12841_s4 + $0x550] sm:$0xff] %v5633_v33  ;;  %5891 = vst.msk [vmem:[%s12841_s4 + $0x558] sm:$0xff] %vm5720_vm1, %v5634_v17  ;;  %v5196_v10 = vpop.permute.xlu1 %5195  ;;  %v4744_v61 = vmul.f32 %v14838_v53, %v14839_v24  ;;  %v14862_v24 = vld [vmem:[#allocation416_spill] sm:$0xff] }
 0x773   :  { %v5611_v47 = vadd.f32 %v5196_v10, %v4715_v31  ;;  %v5612_v57 = vadd.f32 %v5196_v10, %v4716_v14  ;;  %v5261_v63 = vpop.permute.xlu0 %5260  ;;  %v14819_v31 = vld [vmem:[#allocation75_spill] sm:$0xff]  ;;  %v14824_v10 = vld [vmem:[#allocation129_spill] sm:$0xff] }
 0x774   :  { %v5637_v55 = vadd.f32 %v5261_v63, %v4741_v13  ;;  %v5638_v11 = vadd.f32 %v5261_v63, %v4742_v44  ;;  %v4731_v14 = vmul.f32 %v14820_v58, %v14819_v31  ;;  %v14822_v13 = vld [vmem:[#allocation127_spill] sm:$0xff] }
 0x775   :  { %5868 = vst [vmem:[%s12841_s4 + $0x4a0] sm:$0xff] %v5611_v47  ;;  %5869 = vst.msk [vmem:[%s12841_s4 + $0x4a8] sm:$0xff] %vm5720_vm1, %v5612_v57  ;;  %v4757_v44 = vmul.f32 %v14823_v20, %v14822_v13  ;;  %v4758_v47 = vmul.f32 %v14823_v20, %v14824_v10  ;;  %v14845_v13 = vld [vmem:[#allocation109_spill] sm:$0xff] }
 0x776   :  { %5894 = vst [vmem:[%s12841_s4 + $0x570] sm:$0xff] %v5637_v55  ;;  %5895 = vst.msk [vmem:[%s12841_s4 + $0x578] sm:$0xff] %vm5720_vm1, %v5638_v11  ;;  %v5206_v8 = vpop.permute.xlu1 %5205  ;;  %v4748_v20 = vmul.f32 %v14844_v37, %v14845_v13  ;;  %v14847_v10 = vld [vmem:[#allocation413_spill] sm:$0xff]  ;;  %v14868_v13 = vld [vmem:[#allocation424_spill] sm:$0xff] }
 0x777   :  { %v5615_v7 = vadd.f32 %v5206_v8, %v4719_v0  ;;  %v5616_v15 = vadd.f32 %v5206_v8, %v4720_v23  ;;  %v5271_v59 = vpop.permute.xlu0 %5270  ;;  %v14825_v0 = vld [vmem:[#allocation83_spill] sm:$0xff]  ;;  %v14830_v8 = vld [vmem:[#allocation137_spill] sm:$0xff] }
 0x778   :  { %v5641_v62 = vadd.f32 %v5271_v59, %v4745_v49  ;;  %v5642_v51 = vadd.f32 %v5271_v59, %v4746_v54  ;;  %v4735_v23 = vmul.f32 %v14826_v32, %v14825_v0  ;;  %v14828_v49 = vld [vmem:[#allocation135_spill] sm:$0xff] }
 0x779   :  { %5872 = vst [vmem:[%s12841_s4 + $0x4c0] sm:$0xff] %v5615_v7  ;;  %5873 = vst.msk [vmem:[%s12841_s4 + $0x4c8] sm:$0xff] %vm5720_vm1, %v5616_v15  ;;  %v4761_v54 = vmul.f32 %v14829_v1, %v14828_v49  ;;  %v4762_v7 = vmul.f32 %v14829_v1, %v14830_v8  ;;  %v14851_v49 = vld [vmem:[#allocation117_spill] sm:$0xff] }
 0x77a   :  { %5898 = vst [vmem:[%s12841_s4 + $0x590] sm:$0xff] %v5641_v62  ;;  %5899 = vst.msk [vmem:[%s12841_s4 + $0x598] sm:$0xff] %vm5720_vm1, %v5642_v51  ;;  %v5216_v22 = vpop.permute.xlu1 %5215  ;;  %v4752_v1 = vmul.f32 %v14850_v35, %v14851_v49  ;;  %v14853_v8 = vld [vmem:[#allocation149_spill] sm:$0xff]  ;;  %v14874_v49 = vld [vmem:[#allocation78_spill] sm:$0xff] }
 0x77b   :  { %v5619_v34 = vadd.f32 %v5216_v22, %v4723_v5  ;;  %v5620_v6 = vadd.f32 %v5216_v22, %v4724_v16  ;;  %v5281_v56 = vpop.permute.xlu0 %5280  ;;  %v14831_v5 = vld [vmem:[#allocation91_spill] sm:$0xff]  ;;  %v14836_v22 = vld [vmem:[#allocation145_spill] sm:$0xff] }
 0x77c   :  { %v5645_v40 = vadd.f32 %v5281_v56, %v4749_v50  ;;  %v5646_v45 = vadd.f32 %v5281_v56, %v4750_v52  ;;  %v4739_v16 = vmul.f32 %v14832_v21, %v14831_v5  ;;  %v14834_v50 = vld [vmem:[#allocation143_spill] sm:$0xff] }
 0x77d   :  { %5876 = vst [vmem:[%s12841_s4 + $0x4e0] sm:$0xff] %v5619_v34  ;;  %5877 = vst.msk [vmem:[%s12841_s4 + $0x4e8] sm:$0xff] %vm5720_vm1, %v5620_v6  ;;  %v4765_v52 = vmul.f32 %v14835_v42, %v14834_v50  ;;  %v4766_v34 = vmul.f32 %v14835_v42, %v14836_v22  ;;  %v14857_v50 = vld [vmem:[#allocation125_spill] sm:$0xff] }
 0x77e   :  { %5902 = vst [vmem:[%s12841_s4 + $0x5b0] sm:$0xff] %v5645_v40  ;;  %5903 = vst.msk [vmem:[%s12841_s4 + $0x5b8] sm:$0xff] %vm5720_vm1, %v5646_v45  ;;  %v5226_v36 = vpop.permute.xlu1 %5225  ;;  %v4756_v42 = vmul.f32 %v14856_v19, %v14857_v50  ;;  %v14859_v22 = vld [vmem:[#allocation293_spill] sm:$0xff] }
 0x77f   :  { %v5623_v27 = vadd.f32 %v5226_v36, %v4727_v30  ;;  %v5624_v33 = vadd.f32 %v5226_v36, %v4728_v41  ;;  %v5291_v17 = vpop.permute.xlu0 %5290  ;;  %v14837_v30 = vld [vmem:[#allocation99_spill] sm:$0xff]  ;;  %v14880_v50 = vld [vmem:[#allocation309_spill] sm:$0xff] }
 0x780   :  { %v5649_v3 = vadd.f32 %v5291_v17, %v4753_v38  ;;  %v5650_v4 = vadd.f32 %v5291_v17, %v4754_v46  ;;  %v4743_v41 = vmul.f32 %v14838_v53, %v14837_v30  ;;  %v14840_v38 = vld [vmem:[#allocation154_spill] sm:$0xff]  ;;  %v14842_v36 = vld [vmem:[#allocation155_spill] sm:$0xff] }
 0x781   :  { %5880 = vst [vmem:[%s12841_s4 + $0x500] sm:$0xff] %v5623_v27  ;;  %5881 = vst.msk [vmem:[%s12841_s4 + $0x508] sm:$0xff] %vm5720_vm1, %v5624_v33  ;;  %v4769_v46 = vmul.f32 %v14841_v48, %v14840_v38  ;;  %v4770_v27 = vmul.f32 %v14841_v48, %v14842_v36  ;;  %v14863_v38 = vld [vmem:[#allocation133_spill] sm:$0xff]  ;;  %v14865_v36 = vld [vmem:[#allocation80_spill] sm:$0xff] }
 0x782   :  { %5906 = vst [vmem:[%s12841_s4 + $0x5d0] sm:$0xff] %v5649_v3  ;;  %5907 = vst.msk [vmem:[%s12841_s4 + $0x5d8] sm:$0xff] %vm5720_vm1, %v5650_v4  ;;  %v5236_v57 = vpop.permute.xlu1 %5235  ;;  %v4760_v48 = vmul.f32 %v14862_v24, %v14863_v38  ;;  %v14886_v38 = vld [vmem:[#allocation422_spill] sm:$0xff] }
 0x783   :  { %v5627_v63 = vadd.f32 %v5236_v57, %v4731_v14  ;;  %v5628_v55 = vadd.f32 %v5236_v57, %v4732_v26  ;;  %v5301_v11 = vpop.permute.xlu0 %5300  ;;  %v14843_v14 = vld [vmem:[#allocation107_spill] sm:$0xff]  ;;  %v14848_v57 = vld [vmem:[#allocation168_spill] sm:$0xff] }
 0x784   :  { %v5653_v28 = vadd.f32 %v5301_v11, %v4757_v44  ;;  %v5654_v18 = vadd.f32 %v5301_v11, %v4758_v47  ;;  %v4747_v26 = vmul.f32 %v14844_v37, %v14843_v14  ;;  %v14846_v44 = vld [vmem:[#allocation165_spill] sm:$0xff] }
 0x785   :  { %5884 = vst [vmem:[%s12841_s4 + $0x520] sm:$0xff] %v5627_v63  ;;  %5885 = vst.msk [vmem:[%s12841_s4 + $0x528] sm:$0xff] %vm5720_vm1, %v5628_v55  ;;  %v4773_v47 = vmul.f32 %v14847_v10, %v14846_v44  ;;  %v4774_v63 = vmul.f32 %v14847_v10, %v14848_v57  ;;  %v14869_v44 = vld [vmem:[#allocation141_spill] sm:$0xff]  ;;  %v14871_v57 = vld [vmem:[#allocation420_spill] sm:$0xff] }
 0x786   :  { %5910 = vst [vmem:[%s12841_s4 + $0x5f0] sm:$0xff] %v5653_v28  ;;  %5911 = vst.msk [vmem:[%s12841_s4 + $0x5f8] sm:$0xff] %vm5720_vm1, %v5654_v18  ;;  %v5246_v15 = vpop.permute.xlu1 %5245  ;;  %v4764_v10 = vmul.f32 %v14868_v13, %v14869_v44  ;;  %v14892_v44 = vld [vmem:[#allocation430_spill] sm:$0xff] }
 0x787   :  { %v5631_v59 = vadd.f32 %v5246_v15, %v4735_v23  ;;  %v5632_v62 = vadd.f32 %v5246_v15, %v4736_v9  ;;  %v5311_v51 = vpop.permute.xlu0 %5310  ;;  %v14849_v23 = vld [vmem:[#allocation115_spill] sm:$0xff]  ;;  %v14854_v15 = vld [vmem:[#allocation180_spill] sm:$0xff] }
 0x788   :  { %v5657_v43 = vadd.f32 %v5311_v51, %v4761_v54  ;;  %v5658_v2 = vadd.f32 %v5311_v51, %v4762_v7  ;;  %v4751_v9 = vmul.f32 %v14850_v35, %v14849_v23  ;;  %v14852_v54 = vld [vmem:[#allocation177_spill] sm:$0xff] }
 0x789   :  { %5888 = vst [vmem:[%s12841_s4 + $0x540] sm:$0xff] %v5631_v59  ;;  %5889 = vst.msk [vmem:[%s12841_s4 + $0x548] sm:$0xff] %vm5720_vm1, %v5632_v62  ;;  %v4777_v7 = vmul.f32 %v14853_v8, %v14852_v54  ;;  %v4778_v59 = vmul.f32 %v14853_v8, %v14854_v15  ;;  %v14875_v54 = vld [vmem:[#allocation151_spill] sm:$0xff]  ;;  %v14877_v15 = vld [vmem:[#allocation298_spill] sm:$0xff] }
 0x78a   :  { %5914 = vst [vmem:[%s12841_s4 + $0x610] sm:$0xff] %v5657_v43  ;;  %5915 = vst.msk [vmem:[%s12841_s4 + $0x618] sm:$0xff] %vm5720_vm1, %v5658_v2  ;;  %v5256_v6 = vpop.permute.xlu1 %5255  ;;  %v4768_v8 = vmul.f32 %v14874_v49, %v14875_v54  ;;  %v14898_v54 = vld [vmem:[#allocation434_spill] sm:$0xff] }
 0x78b   :  { %v5635_v56 = vadd.f32 %v5256_v6, %v4739_v16  ;;  %v5636_v40 = vadd.f32 %v5256_v6, %v4740_v29  ;;  %v5321_v45 = vpop.permute.xlu0 %5320  ;;  %v14855_v16 = vld [vmem:[#allocation123_spill] sm:$0xff]  ;;  %v14860_v6 = vld [vmem:[#allocation190_spill] sm:$0xff] }
 0x78c   :  { %v5661_v25 = vadd.f32 %v5321_v45, %v4765_v52  ;;  %v5662_v39 = vadd.f32 %v5321_v45, %v4766_v34  ;;  %v4755_v29 = vmul.f32 %v14856_v19, %v14855_v16  ;;  %v14858_v52 = vld [vmem:[#allocation188_spill] sm:$0xff] }
 0x78d   :  { %5892 = vst [vmem:[%s12841_s4 + $0x560] sm:$0xff] %v5635_v56  ;;  %5893 = vst.msk [vmem:[%s12841_s4 + $0x568] sm:$0xff] %vm5720_vm1, %v5636_v40  ;;  %v4781_v34 = vmul.f32 %v14859_v22, %v14858_v52  ;;  %v4782_v56 = vmul.f32 %v14859_v22, %v14860_v6  ;;  %v14881_v52 = vld [vmem:[#allocation163_spill] sm:$0xff]  ;;  %v14883_v6 = vld [vmem:[#allocation284_spill] sm:$0xff] }
 0x78e   :  { %5918 = vst [vmem:[%s12841_s4 + $0x630] sm:$0xff] %v5661_v25  ;;  %5919 = vst.msk [vmem:[%s12841_s4 + $0x638] sm:$0xff] %vm5720_vm1, %v5662_v39  ;;  %v5266_v33 = vpop.permute.xlu1 %5265  ;;  %v4772_v22 = vmul.f32 %v14880_v50, %v14881_v52  ;;  %v14904_v52 = vld [vmem:[#allocation74_spill] sm:$0xff] }
 0x78f   :  { %v5639_v17 = vadd.f32 %v5266_v33, %v4743_v41  ;;  %v5640_v3 = vadd.f32 %v5266_v33, %v4744_v61  ;;  %v5331_v4 = vpop.permute.xlu0 %5330  ;;  %v14861_v41 = vld [vmem:[#allocation131_spill] sm:$0xff]  ;;  %v14866_v33 = vld [vmem:[#allocation202_spill] sm:$0xff] }
 0x790   :  { %v5665_v31 = vadd.f32 %v5331_v4, %v4769_v46  ;;  %v5666_v58 = vadd.f32 %v5331_v4, %v4770_v27  ;;  %v4759_v61 = vmul.f32 %v14862_v24, %v14861_v41  ;;  %v14864_v46 = vld [vmem:[#allocation200_spill] sm:$0xff] }
 0x791   :  { %5896 = vst [vmem:[%s12841_s4 + $0x580] sm:$0xff] %v5639_v17  ;;  %5897 = vst.msk [vmem:[%s12841_s4 + $0x588] sm:$0xff] %vm5720_vm1, %v5640_v3  ;;  %v4785_v27 = vmul.f32 %v14865_v36, %v14864_v46  ;;  %v4786_v17 = vmul.f32 %v14865_v36, %v14866_v33  ;;  %v14887_v46 = vld [vmem:[#allocation175_spill] sm:$0xff] }
 0x792   :  { %5922 = vst [vmem:[%s12841_s4 + $0x650] sm:$0xff] %v5665_v31  ;;  %5923 = vst.msk [vmem:[%s12841_s4 + $0x658] sm:$0xff] %vm5720_vm1, %v5666_v58  ;;  %v5276_v55 = vpop.permute.xlu1 %5275  ;;  %v4776_v36 = vmul.f32 %v14886_v38, %v14887_v46  ;;  %v14889_v33 = vld [vmem:[#allocation431_spill] sm:$0xff]  ;;  %v14910_v46 = vld [vmem:[#allocation436_spill] sm:$0xff] }
 0x793   :  { %v5643_v11 = vadd.f32 %v5276_v55, %v4747_v26  ;;  %v5644_v28 = vadd.f32 %v5276_v55, %v4748_v20  ;;  %v5341_v18 = vpop.permute.xlu0 %5340  ;;  %v14867_v26 = vld [vmem:[#allocation139_spill] sm:$0xff]  ;;  %v14872_v55 = vld [vmem:[#allocation214_spill] sm:$0xff] }
 0x794   :  { %v5669_v0 = vadd.f32 %v5341_v18, %v4773_v47  ;;  %v5670_v32 = vadd.f32 %v5341_v18, %v4774_v63  ;;  %v4763_v20 = vmul.f32 %v14868_v13, %v14867_v26  ;;  %v14870_v47 = vld [vmem:[#allocation212_spill] sm:$0xff] }
 0x795   :  { %5900 = vst [vmem:[%s12841_s4 + $0x5a0] sm:$0xff] %v5643_v11  ;;  %5901 = vst.msk [vmem:[%s12841_s4 + $0x5a8] sm:$0xff] %vm5720_vm1, %v5644_v28  ;;  %v4789_v63 = vmul.f32 %v14871_v57, %v14870_v47  ;;  %v4790_v11 = vmul.f32 %v14871_v57, %v14872_v55  ;;  %v14893_v47 = vld [vmem:[#allocation186_spill] sm:$0xff]  ;;  %v14895_v55 = vld [vmem:[#allocation76_spill] sm:$0xff] }
 0x796   :  { %5926 = vst [vmem:[%s12841_s4 + $0x670] sm:$0xff] %v5669_v0  ;;  %5927 = vst.msk [vmem:[%s12841_s4 + $0x678] sm:$0xff] %vm5720_vm1, %v5670_v32  ;;  %v5286_v62 = vpop.permute.xlu1 %5285  ;;  %v4780_v57 = vmul.f32 %v14892_v44, %v14893_v47  ;;  %v14916_v47 = vld [vmem:[#allocation439_spill] sm:$0xff] }
 0x797   :  { %v5647_v51 = vadd.f32 %v5286_v62, %v4751_v9  ;;  %v5648_v43 = vadd.f32 %v5286_v62, %v4752_v1  ;;  %v5351_v2 = vpop.permute.xlu0 %5350  ;;  %v14873_v9 = vld [vmem:[#allocation147_spill] sm:$0xff]  ;;  %v14878_v62 = vld [vmem:[#allocation226_spill] sm:$0xff] }
 0x798   :  { %v5673_v5 = vadd.f32 %v5351_v2, %v4777_v7  ;;  %v5674_v21 = vadd.f32 %v5351_v2, %v4778_v59  ;;  %v4767_v1 = vmul.f32 %v14874_v49, %v14873_v9  ;;  %v14876_v7 = vld [vmem:[#allocation224_spill] sm:$0xff] }
 0x799   :  { %5904 = vst [vmem:[%s12841_s4 + $0x5c0] sm:$0xff] %v5647_v51  ;;  %5905 = vst.msk [vmem:[%s12841_s4 + $0x5c8] sm:$0xff] %vm5720_vm1, %v5648_v43  ;;  %v4793_v59 = vmul.f32 %v14877_v15, %v14876_v7  ;;  %v4794_v51 = vmul.f32 %v14877_v15, %v14878_v62  ;;  %v14899_v7 = vld [vmem:[#allocation198_spill] sm:$0xff]  ;;  %v14901_v62 = vld [vmem:[#allocation348_spill] sm:$0xff] }
 0x79a   :  { %5930 = vst [vmem:[%s12841_s4 + $0x690] sm:$0xff] %v5673_v5  ;;  %5931 = vst.msk [vmem:[%s12841_s4 + $0x698] sm:$0xff] %vm5720_vm1, %v5674_v21  ;;  %v5296_v40 = vpop.permute.xlu1 %5295  ;;  %v4784_v15 = vmul.f32 %v14898_v54, %v14899_v7  ;;  %v14922_v7 = vld [vmem:[#allocation300_spill] sm:$0xff] }
 0x79b   :  { %v5651_v45 = vadd.f32 %v5296_v40, %v4755_v29  ;;  %v5652_v25 = vadd.f32 %v5296_v40, %v4756_v42  ;;  %v5361_v39 = vpop.permute.xlu0 %5360  ;;  %v14879_v29 = vld [vmem:[#allocation158_spill] sm:$0xff] }
 0x79c   :  { %v5677_v30 = vadd.f32 %v5361_v39, %v4781_v34  ;;  %v5678_v53 = vadd.f32 %v5361_v39, %v4782_v56  ;;  %v4771_v42 = vmul.f32 %v14880_v50, %v14879_v29  ;;  %v14882_v34 = vld [vmem:[#allocation236_spill] sm:$0xff]  ;;  %v14884_v40 = vld [vmem:[#allocation238_spill] sm:$0xff] }
 0x79d   :  { %5908 = vst [vmem:[%s12841_s4 + $0x5e0] sm:$0xff] %v5651_v45  ;;  %5909 = vst.msk [vmem:[%s12841_s4 + $0x5e8] sm:$0xff] %vm5720_vm1, %v5652_v25  ;;  %v4797_v56 = vmul.f32 %v14883_v6, %v14882_v34  ;;  %v4798_v45 = vmul.f32 %v14883_v6, %v14884_v40  ;;  %v14905_v34 = vld [vmem:[#allocation210_spill] sm:$0xff]  ;;  %v14907_v40 = vld [vmem:[#allocation432_spill] sm:$0xff] }
 0x79e   :  { %5934 = vst [vmem:[%s12841_s4 + $0x6b0] sm:$0xff] %v5677_v30  ;;  %5935 = vst.msk [vmem:[%s12841_s4 + $0x6b8] sm:$0xff] %vm5720_vm1, %v5678_v53  ;;  %v5306_v3 = vpop.permute.xlu1 %5305  ;;  %v4788_v6 = vmul.f32 %v14904_v52, %v14905_v34  ;;  %v14928_v34 = vld [vmem:[#allocation444_spill] sm:$0xff] }
 0x79f   :  { %v5655_v4 = vadd.f32 %v5306_v3, %v4759_v61  ;;  %v5656_v31 = vadd.f32 %v5306_v3, %v4760_v48  ;;  %v5371_v58 = vpop.permute.xlu0 %5370  ;;  %v14885_v61 = vld [vmem:[#allocation170_spill] sm:$0xff] }
 0x7a0   :  { %v5681_v14 = vadd.f32 %v5371_v58, %v4785_v27  ;;  %v5682_v37 = vadd.f32 %v5371_v58, %v4786_v17  ;;  %v4775_v48 = vmul.f32 %v14886_v38, %v14885_v61  ;;  %v14888_v27 = vld [vmem:[#allocation248_spill] sm:$0xff]  ;;  %v14890_v3 = vld [vmem:[#allocation250_spill] sm:$0xff] }
 0x7a1   :  { %5912 = vst [vmem:[%s12841_s4 + $0x600] sm:$0xff] %v5655_v4  ;;  %5913 = vst.msk [vmem:[%s12841_s4 + $0x608] sm:$0xff] %vm5720_vm1, %v5656_v31  ;;  %v4801_v17 = vmul.f32 %v14889_v33, %v14888_v27  ;;  %v4802_v4 = vmul.f32 %v14889_v33, %v14890_v3  ;;  %v14911_v27 = vld [vmem:[#allocation222_spill] sm:$0xff]  ;;  %v14913_v3 = vld [vmem:[#allocation443_spill] sm:$0xff] }
 0x7a2   :  { %5938 = vst [vmem:[%s12841_s4 + $0x6d0] sm:$0xff] %v5681_v14  ;;  %5939 = vst.msk [vmem:[%s12841_s4 + $0x6d8] sm:$0xff] %vm5720_vm1, %v5682_v37  ;;  %v5316_v28 = vpop.permute.xlu1 %5315  ;;  %v4792_v33 = vmul.f32 %v14910_v46, %v14911_v27  ;;  %v14933_v27 = vld [vmem:[#allocation302_spill] sm:$0xff] }
 0x7a3   :  { %v5659_v18 = vadd.f32 %v5316_v28, %v4763_v20  ;;  %v5660_v0 = vadd.f32 %v5316_v28, %v4764_v10  ;;  %v5381_v32 = vpop.permute.xlu0 %5380  ;;  %v14891_v20 = vld [vmem:[#allocation182_spill] sm:$0xff] }
 0x7a4   :  { %v5685_v23 = vadd.f32 %v5381_v32, %v4789_v63  ;;  %v5686_v35 = vadd.f32 %v5381_v32, %v4790_v11  ;;  %v4779_v10 = vmul.f32 %v14892_v44, %v14891_v20  ;;  %v14894_v63 = vld [vmem:[#allocation260_spill] sm:$0xff]  ;;  %v14896_v28 = vld [vmem:[#allocation262_spill] sm:$0xff] }
 0x7a5   :  { %5916 = vst [vmem:[%s12841_s4 + $0x620] sm:$0xff] %v5659_v18  ;;  %5917 = vst.msk [vmem:[%s12841_s4 + $0x628] sm:$0xff] %vm5720_vm1, %v5660_v0  ;;  %v4805_v11 = vmul.f32 %v14895_v55, %v14894_v63  ;;  %v4806_v18 = vmul.f32 %v14895_v55, %v14896_v28  ;;  %v14917_v63 = vld [vmem:[#allocation234_spill] sm:$0xff]  ;;  %v14918_v28 = vld [vmem:[#allocation321_spill] sm:$0xff] }
 0x7a6   :  { %5942 = vst [vmem:[%s12841_s4 + $0x6f0] sm:$0xff] %v5685_v23  ;;  %5943 = vst.msk [vmem:[%s12841_s4 + $0x6f8] sm:$0xff] %vm5720_vm1, %v5686_v35  ;;  %v5326_v43 = vpop.permute.xlu1 %5325  ;;  %v4796_v55 = vmul.f32 %v14916_v47, %v14917_v63 }
 0x7a7   :  { %v5663_v2 = vadd.f32 %v5326_v43, %v4767_v1  ;;  %v5664_v5 = vadd.f32 %v5326_v43, %v4768_v8  ;;  %v5391_v21 = vpop.permute.xlu0 %5390  ;;  %v14897_v1 = vld [vmem:[#allocation194_spill] sm:$0xff]  ;;  %v14902_v43 = vld [vmem:[#allocation275_spill] sm:$0xff] }
 0x7a8   :  { %v5689_v16 = vadd.f32 %v5391_v21, %v4793_v59  ;;  %v5690_v19 = vadd.f32 %v5391_v21, %v4794_v51  ;;  %v4783_v8 = vmul.f32 %v14898_v54, %v14897_v1  ;;  %v14900_v59 = vld [vmem:[#allocation273_spill] sm:$0xff] }
 0x7a9   :  { %5920 = vst [vmem:[%s12841_s4 + $0x640] sm:$0xff] %v5663_v2  ;;  %5921 = vst.msk [vmem:[%s12841_s4 + $0x648] sm:$0xff] %vm5720_vm1, %v5664_v5  ;;  %v4809_v51 = vmul.f32 %v14901_v62, %v14900_v59  ;;  %v4810_v2 = vmul.f32 %v14901_v62, %v14902_v43  ;;  %v14923_v59 = vld [vmem:[#allocation246_spill] sm:$0xff] }
 0x7aa   :  { %5946 = vst [vmem:[%s12841_s4 + $0x710] sm:$0xff] %v5689_v16  ;;  %5947 = vst.msk [vmem:[%s12841_s4 + $0x718] sm:$0xff] %vm5720_vm1, %v5690_v19  ;;  %v5336_v25 = vpop.permute.xlu1 %5335  ;;  %v4800_v62 = vmul.f32 %v14922_v7, %v14923_v59 }
 0x7ab   :  { %v5667_v39 = vadd.f32 %v5336_v25, %v4771_v42  ;;  %v5668_v30 = vadd.f32 %v5336_v25, %v4772_v22  ;;  %v5401_v53 = vpop.permute.xlu0 %5400  ;;  %v14903_v42 = vld [vmem:[#allocation206_spill] sm:$0xff]  ;;  %v14908_v25 = vld [vmem:[#allocation291_spill] sm:$0xff] }
 0x7ac   :  { %v5693_v41 = vadd.f32 %v5401_v53, %v4797_v56  ;;  %v5694_v24 = vadd.f32 %v5401_v53, %v4798_v45  ;;  %v4787_v22 = vmul.f32 %v14904_v52, %v14903_v42  ;;  %v14906_v56 = vld [vmem:[#allocation289_spill] sm:$0xff] }
 0x7ad   :  { %5924 = vst [vmem:[%s12841_s4 + $0x660] sm:$0xff] %v5667_v39  ;;  %5925 = vst.msk [vmem:[%s12841_s4 + $0x668] sm:$0xff] %vm5720_vm1, %v5668_v30  ;;  %v4813_v45 = vmul.f32 %v14907_v40, %v14906_v56  ;;  %v4814_v39 = vmul.f32 %v14907_v40, %v14908_v25  ;;  %v14929_v56 = vld [vmem:[#allocation270_spill] sm:$0xff] }
 0x7ae   :  { %5950 = vst [vmem:[%s12841_s4 + $0x730] sm:$0xff] %v5693_v41  ;;  %5951 = vst.msk [vmem:[%s12841_s4 + $0x738] sm:$0xff] %vm5720_vm1, %v5694_v24  ;;  %v5346_v31 = vpop.permute.xlu1 %5345  ;;  %v4808_v40 = vmul.f32 %v14928_v34, %v14929_v56 }
 0x7af   :  { %v5671_v58 = vadd.f32 %v5346_v31, %v4775_v48  ;;  %v5672_v14 = vadd.f32 %v5346_v31, %v4776_v36  ;;  %v5411_v37 = vpop.permute.xlu0 %5410  ;;  %v14909_v48 = vld [vmem:[#allocation218_spill] sm:$0xff]  ;;  %v14914_v31 = vld [vmem:[#allocation307_spill] sm:$0xff] }
 0x7b0   :  { %v5697_v26 = vadd.f32 %v5411_v37, %v4801_v17  ;;  %v5698_v13 = vadd.f32 %v5411_v37, %v4802_v4  ;;  %v4791_v36 = vmul.f32 %v14910_v46, %v14909_v48  ;;  %v14912_v17 = vld [vmem:[#allocation305_spill] sm:$0xff] }
 0x7b1   :  { %5928 = vst [vmem:[%s12841_s4 + $0x680] sm:$0xff] %v5671_v58  ;;  %5929 = vst.msk [vmem:[%s12841_s4 + $0x688] sm:$0xff] %vm5720_vm1, %v5672_v14  ;;  %v4817_v4 = vmul.f32 %v14913_v3, %v14912_v17  ;;  %v4818_v58 = vmul.f32 %v14913_v3, %v14914_v31  ;;  %v14932_v46 = vld [vmem:[#allocation297_spill] sm:$0xff] }
 0x7b2   :  { %5954 = vst [vmem:[%s12841_s4 + $0x750] sm:$0xff] %v5697_v26  ;;  %5955 = vst.msk [vmem:[%s12841_s4 + $0x758] sm:$0xff] %vm5720_vm1, %v5698_v13  ;;  %v5356_v0 = vpop.permute.xlu1 %5355 }
 0x7b3   :  { %v5675_v32 = vadd.f32 %v5356_v0, %v4779_v10  ;;  %v5676_v23 = vadd.f32 %v5356_v0, %v4780_v57  ;;  %v5421_v35 = vpop.permute.xlu0 %5420  ;;  %v14915_v10 = vld [vmem:[#allocation230_spill] sm:$0xff] }
 0x7b4   :  { %v5701_v9 = vadd.f32 %v5421_v35, %v4805_v11  ;;  %v5702_v49 = vadd.f32 %v5421_v35, %v4806_v18  ;;  %v4795_v57 = vmul.f32 %v14916_v47, %v14915_v10  ;;  %v14919_v18 = vld [vmem:[#allocation350_spill] sm:$0xff] }
 0x7b5   :  { %5932 = vst [vmem:[%s12841_s4 + $0x6a0] sm:$0xff] %v5675_v32  ;;  %5933 = vst.msk [vmem:[%s12841_s4 + $0x6a8] sm:$0xff] %vm5720_vm1, %v5676_v23  ;;  %v4821_v0 = vmul.f32 %v14919_v18, %v14918_v28  ;;  %v14920_v32 = vld [vmem:[#allocation323_spill] sm:$0xff] }
 0x7b6   :  { %5958 = vst [vmem:[%s12841_s4 + $0x770] sm:$0xff] %v5701_v9  ;;  %5959 = vst.msk [vmem:[%s12841_s4 + $0x778] sm:$0xff] %vm5720_vm1, %v5702_v49  ;;  %v5366_v5 = vpop.permute.xlu1 %5365  ;;  %v4822_v23 = vmul.f32 %v14919_v18, %v14920_v32 }
 0x7b7   :  { %v5679_v21 = vadd.f32 %v5366_v5, %v4783_v8  ;;  %v5680_v16 = vadd.f32 %v5366_v5, %v4784_v15  ;;  %v5431_v19 = vpop.permute.xlu0 %5430  ;;  %v14921_v8 = vld [vmem:[#allocation242_spill] sm:$0xff] }
 0x7b8   :  { %v5705_v29 = vadd.f32 %v5431_v19, %v4809_v51  ;;  %v5706_v50 = vadd.f32 %v5431_v19, %v4810_v2  ;;  %v4799_v15 = vmul.f32 %v14922_v7, %v14921_v8  ;;  %v14924_v5 = vld [vmem:[#allocation254_spill] sm:$0xff] }
 0x7b9   :  { %5936 = vst [vmem:[%s12841_s4 + $0x6c0] sm:$0xff] %v5679_v21  ;;  %5937 = vst.msk [vmem:[%s12841_s4 + $0x6c8] sm:$0xff] %vm5720_vm1, %v5680_v16  ;;  %v14925_v21 = vld [vmem:[#allocation433_spill] sm:$0xff]  ;;  %v14926_v19 = vld [vmem:[#allocation258_spill] sm:$0xff] }
 0x7ba   :  { %5962 = vst [vmem:[%s12841_s4 + $0x790] sm:$0xff] %v5705_v29  ;;  %5963 = vst.msk [vmem:[%s12841_s4 + $0x798] sm:$0xff] %vm5720_vm1, %v5706_v50  ;;  %v5376_v30 = vpop.permute.xlu1 %5375  ;;  %v4803_v16 = vmul.f32 %v14925_v21, %v14924_v5  ;;  %v4804_v29 = vmul.f32 %v14925_v21, %v14926_v19 }
 0x7bb   :  { %v5683_v53 = vadd.f32 %v5376_v30, %v4787_v22  ;;  %v5684_v41 = vadd.f32 %v5376_v30, %v4788_v6  ;;  %v5441_v24 = vpop.permute.xlu0 %5440  ;;  %v14927_v22 = vld [vmem:[#allocation266_spill] sm:$0xff]  ;;  %v14930_v30 = vld [vmem:[#allocation281_spill] sm:$0xff] }
 0x7bc   :  { %v5709_v61 = vadd.f32 %v5441_v24, %v4813_v45  ;;  %v5710_v38 = vadd.f32 %v5441_v24, %v4814_v39  ;;  %v4807_v6 = vmul.f32 %v14928_v34, %v14927_v22 }
 0x7bd   :  { %5940 = vst [vmem:[%s12841_s4 + $0x6e0] sm:$0xff] %v5683_v53  ;;  %5941 = vst.msk [vmem:[%s12841_s4 + $0x6e8] sm:$0xff] %vm5720_vm1, %v5684_v41  ;;  %v4811_v53 = vmul.f32 %v11525_v12, %v14930_v30  ;;  %v14931_v41 = vld [vmem:[#allocation286_spill] sm:$0xff] }
 0x7be   :  { %5966 = vst [vmem:[%s12841_s4 + $0x7b0] sm:$0xff] %v5709_v61  ;;  %5967 = vst.msk [vmem:[%s12841_s4 + $0x7b8] sm:$0xff] %vm5720_vm1, %v5710_v38  ;;  %v5386_v14 = vpop.permute.xlu1 %5385  ;;  %v4812_v24 = vmul.f32 %v11525_v12, %v14931_v41 }
 0x7bf   :  { %v5687_v37 = vadd.f32 %v5386_v14, %v4791_v36  ;;  %v5688_v26 = vadd.f32 %v5386_v14, %v4792_v33  ;;  %v5451_v13 = vpop.permute.xlu0 %5450  ;;  %v4815_v36 = vmul.f32 %v11571_v60, %v14932_v46  ;;  %v4816_v33 = vmul.f32 %v11571_v60, %v14933_v27  ;;  %v14934_v60 = vld [vmem:[#allocation313_spill] sm:$0xff] }
 0x7c0   :  { %v5713_v20 = vadd.f32 %v5451_v13, %v4817_v4  ;;  %v5714_v44 = vadd.f32 %v5451_v13, %v4818_v58  ;;  %v14935_v4 = vld [vmem:[#allocation446_spill] sm:$0xff] }
 0x7c1   :  { %5944 = vst [vmem:[%s12841_s4 + $0x700] sm:$0xff] %v5687_v37  ;;  %5945 = vst.msk [vmem:[%s12841_s4 + $0x708] sm:$0xff] %vm5720_vm1, %v5688_v26  ;;  %v4819_v31 = vmul.f32 %v14935_v4, %v14934_v60  ;;  %v14936_v58 = vld [vmem:[#allocation318_spill] sm:$0xff] }
 0x7c2   :  { %5970 = vst [vmem:[%s12841_s4 + $0x7d0] sm:$0xff] %v5713_v20  ;;  %5971 = vst.msk [vmem:[%s12841_s4 + $0x7d8] sm:$0xff] %vm5720_vm1, %v5714_v44  ;;  %v5396_v11 = vpop.permute.xlu1 %5395  ;;  %v4820_v14 = vmul.f32 %v14935_v4, %v14936_v58 }
 0x7c3   :  { %v5691_v35 = vadd.f32 %v5396_v11, %v4795_v57  ;;  %v5692_v9 = vadd.f32 %v5396_v11, %v4796_v55  ;;  %v5461_v49 = vpop.permute.xlu0 %5460 }
 0x7c4   :  { %v5717_v1 = vadd.f32 %v5461_v49, %v4821_v0  ;;  %v5718_v54 = vadd.f32 %v5461_v49, %v4822_v23 }
 0x7c5   :  { %5948 = vst [vmem:[%s12841_s4 + $0x720] sm:$0xff] %v5691_v35  ;;  %5949 = vst.msk [vmem:[%s12841_s4 + $0x728] sm:$0xff] %vm5720_vm1, %v5692_v9 }
 0x7c6   :  { %5974 = vst [vmem:[%s12841_s4 + $0x7f0] sm:$0xff] %v5717_v1  ;;  %5975 = vst.msk [vmem:[%s12841_s4 + $0x7f8] sm:$0xff] %vm5720_vm1, %v5718_v54  ;;  %v5406_v51 = vpop.permute.xlu1 %5405 }
 0x7c7   :  { %v5695_v43 = vadd.f32 %v5406_v51, %v4799_v15  ;;  %v5696_v2 = vadd.f32 %v5406_v51, %v4800_v62 }
 0x7c9   :  { %5952 = vst [vmem:[%s12841_s4 + $0x740] sm:$0xff] %v5695_v43  ;;  %5953 = vst.msk [vmem:[%s12841_s4 + $0x748] sm:$0xff] %vm5720_vm1, %v5696_v2 }
 0x7ca   :  { %v5416_v50 = vpop.permute.xlu1 %5415 }
 0x7cb   :  { %v5699_v42 = vadd.f32 %v5416_v50, %v4803_v16  ;;  %v5700_v52 = vadd.f32 %v5416_v50, %v4804_v29 }
 0x7cd   :  { %5956 = vst [vmem:[%s12841_s4 + $0x760] sm:$0xff] %v5699_v42  ;;  %5957 = vst.msk [vmem:[%s12841_s4 + $0x768] sm:$0xff] %vm5720_vm1, %v5700_v52 }
 0x7ce   :  { %v5426_v45 = vpop.permute.xlu1 %5425 }
 0x7cf   :  { %v5703_v25 = vadd.f32 %v5426_v45, %v4807_v6  ;;  %v5704_v39 = vadd.f32 %v5426_v45, %v4808_v40 }
 0x7d1   :  { %5960 = vst [vmem:[%s12841_s4 + $0x780] sm:$0xff] %v5703_v25  ;;  %5961 = vst.msk [vmem:[%s12841_s4 + $0x788] sm:$0xff] %vm5720_vm1, %v5704_v39 }
 0x7d2   :  { %v5436_v61 = vpop.permute.xlu1 %5435 }
 0x7d3   :  { %v5707_v38 = vadd.f32 %v5436_v61, %v4811_v53  ;;  %v5708_v48 = vadd.f32 %v5436_v61, %v4812_v24 }
 0x7d5   :  { %5964 = vst [vmem:[%s12841_s4 + $0x7a0] sm:$0xff] %v5707_v38  ;;  %5965 = vst.msk [vmem:[%s12841_s4 + $0x7a8] sm:$0xff] %vm5720_vm1, %v5708_v48 }
 0x7d6   :  { %v5446_v12 = vpop.permute.xlu1 %5445 }
 0x7d7   :  { %v5711_v17 = vadd.f32 %v5446_v12, %v4815_v36  ;;  %v5712_v3 = vadd.f32 %v5446_v12, %v4816_v33 }
 0x7d9   :  { %5968 = vst [vmem:[%s12841_s4 + $0x7c0] sm:$0xff] %v5711_v17  ;;  %5969 = vst.msk [vmem:[%s12841_s4 + $0x7c8] sm:$0xff] %vm5720_vm1, %v5712_v3 }
 0x7da   :  { %v5456_v37 = vpop.permute.xlu1 %5455 }
 0x7db   :  { %v5715_v26 = vadd.f32 %v5456_v37, %v4819_v31  ;;  %v5716_v13 = vadd.f32 %v5456_v37, %v4820_v14 }
 0x7dd   :  { %5972 = vst [vmem:[%s12841_s4 + $0x7e0] sm:$0xff] %v5715_v26  ;;  %5973 = vst.msk [vmem:[%s12841_s4 + $0x7e8] sm:$0xff] %vm5720_vm1, %v5716_v13 }

</bundles_post_ra>
